<compile_context>
chip_gen: v6e
topology: v6e:2x2x1
jax: 0.10.0
libtpu: 0.0.40
codegen_flags: <defaults>
</compile_context>

<pallas_src>
import functools
import math

import jax
import jax.numpy as jnp
from jax.experimental import pallas as pl
from jax.experimental.pallas import tpu as pltpu


# ---------------------------------------------------------------------------
# Kernels
# ---------------------------------------------------------------------------
def _pointwise_kernel(x_ref, w_ref, b_ref, o_ref, *, relu):
    # 1x1 conv as matmul.  BN scale pre-folded into w; bias added here.
    # x: (TM, Cin)  w: (Cin, Cout)  b: (1, Cout)
    y = jnp.dot(x_ref[...], w_ref[...], preferred_element_type=jnp.float32)
    y = y + b_ref[...]
    if relu:
        y = jnp.maximum(y, 0.0)
    o_ref[...] = y.astype(o_ref.dtype)


def _dw3x3_s1_kernel(xp_ref, w_ref, b_ref, o_ref, *, relu):
    # Depthwise 3x3, stride 1, pad 1.  xp_ref: (1, H+2, W+2, C) padded block.
    # 9 taps are static shifted slices of the padded block (no im2col).
    H, W = o_ref.shape[1], o_ref.shape[2]
    acc = jnp.zeros(o_ref.shape[1:], jnp.float32)
    for di in range(3):
        for dj in range(3):
            tap = xp_ref[0, di:di + H, dj:dj + W, :].astype(jnp.float32)
            acc = acc + tap * w_ref[3 * di + dj]
    y = acc + b_ref[...]
    if relu:
        y = jnp.maximum(y, 0.0)
    o_ref[0] = y.astype(o_ref.dtype)


def _dw3x3_s2_acc(parity_refs, Ho, Wo, Cin, w_ref=None):
    # Shared helper: accumulate the 9 taps of a 3x3 stride-2 pad-1 window from the
    # 4 parity sub-grids of the zero-padded activation (contiguous static slices).
    (ee_ref, eo_ref, oe_ref, oo_ref) = parity_refs
    parity = ((ee_ref, eo_ref), (oe_ref, oo_ref))
    acc = jnp.zeros((Ho, Wo, Cin), jnp.float32)
    for di in range(3):
        for dj in range(3):
            src = parity[di % 2][dj % 2]
            r0, c0 = di // 2, dj // 2
            tap = src[0, r0:r0 + Ho, c0:c0 + Wo, :].astype(jnp.float32)
            if w_ref is not None:
                tap = tap * w_ref[3 * di + dj]
            acc = acc + tap
    return acc


def _dw3x3_s2_kernel(ee_ref, eo_ref, oe_ref, oo_ref, w_ref, b_ref, o_ref, *, relu):
    # Depthwise 3x3, stride 2, pad 1 (+ folded-BN bias, optional ReLU).
    Ho, Wo, C = o_ref.shape[1], o_ref.shape[2], o_ref.shape[3]
    acc = _dw3x3_s2_acc((ee_ref, eo_ref, oe_ref, oo_ref), Ho, Wo, C, w_ref)
    y = acc + b_ref[...]
    if relu:
        y = jnp.maximum(y, 0.0)
    o_ref[0] = y.astype(o_ref.dtype)


def _dw3x3_s2_pw_kernel(ee_ref, eo_ref, oe_ref, oo_ref,
                        wdw_ref, bdw_ref, wpw_ref, bpw_ref, o_ref):
    # Fused dwonsample: dw3x3 s2 (+BN bias) -> 1x1 conv (+BN bias), no ReLU.
    # The depthwise intermediate stays in registers/VMEM (never written to HBM).
    Ho, Wo = o_ref.shape[1], o_ref.shape[2]
    Cin = ee_ref.shape[3]
    acc = _dw3x3_s2_acc((ee_ref, eo_ref, oe_ref, oo_ref), Ho, Wo, Cin, wdw_ref)
    acc = acc + bdw_ref[...]                      # (1,1,Cin) broadcast
    w = wpw_ref[...]                              # (Cin, Cout), BN2 scale folded
    b = bpw_ref[...]                              # (1, Cout)
    # Row-wise 2-D MXU matmuls: avoids an in-kernel (Ho,Wo,C)->(Ho*Wo,C) relayout.
    for h in range(Ho):
        y = jnp.dot(acc[h], w, preferred_element_type=jnp.float32) + b
        o_ref[0, h, :, :] = y.astype(o_ref.dtype)


def _global_branch_kernel(ee_ref, eo_ref, oe_ref, oo_ref, w_ref, o_ref):
    # Fused global branch: AvgPool2d(3, 2, 1) -> 1x1 conv (no bias) -> ReLU.
    # The 1/9 pool divisor is folded into the 1x1 weight on the host.
    Hl, Wl = o_ref.shape[1], o_ref.shape[2]
    C = ee_ref.shape[3]
    acc = _dw3x3_s2_acc((ee_ref, eo_ref, oe_ref, oo_ref), Hl, Wl, C, None)
    w = w_ref[...]                                # (C, Cout) * 1/9
    for h in range(Hl):
        y = jnp.dot(acc[h], w, preferred_element_type=jnp.float32)
        o_ref[0, h, :, :] = jnp.maximum(y, 0.0).astype(o_ref.dtype)


def _add_up_kernel(a_ref, g_ref, o_ref):
    # a: (Hl, 2, Wl, 2, C) full-res view; g: (Hl, 1, Wl, 1, C) low-res branch.
    # Nearest x2 upsample == broadcast over the two size-2 axes, done in VMEM.
    o_ref[...] = a_ref[...] + g_ref[...]


def _add_up2_kernel(a_ref, b_ref, g_ref, o_ref):
    # out = up(g) + a + b  (final residual: global2 + out + xdown)
    o_ref[...] = a_ref[...] + b_ref[...] + g_ref[...]


# ---------------------------------------------------------------------------
# Wrappers (glue: reshape / pad / parity-slice only)
# ---------------------------------------------------------------------------
def _pick_row_tile(m):
    for cand in (1024, 512, 256, 128):
        if m % cand == 0:
            return cand
    return m


def _parity_split(x, Ho, Wo):
    # Pad by 1 and split into the 4 parity sub-grids (~1x input bytes total) so
    # stride-2 kernels only need contiguous static slices (no strided VMEM reads).
    xp = jnp.pad(x, ((0, 0), (1, 1), (1, 1), (0, 0)))
    xee = xp[:, 0::2, 0::2, :][:, :Ho + 1, :Wo + 1, :]
    xeo = xp[:, 0::2, 1::2, :][:, :Ho + 1, :Wo, :]
    xoe = xp[:, 1::2, 0::2, :][:, :Ho, :Wo + 1, :]
    xoo = xp[:, 1::2, 1::2, :][:, :Ho, :Wo, :]
    return xee, xeo, xoe, xoo


def _parity_specs(Ho, Wo, C):
    return [
        pl.BlockSpec((1, Ho + 1, Wo + 1, C), lambda n: (n, 0, 0, 0)),
        pl.BlockSpec((1, Ho + 1, Wo, C), lambda n: (n, 0, 0, 0)),
        pl.BlockSpec((1, Ho, Wo + 1, C), lambda n: (n, 0, 0, 0)),
        pl.BlockSpec((1, Ho, Wo, C), lambda n: (n, 0, 0, 0)),
    ]


def pointwise_conv_bn(x, w, scale, bias, relu):
    """1x1 conv (no bias) + folded BN + optional ReLU.  x: NHWC."""
    N, H, W, Cin = x.shape
    Cout = w.shape[1]
    wf = w * scale[None, :]                 # fold BN scale into the weights
    M = N * H * W
    xm = x.reshape(M, Cin)
    tm = _pick_row_tile(M)
    out = pl.pallas_call(
        functools.partial(_pointwise_kernel, relu=relu),
        out_shape=jax.ShapeDtypeStruct((M, Cout), x.dtype),
        grid=(M // tm,),
        in_specs=[
            pl.BlockSpec((tm, Cin), lambda i: (i, 0)),
            pl.BlockSpec((Cin, Cout), lambda i: (0, 0)),
            pl.BlockSpec((1, Cout), lambda i: (0, 0)),
        ],
        out_specs=pl.BlockSpec((tm, Cout), lambda i: (i, 0)),
        compiler_params=pltpu.CompilerParams(dimension_semantics=("parallel",)),
    )(xm, wf, bias.reshape(1, Cout))
    return out.reshape(N, H, W, Cout)


def depthwise3x3_s1_bn(x, w_dw, scale, bias, relu):
    """Depthwise 3x3, stride 1, pad 1 + folded BN + optional ReLU."""
    N, H, W, C = x.shape
    wf = (w_dw * scale[None, None, :]).reshape(9, 1, 1, C)   # fold BN scale
    xp = jnp.pad(x, ((0, 0), (1, 1), (1, 1), (0, 0)))
    return pl.pallas_call(
        functools.partial(_dw3x3_s1_kernel, relu=relu),
        out_shape=jax.ShapeDtypeStruct((N, H, W, C), x.dtype),
        grid=(N,),
        in_specs=[
            pl.BlockSpec((1, H + 2, W + 2, C), lambda n: (n, 0, 0, 0)),
            pl.BlockSpec((9, 1, 1, C), lambda n: (0, 0, 0, 0)),
            pl.BlockSpec((1, 1, C), lambda n: (0, 0, 0)),
        ],
        out_specs=pl.BlockSpec((1, H, W, C), lambda n: (n, 0, 0, 0)),
        compiler_params=pltpu.CompilerParams(dimension_semantics=("parallel",)),
    )(xp, wf, bias.reshape(1, 1, C))


def depthwise3x3_s2_bn(x, w_dw, scale, bias, relu):
    """Depthwise 3x3, stride 2, pad 1 + folded BN + optional ReLU."""
    N, H, W, C = x.shape
    Ho = (H - 1) // 2 + 1
    Wo = (W - 1) // 2 + 1
    wf = (w_dw * scale[None, None, :]).reshape(9, 1, 1, C)   # fold BN scale
    parts = _parity_split(x, Ho, Wo)
    return pl.pallas_call(
        functools.partial(_dw3x3_s2_kernel, relu=relu),
        out_shape=jax.ShapeDtypeStruct((N, Ho, Wo, C), x.dtype),
        grid=(N,),
        in_specs=_parity_specs(Ho, Wo, C) + [
            pl.BlockSpec((9, 1, 1, C), lambda n: (0, 0, 0, 0)),
            pl.BlockSpec((1, 1, C), lambda n: (0, 0, 0)),
        ],
        out_specs=pl.BlockSpec((1, Ho, Wo, C), lambda n: (n, 0, 0, 0)),
        compiler_params=pltpu.CompilerParams(dimension_semantics=("parallel",)),
    )(*parts, wf, bias.reshape(1, 1, C))


def dwonsample(x, w_dw, bn1_scale, bn1_bias, w_pw, bn2_scale, bn2_bias):
    """Fused: dw3x3 s2 (+BN) -> 1x1 conv (+BN).  One kernel, no HBM intermediate."""
    N, H, W, Cin = x.shape
    Cout = w_pw.shape[1]
    Ho = (H - 1) // 2 + 1
    Wo = (W - 1) // 2 + 1
    wdw = (w_dw * bn1_scale[None, None, :]).reshape(9, 1, 1, Cin)
    wpw = w_pw * bn2_scale[None, :]
    parts = _parity_split(x, Ho, Wo)
    return pl.pallas_call(
        _dw3x3_s2_pw_kernel,
        out_shape=jax.ShapeDtypeStruct((N, Ho, Wo, Cout), x.dtype),
        grid=(N,),
        in_specs=_parity_specs(Ho, Wo, Cin) + [
            pl.BlockSpec((9, 1, 1, Cin), lambda n: (0, 0, 0, 0)),
            pl.BlockSpec((1, 1, Cin), lambda n: (0, 0, 0)),
            pl.BlockSpec((Cin, Cout), lambda n: (0, 0)),
            pl.BlockSpec((1, Cout), lambda n: (0, 0)),
        ],
        out_specs=pl.BlockSpec((1, Ho, Wo, Cout), lambda n: (n, 0, 0, 0)),
        compiler_params=pltpu.CompilerParams(dimension_semantics=("parallel",)),
    )(*parts, wdw, bn1_bias.reshape(1, 1, Cin), wpw, bn2_bias.reshape(1, Cout))


def global_branch(x, w_pw):
    """Fused: AvgPool2d(3, stride=2, pad=1) -> 1x1 conv (no bias) -> ReLU."""
    N, H, W, C = x.shape
    Cout = w_pw.shape[1]
    Hl = (H - 1) // 2 + 1
    Wl = (W - 1) // 2 + 1
    w = w_pw * (1.0 / 9.0)      # fold the count_include_pad avg-pool divisor
    parts = _parity_split(x, Hl, Wl)
    return pl.pallas_call(
        _global_branch_kernel,
        out_shape=jax.ShapeDtypeStruct((N, Hl, Wl, Cout), x.dtype),
        grid=(N,),
        in_specs=_parity_specs(Hl, Wl, C) + [
            pl.BlockSpec((C, Cout), lambda n: (0, 0)),
        ],
        out_specs=pl.BlockSpec((1, Hl, Wl, Cout), lambda n: (n, 0, 0, 0)),
        compiler_params=pltpu.CompilerParams(dimension_semantics=("parallel",)),
    )(*parts, w)


def add_upsampled(a, g, extra=None):
    """Fused `a [+ extra] + nearest_upsample_x2(g)`.

    The 2x2 replication happens inside VMEM via broadcasting on a split view
    (N*H/2, 2, W/2, 2, C); the upsampled tensor is never materialized in HBM.
    """
    N, H, W, C = a.shape
    assert H % 2 == 0 and W % 2 == 0, "nearest-x2 residual requires even H, W"
    Hl, Wl = H // 2, W // 2
    a5 = a.reshape(N * Hl, 2, Wl, 2, C)          # pure view reshapes (row-major)
    g5 = g.reshape(N * Hl, 1, Wl, 1, C)
    full_spec = pl.BlockSpec((Hl, 2, Wl, 2, C), lambda n: (n, 0, 0, 0, 0))
    low_spec = pl.BlockSpec((Hl, 1, Wl, 1, C), lambda n: (n, 0, 0, 0, 0))
    if extra is None:
        kern, ins, in_specs = _add_up_kernel, (a5, g5), [full_spec, low_spec]
    else:
        e5 = extra.reshape(N * Hl, 2, Wl, 2, C)
        kern, ins, in_specs = _add_up2_kernel, (a5, e5, g5), [full_spec, full_spec, low_spec]
    out = pl.pallas_call(
        kern,
        out_shape=jax.ShapeDtypeStruct((N * Hl, 2, Wl, 2, C), a.dtype),
        grid=(N,),
        in_specs=in_specs,
        out_specs=full_spec,
        compiler_params=pltpu.CompilerParams(dimension_semantics=("parallel",)),
    )(*ins)
    return out.reshape(N, H, W, C)


# ---------------------------------------------------------------------------
# Parameter init (deterministic, synthetic; eval-mode BN folded to scale/bias)
# ---------------------------------------------------------------------------
def _fold_bn(key, c, eps=1e-5):
    k1, k2, k3, k4 = jax.random.split(key, 4)
    gamma = 1.0 + 0.1 * jax.random.normal(k1, (c,), jnp.float32)
    beta = 0.1 * jax.random.normal(k2, (c,), jnp.float32)
    mean = 0.1 * jax.random.normal(k3, (c,), jnp.float32)
    var = 1.0 + 0.1 * jax.random.uniform(k4, (c,), jnp.float32)
    scale = gamma * jax.lax.rsqrt(var + eps)
    bias = beta - mean * scale
    return scale, bias


def init_params(key, inp, oup):
    keys = jax.random.split(key, 12)

    def w(k, shape, fan_in):
        return jax.random.normal(k, shape, jnp.float32) * (1.0 / math.sqrt(fan_in))

    p = {}
    # conv1: 1x1 (inp -> oup) + BN + ReLU
    p["conv1_w"] = w(keys[0], (inp, oup), inp)
    p["conv1_scale"], p["conv1_bias"] = _fold_bn(keys[1], oup)
    # dwonsample: dw3x3 s2 (inp) + BN, then 1x1 (inp -> oup) + BN
    p["down_dw_w"] = w(keys[2], (3, 3, inp), 9)
    p["down_bn1_scale"], p["down_bn1_bias"] = _fold_bn(keys[3], inp)
    p["down_pw_w"] = w(keys[4], (inp, oup), inp)
    p["down_bn2_scale"], p["down_bn2_bias"] = _fold_bn(keys[5], oup)
    # conv2: dw3x3 s1 (oup) + BN + ReLU
    p["conv2_dw_w"] = w(keys[6], (3, 3, oup), 9)
    p["conv2_scale"], p["conv2_bias"] = _fold_bn(keys[7], oup)
    # global1 / global2: 1x1 (oup -> oup), no bias, ReLU
    p["g1_w"] = w(keys[8], (oup, oup), oup)
    p["g2_w"] = w(keys[9], (oup, oup), oup)
    # conv3: dw3x3 s2 (oup) + BN
    p["conv3_dw_w"] = w(keys[10], (3, 3, oup), 9)
    p["conv3_scale"], p["conv3_bias"] = _fold_bn(keys[11], oup)
    return p


# ---------------------------------------------------------------------------
# ASBlock.forward
# ---------------------------------------------------------------------------
def asblock_forward(x_nchw, p):
    x = jnp.transpose(x_nchw, (0, 2, 3, 1))  # NCHW -> NHWC

    # out = conv1(x)
    out = pointwise_conv_bn(x, p["conv1_w"], p["conv1_scale"], p["conv1_bias"], relu=True)
    # xdown = dwonsample(x)   (dw s2 + BN + 1x1 + BN fused in one kernel)
    xdown = dwonsample(x, p["down_dw_w"], p["down_bn1_scale"], p["down_bn1_bias"],
                       p["down_pw_w"], p["down_bn2_scale"], p["down_bn2_bias"])
    # out = conv2(out)
    out = depthwise3x3_s1_bn(out, p["conv2_dw_w"], p["conv2_scale"], p["conv2_bias"], relu=True)
    # global1 = up1(global1(out)); out = global1 + out
    g1 = global_branch(out, p["g1_w"])                 # pool + 1x1 + ReLU fused
    out = add_upsampled(out, g1)                       # upsample + add fused
    # out = conv3(out)
    out = depthwise3x3_s2_bn(out, p["conv3_dw_w"], p["conv3_scale"], p["conv3_bias"], relu=False)
    # global2 = up2(global2(out)); out = global2 + out + xdown
    g2 = global_branch(out, p["g2_w"])                 # pool + 1x1 + ReLU fused
    out = add_upsampled(out, g2, extra=xdown)          # upsample + double add fused
    return jnp.transpose(out, (0, 3, 1, 2))            # NHWC -> NCHW


if __name__ == "__main__":
    key = jax.random.PRNGKey(0)
    kx, kp = jax.random.split(key)

    N, inp, H, W = 2, 4, 16, 16
    oup = 8
    x = jax.random.normal(kx, (N, inp, H, W), jnp.float32)  # PyTorch-style NCHW input
    params = init_params(kp, inp, oup)

    fwd = jax.jit(lambda xx: asblock_forward(xx, params))
    out = fwd(x)
    jax.block_until_ready(out)
    assert out.shape == (N, oup, H // 2, W // 2), out.shape
    assert out.dtype == jnp.float32
    print("KERNEL_OK")
</pallas_src>

<mosaic_0001>
module attributes {stable_mosaic.version = 11 : i64} {
  func.func @_pointwise_kernel(%arg0: i32, %arg1: memref<512x4xf32, #tpu.memory_space<vmem>>, %arg2: memref<4x8xf32, #tpu.memory_space<vmem>>, %arg3: memref<1x8xf32, #tpu.memory_space<vmem>>, %arg4: memref<512x8xf32, #tpu.memory_space<vmem>>) attributes {dimension_semantics = [#tpu.dimension_semantics<parallel>], iteration_bounds = array<i64: 1>, scalar_prefetch = 0 : i64, scratch_operands = 0 : i64, tpu.core_type = #tpu.core_type<tc>, window_params = [{transform_indices = @transform_0, window_bounds = array<i64: 512, 4>}, {pipeline_mode = #tpu.pipeline_mode<synchronous>, transform_indices = @transform_1, window_bounds = array<i64: 4, 8>}, {pipeline_mode = #tpu.pipeline_mode<synchronous>, transform_indices = @transform_2, window_bounds = array<i64: 1, 8>}, {transform_indices = @transform_3, window_bounds = array<i64: 512, 8>}]} {
    %c0 = arith.constant 0 : index
    %c0_0 = arith.constant 0 : index
    %0 = vector.load %arg1[%c0, %c0_0] : memref<512x4xf32, #tpu.memory_space<vmem>>, vector<512x4xf32>
    %c0_1 = arith.constant 0 : index
    %c0_2 = arith.constant 0 : index
    %1 = vector.load %arg2[%c0_1, %c0_2] : memref<4x8xf32, #tpu.memory_space<vmem>>, vector<4x8xf32>
    %cst = arith.constant dense<0.000000e+00> : vector<512x8xf32>
    %2 = tpu.matmul %0, %1, %cst {dimension_numbers = #tpu.dot_dimension_numbers<[1], [0], [0], [1], [0, 0, 1, 1], [], []>} : vector<512x4xf32>, vector<4x8xf32>, vector<512x8xf32> -> vector<512x8xf32>
    %c0_3 = arith.constant 0 : index
    %c0_4 = arith.constant 0 : index
    %3 = vector.load %arg3[%c0_3, %c0_4] : memref<1x8xf32, #tpu.memory_space<vmem>>, vector<1x8xf32>
    %4 = vector.broadcast %3 : vector<1x8xf32> to vector<512x8xf32>
    %5 = arith.addf %2, %4 : vector<512x8xf32>
    %cst_5 = arith.constant 0.000000e+00 : f32
    %6 = vector.broadcast %cst_5 : f32 to vector<512x8xf32>
    %7 = arith.maximumf %5, %6 : vector<512x8xf32>
    %c0_6 = arith.constant 0 : index
    %c0_7 = arith.constant 0 : index
    %8 = vector.load %arg4[%c0_6, %c0_7] : memref<512x8xf32, #tpu.memory_space<vmem>>, vector<512x8xf32>
    tpu.vector_store %arg4[%c0_6, %c0_7], %7 {strides = array<i32>} : memref<512x8xf32, #tpu.memory_space<vmem>>, vector<512x8xf32>,
    return
  }
  func.func @transform_0(%arg0: i32) -> (i32, i32) {
    %c0_i32 = arith.constant 0 : i32
    %c0_i32_0 = arith.constant 0 : i32
    return %arg0, %c0_i32 : i32, i32
  }
  func.func @transform_1(%arg0: i32) -> (i32, i32) {
    %c0_i32 = arith.constant 0 : i32
    %c0_i32_0 = arith.constant 0 : i32
    %c0_i32_1 = arith.constant 0 : i32
    return %c0_i32, %c0_i32_0 : i32, i32
  }
  func.func @transform_2(%arg0: i32) -> (i32, i32) {
    %c0_i32 = arith.constant 0 : i32
    %c0_i32_0 = arith.constant 0 : i32
    %c0_i32_1 = arith.constant 0 : i32
    return %c0_i32, %c0_i32_0 : i32, i32
  }
  func.func @transform_3(%arg0: i32) -> (i32, i32) {
    %c0_i32 = arith.constant 0 : i32
    %c0_i32_0 = arith.constant 0 : i32
    return %arg0, %c0_i32 : i32, i32
  }
}

module attributes {stable_mosaic.version = 11 : i64} {
  func.func @_dw3x3_s1_kernel(%arg0: i32, %arg1: memref<1x18x18x8xf32, #tpu.memory_space<vmem>>, %arg2: memref<9x1x1x8xf32, #tpu.memory_space<vmem>>, %arg3: memref<1x1x8xf32, #tpu.memory_space<vmem>>, %arg4: memref<1x16x16x8xf32, #tpu.memory_space<vmem>>) attributes {dimension_semantics = [#tpu.dimension_semantics<parallel>], iteration_bounds = array<i64: 2>, scalar_prefetch = 0 : i64, scratch_operands = 0 : i64, tpu.core_type = #tpu.core_type<tc>, window_params = [{transform_indices = @transform_0, window_bounds = array<i64: 1, 18, 18, 8>}, {pipeline_mode = #tpu.pipeline_mode<synchronous>, transform_indices = @transform_1, window_bounds = array<i64: 9, 1, 1, 8>}, {pipeline_mode = #tpu.pipeline_mode<synchronous>, transform_indices = @transform_2, window_bounds = array<i64: 1, 1, 8>}, {transform_indices = @transform_3, window_bounds = array<i64: 1, 16, 16, 8>}]} {
    %cst = arith.constant 0.000000e+00 : f32
    %0 = vector.broadcast %cst : f32 to vector<16x16x8xf32>
    %c0 = arith.constant 0 : index
    %c0_0 = arith.constant 0 : index
    %c0_1 = arith.constant 0 : index
    %c0_2 = arith.constant 0 : index
    %1 = vector.load %arg1[%c0, %c0_0, %c0_1, %c0_2] : memref<1x18x18x8xf32, #tpu.memory_space<vmem>>, vector<1x16x16x8xf32>
    %2 = vector.shape_cast %1 : vector<1x16x16x8xf32> to vector<16x16x8xf32>
    %c0_3 = arith.constant 0 : index
    %c0_4 = arith.constant 0 : index
    %c0_5 = arith.constant 0 : index
    %c0_6 = arith.constant 0 : index
    %3 = vector.load %arg2[%c0_3, %c0_4, %c0_5, %c0_6] : memref<9x1x1x8xf32, #tpu.memory_space<vmem>>, vector<1x1x1x8xf32>
    %4 = vector.shape_cast %3 : vector<1x1x1x8xf32> to vector<1x1x8xf32>
    %5 = vector.broadcast %4 : vector<1x1x8xf32> to vector<16x16x8xf32>
    %6 = arith.mulf %2, %5 : vector<16x16x8xf32>
    %7 = arith.addf %0, %6 : vector<16x16x8xf32>
    %c0_7 = arith.constant 0 : index
    %c0_8 = arith.constant 0 : index
    %c1 = arith.constant 1 : index
    %c0_9 = arith.constant 0 : index
    %8 = vector.load %arg1[%c0_7, %c0_8, %c1, %c0_9] : memref<1x18x18x8xf32, #tpu.memory_space<vmem>>, vector<1x16x16x8xf32>
    %9 = vector.shape_cast %8 : vector<1x16x16x8xf32> to vector<16x16x8xf32>
    %c1_10 = arith.constant 1 : index
    %c0_11 = arith.constant 0 : index
    %c0_12 = arith.constant 0 : index
    %c0_13 = arith.constant 0 : index
    %10 = vector.load %arg2[%c1_10, %c0_11, %c0_12, %c0_13] : memref<9x1x1x8xf32, #tpu.memory_space<vmem>>, vector<1x1x1x8xf32>
    %11 = vector.shape_cast %10 : vector<1x1x1x8xf32> to vector<1x1x8xf32>
    %12 = vector.broadcast %11 : vector<1x1x8xf32> to vector<16x16x8xf32>
    %13 = arith.mulf %9, %12 : vector<16x16x8xf32>
    %14 = arith.addf %7, %13 : vector<16x16x8xf32>
    %c0_14 = arith.constant 0 : index
    %c0_15 = arith.constant 0 : index
    %c2 = arith.constant 2 : index
    %c0_16 = arith.constant 0 : index
    %15 = vector.load %arg1[%c0_14, %c0_15, %c2, %c0_16] : memref<1x18x18x8xf32, #tpu.memory_space<vmem>>, vector<1x16x16x8xf32>
    %16 = vector.shape_cast %15 : vector<1x16x16x8xf32> to vector<16x16x8xf32>
    %c2_17 = arith.constant 2 : index
    %c0_18 = arith.constant 0 : index
    %c0_19 = arith.constant 0 : index
    %c0_20 = arith.constant 0 : index
    %17 = vector.load %arg2[%c2_17, %c0_18, %c0_19, %c0_20] : memref<9x1x1x8xf32, #tpu.memory_space<vmem>>, vector<1x1x1x8xf32>
    %18 = vector.shape_cast %17 : vector<1x1x1x8xf32> to vector<1x1x8xf32>
    %19 = vector.broadcast %18 : vector<1x1x8xf32> to vector<16x16x8xf32>
    %20 = arith.mulf %16, %19 : vector<16x16x8xf32>
    %21 = arith.addf %14, %20 : vector<16x16x8xf32>
    %c0_21 = arith.constant 0 : index
    %c1_22 = arith.constant 1 : index
    %c0_23 = arith.constant 0 : index
    %c0_24 = arith.constant 0 : index
    %22 = vector.load %arg1[%c0_21, %c1_22, %c0_23, %c0_24] : memref<1x18x18x8xf32, #tpu.memory_space<vmem>>, vector<1x16x16x8xf32>
    %23 = vector.shape_cast %22 : vector<1x16x16x8xf32> to vector<16x16x8xf32>
    %c3 = arith.constant 3 : index
    %c0_25 = arith.constant 0 : index
    %c0_26 = arith.constant 0 : index
    %c0_27 = arith.constant 0 : index
    %24 = vector.load %arg2[%c3, %c0_25, %c0_26, %c0_27] : memref<9x1x1x8xf32, #tpu.memory_space<vmem>>, vector<1x1x1x8xf32>
    %25 = vector.shape_cast %24 : vector<1x1x1x8xf32> to vector<1x1x8xf32>
    %26 = vector.broadcast %25 : vector<1x1x8xf32> to vector<16x16x8xf32>
    %27 = arith.mulf %23, %26 : vector<16x16x8xf32>
    %28 = arith.addf %21, %27 : vector<16x16x8xf32>
    %c0_28 = arith.constant 0 : index
    %c1_29 = arith.constant 1 : index
    %c1_30 = arith.constant 1 : index
    %c0_31 = arith.constant 0 : index
    %29 = vector.load %arg1[%c0_28, %c1_29, %c1_30, %c0_31] : memref<1x18x18x8xf32, #tpu.memory_space<vmem>>, vector<1x16x16x8xf32>
    %30 = vector.shape_cast %29 : vector<1x16x16x8xf32> to vector<16x16x8xf32>
    %c4 = arith.constant 4 : index
    %c0_32 = arith.constant 0 : index
    %c0_33 = arith.constant 0 : index
    %c0_34 = arith.constant 0 : index
    %31 = vector.load %arg2[%c4, %c0_32, %c0_33, %c0_34] : memref<9x1x1x8xf32, #tpu.memory_space<vmem>>, vector<1x1x1x8xf32>
    %32 = vector.shape_cast %31 : vector<1x1x1x8xf32> to vector<1x1x8xf32>
    %33 = vector.broadcast %32 : vector<1x1x8xf32> to vector<16x16x8xf32>
    %34 = arith.mulf %30, %33 : vector<16x16x8xf32>
    %35 = arith.addf %28, %34 : vector<16x16x8xf32>
    %c0_35 = arith.constant 0 : index
    %c1_36 = arith.constant 1 : index
    %c2_37 = arith.constant 2 : index
    %c0_38 = arith.constant 0 : index
    %36 = vector.load %arg1[%c0_35, %c1_36, %c2_37, %c0_38] : memref<1x18x18x8xf32, #tpu.memory_space<vmem>>, vector<1x16x16x8xf32>
    %37 = vector.shape_cast %36 : vector<1x16x16x8xf32> to vector<16x16x8xf32>
    %c5 = arith.constant 5 : index
    %c0_39 = arith.constant 0 : index
    %c0_40 = arith.constant 0 : index
    %c0_41 = arith.constant 0 : index
    %38 = vector.load %arg2[%c5, %c0_39, %c0_40, %c0_41] : memref<9x1x1x8xf32, #tpu.memory_space<vmem>>, vector<1x1x1x8xf32>
    %39 = vector.shape_cast %38 : vector<1x1x1x8xf32> to vector<1x1x8xf32>
    %40 = vector.broadcast %39 : vector<1x1x8xf32> to vector<16x16x8xf32>
    %41 = arith.mulf %37, %40 : vector<16x16x8xf32>
    %42 = arith.addf %35, %41 : vector<16x16x8xf32>
    %c0_42 = arith.constant 0 : index
    %c2_43 = arith.constant 2 : index
    %c0_44 = arith.constant 0 : index
    %c0_45 = arith.constant 0 : index
    %43 = vector.load %arg1[%c0_42, %c2_43, %c0_44, %c0_45] : memref<1x18x18x8xf32, #tpu.memory_space<vmem>>, vector<1x16x16x8xf32>
    %44 = vector.shape_cast %43 : vector<1x16x16x8xf32> to vector<16x16x8xf32>
    %c6 = arith.constant 6 : index
    %c0_46 = arith.constant 0 : index
    %c0_47 = arith.constant 0 : index
    %c0_48 = arith.constant 0 : index
    %45 = vector.load %arg2[%c6, %c0_46, %c0_47, %c0_48] : memref<9x1x1x8xf32, #tpu.memory_space<vmem>>, vector<1x1x1x8xf32>
    %46 = vector.shape_cast %45 : vector<1x1x1x8xf32> to vector<1x1x8xf32>
    %47 = vector.broadcast %46 : vector<1x1x8xf32> to vector<16x16x8xf32>
    %48 = arith.mulf %44, %47 : vector<16x16x8xf32>
    %49 = arith.addf %42, %48 : vector<16x16x8xf32>
    %c0_49 = arith.constant 0 : index
    %c2_50 = arith.constant 2 : index
    %c1_51 = arith.constant 1 : index
    %c0_52 = arith.constant 0 : index
    %50 = vector.load %arg1[%c0_49, %c2_50, %c1_51, %c0_52] : memref<1x18x18x8xf32, #tpu.memory_space<vmem>>, vector<1x16x16x8xf32>
    %51 = vector.shape_cast %50 : vector<1x16x16x8xf32> to vector<16x16x8xf32>
    %c7 = arith.constant 7 : index
    %c0_53 = arith.constant 0 : index
    %c0_54 = arith.constant 0 : index
    %c0_55 = arith.constant 0 : index
    %52 = vector.load %arg2[%c7, %c0_53, %c0_54, %c0_55] : memref<9x1x1x8xf32, #tpu.memory_space<vmem>>, vector<1x1x1x8xf32>
    %53 = vector.shape_cast %52 : vector<1x1x1x8xf32> to vector<1x1x8xf32>
    %54 = vector.broadcast %53 : vector<1x1x8xf32> to vector<16x16x8xf32>
    %55 = arith.mulf %51, %54 : vector<16x16x8xf32>
    %56 = arith.addf %49, %55 : vector<16x16x8xf32>
    %c0_56 = arith.constant 0 : index
    %c2_57 = arith.constant 2 : index
    %c2_58 = arith.constant 2 : index
    %c0_59 = arith.constant 0 : index
    %57 = vector.load %arg1[%c0_56, %c2_57, %c2_58, %c0_59] : memref<1x18x18x8xf32, #tpu.memory_space<vmem>>, vector<1x16x16x8xf32>
    %58 = vector.shape_cast %57 : vector<1x16x16x8xf32> to vector<16x16x8xf32>
    %c8 = arith.constant 8 : index
    %c0_60 = arith.constant 0 : index
    %c0_61 = arith.constant 0 : index
    %c0_62 = arith.constant 0 : index
    %59 = vector.load %arg2[%c8, %c0_60, %c0_61, %c0_62] : memref<9x1x1x8xf32, #tpu.memory_space<vmem>>, vector<1x1x1x8xf32>
    %60 = vector.shape_cast %59 : vector<1x1x1x8xf32> to vector<1x1x8xf32>
    %61 = vector.broadcast %60 : vector<1x1x8xf32> to vector<16x16x8xf32>
    %62 = arith.mulf %58, %61 : vector<16x16x8xf32>
    %63 = arith.addf %56, %62 : vector<16x16x8xf32>
    %c0_63 = arith.constant 0 : index
    %c0_64 = arith.constant 0 : index
    %c0_65 = arith.constant 0 : index
    %64 = vector.load %arg3[%c0_63, %c0_64, %c0_65] : memref<1x1x8xf32, #tpu.memory_space<vmem>>, vector<1x1x8xf32>
    %65 = vector.broadcast %64 : vector<1x1x8xf32> to vector<16x16x8xf32>
    %66 = arith.addf %63, %65 : vector<16x16x8xf32>
    %cst_66 = arith.constant 0.000000e+00 : f32
    %67 = vector.broadcast %cst_66 : f32 to vector<16x16x8xf32>
    %68 = arith.maximumf %66, %67 : vector<16x16x8xf32>
    %c0_67 = arith.constant 0 : index
    %c0_68 = arith.constant 0 : index
    %c0_69 = arith.constant 0 : index
    %c0_70 = arith.constant 0 : index
    %69 = vector.load %arg4[%c0_67, %c0_68, %c0_69, %c0_70] : memref<1x16x16x8xf32, #tpu.memory_space<vmem>>, vector<1x16x16x8xf32>
    %70 = vector.shape_cast %69 : vector<1x16x16x8xf32> to vector<16x16x8xf32>
    %71 = vector.shape_cast %68 : vector<16x16x8xf32> to vector<1x16x16x8xf32>
    tpu.vector_store %arg4[%c0_67, %c0_68, %c0_69, %c0_70], %71 {strides = array<i32>} : memref<1x16x16x8xf32, #tpu.memory_space<vmem>>, vector<1x16x16x8xf32>,
    return
  }
  func.func @transform_0(%arg0: i32) -> (i32, i32, i32, i32) {
    %c0_i32 = arith.constant 0 : i32
    %c0_i32_0 = arith.constant 0 : i32
    %c0_i32_1 = arith.constant 0 : i32
    %c0_i32_2 = arith.constant 0 : i32
    return %arg0, %c0_i32, %c0_i32_0, %c0_i32_1 : i32, i32, i32, i32
  }
  func.func @transform_1(%arg0: i32) -> (i32, i32, i32, i32) {
    %c0_i32 = arith.constant 0 : i32
    %c0_i32_0 = arith.constant 0 : i32
    %c0_i32_1 = arith.constant 0 : i32
    %c0_i32_2 = arith.constant 0 : i32
    %c0_i32_3 = arith.constant 0 : i32
    return %c0_i32, %c0_i32_0, %c0_i32_1, %c0_i32_2 : i32, i32, i32, i32
  }
  func.func @transform_2(%arg0: i32) -> (i32, i32, i32) {
    %c0_i32 = arith.constant 0 : i32
    %c0_i32_0 = arith.constant 0 : i32
    %c0_i32_1 = arith.constant 0 : i32
    %c0_i32_2 = arith.constant 0 : i32
    return %c0_i32, %c0_i32_0, %c0_i32_1 : i32, i32, i32
  }
  func.func @transform_3(%arg0: i32) -> (i32, i32, i32, i32) {
    %c0_i32 = arith.constant 0 : i32
    %c0_i32_0 = arith.constant 0 : i32
    %c0_i32_1 = arith.constant 0 : i32
    %c0_i32_2 = arith.constant 0 : i32
    return %arg0, %c0_i32, %c0_i32_0, %c0_i32_1 : i32, i32, i32, i32
  }
}

module attributes {stable_mosaic.version = 11 : i64} {
  func.func @_global_branch_kernel(%arg0: i32, %arg1: memref<1x9x9x8xf32, #tpu.memory_space<vmem>>, %arg2: memref<1x9x8x8xf32, #tpu.memory_space<vmem>>, %arg3: memref<1x8x9x8xf32, #tpu.memory_space<vmem>>, %arg4: memref<1x8x8x8xf32, #tpu.memory_space<vmem>>, %arg5: memref<8x8xf32, #tpu.memory_space<vmem>>, %arg6: memref<1x8x8x8xf32, #tpu.memory_space<vmem>>) attributes {dimension_semantics = [#tpu.dimension_semantics<parallel>], iteration_bounds = array<i64: 2>, scalar_prefetch = 0 : i64, scratch_operands = 0 : i64, tpu.core_type = #tpu.core_type<tc>, window_params = [{transform_indices = @transform_0, window_bounds = array<i64: 1, 9, 9, 8>}, {transform_indices = @transform_1, window_bounds = array<i64: 1, 9, 8, 8>}, {transform_indices = @transform_2, window_bounds = array<i64: 1, 8, 9, 8>}, {transform_indices = @transform_3, window_bounds = array<i64: 1, 8, 8, 8>}, {pipeline_mode = #tpu.pipeline_mode<synchronous>, transform_indices = @transform_4, window_bounds = array<i64: 8, 8>}, {transform_indices = @transform_5, window_bounds = array<i64: 1, 8, 8, 8>}]} {
    %cst = arith.constant 0.000000e+00 : f32
    %0 = vector.broadcast %cst : f32 to vector<8x8x8xf32>
    %c0 = arith.constant 0 : index
    %c0_0 = arith.constant 0 : index
    %c0_1 = arith.constant 0 : index
    %c0_2 = arith.constant 0 : index
    %1 = vector.load %arg1[%c0, %c0_0, %c0_1, %c0_2] : memref<1x9x9x8xf32, #tpu.memory_space<vmem>>, vector<1x8x8x8xf32>
    %2 = vector.shape_cast %1 : vector<1x8x8x8xf32> to vector<8x8x8xf32>
    %3 = arith.addf %0, %2 : vector<8x8x8xf32>
    %c0_3 = arith.constant 0 : index
    %c0_4 = arith.constant 0 : index
    %c0_5 = arith.constant 0 : index
    %c0_6 = arith.constant 0 : index
    %4 = vector.load %arg2[%c0_3, %c0_4, %c0_5, %c0_6] : memref<1x9x8x8xf32, #tpu.memory_space<vmem>>, vector<1x8x8x8xf32>
    %5 = vector.shape_cast %4 : vector<1x8x8x8xf32> to vector<8x8x8xf32>
    %6 = arith.addf %3, %5 : vector<8x8x8xf32>
    %c0_7 = arith.constant 0 : index
    %c0_8 = arith.constant 0 : index
    %c1 = arith.constant 1 : index
    %c0_9 = arith.constant 0 : index
    %7 = vector.load %arg1[%c0_7, %c0_8, %c1, %c0_9] : memref<1x9x9x8xf32, #tpu.memory_space<vmem>>, vector<1x8x8x8xf32>
    %8 = vector.shape_cast %7 : vector<1x8x8x8xf32> to vector<8x8x8xf32>
    %9 = arith.addf %6, %8 : vector<8x8x8xf32>
    %c0_10 = arith.constant 0 : index
    %c0_11 = arith.constant 0 : index
    %c0_12 = arith.constant 0 : index
    %c0_13 = arith.constant 0 : index
    %10 = vector.load %arg3[%c0_10, %c0_11, %c0_12, %c0_13] : memref<1x8x9x8xf32, #tpu.memory_space<vmem>>, vector<1x8x8x8xf32>
    %11 = vector.shape_cast %10 : vector<1x8x8x8xf32> to vector<8x8x8xf32>
    %12 = arith.addf %9, %11 : vector<8x8x8xf32>
    %c0_14 = arith.constant 0 : index
    %c0_15 = arith.constant 0 : index
    %c0_16 = arith.constant 0 : index
    %c0_17 = arith.constant 0 : index
    %13 = vector.load %arg4[%c0_14, %c0_15, %c0_16, %c0_17] : memref<1x8x8x8xf32, #tpu.memory_space<vmem>>, vector<1x8x8x8xf32>
    %14 = vector.shape_cast %13 : vector<1x8x8x8xf32> to vector<8x8x8xf32>
    %15 = arith.addf %12, %14 : vector<8x8x8xf32>
    %c0_18 = arith.constant 0 : index
    %c0_19 = arith.constant 0 : index
    %c1_20 = arith.constant 1 : index
    %c0_21 = arith.constant 0 : index
    %16 = vector.load %arg3[%c0_18, %c0_19, %c1_20, %c0_21] : memref<1x8x9x8xf32, #tpu.memory_space<vmem>>, vector<1x8x8x8xf32>
    %17 = vector.shape_cast %16 : vector<1x8x8x8xf32> to vector<8x8x8xf32>
    %18 = arith.addf %15, %17 : vector<8x8x8xf32>
    %c0_22 = arith.constant 0 : index
    %c1_23 = arith.constant 1 : index
    %c0_24 = arith.constant 0 : index
    %c0_25 = arith.constant 0 : index
    %19 = vector.load %arg1[%c0_22, %c1_23, %c0_24, %c0_25] : memref<1x9x9x8xf32, #tpu.memory_space<vmem>>, vector<1x8x8x8xf32>
    %20 = vector.shape_cast %19 : vector<1x8x8x8xf32> to vector<8x8x8xf32>
    %21 = arith.addf %18, %20 : vector<8x8x8xf32>
    %c0_26 = arith.constant 0 : index
    %c1_27 = arith.constant 1 : index
    %c0_28 = arith.constant 0 : index
    %c0_29 = arith.constant 0 : index
    %22 = vector.load %arg2[%c0_26, %c1_27, %c0_28, %c0_29] : memref<1x9x8x8xf32, #tpu.memory_space<vmem>>, vector<1x8x8x8xf32>
    %23 = vector.shape_cast %22 : vector<1x8x8x8xf32> to vector<8x8x8xf32>
    %24 = arith.addf %21, %23 : vector<8x8x8xf32>
    %c0_30 = arith.constant 0 : index
    %c1_31 = arith.constant 1 : index
    %c1_32 = arith.constant 1 : index
    %c0_33 = arith.constant 0 : index
    %25 = vector.load %arg1[%c0_30, %c1_31, %c1_32, %c0_33] : memref<1x9x9x8xf32, #tpu.memory_space<vmem>>, vector<1x8x8x8xf32>
    %26 = vector.shape_cast %25 : vector<1x8x8x8xf32> to vector<8x8x8xf32>
    %27 = arith.addf %24, %26 : vector<8x8x8xf32>
    %c0_34 = arith.constant 0 : index
    %c0_35 = arith.constant 0 : index
    %28 = vector.load %arg5[%c0_34, %c0_35] : memref<8x8xf32, #tpu.memory_space<vmem>>, vector<8x8xf32>
    %29 = vector.extract_strided_slice %27 {offsets = [0, 0, 0], sizes = [1, 8, 8], strides = [1, 1, 1]} : vector<8x8x8xf32> to vector<1x8x8xf32>
    %30 = vector.shape_cast %29 : vector<1x8x8xf32> to vector<8x8xf32>
    %cst_36 = arith.constant dense<0.000000e+00> : vector<8x8xf32>
    %31 = tpu.matmul %30, %28, %cst_36 {dimension_numbers = #tpu.dot_dimension_numbers<[1], [0], [0], [1], [0, 0, 1, 1], [], []>} : vector<8x8xf32>, vector<8x8xf32>, vector<8x8xf32> -> vector<8x8xf32>
    %cst_37 = arith.constant 0.000000e+00 : f32
    %32 = vector.broadcast %cst_37 : f32 to vector<8x8xf32>
    %33 = arith.maximumf %31, %32 : vector<8x8xf32>
    %c0_38 = arith.constant 0 : index
    %c0_39 = arith.constant 0 : index
    %c0_40 = arith.constant 0 : index
    %c0_41 = arith.constant 0 : index
    %34 = vector.load %arg6[%c0_38, %c0_39, %c0_40, %c0_41] : memref<1x8x8x8xf32, #tpu.memory_space<vmem>>, vector<1x1x8x8xf32>
    %35 = vector.shape_cast %34 : vector<1x1x8x8xf32> to vector<8x8xf32>
    %36 = vector.shape_cast %33 : vector<8x8xf32> to vector<1x1x8x8xf32>
    tpu.vector_store %arg6[%c0_38, %c0_39, %c0_40, %c0_41], %36 {strides = array<i32>} : memref<1x8x8x8xf32, #tpu.memory_space<vmem>>, vector<1x1x8x8xf32>,
    %37 = vector.extract_strided_slice %27 {offsets = [1, 0, 0], sizes = [1, 8, 8], strides = [1, 1, 1]} : vector<8x8x8xf32> to vector<1x8x8xf32>
    %38 = vector.shape_cast %37 : vector<1x8x8xf32> to vector<8x8xf32>
    %cst_42 = arith.constant dense<0.000000e+00> : vector<8x8xf32>
    %39 = tpu.matmul %38, %28, %cst_42 {dimension_numbers = #tpu.dot_dimension_numbers<[1], [0], [0], [1], [0, 0, 1, 1], [], []>} : vector<8x8xf32>, vector<8x8xf32>, vector<8x8xf32> -> vector<8x8xf32>
    %cst_43 = arith.constant 0.000000e+00 : f32
    %40 = vector.broadcast %cst_43 : f32 to vector<8x8xf32>
    %41 = arith.maximumf %39, %40 : vector<8x8xf32>
    %c0_44 = arith.constant 0 : index
    %c1_45 = arith.constant 1 : index
    %c0_46 = arith.constant 0 : index
    %c0_47 = arith.constant 0 : index
    %42 = vector.load %arg6[%c0_44, %c1_45, %c0_46, %c0_47] : memref<1x8x8x8xf32, #tpu.memory_space<vmem>>, vector<1x1x8x8xf32>
    %43 = vector.shape_cast %42 : vector<1x1x8x8xf32> to vector<8x8xf32>
    %44 = vector.shape_cast %41 : vector<8x8xf32> to vector<1x1x8x8xf32>
    tpu.vector_store %arg6[%c0_44, %c1_45, %c0_46, %c0_47], %44 {strides = array<i32>} : memref<1x8x8x8xf32, #tpu.memory_space<vmem>>, vector<1x1x8x8xf32>,
    %45 = vector.extract_strided_slice %27 {offsets = [2, 0, 0], sizes = [1, 8, 8], strides = [1, 1, 1]} : vector<8x8x8xf32> to vector<1x8x8xf32>
    %46 = vector.shape_cast %45 : vector<1x8x8xf32> to vector<8x8xf32>
    %cst_48 = arith.constant dense<0.000000e+00> : vector<8x8xf32>
    %47 = tpu.matmul %46, %28, %cst_48 {dimension_numbers = #tpu.dot_dimension_numbers<[1], [0], [0], [1], [0, 0, 1, 1], [], []>} : vector<8x8xf32>, vector<8x8xf32>, vector<8x8xf32> -> vector<8x8xf32>
    %cst_49 = arith.constant 0.000000e+00 : f32
    %48 = vector.broadcast %cst_49 : f32 to vector<8x8xf32>
    %49 = arith.maximumf %47, %48 : vector<8x8xf32>
    %c0_50 = arith.constant 0 : index
    %c2 = arith.constant 2 : index
    %c0_51 = arith.constant 0 : index
    %c0_52 = arith.constant 0 : index
    %50 = vector.load %arg6[%c0_50, %c2, %c0_51, %c0_52] : memref<1x8x8x8xf32, #tpu.memory_space<vmem>>, vector<1x1x8x8xf32>
    %51 = vector.shape_cast %50 : vector<1x1x8x8xf32> to vector<8x8xf32>
    %52 = vector.shape_cast %49 : vector<8x8xf32> to vector<1x1x8x8xf32>
    tpu.vector_store %arg6[%c0_50, %c2, %c0_51, %c0_52], %52 {strides = array<i32>} : memref<1x8x8x8xf32, #tpu.memory_space<vmem>>, vector<1x1x8x8xf32>,
    %53 = vector.extract_strided_slice %27 {offsets = [3, 0, 0], sizes = [1, 8, 8], strides = [1, 1, 1]} : vector<8x8x8xf32> to vector<1x8x8xf32>
    %54 = vector.shape_cast %53 : vector<1x8x8xf32> to vector<8x8xf32>
    %cst_53 = arith.constant dense<0.000000e+00> : vector<8x8xf32>
    %55 = tpu.matmul %54, %28, %cst_53 {dimension_numbers = #tpu.dot_dimension_numbers<[1], [0], [0], [1], [0, 0, 1, 1], [], []>} : vector<8x8xf32>, vector<8x8xf32>, vector<8x8xf32> -> vector<8x8xf32>
    %cst_54 = arith.constant 0.000000e+00 : f32
    %56 = vector.broadcast %cst_54 : f32 to vector<8x8xf32>
    %57 = arith.maximumf %55, %56 : vector<8x8xf32>
    %c0_55 = arith.constant 0 : index
    %c3 = arith.constant 3 : index
    %c0_56 = arith.constant 0 : index
    %c0_57 = arith.constant 0 : index
    %58 = vector.load %arg6[%c0_55, %c3, %c0_56, %c0_57] : memref<1x8x8x8xf32, #tpu.memory_space<vmem>>, vector<1x1x8x8xf32>
    %59 = vector.shape_cast %58 : vector<1x1x8x8xf32> to vector<8x8xf32>
    %60 = vector.shape_cast %57 : vector<8x8xf32> to vector<1x1x8x8xf32>
    tpu.vector_store %arg6[%c0_55, %c3, %c0_56, %c0_57], %60 {strides = array<i32>} : memref<1x8x8x8xf32, #tpu.memory_space<vmem>>, vector<1x1x8x8xf32>,
    %61 = vector.extract_strided_slice %27 {offsets = [4, 0, 0], sizes = [1, 8, 8], strides = [1, 1, 1]} : vector<8x8x8xf32> to vector<1x8x8xf32>
    %62 = vector.shape_cast %61 : vector<1x8x8xf32> to vector<8x8xf32>
    %cst_58 = arith.constant dense<0.000000e+00> : vector<8x8xf32>
    %63 = tpu.matmul %62, %28, %cst_58 {dimension_numbers = #tpu.dot_dimension_numbers<[1], [0], [0], [1], [0, 0, 1, 1], [], []>} : vector<8x8xf32>, vector<8x8xf32>, vector<8x8xf32> -> vector<8x8xf32>
    %cst_59 = arith.constant 0.000000e+00 : f32
    %64 = vector.broadcast %cst_59 : f32 to vector<8x8xf32>
    %65 = arith.maximumf %63, %64 : vector<8x8xf32>
    %c0_60 = arith.constant 0 : index
    %c4 = arith.constant 4 : index
    %c0_61 = arith.constant 0 : index
    %c0_62 = arith.constant 0 : index
    %66 = vector.load %arg6[%c0_60, %c4, %c0_61, %c0_62] : memref<1x8x8x8xf32, #tpu.memory_space<vmem>>, vector<1x1x8x8xf32>
    %67 = vector.shape_cast %66 : vector<1x1x8x8xf32> to vector<8x8xf32>
    %68 = vector.shape_cast %65 : vector<8x8xf32> to vector<1x1x8x8xf32>
    tpu.vector_store %arg6[%c0_60, %c4, %c0_61, %c0_62], %68 {strides = array<i32>} : memref<1x8x8x8xf32, #tpu.memory_space<vmem>>, vector<1x1x8x8xf32>,
    %69 = vector.extract_strided_slice %27 {offsets = [5, 0, 0], sizes = [1, 8, 8], strides = [1, 1, 1]} : vector<8x8x8xf32> to vector<1x8x8xf32>
    %70 = vector.shape_cast %69 : vector<1x8x8xf32> to vector<8x8xf32>
    %cst_63 = arith.constant dense<0.000000e+00> : vector<8x8xf32>
    %71 = tpu.matmul %70, %28, %cst_63 {dimension_numbers = #tpu.dot_dimension_numbers<[1], [0], [0], [1], [0, 0, 1, 1], [], []>} : vector<8x8xf32>, vector<8x8xf32>, vector<8x8xf32> -> vector<8x8xf32>
    %cst_64 = arith.constant 0.000000e+00 : f32
    %72 = vector.broadcast %cst_64 : f32 to vector<8x8xf32>
    %73 = arith.maximumf %71, %72 : vector<8x8xf32>
    %c0_65 = arith.constant 0 : index
    %c5 = arith.constant 5 : index
    %c0_66 = arith.constant 0 : index
    %c0_67 = arith.constant 0 : index
    %74 = vector.load %arg6[%c0_65, %c5, %c0_66, %c0_67] : memref<1x8x8x8xf32, #tpu.memory_space<vmem>>, vector<1x1x8x8xf32>
    %75 = vector.shape_cast %74 : vector<1x1x8x8xf32> to vector<8x8xf32>
    %76 = vector.shape_cast %73 : vector<8x8xf32> to vector<1x1x8x8xf32>
    tpu.vector_store %arg6[%c0_65, %c5, %c0_66, %c0_67], %76 {strides = array<i32>} : memref<1x8x8x8xf32, #tpu.memory_space<vmem>>, vector<1x1x8x8xf32>,
    %77 = vector.extract_strided_slice %27 {offsets = [6, 0, 0], sizes = [1, 8, 8], strides = [1, 1, 1]} : vector<8x8x8xf32> to vector<1x8x8xf32>
    %78 = vector.shape_cast %77 : vector<1x8x8xf32> to vector<8x8xf32>
    %cst_68 = arith.constant dense<0.000000e+00> : vector<8x8xf32>
    %79 = tpu.matmul %78, %28, %cst_68 {dimension_numbers = #tpu.dot_dimension_numbers<[1], [0], [0], [1], [0, 0, 1, 1], [], []>} : vector<8x8xf32>, vector<8x8xf32>, vector<8x8xf32> -> vector<8x8xf32>
    %cst_69 = arith.constant 0.000000e+00 : f32
    %80 = vector.broadcast %cst_69 : f32 to vector<8x8xf32>
    %81 = arith.maximumf %79, %80 : vector<8x8xf32>
    %c0_70 = arith.constant 0 : index
    %c6 = arith.constant 6 : index
    %c0_71 = arith.constant 0 : index
    %c0_72 = arith.constant 0 : index
    %82 = vector.load %arg6[%c0_70, %c6, %c0_71, %c0_72] : memref<1x8x8x8xf32, #tpu.memory_space<vmem>>, vector<1x1x8x8xf32>
    %83 = vector.shape_cast %82 : vector<1x1x8x8xf32> to vector<8x8xf32>
    %84 = vector.shape_cast %81 : vector<8x8xf32> to vector<1x1x8x8xf32>
    tpu.vector_store %arg6[%c0_70, %c6, %c0_71, %c0_72], %84 {strides = array<i32>} : memref<1x8x8x8xf32, #tpu.memory_space<vmem>>, vector<1x1x8x8xf32>,
    %85 = vector.extract_strided_slice %27 {offsets = [7, 0, 0], sizes = [1, 8, 8], strides = [1, 1, 1]} : vector<8x8x8xf32> to vector<1x8x8xf32>
    %86 = vector.shape_cast %85 : vector<1x8x8xf32> to vector<8x8xf32>
    %cst_73 = arith.constant dense<0.000000e+00> : vector<8x8xf32>
    %87 = tpu.matmul %86, %28, %cst_73 {dimension_numbers = #tpu.dot_dimension_numbers<[1], [0], [0], [1], [0, 0, 1, 1], [], []>} : vector<8x8xf32>, vector<8x8xf32>, vector<8x8xf32> -> vector<8x8xf32>
    %cst_74 = arith.constant 0.000000e+00 : f32
    %88 = vector.broadcast %cst_74 : f32 to vector<8x8xf32>
    %89 = arith.maximumf %87, %88 : vector<8x8xf32>
    %c0_75 = arith.constant 0 : index
    %c7 = arith.constant 7 : index
    %c0_76 = arith.constant 0 : index
    %c0_77 = arith.constant 0 : index
    %90 = vector.load %arg6[%c0_75, %c7, %c0_76, %c0_77] : memref<1x8x8x8xf32, #tpu.memory_space<vmem>>, vector<1x1x8x8xf32>
    %91 = vector.shape_cast %90 : vector<1x1x8x8xf32> to vector<8x8xf32>
    %92 = vector.shape_cast %89 : vector<8x8xf32> to vector<1x1x8x8xf32>
    tpu.vector_store %arg6[%c0_75, %c7, %c0_76, %c0_77], %92 {strides = array<i32>} : memref<1x8x8x8xf32, #tpu.memory_space<vmem>>, vector<1x1x8x8xf32>,
    return
  }
  func.func @transform_0(%arg0: i32) -> (i32, i32, i32, i32) {
    %c0_i32 = arith.constant 0 : i32
    %c0_i32_0 = arith.constant 0 : i32
    %c0_i32_1 = arith.constant 0 : i32
    %c0_i32_2 = arith.constant 0 : i32
    return %arg0, %c0_i32, %c0_i32_0, %c0_i32_1 : i32, i32, i32, i32
  }
  func.func @transform_1(%arg0: i32) -> (i32, i32, i32, i32) {
    %c0_i32 = arith.constant 0 : i32
    %c0_i32_0 = arith.constant 0 : i32
    %c0_i32_1 = arith.constant 0 : i32
    %c0_i32_2 = arith.constant 0 : i32
    return %arg0, %c0_i32, %c0_i32_0, %c0_i32_1 : i32, i32, i32, i32
  }
  func.func @transform_2(%arg0: i32) -> (i32, i32, i32, i32) {
    %c0_i32 = arith.constant 0 : i32
    %c0_i32_0 = arith.constant 0 : i32
    %c0_i32_1 = arith.constant 0 : i32
    %c0_i32_2 = arith.constant 0 : i32
    return %arg0, %c0_i32, %c0_i32_0, %c0_i32_1 : i32, i32, i32, i32
  }
  func.func @transform_3(%arg0: i32) -> (i32, i32, i32, i32) {
    %c0_i32 = arith.constant 0 : i32
    %c0_i32_0 = arith.constant 0 : i32
    %c0_i32_1 = arith.constant 0 : i32
    %c0_i32_2 = arith.constant 0 : i32
    return %arg0, %c0_i32, %c0_i32_0, %c0_i32_1 : i32, i32, i32, i32
  }
  func.func @transform_4(%arg0: i32) -> (i32, i32) {
    %c0_i32 = arith.constant 0 : i32
    %c0_i32_0 = arith.constant 0 : i32
    %c0_i32_1 = arith.constant 0 : i32
    return %c0_i32, %c0_i32_0 : i32, i32
  }
  func.func @transform_5(%arg0: i32) -> (i32, i32, i32, i32) {
    %c0_i32 = arith.constant 0 : i32
    %c0_i32_0 = arith.constant 0 : i32
    %c0_i32_1 = arith.constant 0 : i32
    %c0_i32_2 = arith.constant 0 : i32
    return %arg0, %c0_i32, %c0_i32_0, %c0_i32_1 : i32, i32, i32, i32
  }
}

module attributes {stable_mosaic.version = 11 : i64} {
  func.func @_add_up_kernel(%arg0: i32, %arg1: memref<8x2x8x2x8xf32, #tpu.memory_space<vmem>>, %arg2: memref<8x1x8x1x8xf32, #tpu.memory_space<vmem>>, %arg3: memref<8x2x8x2x8xf32, #tpu.memory_space<vmem>>) attributes {dimension_semantics = [#tpu.dimension_semantics<parallel>], iteration_bounds = array<i64: 2>, scalar_prefetch = 0 : i64, scratch_operands = 0 : i64, tpu.core_type = #tpu.core_type<tc>, window_params = [{transform_indices = @transform_0, window_bounds = array<i64: 8, 2, 8, 2, 8>}, {transform_indices = @transform_1, window_bounds = array<i64: 8, 1, 8, 1, 8>}, {transform_indices = @transform_2, window_bounds = array<i64: 8, 2, 8, 2, 8>}]} {
    %c0 = arith.constant 0 : index
    %c0_0 = arith.constant 0 : index
    %c0_1 = arith.constant 0 : index
    %c0_2 = arith.constant 0 : index
    %c0_3 = arith.constant 0 : index
    %0 = vector.load %arg1[%c0, %c0_0, %c0_1, %c0_2, %c0_3] : memref<8x2x8x2x8xf32, #tpu.memory_space<vmem>>, vector<8x2x8x2x8xf32>
    %c0_4 = arith.constant 0 : index
    %c0_5 = arith.constant 0 : index
    %c0_6 = arith.constant 0 : index
    %c0_7 = arith.constant 0 : index
    %c0_8 = arith.constant 0 : index
    %1 = vector.load %arg2[%c0_4, %c0_5, %c0_6, %c0_7, %c0_8] : memref<8x1x8x1x8xf32, #tpu.memory_space<vmem>>, vector<8x1x8x1x8xf32>
    %2 = vector.broadcast %1 : vector<8x1x8x1x8xf32> to vector<8x2x8x2x8xf32>
    %3 = arith.addf %0, %2 : vector<8x2x8x2x8xf32>
    %c0_9 = arith.constant 0 : index
    %c0_10 = arith.constant 0 : index
    %c0_11 = arith.constant 0 : index
    %c0_12 = arith.constant 0 : index
    %c0_13 = arith.constant 0 : index
    %4 = vector.load %arg3[%c0_9, %c0_10, %c0_11, %c0_12, %c0_13] : memref<8x2x8x2x8xf32, #tpu.memory_space<vmem>>, vector<8x2x8x2x8xf32>
    tpu.vector_store %arg3[%c0_9, %c0_10, %c0_11, %c0_12, %c0_13], %3 {strides = array<i32>} : memref<8x2x8x2x8xf32, #tpu.memory_space<vmem>>, vector<8x2x8x2x8xf32>,
    return
  }
  func.func @transform_0(%arg0: i32) -> (i32, i32, i32, i32, i32) {
    %c0_i32 = arith.constant 0 : i32
    %c0_i32_0 = arith.constant 0 : i32
    %c0_i32_1 = arith.constant 0 : i32
    %c0_i32_2 = arith.constant 0 : i32
    %c0_i32_3 = arith.constant 0 : i32
    return %arg0, %c0_i32, %c0_i32_0, %c0_i32_1, %c0_i32_2 : i32, i32, i32, i32, i32
  }
  func.func @transform_1(%arg0: i32) -> (i32, i32, i32, i32, i32) {
    %c0_i32 = arith.constant 0 : i32
    %c0_i32_0 = arith.constant 0 : i32
    %c0_i32_1 = arith.constant 0 : i32
    %c0_i32_2 = arith.constant 0 : i32
    %c0_i32_3 = arith.constant 0 : i32
    return %arg0, %c0_i32, %c0_i32_0, %c0_i32_1, %c0_i32_2 : i32, i32, i32, i32, i32
  }
  func.func @transform_2(%arg0: i32) -> (i32, i32, i32, i32, i32) {
    %c0_i32 = arith.constant 0 : i32
    %c0_i32_0 = arith.constant 0 : i32
    %c0_i32_1 = arith.constant 0 : i32
    %c0_i32_2 = arith.constant 0 : i32
    %c0_i32_3 = arith.constant 0 : i32
    return %arg0, %c0_i32, %c0_i32_0, %c0_i32_1, %c0_i32_2 : i32, i32, i32, i32, i32
  }
}

module attributes {stable_mosaic.version = 11 : i64} {
  func.func @_dw3x3_s2_kernel(%arg0: i32, %arg1: memref<1x9x9x8xf32, #tpu.memory_space<vmem>>, %arg2: memref<1x9x8x8xf32, #tpu.memory_space<vmem>>, %arg3: memref<1x8x9x8xf32, #tpu.memory_space<vmem>>, %arg4: memref<1x8x8x8xf32, #tpu.memory_space<vmem>>, %arg5: memref<9x1x1x8xf32, #tpu.memory_space<vmem>>, %arg6: memref<1x1x8xf32, #tpu.memory_space<vmem>>, %arg7: memref<1x8x8x8xf32, #tpu.memory_space<vmem>>) attributes {dimension_semantics = [#tpu.dimension_semantics<parallel>], iteration_bounds = array<i64: 2>, scalar_prefetch = 0 : i64, scratch_operands = 0 : i64, tpu.core_type = #tpu.core_type<tc>, window_params = [{transform_indices = @transform_0, window_bounds = array<i64: 1, 9, 9, 8>}, {transform_indices = @transform_1, window_bounds = array<i64: 1, 9, 8, 8>}, {transform_indices = @transform_2, window_bounds = array<i64: 1, 8, 9, 8>}, {transform_indices = @transform_3, window_bounds = array<i64: 1, 8, 8, 8>}, {pipeline_mode = #tpu.pipeline_mode<synchronous>, transform_indices = @transform_4, window_bounds = array<i64: 9, 1, 1, 8>}, {pipeline_mode = #tpu.pipeline_mode<synchronous>, transform_indices = @transform_5, window_bounds = array<i64: 1, 1, 8>}, {transform_indices = @transform_6, window_bounds = array<i64: 1, 8, 8, 8>}]} {
    %cst = arith.constant 0.000000e+00 : f32
    %0 = vector.broadcast %cst : f32 to vector<8x8x8xf32>
    %c0 = arith.constant 0 : index
    %c0_0 = arith.constant 0 : index
    %c0_1 = arith.constant 0 : index
    %c0_2 = arith.constant 0 : index
    %1 = vector.load %arg1[%c0, %c0_0, %c0_1, %c0_2] : memref<1x9x9x8xf32, #tpu.memory_space<vmem>>, vector<1x8x8x8xf32>
    %2 = vector.shape_cast %1 : vector<1x8x8x8xf32> to vector<8x8x8xf32>
    %c0_3 = arith.constant 0 : index
    %c0_4 = arith.constant 0 : index
    %c0_5 = arith.constant 0 : index
    %c0_6 = arith.constant 0 : index
    %3 = vector.load %arg5[%c0_3, %c0_4, %c0_5, %c0_6] : memref<9x1x1x8xf32, #tpu.memory_space<vmem>>, vector<1x1x1x8xf32>
    %4 = vector.shape_cast %3 : vector<1x1x1x8xf32> to vector<1x1x8xf32>
    %5 = vector.broadcast %4 : vector<1x1x8xf32> to vector<8x8x8xf32>
    %6 = arith.mulf %2, %5 : vector<8x8x8xf32>
    %7 = arith.addf %0, %6 : vector<8x8x8xf32>
    %c0_7 = arith.constant 0 : index
    %c0_8 = arith.constant 0 : index
    %c0_9 = arith.constant 0 : index
    %c0_10 = arith.constant 0 : index
    %8 = vector.load %arg2[%c0_7, %c0_8, %c0_9, %c0_10] : memref<1x9x8x8xf32, #tpu.memory_space<vmem>>, vector<1x8x8x8xf32>
    %9 = vector.shape_cast %8 : vector<1x8x8x8xf32> to vector<8x8x8xf32>
    %c1 = arith.constant 1 : index
    %c0_11 = arith.constant 0 : index
    %c0_12 = arith.constant 0 : index
    %c0_13 = arith.constant 0 : index
    %10 = vector.load %arg5[%c1, %c0_11, %c0_12, %c0_13] : memref<9x1x1x8xf32, #tpu.memory_space<vmem>>, vector<1x1x1x8xf32>
    %11 = vector.shape_cast %10 : vector<1x1x1x8xf32> to vector<1x1x8xf32>
    %12 = vector.broadcast %11 : vector<1x1x8xf32> to vector<8x8x8xf32>
    %13 = arith.mulf %9, %12 : vector<8x8x8xf32>
    %14 = arith.addf %7, %13 : vector<8x8x8xf32>
    %c0_14 = arith.constant 0 : index
    %c0_15 = arith.constant 0 : index
    %c1_16 = arith.constant 1 : index
    %c0_17 = arith.constant 0 : index
    %15 = vector.load %arg1[%c0_14, %c0_15, %c1_16, %c0_17] : memref<1x9x9x8xf32, #tpu.memory_space<vmem>>, vector<1x8x8x8xf32>
    %16 = vector.shape_cast %15 : vector<1x8x8x8xf32> to vector<8x8x8xf32>
    %c2 = arith.constant 2 : index
    %c0_18 = arith.constant 0 : index
    %c0_19 = arith.constant 0 : index
    %c0_20 = arith.constant 0 : index
    %17 = vector.load %arg5[%c2, %c0_18, %c0_19, %c0_20] : memref<9x1x1x8xf32, #tpu.memory_space<vmem>>, vector<1x1x1x8xf32>
    %18 = vector.shape_cast %17 : vector<1x1x1x8xf32> to vector<1x1x8xf32>
    %19 = vector.broadcast %18 : vector<1x1x8xf32> to vector<8x8x8xf32>
    %20 = arith.mulf %16, %19 : vector<8x8x8xf32>
    %21 = arith.addf %14, %20 : vector<8x8x8xf32>
    %c0_21 = arith.constant 0 : index
    %c0_22 = arith.constant 0 : index
    %c0_23 = arith.constant 0 : index
    %c0_24 = arith.constant 0 : index
    %22 = vector.load %arg3[%c0_21, %c0_22, %c0_23, %c0_24] : memref<1x8x9x8xf32, #tpu.memory_space<vmem>>, vector<1x8x8x8xf32>
    %23 = vector.shape_cast %22 : vector<1x8x8x8xf32> to vector<8x8x8xf32>
    %c3 = arith.constant 3 : index
    %c0_25 = arith.constant 0 : index
    %c0_26 = arith.constant 0 : index
    %c0_27 = arith.constant 0 : index
    %24 = vector.load %arg5[%c3, %c0_25, %c0_26, %c0_27] : memref<9x1x1x8xf32, #tpu.memory_space<vmem>>, vector<1x1x1x8xf32>
    %25 = vector.shape_cast %24 : vector<1x1x1x8xf32> to vector<1x1x8xf32>
    %26 = vector.broadcast %25 : vector<1x1x8xf32> to vector<8x8x8xf32>
    %27 = arith.mulf %23, %26 : vector<8x8x8xf32>
    %28 = arith.addf %21, %27 : vector<8x8x8xf32>
    %c0_28 = arith.constant 0 : index
    %c0_29 = arith.constant 0 : index
    %c0_30 = arith.constant 0 : index
    %c0_31 = arith.constant 0 : index
    %29 = vector.load %arg4[%c0_28, %c0_29, %c0_30, %c0_31] : memref<1x8x8x8xf32, #tpu.memory_space<vmem>>, vector<1x8x8x8xf32>
    %30 = vector.shape_cast %29 : vector<1x8x8x8xf32> to vector<8x8x8xf32>
    %c4 = arith.constant 4 : index
    %c0_32 = arith.constant 0 : index
    %c0_33 = arith.constant 0 : index
    %c0_34 = arith.constant 0 : index
    %31 = vector.load %arg5[%c4, %c0_32, %c0_33, %c0_34] : memref<9x1x1x8xf32, #tpu.memory_space<vmem>>, vector<1x1x1x8xf32>
    %32 = vector.shape_cast %31 : vector<1x1x1x8xf32> to vector<1x1x8xf32>
    %33 = vector.broadcast %32 : vector<1x1x8xf32> to vector<8x8x8xf32>
    %34 = arith.mulf %30, %33 : vector<8x8x8xf32>
    %35 = arith.addf %28, %34 : vector<8x8x8xf32>
    %c0_35 = arith.constant 0 : index
    %c0_36 = arith.constant 0 : index
    %c1_37 = arith.constant 1 : index
    %c0_38 = arith.constant 0 : index
    %36 = vector.load %arg3[%c0_35, %c0_36, %c1_37, %c0_38] : memref<1x8x9x8xf32, #tpu.memory_space<vmem>>, vector<1x8x8x8xf32>
    %37 = vector.shape_cast %36 : vector<1x8x8x8xf32> to vector<8x8x8xf32>
    %c5 = arith.constant 5 : index
    %c0_39 = arith.constant 0 : index
    %c0_40 = arith.constant 0 : index
    %c0_41 = arith.constant 0 : index
    %38 = vector.load %arg5[%c5, %c0_39, %c0_40, %c0_41] : memref<9x1x1x8xf32, #tpu.memory_space<vmem>>, vector<1x1x1x8xf32>
    %39 = vector.shape_cast %38 : vector<1x1x1x8xf32> to vector<1x1x8xf32>
    %40 = vector.broadcast %39 : vector<1x1x8xf32> to vector<8x8x8xf32>
    %41 = arith.mulf %37, %40 : vector<8x8x8xf32>
    %42 = arith.addf %35, %41 : vector<8x8x8xf32>
    %c0_42 = arith.constant 0 : index
    %c1_43 = arith.constant 1 : index
    %c0_44 = arith.constant 0 : index
    %c0_45 = arith.constant 0 : index
    %43 = vector.load %arg1[%c0_42, %c1_43, %c0_44, %c0_45] : memref<1x9x9x8xf32, #tpu.memory_space<vmem>>, vector<1x8x8x8xf32>
    %44 = vector.shape_cast %43 : vector<1x8x8x8xf32> to vector<8x8x8xf32>
    %c6 = arith.constant 6 : index
    %c0_46 = arith.constant 0 : index
    %c0_47 = arith.constant 0 : index
    %c0_48 = arith.constant 0 : index
    %45 = vector.load %arg5[%c6, %c0_46, %c0_47, %c0_48] : memref<9x1x1x8xf32, #tpu.memory_space<vmem>>, vector<1x1x1x8xf32>
    %46 = vector.shape_cast %45 : vector<1x1x1x8xf32> to vector<1x1x8xf32>
    %47 = vector.broadcast %46 : vector<1x1x8xf32> to vector<8x8x8xf32>
    %48 = arith.mulf %44, %47 : vector<8x8x8xf32>
    %49 = arith.addf %42, %48 : vector<8x8x8xf32>
    %c0_49 = arith.constant 0 : index
    %c1_50 = arith.constant 1 : index
    %c0_51 = arith.constant 0 : index
    %c0_52 = arith.constant 0 : index
    %50 = vector.load %arg2[%c0_49, %c1_50, %c0_51, %c0_52] : memref<1x9x8x8xf32, #tpu.memory_space<vmem>>, vector<1x8x8x8xf32>
    %51 = vector.shape_cast %50 : vector<1x8x8x8xf32> to vector<8x8x8xf32>
    %c7 = arith.constant 7 : index
    %c0_53 = arith.constant 0 : index
    %c0_54 = arith.constant 0 : index
    %c0_55 = arith.constant 0 : index
    %52 = vector.load %arg5[%c7, %c0_53, %c0_54, %c0_55] : memref<9x1x1x8xf32, #tpu.memory_space<vmem>>, vector<1x1x1x8xf32>
    %53 = vector.shape_cast %52 : vector<1x1x1x8xf32> to vector<1x1x8xf32>
    %54 = vector.broadcast %53 : vector<1x1x8xf32> to vector<8x8x8xf32>
    %55 = arith.mulf %51, %54 : vector<8x8x8xf32>
    %56 = arith.addf %49, %55 : vector<8x8x8xf32>
    %c0_56 = arith.constant 0 : index
    %c1_57 = arith.constant 1 : index
    %c1_58 = arith.constant 1 : index
    %c0_59 = arith.constant 0 : index
    %57 = vector.load %arg1[%c0_56, %c1_57, %c1_58, %c0_59] : memref<1x9x9x8xf32, #tpu.memory_space<vmem>>, vector<1x8x8x8xf32>
    %58 = vector.shape_cast %57 : vector<1x8x8x8xf32> to vector<8x8x8xf32>
    %c8 = arith.constant 8 : index
    %c0_60 = arith.constant 0 : index
    %c0_61 = arith.constant 0 : index
    %c0_62 = arith.constant 0 : index
    %59 = vector.load %arg5[%c8, %c0_60, %c0_61, %c0_62] : memref<9x1x1x8xf32, #tpu.memory_space<vmem>>, vector<1x1x1x8xf32>
    %60 = vector.shape_cast %59 : vector<1x1x1x8xf32> to vector<1x1x8xf32>
    %61 = vector.broadcast %60 : vector<1x1x8xf32> to vector<8x8x8xf32>
    %62 = arith.mulf %58, %61 : vector<8x8x8xf32>
    %63 = arith.addf %56, %62 : vector<8x8x8xf32>
    %c0_63 = arith.constant 0 : index
    %c0_64 = arith.constant 0 : index
    %c0_65 = arith.constant 0 : index
    %64 = vector.load %arg6[%c0_63, %c0_64, %c0_65] : memref<1x1x8xf32, #tpu.memory_space<vmem>>, vector<1x1x8xf32>
    %65 = vector.broadcast %64 : vector<1x1x8xf32> to vector<8x8x8xf32>
    %66 = arith.addf %63, %65 : vector<8x8x8xf32>
    %c0_66 = arith.constant 0 : index
    %c0_67 = arith.constant 0 : index
    %c0_68 = arith.constant 0 : index
    %c0_69 = arith.constant 0 : index
    %67 = vector.load %arg7[%c0_66, %c0_67, %c0_68, %c0_69] : memref<1x8x8x8xf32, #tpu.memory_space<vmem>>, vector<1x8x8x8xf32>
    %68 = vector.shape_cast %67 : vector<1x8x8x8xf32> to vector<8x8x8xf32>
    %69 = vector.shape_cast %66 : vector<8x8x8xf32> to vector<1x8x8x8xf32>
    tpu.vector_store %arg7[%c0_66, %c0_67, %c0_68, %c0_69], %69 {strides = array<i32>} : memref<1x8x8x8xf32, #tpu.memory_space<vmem>>, vector<1x8x8x8xf32>,
    return
  }
  func.func @transform_0(%arg0: i32) -> (i32, i32, i32, i32) {
    %c0_i32 = arith.constant 0 : i32
    %c0_i32_0 = arith.constant 0 : i32
    %c0_i32_1 = arith.constant 0 : i32
    %c0_i32_2 = arith.constant 0 : i32
    return %arg0, %c0_i32, %c0_i32_0, %c0_i32_1 : i32, i32, i32, i32
  }
  func.func @transform_1(%arg0: i32) -> (i32, i32, i32, i32) {
    %c0_i32 = arith.constant 0 : i32
    %c0_i32_0 = arith.constant 0 : i32
    %c0_i32_1 = arith.constant 0 : i32
    %c0_i32_2 = arith.constant 0 : i32
    return %arg0, %c0_i32, %c0_i32_0, %c0_i32_1 : i32, i32, i32, i32
  }
  func.func @transform_2(%arg0: i32) -> (i32, i32, i32, i32) {
    %c0_i32 = arith.constant 0 : i32
    %c0_i32_0 = arith.constant 0 : i32
    %c0_i32_1 = arith.constant 0 : i32
    %c0_i32_2 = arith.constant 0 : i32
    return %arg0, %c0_i32, %c0_i32_0, %c0_i32_1 : i32, i32, i32, i32
  }
  func.func @transform_3(%arg0: i32) -> (i32, i32, i32, i32) {
    %c0_i32 = arith.constant 0 : i32
    %c0_i32_0 = arith.constant 0 : i32
    %c0_i32_1 = arith.constant 0 : i32
    %c0_i32_2 = arith.constant 0 : i32
    return %arg0, %c0_i32, %c0_i32_0, %c0_i32_1 : i32, i32, i32, i32
  }
  func.func @transform_4(%arg0: i32) -> (i32, i32, i32, i32) {
    %c0_i32 = arith.constant 0 : i32
    %c0_i32_0 = arith.constant 0 : i32
    %c0_i32_1 = arith.constant 0 : i32
    %c0_i32_2 = arith.constant 0 : i32
    %c0_i32_3 = arith.constant 0 : i32
    return %c0_i32, %c0_i32_0, %c0_i32_1, %c0_i32_2 : i32, i32, i32, i32
  }
  func.func @transform_5(%arg0: i32) -> (i32, i32, i32) {
    %c0_i32 = arith.constant 0 : i32
    %c0_i32_0 = arith.constant 0 : i32
    %c0_i32_1 = arith.constant 0 : i32
    %c0_i32_2 = arith.constant 0 : i32
    return %c0_i32, %c0_i32_0, %c0_i32_1 : i32, i32, i32
  }
  func.func @transform_6(%arg0: i32) -> (i32, i32, i32, i32) {
    %c0_i32 = arith.constant 0 : i32
    %c0_i32_0 = arith.constant 0 : i32
    %c0_i32_1 = arith.constant 0 : i32
    %c0_i32_2 = arith.constant 0 : i32
    return %arg0, %c0_i32, %c0_i32_0, %c0_i32_1 : i32, i32, i32, i32
  }
}

module attributes {stable_mosaic.version = 11 : i64} {
  func.func @_global_branch_kernel(%arg0: i32, %arg1: memref<1x5x5x8xf32, #tpu.memory_space<vmem>>, %arg2: memref<1x5x4x8xf32, #tpu.memory_space<vmem>>, %arg3: memref<1x4x5x8xf32, #tpu.memory_space<vmem>>, %arg4: memref<1x4x4x8xf32, #tpu.memory_space<vmem>>, %arg5: memref<8x8xf32, #tpu.memory_space<vmem>>, %arg6: memref<1x4x4x8xf32, #tpu.memory_space<vmem>>) attributes {dimension_semantics = [#tpu.dimension_semantics<parallel>], iteration_bounds = array<i64: 2>, scalar_prefetch = 0 : i64, scratch_operands = 0 : i64, tpu.core_type = #tpu.core_type<tc>, window_params = [{transform_indices = @transform_0, window_bounds = array<i64: 1, 5, 5, 8>}, {transform_indices = @transform_1, window_bounds = array<i64: 1, 5, 4, 8>}, {transform_indices = @transform_2, window_bounds = array<i64: 1, 4, 5, 8>}, {transform_indices = @transform_3, window_bounds = array<i64: 1, 4, 4, 8>}, {pipeline_mode = #tpu.pipeline_mode<synchronous>, transform_indices = @transform_4, window_bounds = array<i64: 8, 8>}, {transform_indices = @transform_5, window_bounds = array<i64: 1, 4, 4, 8>}]} {
    %cst = arith.constant 0.000000e+00 : f32
    %0 = vector.broadcast %cst : f32 to vector<4x4x8xf32>
    %c0 = arith.constant 0 : index
    %c0_0 = arith.constant 0 : index
    %c0_1 = arith.constant 0 : index
    %c0_2 = arith.constant 0 : index
    %1 = vector.load %arg1[%c0, %c0_0, %c0_1, %c0_2] : memref<1x5x5x8xf32, #tpu.memory_space<vmem>>, vector<1x4x4x8xf32>
    %2 = vector.shape_cast %1 : vector<1x4x4x8xf32> to vector<4x4x8xf32>
    %3 = arith.addf %0, %2 : vector<4x4x8xf32>
    %c0_3 = arith.constant 0 : index
    %c0_4 = arith.constant 0 : index
    %c0_5 = arith.constant 0 : index
    %c0_6 = arith.constant 0 : index
    %4 = vector.load %arg2[%c0_3, %c0_4, %c0_5, %c0_6] : memref<1x5x4x8xf32, #tpu.memory_space<vmem>>, vector<1x4x4x8xf32>
    %5 = vector.shape_cast %4 : vector<1x4x4x8xf32> to vector<4x4x8xf32>
    %6 = arith.addf %3, %5 : vector<4x4x8xf32>
    %c0_7 = arith.constant 0 : index
    %c0_8 = arith.constant 0 : index
    %c1 = arith.constant 1 : index
    %c0_9 = arith.constant 0 : index
    %7 = vector.load %arg1[%c0_7, %c0_8, %c1, %c0_9] : memref<1x5x5x8xf32, #tpu.memory_space<vmem>>, vector<1x4x4x8xf32>
    %8 = vector.shape_cast %7 : vector<1x4x4x8xf32> to vector<4x4x8xf32>
    %9 = arith.addf %6, %8 : vector<4x4x8xf32>
    %c0_10 = arith.constant 0 : index
    %c0_11 = arith.constant 0 : index
    %c0_12 = arith.constant 0 : index
    %c0_13 = arith.constant 0 : index
    %10 = vector.load %arg3[%c0_10, %c0_11, %c0_12, %c0_13] : memref<1x4x5x8xf32, #tpu.memory_space<vmem>>, vector<1x4x4x8xf32>
    %11 = vector.shape_cast %10 : vector<1x4x4x8xf32> to vector<4x4x8xf32>
    %12 = arith.addf %9, %11 : vector<4x4x8xf32>
    %c0_14 = arith.constant 0 : index
    %c0_15 = arith.constant 0 : index
    %c0_16 = arith.constant 0 : index
    %c0_17 = arith.constant 0 : index
    %13 = vector.load %arg4[%c0_14, %c0_15, %c0_16, %c0_17] : memref<1x4x4x8xf32, #tpu.memory_space<vmem>>, vector<1x4x4x8xf32>
    %14 = vector.shape_cast %13 : vector<1x4x4x8xf32> to vector<4x4x8xf32>
    %15 = arith.addf %12, %14 : vector<4x4x8xf32>
    %c0_18 = arith.constant 0 : index
    %c0_19 = arith.constant 0 : index
    %c1_20 = arith.constant 1 : index
    %c0_21 = arith.constant 0 : index
    %16 = vector.load %arg3[%c0_18, %c0_19, %c1_20, %c0_21] : memref<1x4x5x8xf32, #tpu.memory_space<vmem>>, vector<1x4x4x8xf32>
    %17 = vector.shape_cast %16 : vector<1x4x4x8xf32> to vector<4x4x8xf32>
    %18 = arith.addf %15, %17 : vector<4x4x8xf32>
    %c0_22 = arith.constant 0 : index
    %c1_23 = arith.constant 1 : index
    %c0_24 = arith.constant 0 : index
    %c0_25 = arith.constant 0 : index
    %19 = vector.load %arg1[%c0_22, %c1_23, %c0_24, %c0_25] : memref<1x5x5x8xf32, #tpu.memory_space<vmem>>, vector<1x4x4x8xf32>
    %20 = vector.shape_cast %19 : vector<1x4x4x8xf32> to vector<4x4x8xf32>
    %21 = arith.addf %18, %20 : vector<4x4x8xf32>
    %c0_26 = arith.constant 0 : index
    %c1_27 = arith.constant 1 : index
    %c0_28 = arith.constant 0 : index
    %c0_29 = arith.constant 0 : index
    %22 = vector.load %arg2[%c0_26, %c1_27, %c0_28, %c0_29] : memref<1x5x4x8xf32, #tpu.memory_space<vmem>>, vector<1x4x4x8xf32>
    %23 = vector.shape_cast %22 : vector<1x4x4x8xf32> to vector<4x4x8xf32>
    %24 = arith.addf %21, %23 : vector<4x4x8xf32>
    %c0_30 = arith.constant 0 : index
    %c1_31 = arith.constant 1 : index
    %c1_32 = arith.constant 1 : index
    %c0_33 = arith.constant 0 : index
    %25 = vector.load %arg1[%c0_30, %c1_31, %c1_32, %c0_33] : memref<1x5x5x8xf32, #tpu.memory_space<vmem>>, vector<1x4x4x8xf32>
    %26 = vector.shape_cast %25 : vector<1x4x4x8xf32> to vector<4x4x8xf32>
    %27 = arith.addf %24, %26 : vector<4x4x8xf32>
    %c0_34 = arith.constant 0 : index
    %c0_35 = arith.constant 0 : index
    %28 = vector.load %arg5[%c0_34, %c0_35] : memref<8x8xf32, #tpu.memory_space<vmem>>, vector<8x8xf32>
    %29 = vector.extract_strided_slice %27 {offsets = [0, 0, 0], sizes = [1, 4, 8], strides = [1, 1, 1]} : vector<4x4x8xf32> to vector<1x4x8xf32>
    %30 = vector.shape_cast %29 : vector<1x4x8xf32> to vector<4x8xf32>
    %cst_36 = arith.constant dense<0.000000e+00> : vector<4x8xf32>
    %31 = tpu.matmul %30, %28, %cst_36 {dimension_numbers = #tpu.dot_dimension_numbers<[1], [0], [0], [1], [0, 0, 1, 1], [], []>} : vector<4x8xf32>, vector<8x8xf32>, vector<4x8xf32> -> vector<4x8xf32>
    %cst_37 = arith.constant 0.000000e+00 : f32
    %32 = vector.broadcast %cst_37 : f32 to vector<4x8xf32>
    %33 = arith.maximumf %31, %32 : vector<4x8xf32>
    %c0_38 = arith.constant 0 : index
    %c0_39 = arith.constant 0 : index
    %c0_40 = arith.constant 0 : index
    %c0_41 = arith.constant 0 : index
    %34 = vector.load %arg6[%c0_38, %c0_39, %c0_40, %c0_41] : memref<1x4x4x8xf32, #tpu.memory_space<vmem>>, vector<1x1x4x8xf32>
    %35 = vector.shape_cast %34 : vector<1x1x4x8xf32> to vector<4x8xf32>
    %36 = vector.shape_cast %33 : vector<4x8xf32> to vector<1x1x4x8xf32>
    tpu.vector_store %arg6[%c0_38, %c0_39, %c0_40, %c0_41], %36 {strides = array<i32>} : memref<1x4x4x8xf32, #tpu.memory_space<vmem>>, vector<1x1x4x8xf32>,
    %37 = vector.extract_strided_slice %27 {offsets = [1, 0, 0], sizes = [1, 4, 8], strides = [1, 1, 1]} : vector<4x4x8xf32> to vector<1x4x8xf32>
    %38 = vector.shape_cast %37 : vector<1x4x8xf32> to vector<4x8xf32>
    %cst_42 = arith.constant dense<0.000000e+00> : vector<4x8xf32>
    %39 = tpu.matmul %38, %28, %cst_42 {dimension_numbers = #tpu.dot_dimension_numbers<[1], [0], [0], [1], [0, 0, 1, 1], [], []>} : vector<4x8xf32>, vector<8x8xf32>, vector<4x8xf32> -> vector<4x8xf32>
    %cst_43 = arith.constant 0.000000e+00 : f32
    %40 = vector.broadcast %cst_43 : f32 to vector<4x8xf32>
    %41 = arith.maximumf %39, %40 : vector<4x8xf32>
    %c0_44 = arith.constant 0 : index
    %c1_45 = arith.constant 1 : index
    %c0_46 = arith.constant 0 : index
    %c0_47 = arith.constant 0 : index
    %42 = vector.load %arg6[%c0_44, %c1_45, %c0_46, %c0_47] : memref<1x4x4x8xf32, #tpu.memory_space<vmem>>, vector<1x1x4x8xf32>
    %43 = vector.shape_cast %42 : vector<1x1x4x8xf32> to vector<4x8xf32>
    %44 = vector.shape_cast %41 : vector<4x8xf32> to vector<1x1x4x8xf32>
    tpu.vector_store %arg6[%c0_44, %c1_45, %c0_46, %c0_47], %44 {strides = array<i32>} : memref<1x4x4x8xf32, #tpu.memory_space<vmem>>, vector<1x1x4x8xf32>,
    %45 = vector.extract_strided_slice %27 {offsets = [2, 0, 0], sizes = [1, 4, 8], strides = [1, 1, 1]} : vector<4x4x8xf32> to vector<1x4x8xf32>
    %46 = vector.shape_cast %45 : vector<1x4x8xf32> to vector<4x8xf32>
    %cst_48 = arith.constant dense<0.000000e+00> : vector<4x8xf32>
    %47 = tpu.matmul %46, %28, %cst_48 {dimension_numbers = #tpu.dot_dimension_numbers<[1], [0], [0], [1], [0, 0, 1, 1], [], []>} : vector<4x8xf32>, vector<8x8xf32>, vector<4x8xf32> -> vector<4x8xf32>
    %cst_49 = arith.constant 0.000000e+00 : f32
    %48 = vector.broadcast %cst_49 : f32 to vector<4x8xf32>
    %49 = arith.maximumf %47, %48 : vector<4x8xf32>
    %c0_50 = arith.constant 0 : index
    %c2 = arith.constant 2 : index
    %c0_51 = arith.constant 0 : index
    %c0_52 = arith.constant 0 : index
    %50 = vector.load %arg6[%c0_50, %c2, %c0_51, %c0_52] : memref<1x4x4x8xf32, #tpu.memory_space<vmem>>, vector<1x1x4x8xf32>
    %51 = vector.shape_cast %50 : vector<1x1x4x8xf32> to vector<4x8xf32>
    %52 = vector.shape_cast %49 : vector<4x8xf32> to vector<1x1x4x8xf32>
    tpu.vector_store %arg6[%c0_50, %c2, %c0_51, %c0_52], %52 {strides = array<i32>} : memref<1x4x4x8xf32, #tpu.memory_space<vmem>>, vector<1x1x4x8xf32>,
    %53 = vector.extract_strided_slice %27 {offsets = [3, 0, 0], sizes = [1, 4, 8], strides = [1, 1, 1]} : vector<4x4x8xf32> to vector<1x4x8xf32>
    %54 = vector.shape_cast %53 : vector<1x4x8xf32> to vector<4x8xf32>
    %cst_53 = arith.constant dense<0.000000e+00> : vector<4x8xf32>
    %55 = tpu.matmul %54, %28, %cst_53 {dimension_numbers = #tpu.dot_dimension_numbers<[1], [0], [0], [1], [0, 0, 1, 1], [], []>} : vector<4x8xf32>, vector<8x8xf32>, vector<4x8xf32> -> vector<4x8xf32>
    %cst_54 = arith.constant 0.000000e+00 : f32
    %56 = vector.broadcast %cst_54 : f32 to vector<4x8xf32>
    %57 = arith.maximumf %55, %56 : vector<4x8xf32>
    %c0_55 = arith.constant 0 : index
    %c3 = arith.constant 3 : index
    %c0_56 = arith.constant 0 : index
    %c0_57 = arith.constant 0 : index
    %58 = vector.load %arg6[%c0_55, %c3, %c0_56, %c0_57] : memref<1x4x4x8xf32, #tpu.memory_space<vmem>>, vector<1x1x4x8xf32>
    %59 = vector.shape_cast %58 : vector<1x1x4x8xf32> to vector<4x8xf32>
    %60 = vector.shape_cast %57 : vector<4x8xf32> to vector<1x1x4x8xf32>
    tpu.vector_store %arg6[%c0_55, %c3, %c0_56, %c0_57], %60 {strides = array<i32>} : memref<1x4x4x8xf32, #tpu.memory_space<vmem>>, vector<1x1x4x8xf32>,
    return
  }
  func.func @transform_0(%arg0: i32) -> (i32, i32, i32, i32) {
    %c0_i32 = arith.constant 0 : i32
    %c0_i32_0 = arith.constant 0 : i32
    %c0_i32_1 = arith.constant 0 : i32
    %c0_i32_2 = arith.constant 0 : i32
    return %arg0, %c0_i32, %c0_i32_0, %c0_i32_1 : i32, i32, i32, i32
  }
  func.func @transform_1(%arg0: i32) -> (i32, i32, i32, i32) {
    %c0_i32 = arith.constant 0 : i32
    %c0_i32_0 = arith.constant 0 : i32
    %c0_i32_1 = arith.constant 0 : i32
    %c0_i32_2 = arith.constant 0 : i32
    return %arg0, %c0_i32, %c0_i32_0, %c0_i32_1 : i32, i32, i32, i32
  }
  func.func @transform_2(%arg0: i32) -> (i32, i32, i32, i32) {
    %c0_i32 = arith.constant 0 : i32
    %c0_i32_0 = arith.constant 0 : i32
    %c0_i32_1 = arith.constant 0 : i32
    %c0_i32_2 = arith.constant 0 : i32
    return %arg0, %c0_i32, %c0_i32_0, %c0_i32_1 : i32, i32, i32, i32
  }
  func.func @transform_3(%arg0: i32) -> (i32, i32, i32, i32) {
    %c0_i32 = arith.constant 0 : i32
    %c0_i32_0 = arith.constant 0 : i32
    %c0_i32_1 = arith.constant 0 : i32
    %c0_i32_2 = arith.constant 0 : i32
    return %arg0, %c0_i32, %c0_i32_0, %c0_i32_1 : i32, i32, i32, i32
  }
  func.func @transform_4(%arg0: i32) -> (i32, i32) {
    %c0_i32 = arith.constant 0 : i32
    %c0_i32_0 = arith.constant 0 : i32
    %c0_i32_1 = arith.constant 0 : i32
    return %c0_i32, %c0_i32_0 : i32, i32
  }
  func.func @transform_5(%arg0: i32) -> (i32, i32, i32, i32) {
    %c0_i32 = arith.constant 0 : i32
    %c0_i32_0 = arith.constant 0 : i32
    %c0_i32_1 = arith.constant 0 : i32
    %c0_i32_2 = arith.constant 0 : i32
    return %arg0, %c0_i32, %c0_i32_0, %c0_i32_1 : i32, i32, i32, i32
  }
}

module attributes {stable_mosaic.version = 11 : i64} {
  func.func @_add_up2_kernel(%arg0: i32, %arg1: memref<4x2x4x2x8xf32, #tpu.memory_space<vmem>>, %arg2: memref<4x2x4x2x8xf32, #tpu.memory_space<vmem>>, %arg3: memref<4x1x4x1x8xf32, #tpu.memory_space<vmem>>, %arg4: memref<4x2x4x2x8xf32, #tpu.memory_space<vmem>>) attributes {dimension_semantics = [#tpu.dimension_semantics<parallel>], iteration_bounds = array<i64: 2>, scalar_prefetch = 0 : i64, scratch_operands = 0 : i64, tpu.core_type = #tpu.core_type<tc>, window_params = [{transform_indices = @transform_0, window_bounds = array<i64: 4, 2, 4, 2, 8>}, {transform_indices = @transform_1, window_bounds = array<i64: 4, 2, 4, 2, 8>}, {transform_indices = @transform_2, window_bounds = array<i64: 4, 1, 4, 1, 8>}, {transform_indices = @transform_3, window_bounds = array<i64: 4, 2, 4, 2, 8>}]} {
    %c0 = arith.constant 0 : index
    %c0_0 = arith.constant 0 : index
    %c0_1 = arith.constant 0 : index
    %c0_2 = arith.constant 0 : index
    %c0_3 = arith.constant 0 : index
    %0 = vector.load %arg1[%c0, %c0_0, %c0_1, %c0_2, %c0_3] : memref<4x2x4x2x8xf32, #tpu.memory_space<vmem>>, vector<4x2x4x2x8xf32>
    %c0_4 = arith.constant 0 : index
    %c0_5 = arith.constant 0 : index
    %c0_6 = arith.constant 0 : index
    %c0_7 = arith.constant 0 : index
    %c0_8 = arith.constant 0 : index
    %1 = vector.load %arg2[%c0_4, %c0_5, %c0_6, %c0_7, %c0_8] : memref<4x2x4x2x8xf32, #tpu.memory_space<vmem>>, vector<4x2x4x2x8xf32>
    %2 = arith.addf %0, %1 : vector<4x2x4x2x8xf32>
    %c0_9 = arith.constant 0 : index
    %c0_10 = arith.constant 0 : index
    %c0_11 = arith.constant 0 : index
    %c0_12 = arith.constant 0 : index
    %c0_13 = arith.constant 0 : index
    %3 = vector.load %arg3[%c0_9, %c0_10, %c0_11, %c0_12, %c0_13] : memref<4x1x4x1x8xf32, #tpu.memory_space<vmem>>, vector<4x1x4x1x8xf32>
    %4 = vector.broadcast %3 : vector<4x1x4x1x8xf32> to vector<4x2x4x2x8xf32>
    %5 = arith.addf %2, %4 : vector<4x2x4x2x8xf32>
    %c0_14 = arith.constant 0 : index
    %c0_15 = arith.constant 0 : index
    %c0_16 = arith.constant 0 : index
    %c0_17 = arith.constant 0 : index
    %c0_18 = arith.constant 0 : index
    %6 = vector.load %arg4[%c0_14, %c0_15, %c0_16, %c0_17, %c0_18] : memref<4x2x4x2x8xf32, #tpu.memory_space<vmem>>, vector<4x2x4x2x8xf32>
    tpu.vector_store %arg4[%c0_14, %c0_15, %c0_16, %c0_17, %c0_18], %5 {strides = array<i32>} : memref<4x2x4x2x8xf32, #tpu.memory_space<vmem>>, vector<4x2x4x2x8xf32>,
    return
  }
  func.func @transform_0(%arg0: i32) -> (i32, i32, i32, i32, i32) {
    %c0_i32 = arith.constant 0 : i32
    %c0_i32_0 = arith.constant 0 : i32
    %c0_i32_1 = arith.constant 0 : i32
    %c0_i32_2 = arith.constant 0 : i32
    %c0_i32_3 = arith.constant 0 : i32
    return %arg0, %c0_i32, %c0_i32_0, %c0_i32_1, %c0_i32_2 : i32, i32, i32, i32, i32
  }
  func.func @transform_1(%arg0: i32) -> (i32, i32, i32, i32, i32) {
    %c0_i32 = arith.constant 0 : i32
    %c0_i32_0 = arith.constant 0 : i32
    %c0_i32_1 = arith.constant 0 : i32
    %c0_i32_2 = arith.constant 0 : i32
    %c0_i32_3 = arith.constant 0 : i32
    return %arg0, %c0_i32, %c0_i32_0, %c0_i32_1, %c0_i32_2 : i32, i32, i32, i32, i32
  }
  func.func @transform_2(%arg0: i32) -> (i32, i32, i32, i32, i32) {
    %c0_i32 = arith.constant 0 : i32
    %c0_i32_0 = arith.constant 0 : i32
    %c0_i32_1 = arith.constant 0 : i32
    %c0_i32_2 = arith.constant 0 : i32
    %c0_i32_3 = arith.constant 0 : i32
    return %arg0, %c0_i32, %c0_i32_0, %c0_i32_1, %c0_i32_2 : i32, i32, i32, i32, i32
  }
  func.func @transform_3(%arg0: i32) -> (i32, i32, i32, i32, i32) {
    %c0_i32 = arith.constant 0 : i32
    %c0_i32_0 = arith.constant 0 : i32
    %c0_i32_1 = arith.constant 0 : i32
    %c0_i32_2 = arith.constant 0 : i32
    %c0_i32_3 = arith.constant 0 : i32
    return %arg0, %c0_i32, %c0_i32_0, %c0_i32_1, %c0_i32_2 : i32, i32, i32, i32, i32
  }
}

module attributes {stable_mosaic.version = 11 : i64} {
  func.func @_dw3x3_s2_pw_kernel(%arg0: i32, %arg1: memref<1x9x9x4xf32, #tpu.memory_space<vmem>>, %arg2: memref<1x9x8x4xf32, #tpu.memory_space<vmem>>, %arg3: memref<1x8x9x4xf32, #tpu.memory_space<vmem>>, %arg4: memref<1x8x8x4xf32, #tpu.memory_space<vmem>>, %arg5: memref<9x1x1x4xf32, #tpu.memory_space<vmem>>, %arg6: memref<1x1x4xf32, #tpu.memory_space<vmem>>, %arg7: memref<4x8xf32, #tpu.memory_space<vmem>>, %arg8: memref<1x8xf32, #tpu.memory_space<vmem>>, %arg9: memref<1x8x8x8xf32, #tpu.memory_space<vmem>>) attributes {dimension_semantics = [#tpu.dimension_semantics<parallel>], iteration_bounds = array<i64: 2>, scalar_prefetch = 0 : i64, scratch_operands = 0 : i64, tpu.core_type = #tpu.core_type<tc>, window_params = [{transform_indices = @transform_0, window_bounds = array<i64: 1, 9, 9, 4>}, {transform_indices = @transform_1, window_bounds = array<i64: 1, 9, 8, 4>}, {transform_indices = @transform_2, window_bounds = array<i64: 1, 8, 9, 4>}, {transform_indices = @transform_3, window_bounds = array<i64: 1, 8, 8, 4>}, {pipeline_mode = #tpu.pipeline_mode<synchronous>, transform_indices = @transform_4, window_bounds = array<i64: 9, 1, 1, 4>}, {pipeline_mode = #tpu.pipeline_mode<synchronous>, transform_indices = @transform_5, window_bounds = array<i64: 1, 1, 4>}, {pipeline_mode = #tpu.pipeline_mode<synchronous>, transform_indices = @transform_6, window_bounds = array<i64: 4, 8>}, {pipeline_mode = #tpu.pipeline_mode<synchronous>, transform_indices = @transform_7, window_bounds = array<i64: 1, 8>}, {transform_indices = @transform_8, window_bounds = array<i64: 1, 8, 8, 8>}]} {
    %cst = arith.constant 0.000000e+00 : f32
    %0 = vector.broadcast %cst : f32 to vector<8x8x4xf32>
    %c0 = arith.constant 0 : index
    %c0_0 = arith.constant 0 : index
    %c0_1 = arith.constant 0 : index
    %c0_2 = arith.constant 0 : index
    %1 = vector.load %arg1[%c0, %c0_0, %c0_1, %c0_2] : memref<1x9x9x4xf32, #tpu.memory_space<vmem>>, vector<1x8x8x4xf32>
    %2 = vector.shape_cast %1 : vector<1x8x8x4xf32> to vector<8x8x4xf32>
    %c0_3 = arith.constant 0 : index
    %c0_4 = arith.constant 0 : index
    %c0_5 = arith.constant 0 : index
    %c0_6 = arith.constant 0 : index
    %3 = vector.load %arg5[%c0_3, %c0_4, %c0_5, %c0_6] : memref<9x1x1x4xf32, #tpu.memory_space<vmem>>, vector<1x1x1x4xf32>
    %4 = vector.shape_cast %3 : vector<1x1x1x4xf32> to vector<1x1x4xf32>
    %5 = vector.broadcast %4 : vector<1x1x4xf32> to vector<8x8x4xf32>
    %6 = arith.mulf %2, %5 : vector<8x8x4xf32>
    %7 = arith.addf %0, %6 : vector<8x8x4xf32>
    %c0_7 = arith.constant 0 : index
    %c0_8 = arith.constant 0 : index
    %c0_9 = arith.constant 0 : index
    %c0_10 = arith.constant 0 : index
    %8 = vector.load %arg2[%c0_7, %c0_8, %c0_9, %c0_10] : memref<1x9x8x4xf32, #tpu.memory_space<vmem>>, vector<1x8x8x4xf32>
    %9 = vector.shape_cast %8 : vector<1x8x8x4xf32> to vector<8x8x4xf32>
    %c1 = arith.constant 1 : index
    %c0_11 = arith.constant 0 : index
    %c0_12 = arith.constant 0 : index
    %c0_13 = arith.constant 0 : index
    %10 = vector.load %arg5[%c1, %c0_11, %c0_12, %c0_13] : memref<9x1x1x4xf32, #tpu.memory_space<vmem>>, vector<1x1x1x4xf32>
    %11 = vector.shape_cast %10 : vector<1x1x1x4xf32> to vector<1x1x4xf32>
    %12 = vector.broadcast %11 : vector<1x1x4xf32> to vector<8x8x4xf32>
    %13 = arith.mulf %9, %12 : vector<8x8x4xf32>
    %14 = arith.addf %7, %13 : vector<8x8x4xf32>
    %c0_14 = arith.constant 0 : index
    %c0_15 = arith.constant 0 : index
    %c1_16 = arith.constant 1 : index
    %c0_17 = arith.constant 0 : index
    %15 = vector.load %arg1[%c0_14, %c0_15, %c1_16, %c0_17] : memref<1x9x9x4xf32, #tpu.memory_space<vmem>>, vector<1x8x8x4xf32>
    %16 = vector.shape_cast %15 : vector<1x8x8x4xf32> to vector<8x8x4xf32>
    %c2 = arith.constant 2 : index
    %c0_18 = arith.constant 0 : index
    %c0_19 = arith.constant 0 : index
    %c0_20 = arith.constant 0 : index
    %17 = vector.load %arg5[%c2, %c0_18, %c0_19, %c0_20] : memref<9x1x1x4xf32, #tpu.memory_space<vmem>>, vector<1x1x1x4xf32>
    %18 = vector.shape_cast %17 : vector<1x1x1x4xf32> to vector<1x1x4xf32>
    %19 = vector.broadcast %18 : vector<1x1x4xf32> to vector<8x8x4xf32>
    %20 = arith.mulf %16, %19 : vector<8x8x4xf32>
    %21 = arith.addf %14, %20 : vector<8x8x4xf32>
    %c0_21 = arith.constant 0 : index
    %c0_22 = arith.constant 0 : index
    %c0_23 = arith.constant 0 : index
    %c0_24 = arith.constant 0 : index
    %22 = vector.load %arg3[%c0_21, %c0_22, %c0_23, %c0_24] : memref<1x8x9x4xf32, #tpu.memory_space<vmem>>, vector<1x8x8x4xf32>
    %23 = vector.shape_cast %22 : vector<1x8x8x4xf32> to vector<8x8x4xf32>
    %c3 = arith.constant 3 : index
    %c0_25 = arith.constant 0 : index
    %c0_26 = arith.constant 0 : index
    %c0_27 = arith.constant 0 : index
    %24 = vector.load %arg5[%c3, %c0_25, %c0_26, %c0_27] : memref<9x1x1x4xf32, #tpu.memory_space<vmem>>, vector<1x1x1x4xf32>
    %25 = vector.shape_cast %24 : vector<1x1x1x4xf32> to vector<1x1x4xf32>
    %26 = vector.broadcast %25 : vector<1x1x4xf32> to vector<8x8x4xf32>
    %27 = arith.mulf %23, %26 : vector<8x8x4xf32>
    %28 = arith.addf %21, %27 : vector<8x8x4xf32>
    %c0_28 = arith.constant 0 : index
    %c0_29 = arith.constant 0 : index
    %c0_30 = arith.constant 0 : index
    %c0_31 = arith.constant 0 : index
    %29 = vector.load %arg4[%c0_28, %c0_29, %c0_30, %c0_31] : memref<1x8x8x4xf32, #tpu.memory_space<vmem>>, vector<1x8x8x4xf32>
    %30 = vector.shape_cast %29 : vector<1x8x8x4xf32> to vector<8x8x4xf32>
    %c4 = arith.constant 4 : index
    %c0_32 = arith.constant 0 : index
    %c0_33 = arith.constant 0 : index
    %c0_34 = arith.constant 0 : index
    %31 = vector.load %arg5[%c4, %c0_32, %c0_33, %c0_34] : memref<9x1x1x4xf32, #tpu.memory_space<vmem>>, vector<1x1x1x4xf32>
    %32 = vector.shape_cast %31 : vector<1x1x1x4xf32> to vector<1x1x4xf32>
    %33 = vector.broadcast %32 : vector<1x1x4xf32> to vector<8x8x4xf32>
    %34 = arith.mulf %30, %33 : vector<8x8x4xf32>
    %35 = arith.addf %28, %34 : vector<8x8x4xf32>
    %c0_35 = arith.constant 0 : index
    %c0_36 = arith.constant 0 : index
    %c1_37 = arith.constant 1 : index
    %c0_38 = arith.constant 0 : index
    %36 = vector.load %arg3[%c0_35, %c0_36, %c1_37, %c0_38] : memref<1x8x9x4xf32, #tpu.memory_space<vmem>>, vector<1x8x8x4xf32>
    %37 = vector.shape_cast %36 : vector<1x8x8x4xf32> to vector<8x8x4xf32>
    %c5 = arith.constant 5 : index
    %c0_39 = arith.constant 0 : index
    %c0_40 = arith.constant 0 : index
    %c0_41 = arith.constant 0 : index
    %38 = vector.load %arg5[%c5, %c0_39, %c0_40, %c0_41] : memref<9x1x1x4xf32, #tpu.memory_space<vmem>>, vector<1x1x1x4xf32>
    %39 = vector.shape_cast %38 : vector<1x1x1x4xf32> to vector<1x1x4xf32>
    %40 = vector.broadcast %39 : vector<1x1x4xf32> to vector<8x8x4xf32>
    %41 = arith.mulf %37, %40 : vector<8x8x4xf32>
    %42 = arith.addf %35, %41 : vector<8x8x4xf32>
    %c0_42 = arith.constant 0 : index
    %c1_43 = arith.constant 1 : index
    %c0_44 = arith.constant 0 : index
    %c0_45 = arith.constant 0 : index
    %43 = vector.load %arg1[%c0_42, %c1_43, %c0_44, %c0_45] : memref<1x9x9x4xf32, #tpu.memory_space<vmem>>, vector<1x8x8x4xf32>
    %44 = vector.shape_cast %43 : vector<1x8x8x4xf32> to vector<8x8x4xf32>
    %c6 = arith.constant 6 : index
    %c0_46 = arith.constant 0 : index
    %c0_47 = arith.constant 0 : index
    %c0_48 = arith.constant 0 : index
    %45 = vector.load %arg5[%c6, %c0_46, %c0_47, %c0_48] : memref<9x1x1x4xf32, #tpu.memory_space<vmem>>, vector<1x1x1x4xf32>
    %46 = vector.shape_cast %45 : vector<1x1x1x4xf32> to vector<1x1x4xf32>
    %47 = vector.broadcast %46 : vector<1x1x4xf32> to vector<8x8x4xf32>
    %48 = arith.mulf %44, %47 : vector<8x8x4xf32>
    %49 = arith.addf %42, %48 : vector<8x8x4xf32>
    %c0_49 = arith.constant 0 : index
    %c1_50 = arith.constant 1 : index
    %c0_51 = arith.constant 0 : index
    %c0_52 = arith.constant 0 : index
    %50 = vector.load %arg2[%c0_49, %c1_50, %c0_51, %c0_52] : memref<1x9x8x4xf32, #tpu.memory_space<vmem>>, vector<1x8x8x4xf32>
    %51 = vector.shape_cast %50 : vector<1x8x8x4xf32> to vector<8x8x4xf32>
    %c7 = arith.constant 7 : index
    %c0_53 = arith.constant 0 : index
    %c0_54 = arith.constant 0 : index
    %c0_55 = arith.constant 0 : index
    %52 = vector.load %arg5[%c7, %c0_53, %c0_54, %c0_55] : memref<9x1x1x4xf32, #tpu.memory_space<vmem>>, vector<1x1x1x4xf32>
    %53 = vector.shape_cast %52 : vector<1x1x1x4xf32> to vector<1x1x4xf32>
    %54 = vector.broadcast %53 : vector<1x1x4xf32> to vector<8x8x4xf32>
    %55 = arith.mulf %51, %54 : vector<8x8x4xf32>
    %56 = arith.addf %49, %55 : vector<8x8x4xf32>
    %c0_56 = arith.constant 0 : index
    %c1_57 = arith.constant 1 : index
    %c1_58 = arith.constant 1 : index
    %c0_59 = arith.constant 0 : index
    %57 = vector.load %arg1[%c0_56, %c1_57, %c1_58, %c0_59] : memref<1x9x9x4xf32, #tpu.memory_space<vmem>>, vector<1x8x8x4xf32>
    %58 = vector.shape_cast %57 : vector<1x8x8x4xf32> to vector<8x8x4xf32>
    %c8 = arith.constant 8 : index
    %c0_60 = arith.constant 0 : index
    %c0_61 = arith.constant 0 : index
    %c0_62 = arith.constant 0 : index
    %59 = vector.load %arg5[%c8, %c0_60, %c0_61, %c0_62] : memref<9x1x1x4xf32, #tpu.memory_space<vmem>>, vector<1x1x1x4xf32>
    %60 = vector.shape_cast %59 : vector<1x1x1x4xf32> to vector<1x1x4xf32>
    %61 = vector.broadcast %60 : vector<1x1x4xf32> to vector<8x8x4xf32>
    %62 = arith.mulf %58, %61 : vector<8x8x4xf32>
    %63 = arith.addf %56, %62 : vector<8x8x4xf32>
    %c0_63 = arith.constant 0 : index
    %c0_64 = arith.constant 0 : index
    %c0_65 = arith.constant 0 : index
    %64 = vector.load %arg6[%c0_63, %c0_64, %c0_65] : memref<1x1x4xf32, #tpu.memory_space<vmem>>, vector<1x1x4xf32>
    %65 = vector.broadcast %64 : vector<1x1x4xf32> to vector<8x8x4xf32>
    %66 = arith.addf %63, %65 : vector<8x8x4xf32>
    %c0_66 = arith.constant 0 : index
    %c0_67 = arith.constant 0 : index
    %67 = vector.load %arg7[%c0_66, %c0_67] : memref<4x8xf32, #tpu.memory_space<vmem>>, vector<4x8xf32>
    %c0_68 = arith.constant 0 : index
    %c0_69 = arith.constant 0 : index
    %68 = vector.load %arg8[%c0_68, %c0_69] : memref<1x8xf32, #tpu.memory_space<vmem>>, vector<1x8xf32>
    %69 = vector.extract_strided_slice %66 {offsets = [0, 0, 0], sizes = [1, 8, 4], strides = [1, 1, 1]} : vector<8x8x4xf32> to vector<1x8x4xf32>
    %70 = vector.shape_cast %69 : vector<1x8x4xf32> to vector<8x4xf32>
    %cst_70 = arith.constant dense<0.000000e+00> : vector<8x8xf32>
    %71 = tpu.matmul %70, %67, %cst_70 {dimension_numbers = #tpu.dot_dimension_numbers<[1], [0], [0], [1], [0, 0, 1, 1], [], []>} : vector<8x4xf32>, vector<4x8xf32>, vector<8x8xf32> -> vector<8x8xf32>
    %72 = vector.broadcast %68 : vector<1x8xf32> to vector<8x8xf32>
    %73 = arith.addf %71, %72 : vector<8x8xf32>
    %c0_71 = arith.constant 0 : index
    %c0_72 = arith.constant 0 : index
    %c0_73 = arith.constant 0 : index
    %c0_74 = arith.constant 0 : index
    %74 = vector.load %arg9[%c0_71, %c0_72, %c0_73, %c0_74] : memref<1x8x8x8xf32, #tpu.memory_space<vmem>>, vector<1x1x8x8xf32>
    %75 = vector.shape_cast %74 : vector<1x1x8x8xf32> to vector<8x8xf32>
    %76 = vector.shape_cast %73 : vector<8x8xf32> to vector<1x1x8x8xf32>
    tpu.vector_store %arg9[%c0_71, %c0_72, %c0_73, %c0_74], %76 {strides = array<i32>} : memref<1x8x8x8xf32, #tpu.memory_space<vmem>>, vector<1x1x8x8xf32>,
    %77 = vector.extract_strided_slice %66 {offsets = [1, 0, 0], sizes = [1, 8, 4], strides = [1, 1, 1]} : vector<8x8x4xf32> to vector<1x8x4xf32>
    %78 = vector.shape_cast %77 : vector<1x8x4xf32> to vector<8x4xf32>
    %cst_75 = arith.constant dense<0.000000e+00> : vector<8x8xf32>
    %79 = tpu.matmul %78, %67, %cst_75 {dimension_numbers = #tpu.dot_dimension_numbers<[1], [0], [0], [1], [0, 0, 1, 1], [], []>} : vector<8x4xf32>, vector<4x8xf32>, vector<8x8xf32> -> vector<8x8xf32>
    %80 = vector.broadcast %68 : vector<1x8xf32> to vector<8x8xf32>
    %81 = arith.addf %79, %80 : vector<8x8xf32>
    %c0_76 = arith.constant 0 : index
    %c1_77 = arith.constant 1 : index
    %c0_78 = arith.constant 0 : index
    %c0_79 = arith.constant 0 : index
    %82 = vector.load %arg9[%c0_76, %c1_77, %c0_78, %c0_79] : memref<1x8x8x8xf32, #tpu.memory_space<vmem>>, vector<1x1x8x8xf32>
    %83 = vector.shape_cast %82 : vector<1x1x8x8xf32> to vector<8x8xf32>
    %84 = vector.shape_cast %81 : vector<8x8xf32> to vector<1x1x8x8xf32>
    tpu.vector_store %arg9[%c0_76, %c1_77, %c0_78, %c0_79], %84 {strides = array<i32>} : memref<1x8x8x8xf32, #tpu.memory_space<vmem>>, vector<1x1x8x8xf32>,
    %85 = vector.extract_strided_slice %66 {offsets = [2, 0, 0], sizes = [1, 8, 4], strides = [1, 1, 1]} : vector<8x8x4xf32> to vector<1x8x4xf32>
    %86 = vector.shape_cast %85 : vector<1x8x4xf32> to vector<8x4xf32>
    %cst_80 = arith.constant dense<0.000000e+00> : vector<8x8xf32>
    %87 = tpu.matmul %86, %67, %cst_80 {dimension_numbers = #tpu.dot_dimension_numbers<[1], [0], [0], [1], [0, 0, 1, 1], [], []>} : vector<8x4xf32>, vector<4x8xf32>, vector<8x8xf32> -> vector<8x8xf32>
    %88 = vector.broadcast %68 : vector<1x8xf32> to vector<8x8xf32>
    %89 = arith.addf %87, %88 : vector<8x8xf32>
    %c0_81 = arith.constant 0 : index
    %c2_82 = arith.constant 2 : index
    %c0_83 = arith.constant 0 : index
    %c0_84 = arith.constant 0 : index
    %90 = vector.load %arg9[%c0_81, %c2_82, %c0_83, %c0_84] : memref<1x8x8x8xf32, #tpu.memory_space<vmem>>, vector<1x1x8x8xf32>
    %91 = vector.shape_cast %90 : vector<1x1x8x8xf32> to vector<8x8xf32>
    %92 = vector.shape_cast %89 : vector<8x8xf32> to vector<1x1x8x8xf32>
    tpu.vector_store %arg9[%c0_81, %c2_82, %c0_83, %c0_84], %92 {strides = array<i32>} : memref<1x8x8x8xf32, #tpu.memory_space<vmem>>, vector<1x1x8x8xf32>,
    %93 = vector.extract_strided_slice %66 {offsets = [3, 0, 0], sizes = [1, 8, 4], strides = [1, 1, 1]} : vector<8x8x4xf32> to vector<1x8x4xf32>
    %94 = vector.shape_cast %93 : vector<1x8x4xf32> to vector<8x4xf32>
    %cst_85 = arith.constant dense<0.000000e+00> : vector<8x8xf32>
    %95 = tpu.matmul %94, %67, %cst_85 {dimension_numbers = #tpu.dot_dimension_numbers<[1], [0], [0], [1], [0, 0, 1, 1], [], []>} : vector<8x4xf32>, vector<4x8xf32>, vector<8x8xf32> -> vector<8x8xf32>
    %96 = vector.broadcast %68 : vector<1x8xf32> to vector<8x8xf32>
    %97 = arith.addf %95, %96 : vector<8x8xf32>
    %c0_86 = arith.constant 0 : index
    %c3_87 = arith.constant 3 : index
    %c0_88 = arith.constant 0 : index
    %c0_89 = arith.constant 0 : index
    %98 = vector.load %arg9[%c0_86, %c3_87, %c0_88, %c0_89] : memref<1x8x8x8xf32, #tpu.memory_space<vmem>>, vector<1x1x8x8xf32>
    %99 = vector.shape_cast %98 : vector<1x1x8x8xf32> to vector<8x8xf32>
    %100 = vector.shape_cast %97 : vector<8x8xf32> to vector<1x1x8x8xf32>
    tpu.vector_store %arg9[%c0_86, %c3_87, %c0_88, %c0_89], %100 {strides = array<i32>} : memref<1x8x8x8xf32, #tpu.memory_space<vmem>>, vector<1x1x8x8xf32>,
    %101 = vector.extract_strided_slice %66 {offsets = [4, 0, 0], sizes = [1, 8, 4], strides = [1, 1, 1]} : vector<8x8x4xf32> to vector<1x8x4xf32>
    %102 = vector.shape_cast %101 : vector<1x8x4xf32> to vector<8x4xf32>
    %cst_90 = arith.constant dense<0.000000e+00> : vector<8x8xf32>
    %103 = tpu.matmul %102, %67, %cst_90 {dimension_numbers = #tpu.dot_dimension_numbers<[1], [0], [0], [1], [0, 0, 1, 1], [], []>} : vector<8x4xf32>, vector<4x8xf32>, vector<8x8xf32> -> vector<8x8xf32>
    %104 = vector.broadcast %68 : vector<1x8xf32> to vector<8x8xf32>
    %105 = arith.addf %103, %104 : vector<8x8xf32>
    %c0_91 = arith.constant 0 : index
    %c4_92 = arith.constant 4 : index
    %c0_93 = arith.constant 0 : index
    %c0_94 = arith.constant 0 : index
    %106 = vector.load %arg9[%c0_91, %c4_92, %c0_93, %c0_94] : memref<1x8x8x8xf32, #tpu.memory_space<vmem>>, vector<1x1x8x8xf32>
    %107 = vector.shape_cast %106 : vector<1x1x8x8xf32> to vector<8x8xf32>
    %108 = vector.shape_cast %105 : vector<8x8xf32> to vector<1x1x8x8xf32>
    tpu.vector_store %arg9[%c0_91, %c4_92, %c0_93, %c0_94], %108 {strides = array<i32>} : memref<1x8x8x8xf32, #tpu.memory_space<vmem>>, vector<1x1x8x8xf32>,
    %109 = vector.extract_strided_slice %66 {offsets = [5, 0, 0], sizes = [1, 8, 4], strides = [1, 1, 1]} : vector<8x8x4xf32> to vector<1x8x4xf32>
    %110 = vector.shape_cast %109 : vector<1x8x4xf32> to vector<8x4xf32>
    %cst_95 = arith.constant dense<0.000000e+00> : vector<8x8xf32>
    %111 = tpu.matmul %110, %67, %cst_95 {dimension_numbers = #tpu.dot_dimension_numbers<[1], [0], [0], [1], [0, 0, 1, 1], [], []>} : vector<8x4xf32>, vector<4x8xf32>, vector<8x8xf32> -> vector<8x8xf32>
    %112 = vector.broadcast %68 : vector<1x8xf32> to vector<8x8xf32>
    %113 = arith.addf %111, %112 : vector<8x8xf32>
    %c0_96 = arith.constant 0 : index
    %c5_97 = arith.constant 5 : index
    %c0_98 = arith.constant 0 : index
    %c0_99 = arith.constant 0 : index
    %114 = vector.load %arg9[%c0_96, %c5_97, %c0_98, %c0_99] : memref<1x8x8x8xf32, #tpu.memory_space<vmem>>, vector<1x1x8x8xf32>
    %115 = vector.shape_cast %114 : vector<1x1x8x8xf32> to vector<8x8xf32>
    %116 = vector.shape_cast %113 : vector<8x8xf32> to vector<1x1x8x8xf32>
    tpu.vector_store %arg9[%c0_96, %c5_97, %c0_98, %c0_99], %116 {strides = array<i32>} : memref<1x8x8x8xf32, #tpu.memory_space<vmem>>, vector<1x1x8x8xf32>,
    %117 = vector.extract_strided_slice %66 {offsets = [6, 0, 0], sizes = [1, 8, 4], strides = [1, 1, 1]} : vector<8x8x4xf32> to vector<1x8x4xf32>
    %118 = vector.shape_cast %117 : vector<1x8x4xf32> to vector<8x4xf32>
    %cst_100 = arith.constant dense<0.000000e+00> : vector<8x8xf32>
    %119 = tpu.matmul %118, %67, %cst_100 {dimension_numbers = #tpu.dot_dimension_numbers<[1], [0], [0], [1], [0, 0, 1, 1], [], []>} : vector<8x4xf32>, vector<4x8xf32>, vector<8x8xf32> -> vector<8x8xf32>
    %120 = vector.broadcast %68 : vector<1x8xf32> to vector<8x8xf32>
    %121 = arith.addf %119, %120 : vector<8x8xf32>
    %c0_101 = arith.constant 0 : index
    %c6_102 = arith.constant 6 : index
    %c0_103 = arith.constant 0 : index
    %c0_104 = arith.constant 0 : index
    %122 = vector.load %arg9[%c0_101, %c6_102, %c0_103, %c0_104] : memref<1x8x8x8xf32, #tpu.memory_space<vmem>>, vector<1x1x8x8xf32>
    %123 = vector.shape_cast %122 : vector<1x1x8x8xf32> to vector<8x8xf32>
    %124 = vector.shape_cast %121 : vector<8x8xf32> to vector<1x1x8x8xf32>
    tpu.vector_store %arg9[%c0_101, %c6_102, %c0_103, %c0_104], %124 {strides = array<i32>} : memref<1x8x8x8xf32, #tpu.memory_space<vmem>>, vector<1x1x8x8xf32>,
    %125 = vector.extract_strided_slice %66 {offsets = [7, 0, 0], sizes = [1, 8, 4], strides = [1, 1, 1]} : vector<8x8x4xf32> to vector<1x8x4xf32>
    %126 = vector.shape_cast %125 : vector<1x8x4xf32> to vector<8x4xf32>
    %cst_105 = arith.constant dense<0.000000e+00> : vector<8x8xf32>
    %127 = tpu.matmul %126, %67, %cst_105 {dimension_numbers = #tpu.dot_dimension_numbers<[1], [0], [0], [1], [0, 0, 1, 1], [], []>} : vector<8x4xf32>, vector<4x8xf32>, vector<8x8xf32> -> vector<8x8xf32>
    %128 = vector.broadcast %68 : vector<1x8xf32> to vector<8x8xf32>
    %129 = arith.addf %127, %128 : vector<8x8xf32>
    %c0_106 = arith.constant 0 : index
    %c7_107 = arith.constant 7 : index
    %c0_108 = arith.constant 0 : index
    %c0_109 = arith.constant 0 : index
    %130 = vector.load %arg9[%c0_106, %c7_107, %c0_108, %c0_109] : memref<1x8x8x8xf32, #tpu.memory_space<vmem>>, vector<1x1x8x8xf32>
    %131 = vector.shape_cast %130 : vector<1x1x8x8xf32> to vector<8x8xf32>
    %132 = vector.shape_cast %129 : vector<8x8xf32> to vector<1x1x8x8xf32>
    tpu.vector_store %arg9[%c0_106, %c7_107, %c0_108, %c0_109], %132 {strides = array<i32>} : memref<1x8x8x8xf32, #tpu.memory_space<vmem>>, vector<1x1x8x8xf32>,
    return
  }
  func.func @transform_0(%arg0: i32) -> (i32, i32, i32, i32) {
    %c0_i32 = arith.constant 0 : i32
    %c0_i32_0 = arith.constant 0 : i32
    %c0_i32_1 = arith.constant 0 : i32
    %c0_i32_2 = arith.constant 0 : i32
    return %arg0, %c0_i32, %c0_i32_0, %c0_i32_1 : i32, i32, i32, i32
  }
  func.func @transform_1(%arg0: i32) -> (i32, i32, i32, i32) {
    %c0_i32 = arith.constant 0 : i32
    %c0_i32_0 = arith.constant 0 : i32
    %c0_i32_1 = arith.constant 0 : i32
    %c0_i32_2 = arith.constant 0 : i32
    return %arg0, %c0_i32, %c0_i32_0, %c0_i32_1 : i32, i32, i32, i32
  }
  func.func @transform_2(%arg0: i32) -> (i32, i32, i32, i32) {
    %c0_i32 = arith.constant 0 : i32
    %c0_i32_0 = arith.constant 0 : i32
    %c0_i32_1 = arith.constant 0 : i32
    %c0_i32_2 = arith.constant 0 : i32
    return %arg0, %c0_i32, %c0_i32_0, %c0_i32_1 : i32, i32, i32, i32
  }
  func.func @transform_3(%arg0: i32) -> (i32, i32, i32, i32) {
    %c0_i32 = arith.constant 0 : i32
    %c0_i32_0 = arith.constant 0 : i32
    %c0_i32_1 = arith.constant 0 : i32
    %c0_i32_2 = arith.constant 0 : i32
    return %arg0, %c0_i32, %c0_i32_0, %c0_i32_1 : i32, i32, i32, i32
  }
  func.func @transform_4(%arg0: i32) -> (i32, i32, i32, i32) {
    %c0_i32 = arith.constant 0 : i32
    %c0_i32_0 = arith.constant 0 : i32
    %c0_i32_1 = arith.constant 0 : i32
    %c0_i32_2 = arith.constant 0 : i32
    %c0_i32_3 = arith.constant 0 : i32
    return %c0_i32, %c0_i32_0, %c0_i32_1, %c0_i32_2 : i32, i32, i32, i32
  }
  func.func @transform_5(%arg0: i32) -> (i32, i32, i32) {
    %c0_i32 = arith.constant 0 : i32
    %c0_i32_0 = arith.constant 0 : i32
    %c0_i32_1 = arith.constant 0 : i32
    %c0_i32_2 = arith.constant 0 : i32
    return %c0_i32, %c0_i32_0, %c0_i32_1 : i32, i32, i32
  }
  func.func @transform_6(%arg0: i32) -> (i32, i32) {
    %c0_i32 = arith.constant 0 : i32
    %c0_i32_0 = arith.constant 0 : i32
    %c0_i32_1 = arith.constant 0 : i32
    return %c0_i32, %c0_i32_0 : i32, i32
  }
  func.func @transform_7(%arg0: i32) -> (i32, i32) {
    %c0_i32 = arith.constant 0 : i32
    %c0_i32_0 = arith.constant 0 : i32
    %c0_i32_1 = arith.constant 0 : i32
    return %c0_i32, %c0_i32_0 : i32, i32
  }
  func.func @transform_8(%arg0: i32) -> (i32, i32, i32, i32) {
    %c0_i32 = arith.constant 0 : i32
    %c0_i32_0 = arith.constant 0 : i32
    %c0_i32_1 = arith.constant 0 : i32
    %c0_i32_2 = arith.constant 0 : i32
    return %arg0, %c0_i32, %c0_i32_0, %c0_i32_1 : i32, i32, i32, i32
  }
}

</mosaic_0001>

<bundles_post_ra>
// kernel: _lambda_.8
= control target key start
LH: loop header
LB: loop body
LE: loop exit
PB: predicated region body
PF: predicated region fallthrough
CT: control target
= control target key end

     0   :  { %vm279_vm0 = vcmask 1043456   ;;  %vm86_vm1 = vcmask 31744   ;;  %vm732_vm2 = vcmask 64512   ;;  %s1636_s1 = inlined_call_operand.vmem [shape: f32[4,8], index: 1, kind: input, shape index: {}]   ;;  %s1637_s0 = inlined_call_operand.vmem [shape: f32[512,4], index: 0, kind: input, shape index: {}]   ;;  %s1638_s2 = inlined_call_operand.vmem [shape: f32[1,8], index: 2, kind: input, shape index: {}]   ;;  %s1639_s3 = inlined_call_operand.vmem [shape: f32[512,8], index: 3, kind: output, shape index: {}]  }
   0x1   :  { %v78_v0 = vld [vmem:[%s1636_s1] sm:$0xf]  ;;  %v15_v3 = vld [vmem:[%s1637_s0 + $0x8] sm:$0xff]  ;;  %v16_v5 = vld [vmem:[%s1637_s0 + $0x10] sm:$0xff] }
   0x2   :  { %v14_v1 = vld [vmem:[%s1637_s0] sm:$0xff]  ;;  %932 = vmatprep.subr.msk.mxu0 %vm279_vm0, %v78_v0  ;;  %1030 = vmatprep.subr.msk.mxu1 %vm279_vm0, %v78_v0  ;;  %v47_v4 = vld [vmem:[%s1637_s0 + $0x108] sm:$0xff]  ;;  %v48_v6 = vld [vmem:[%s1637_s0 + $0x110] sm:$0xff] }
   0x3   :  { %v46_v2 = vld [vmem:[%s1637_s0 + $0x100] sm:$0xff]  ;;  %933 = vmatpush3.msk.msra.mxu0 %vm279_vm0, %v78_v0  ;;  %1031 = vmatpush3.msk.msra.mxu1 %vm279_vm0, %v78_v0  ;;  %v17_v7 = vld [vmem:[%s1637_s0 + $0x18] sm:$0xff]  ;;  %v19_v11 = vld [vmem:[%s1637_s0 + $0x28] sm:$0xff] }
   0x4   :  { %934 = vmatprep.mubr.msk.f32.mxu0 %vm86_vm1, %v14_v1  ;;  %982 = vmatprep.mubr.msk.f32.mxu1 %vm86_vm1, %v46_v2  ;;  %v49_v8 = vld [vmem:[%s1637_s0 + $0x118] sm:$0xff]  ;;  %v18_v9 = vld [vmem:[%s1637_s0 + $0x20] sm:$0xff]  ;;  %v51_v12 = vld [vmem:[%s1637_s0 + $0x128] sm:$0xff] }
   0x5   :  { %935 = vmatmul.mubr.msk.f32.vlgmr.msra.gmra.mxu0 %vm86_vm1, %v15_v3  ;;  %983 = vmatmul.mubr.msk.f32.vlgmr.msra.gmra.mxu1 %vm86_vm1, %v47_v4  ;;  %v50_v10 = vld [vmem:[%s1637_s0 + $0x120] sm:$0xff]  ;;  %v20_v13 = vld [vmem:[%s1637_s0 + $0x30] sm:$0xff]  ;;  %v21_v15 = vld [vmem:[%s1637_s0 + $0x38] sm:$0xff] }
   0x6   :  { %937 = vmatprep.mubr.msk.f32.mxu0 %vm86_vm1, %v16_v5  ;;  %985 = vmatprep.mubr.msk.f32.mxu1 %vm86_vm1, %v48_v6  ;;  %v52_v14 = vld [vmem:[%s1637_s0 + $0x130] sm:$0xff]  ;;  %v53_v16 = vld [vmem:[%s1637_s0 + $0x138] sm:$0xff]  ;;  %v22_v17 = vld [vmem:[%s1637_s0 + $0x40] sm:$0xff] }
   0x7   :  { %v54_v18 = vld [vmem:[%s1637_s0 + $0x140] sm:$0xff]  ;;  %v23_v19 = vld [vmem:[%s1637_s0 + $0x48] sm:$0xff]  ;;  %v24_v21 = vld [vmem:[%s1637_s0 + $0x50] sm:$0xff] }
   0x8   :  { %v55_v20 = vld [vmem:[%s1637_s0 + $0x148] sm:$0xff]  ;;  %v56_v22 = vld [vmem:[%s1637_s0 + $0x150] sm:$0xff]  ;;  %v25_v23 = vld [vmem:[%s1637_s0 + $0x58] sm:$0xff] }
   0x9   :  { %938 = vmatmul.mubr.msk.f32.gmra.mxu0 %vm86_vm1, %v17_v7  ;;  %986 = vmatmul.mubr.msk.f32.gmra.mxu1 %vm86_vm1, %v49_v8  ;;  %v57_v24 = vld [vmem:[%s1637_s0 + $0x158] sm:$0xff]  ;;  %v26_v25 = vld [vmem:[%s1637_s0 + $0x60] sm:$0xff]  ;;  %v27_v27 = vld [vmem:[%s1637_s0 + $0x68] sm:$0xff] }
   0xa   :  { %940 = vmatprep.mubr.msk.f32.mxu0 %vm86_vm1, %v18_v9  ;;  %988 = vmatprep.mubr.msk.f32.mxu1 %vm86_vm1, %v50_v10  ;;  %v58_v26 = vld [vmem:[%s1637_s0 + $0x160] sm:$0xff]  ;;  %v59_v28 = vld [vmem:[%s1637_s0 + $0x168] sm:$0xff]  ;;  %v28_v29 = vld [vmem:[%s1637_s0 + $0x70] sm:$0xff] }
   0xb   :  { %v60_v30 = vld [vmem:[%s1637_s0 + $0x170] sm:$0xff]  ;;  %v29_v31 = vld [vmem:[%s1637_s0 + $0x78] sm:$0xff]  ;;  %v30_v33 = vld [vmem:[%s1637_s0 + $0x80] sm:$0xff] }
   0xc   :  { %v61_v32 = vld [vmem:[%s1637_s0 + $0x178] sm:$0xff]  ;;  %v62_v34 = vld [vmem:[%s1637_s0 + $0x180] sm:$0xff]  ;;  %v31_v35 = vld [vmem:[%s1637_s0 + $0x88] sm:$0xff] }
   0xd   :  { %941 = vmatmul.mubr.msk.f32.gmra.mxu0 %vm86_vm1, %v19_v11  ;;  %989 = vmatmul.mubr.msk.f32.gmra.mxu1 %vm86_vm1, %v51_v12  ;;  %v63_v36 = vld [vmem:[%s1637_s0 + $0x188] sm:$0xff]  ;;  %v32_v37 = vld [vmem:[%s1637_s0 + $0x90] sm:$0xff]  ;;  %v33_v39 = vld [vmem:[%s1637_s0 + $0x98] sm:$0xff] }
   0xe   :  { %943 = vmatprep.mubr.msk.f32.mxu0 %vm86_vm1, %v20_v13  ;;  %991 = vmatprep.mubr.msk.f32.mxu1 %vm86_vm1, %v52_v14  ;;  %v64_v38 = vld [vmem:[%s1637_s0 + $0x190] sm:$0xff]  ;;  %v65_v40 = vld [vmem:[%s1637_s0 + $0x198] sm:$0xff]  ;;  %v34_v41 = vld [vmem:[%s1637_s0 + $0xa0] sm:$0xff] }
   0xf   :  { %v66_v42 = vld [vmem:[%s1637_s0 + $0x1a0] sm:$0xff]  ;;  %v35_v43 = vld [vmem:[%s1637_s0 + $0xa8] sm:$0xff]  ;;  %v36_v45 = vld [vmem:[%s1637_s0 + $0xb0] sm:$0xff] }
  0x10   :  { %v67_v44 = vld [vmem:[%s1637_s0 + $0x1a8] sm:$0xff]  ;;  %v68_v46 = vld [vmem:[%s1637_s0 + $0x1b0] sm:$0xff]  ;;  %v37_v47 = vld [vmem:[%s1637_s0 + $0xb8] sm:$0xff] }
  0x11   :  { %944 = vmatmul.mubr.msk.f32.gmra.mxu0 %vm86_vm1, %v21_v15  ;;  %992 = vmatmul.mubr.msk.f32.gmra.mxu1 %vm86_vm1, %v53_v16  ;;  %v69_v48 = vld [vmem:[%s1637_s0 + $0x1b8] sm:$0xff]  ;;  %v38_v49 = vld [vmem:[%s1637_s0 + $0xc0] sm:$0xff]  ;;  %v39_v51 = vld [vmem:[%s1637_s0 + $0xc8] sm:$0xff] }
  0x12   :  { %946 = vmatprep.mubr.msk.f32.mxu0 %vm86_vm1, %v22_v17  ;;  %994 = vmatprep.mubr.msk.f32.mxu1 %vm86_vm1, %v54_v18  ;;  %v70_v50 = vld [vmem:[%s1637_s0 + $0x1c0] sm:$0xff]  ;;  %v71_v52 = vld [vmem:[%s1637_s0 + $0x1c8] sm:$0xff]  ;;  %v40_v53 = vld [vmem:[%s1637_s0 + $0xd0] sm:$0xff] }
  0x13   :  { %v72_v54 = vld [vmem:[%s1637_s0 + $0x1d0] sm:$0xff]  ;;  %v41_v55 = vld [vmem:[%s1637_s0 + $0xd8] sm:$0xff]  ;;  %v42_v57 = vld [vmem:[%s1637_s0 + $0xe0] sm:$0xff] }
  0x14   :  { %v73_v56 = vld [vmem:[%s1637_s0 + $0x1d8] sm:$0xff]  ;;  %v74_v58 = vld [vmem:[%s1637_s0 + $0x1e0] sm:$0xff]  ;;  %v43_v59 = vld [vmem:[%s1637_s0 + $0xe8] sm:$0xff] }
  0x15   :  { %947 = vmatmul.mubr.msk.f32.gmra.mxu0 %vm86_vm1, %v23_v19  ;;  %995 = vmatmul.mubr.msk.f32.gmra.mxu1 %vm86_vm1, %v55_v20  ;;  %v75_v60 = vld [vmem:[%s1637_s0 + $0x1e8] sm:$0xff]  ;;  %v44_v61 = vld [vmem:[%s1637_s0 + $0xf0] sm:$0xff]  ;;  %v45_v63 = vld [vmem:[%s1637_s0 + $0xf8] sm:$0xff] }
  0x16   :  { %949 = vmatprep.mubr.msk.f32.mxu0 %vm86_vm1, %v24_v21  ;;  %997 = vmatprep.mubr.msk.f32.mxu1 %vm86_vm1, %v56_v22  ;;  %v76_v62 = vld [vmem:[%s1637_s0 + $0x1f0] sm:$0xff]  ;;  %v77_v0 = vld [vmem:[%s1637_s0 + $0x1f8] sm:$0xff]  ;;  %v1314_v1 = vld [vmem:[%s1638_s2] ss:$0 sm:$0xff] }
  0x19   :  { %950 = vmatmul.mubr.msk.f32.gmra.mxu0 %vm86_vm1, %v25_v23  ;;  %998 = vmatmul.mubr.msk.f32.gmra.mxu1 %vm86_vm1, %v57_v24 }
  0x1a   :  { %952 = vmatprep.mubr.msk.f32.mxu0 %vm86_vm1, %v26_v25  ;;  %1000 = vmatprep.mubr.msk.f32.mxu1 %vm86_vm1, %v58_v26 }
  0x1d   :  { %953 = vmatmul.mubr.msk.f32.gmra.mxu0 %vm86_vm1, %v27_v27  ;;  %1001 = vmatmul.mubr.msk.f32.gmra.mxu1 %vm86_vm1, %v59_v28 }
  0x1e   :  { %955 = vmatprep.mubr.msk.f32.mxu0 %vm86_vm1, %v28_v29  ;;  %1003 = vmatprep.mubr.msk.f32.mxu1 %vm86_vm1, %v60_v30 }
  0x21   :  { %956 = vmatmul.mubr.msk.f32.gmra.mxu0 %vm86_vm1, %v29_v31  ;;  %1004 = vmatmul.mubr.msk.f32.gmra.mxu1 %vm86_vm1, %v61_v32 }
  0x22   :  { %958 = vmatprep.mubr.msk.f32.mxu0 %vm86_vm1, %v30_v33  ;;  %1006 = vmatprep.mubr.msk.f32.mxu1 %vm86_vm1, %v62_v34 }
  0x25   :  { %959 = vmatmul.mubr.msk.f32.gmra.mxu0 %vm86_vm1, %v31_v35  ;;  %1007 = vmatmul.mubr.msk.f32.gmra.mxu1 %vm86_vm1, %v63_v36 }
  0x26   :  { %961 = vmatprep.mubr.msk.f32.mxu0 %vm86_vm1, %v32_v37  ;;  %1009 = vmatprep.mubr.msk.f32.mxu1 %vm86_vm1, %v64_v38 }
  0x29   :  { %962 = vmatmul.mubr.msk.f32.gmra.mxu0 %vm86_vm1, %v33_v39  ;;  %1010 = vmatmul.mubr.msk.f32.gmra.mxu1 %vm86_vm1, %v65_v40 }
  0x2a   :  { %964 = vmatprep.mubr.msk.f32.mxu0 %vm86_vm1, %v34_v41  ;;  %1012 = vmatprep.mubr.msk.f32.mxu1 %vm86_vm1, %v66_v42 }
  0x2d   :  { %965 = vmatmul.mubr.msk.f32.gmra.mxu0 %vm86_vm1, %v35_v43  ;;  %1013 = vmatmul.mubr.msk.f32.gmra.mxu1 %vm86_vm1, %v67_v44 }
  0x2e   :  { %967 = vmatprep.mubr.msk.f32.mxu0 %vm86_vm1, %v36_v45  ;;  %1015 = vmatprep.mubr.msk.f32.mxu1 %vm86_vm1, %v68_v46 }
  0x31   :  { %968 = vmatmul.mubr.msk.f32.gmra.mxu0 %vm86_vm1, %v37_v47  ;;  %1016 = vmatmul.mubr.msk.f32.gmra.mxu1 %vm86_vm1, %v69_v48 }
  0x32   :  { %970 = vmatprep.mubr.msk.f32.mxu0 %vm86_vm1, %v38_v49  ;;  %1018 = vmatprep.mubr.msk.f32.mxu1 %vm86_vm1, %v70_v50 }
  0x35   :  { %971 = vmatmul.mubr.msk.f32.gmra.mxu0 %vm86_vm1, %v39_v51  ;;  %1019 = vmatmul.mubr.msk.f32.gmra.mxu1 %vm86_vm1, %v71_v52 }
  0x36   :  { %973 = vmatprep.mubr.msk.f32.mxu0 %vm86_vm1, %v40_v53  ;;  %1021 = vmatprep.mubr.msk.f32.mxu1 %vm86_vm1, %v72_v54 }
  0x39   :  { %974 = vmatmul.mubr.msk.f32.gmra.mxu0 %vm86_vm1, %v41_v55  ;;  %1022 = vmatmul.mubr.msk.f32.gmra.mxu1 %vm86_vm1, %v73_v56 }
  0x3a   :  { %976 = vmatprep.mubr.msk.f32.mxu0 %vm86_vm1, %v42_v57  ;;  %1024 = vmatprep.mubr.msk.f32.mxu1 %vm86_vm1, %v74_v58 }
  0x3d   :  { %977 = vmatmul.mubr.msk.f32.gmra.mxu0 %vm86_vm1, %v43_v59  ;;  %1025 = vmatmul.mubr.msk.f32.gmra.mxu1 %vm86_vm1, %v75_v60 }
  0x3e   :  { %979 = vmatprep.mubr.msk.f32.mxu0 %vm86_vm1, %v44_v61  ;;  %1027 = vmatprep.mubr.msk.f32.mxu1 %vm86_vm1, %v76_v62 }
  0x41   :  { %980 = vmatmul.mubr.msk.f32.gmra.mxu0 %vm86_vm1, %v45_v63  ;;  %1028 = vmatmul.mubr.msk.f32.gmra.mxu1 %vm86_vm1, %v77_v0 }
  0xc5   :  { %v936_v2 = vpop.f32.mrf.mxu0  ;;  %v984_v3 = vpop.f32.mrf.mxu1 }
  0xc6   :  { %v355_v4 = vadd.f32 %v936_v2, %v1314_v1  ;;  %v515_v5 = vadd.f32 %v984_v3, %v1314_v1 }
  0xc7   :  { %v349_v6 = vpop.f32.mrf.mxu0  ;;  %v509_v7 = vpop.f32.mrf.mxu1 }
  0xc8   :  { %v669_v8 = vmax.f32 %v355_v4, 0.0  ;;  %v701_v9 = vmax.f32 %v515_v5, 0.0  ;;  %v350_v10 = vadd.f32 %v1314_v1, %v349_v6  ;;  %v510_v11 = vadd.f32 %v1314_v1, %v509_v7 }
  0xc9   :  { %v939_v12 = vpop.f32.mrf.mxu0  ;;  %v987_v13 = vpop.f32.mrf.mxu1 }
  0xca   :  { %734 = vst.msk [vmem:[%s1639_s3 + $0x8] sm:$0xff] %vm732_vm2, %v669_v8  ;;  %766 = vst.msk [vmem:[%s1639_s3 + $0x108] sm:$0xff] %vm732_vm2, %v701_v9  ;;  %v668_v14 = vmax.f32 %v350_v10, 0.0  ;;  %v700_v15 = vmax.f32 %v510_v11, 0.0  ;;  %v365_v16 = vadd.f32 %v939_v12, %v1314_v1  ;;  %v525_v17 = vadd.f32 %v987_v13, %v1314_v1 }
  0xcb   :  { %v359_v18 = vpop.f32.mrf.mxu0  ;;  %v519_v19 = vpop.f32.mrf.mxu1 }
  0xcc   :  { %733 = vst.msk [vmem:[%s1639_s3] sm:$0xff] %vm732_vm2, %v668_v14  ;;  %765 = vst.msk [vmem:[%s1639_s3 + $0x100] sm:$0xff] %vm732_vm2, %v700_v15  ;;  %v671_v20 = vmax.f32 %v365_v16, 0.0  ;;  %v703_v21 = vmax.f32 %v525_v17, 0.0  ;;  %v360_v22 = vadd.f32 %v1314_v1, %v359_v18  ;;  %v520_v23 = vadd.f32 %v1314_v1, %v519_v19 }
  0xcd   :  { %v942_v24 = vpop.f32.mrf.mxu0  ;;  %v990_v25 = vpop.f32.mrf.mxu1 }
  0xce   :  { %736 = vst.msk [vmem:[%s1639_s3 + $0x18] sm:$0xff] %vm732_vm2, %v671_v20  ;;  %768 = vst.msk [vmem:[%s1639_s3 + $0x118] sm:$0xff] %vm732_vm2, %v703_v21  ;;  %v670_v26 = vmax.f32 %v360_v22, 0.0  ;;  %v702_v27 = vmax.f32 %v520_v23, 0.0  ;;  %v375_v28 = vadd.f32 %v942_v24, %v1314_v1  ;;  %v535_v29 = vadd.f32 %v990_v25, %v1314_v1 }
  0xcf   :  { %v369_v30 = vpop.f32.mrf.mxu0  ;;  %v529_v31 = vpop.f32.mrf.mxu1 }
  0xd0   :  { %735 = vst.msk [vmem:[%s1639_s3 + $0x10] sm:$0xff] %vm732_vm2, %v670_v26  ;;  %767 = vst.msk [vmem:[%s1639_s3 + $0x110] sm:$0xff] %vm732_vm2, %v702_v27  ;;  %v673_v32 = vmax.f32 %v375_v28, 0.0  ;;  %v705_v33 = vmax.f32 %v535_v29, 0.0  ;;  %v370_v34 = vadd.f32 %v1314_v1, %v369_v30  ;;  %v530_v35 = vadd.f32 %v1314_v1, %v529_v31 }
  0xd1   :  { %v945_v36 = vpop.f32.mrf.mxu0  ;;  %v993_v37 = vpop.f32.mrf.mxu1 }
  0xd2   :  { %738 = vst.msk [vmem:[%s1639_s3 + $0x28] sm:$0xff] %vm732_vm2, %v673_v32  ;;  %770 = vst.msk [vmem:[%s1639_s3 + $0x128] sm:$0xff] %vm732_vm2, %v705_v33  ;;  %v672_v38 = vmax.f32 %v370_v34, 0.0  ;;  %v704_v39 = vmax.f32 %v530_v35, 0.0  ;;  %v385_v40 = vadd.f32 %v945_v36, %v1314_v1  ;;  %v545_v41 = vadd.f32 %v993_v37, %v1314_v1 }
  0xd3   :  { %v379_v42 = vpop.f32.mrf.mxu0  ;;  %v539_v43 = vpop.f32.mrf.mxu1 }
  0xd4   :  { %737 = vst.msk [vmem:[%s1639_s3 + $0x20] sm:$0xff] %vm732_vm2, %v672_v38  ;;  %769 = vst.msk [vmem:[%s1639_s3 + $0x120] sm:$0xff] %vm732_vm2, %v704_v39  ;;  %v675_v44 = vmax.f32 %v385_v40, 0.0  ;;  %v707_v45 = vmax.f32 %v545_v41, 0.0  ;;  %v380_v46 = vadd.f32 %v1314_v1, %v379_v42  ;;  %v540_v47 = vadd.f32 %v1314_v1, %v539_v43 }
  0xd5   :  { %v948_v48 = vpop.f32.mrf.mxu0  ;;  %v996_v49 = vpop.f32.mrf.mxu1 }
  0xd6   :  { %740 = vst.msk [vmem:[%s1639_s3 + $0x38] sm:$0xff] %vm732_vm2, %v675_v44  ;;  %772 = vst.msk [vmem:[%s1639_s3 + $0x138] sm:$0xff] %vm732_vm2, %v707_v45  ;;  %v674_v50 = vmax.f32 %v380_v46, 0.0  ;;  %v706_v51 = vmax.f32 %v540_v47, 0.0  ;;  %v395_v52 = vadd.f32 %v948_v48, %v1314_v1  ;;  %v555_v53 = vadd.f32 %v996_v49, %v1314_v1 }
  0xd7   :  { %v389_v54 = vpop.f32.mrf.mxu0  ;;  %v549_v55 = vpop.f32.mrf.mxu1 }
  0xd8   :  { %739 = vst.msk [vmem:[%s1639_s3 + $0x30] sm:$0xff] %vm732_vm2, %v674_v50  ;;  %771 = vst.msk [vmem:[%s1639_s3 + $0x130] sm:$0xff] %vm732_vm2, %v706_v51  ;;  %v677_v56 = vmax.f32 %v395_v52, 0.0  ;;  %v709_v57 = vmax.f32 %v555_v53, 0.0  ;;  %v390_v58 = vadd.f32 %v1314_v1, %v389_v54  ;;  %v550_v59 = vadd.f32 %v1314_v1, %v549_v55 }
  0xd9   :  { %v951_v60 = vpop.f32.mrf.mxu0  ;;  %v999_v61 = vpop.f32.mrf.mxu1 }
  0xda   :  { %742 = vst.msk [vmem:[%s1639_s3 + $0x48] sm:$0xff] %vm732_vm2, %v677_v56  ;;  %774 = vst.msk [vmem:[%s1639_s3 + $0x148] sm:$0xff] %vm732_vm2, %v709_v57  ;;  %v676_v62 = vmax.f32 %v390_v58, 0.0  ;;  %v708_v63 = vmax.f32 %v550_v59, 0.0  ;;  %v405_v0 = vadd.f32 %v951_v60, %v1314_v1  ;;  %v565_v2 = vadd.f32 %v999_v61, %v1314_v1 }
  0xdb   :  { %v399_v3 = vpop.f32.mrf.mxu0  ;;  %v559_v4 = vpop.f32.mrf.mxu1 }
  0xdc   :  { %741 = vst.msk [vmem:[%s1639_s3 + $0x40] sm:$0xff] %vm732_vm2, %v676_v62  ;;  %773 = vst.msk [vmem:[%s1639_s3 + $0x140] sm:$0xff] %vm732_vm2, %v708_v63  ;;  %v679_v5 = vmax.f32 %v405_v0, 0.0  ;;  %v711_v6 = vmax.f32 %v565_v2, 0.0  ;;  %v400_v7 = vadd.f32 %v1314_v1, %v399_v3  ;;  %v560_v8 = vadd.f32 %v1314_v1, %v559_v4 }
  0xdd   :  { %v954_v9 = vpop.f32.mrf.mxu0  ;;  %v1002_v10 = vpop.f32.mrf.mxu1 }
  0xde   :  { %744 = vst.msk [vmem:[%s1639_s3 + $0x58] sm:$0xff] %vm732_vm2, %v679_v5  ;;  %776 = vst.msk [vmem:[%s1639_s3 + $0x158] sm:$0xff] %vm732_vm2, %v711_v6  ;;  %v678_v11 = vmax.f32 %v400_v7, 0.0  ;;  %v710_v12 = vmax.f32 %v560_v8, 0.0  ;;  %v415_v13 = vadd.f32 %v954_v9, %v1314_v1  ;;  %v575_v14 = vadd.f32 %v1002_v10, %v1314_v1 }
  0xdf   :  { %v409_v15 = vpop.f32.mrf.mxu0  ;;  %v569_v16 = vpop.f32.mrf.mxu1 }
  0xe0   :  { %743 = vst.msk [vmem:[%s1639_s3 + $0x50] sm:$0xff] %vm732_vm2, %v678_v11  ;;  %775 = vst.msk [vmem:[%s1639_s3 + $0x150] sm:$0xff] %vm732_vm2, %v710_v12  ;;  %v681_v17 = vmax.f32 %v415_v13, 0.0  ;;  %v713_v18 = vmax.f32 %v575_v14, 0.0  ;;  %v410_v19 = vadd.f32 %v1314_v1, %v409_v15  ;;  %v570_v20 = vadd.f32 %v1314_v1, %v569_v16 }
  0xe1   :  { %v957_v21 = vpop.f32.mrf.mxu0  ;;  %v1005_v22 = vpop.f32.mrf.mxu1 }
  0xe2   :  { %746 = vst.msk [vmem:[%s1639_s3 + $0x68] sm:$0xff] %vm732_vm2, %v681_v17  ;;  %778 = vst.msk [vmem:[%s1639_s3 + $0x168] sm:$0xff] %vm732_vm2, %v713_v18  ;;  %v680_v23 = vmax.f32 %v410_v19, 0.0  ;;  %v712_v24 = vmax.f32 %v570_v20, 0.0  ;;  %v425_v25 = vadd.f32 %v957_v21, %v1314_v1  ;;  %v585_v26 = vadd.f32 %v1005_v22, %v1314_v1 }
  0xe3   :  { %v419_v27 = vpop.f32.mrf.mxu0  ;;  %v579_v28 = vpop.f32.mrf.mxu1 }
  0xe4   :  { %745 = vst.msk [vmem:[%s1639_s3 + $0x60] sm:$0xff] %vm732_vm2, %v680_v23  ;;  %777 = vst.msk [vmem:[%s1639_s3 + $0x160] sm:$0xff] %vm732_vm2, %v712_v24  ;;  %v683_v29 = vmax.f32 %v425_v25, 0.0  ;;  %v715_v30 = vmax.f32 %v585_v26, 0.0  ;;  %v420_v31 = vadd.f32 %v1314_v1, %v419_v27  ;;  %v580_v32 = vadd.f32 %v1314_v1, %v579_v28 }
  0xe5   :  { %v960_v33 = vpop.f32.mrf.mxu0  ;;  %v1008_v34 = vpop.f32.mrf.mxu1 }
  0xe6   :  { %748 = vst.msk [vmem:[%s1639_s3 + $0x78] sm:$0xff] %vm732_vm2, %v683_v29  ;;  %780 = vst.msk [vmem:[%s1639_s3 + $0x178] sm:$0xff] %vm732_vm2, %v715_v30  ;;  %v682_v35 = vmax.f32 %v420_v31, 0.0  ;;  %v714_v36 = vmax.f32 %v580_v32, 0.0  ;;  %v435_v37 = vadd.f32 %v960_v33, %v1314_v1  ;;  %v595_v38 = vadd.f32 %v1008_v34, %v1314_v1 }
  0xe7   :  { %v429_v39 = vpop.f32.mrf.mxu0  ;;  %v589_v40 = vpop.f32.mrf.mxu1 }
  0xe8   :  { %747 = vst.msk [vmem:[%s1639_s3 + $0x70] sm:$0xff] %vm732_vm2, %v682_v35  ;;  %779 = vst.msk [vmem:[%s1639_s3 + $0x170] sm:$0xff] %vm732_vm2, %v714_v36  ;;  %v685_v41 = vmax.f32 %v435_v37, 0.0  ;;  %v717_v42 = vmax.f32 %v595_v38, 0.0  ;;  %v430_v43 = vadd.f32 %v1314_v1, %v429_v39  ;;  %v590_v44 = vadd.f32 %v1314_v1, %v589_v40 }
  0xe9   :  { %v963_v45 = vpop.f32.mrf.mxu0  ;;  %v1011_v46 = vpop.f32.mrf.mxu1 }
  0xea   :  { %750 = vst.msk [vmem:[%s1639_s3 + $0x88] sm:$0xff] %vm732_vm2, %v685_v41  ;;  %782 = vst.msk [vmem:[%s1639_s3 + $0x188] sm:$0xff] %vm732_vm2, %v717_v42  ;;  %v684_v47 = vmax.f32 %v430_v43, 0.0  ;;  %v716_v48 = vmax.f32 %v590_v44, 0.0  ;;  %v445_v49 = vadd.f32 %v963_v45, %v1314_v1  ;;  %v605_v50 = vadd.f32 %v1011_v46, %v1314_v1 }
  0xeb   :  { %v439_v51 = vpop.f32.mrf.mxu0  ;;  %v599_v52 = vpop.f32.mrf.mxu1 }
  0xec   :  { %749 = vst.msk [vmem:[%s1639_s3 + $0x80] sm:$0xff] %vm732_vm2, %v684_v47  ;;  %781 = vst.msk [vmem:[%s1639_s3 + $0x180] sm:$0xff] %vm732_vm2, %v716_v48  ;;  %v687_v53 = vmax.f32 %v445_v49, 0.0  ;;  %v719_v54 = vmax.f32 %v605_v50, 0.0  ;;  %v440_v55 = vadd.f32 %v1314_v1, %v439_v51  ;;  %v600_v56 = vadd.f32 %v1314_v1, %v599_v52 }
  0xed   :  { %v966_v57 = vpop.f32.mrf.mxu0  ;;  %v1014_v58 = vpop.f32.mrf.mxu1 }
  0xee   :  { %752 = vst.msk [vmem:[%s1639_s3 + $0x98] sm:$0xff] %vm732_vm2, %v687_v53  ;;  %784 = vst.msk [vmem:[%s1639_s3 + $0x198] sm:$0xff] %vm732_vm2, %v719_v54  ;;  %v686_v59 = vmax.f32 %v440_v55, 0.0  ;;  %v718_v60 = vmax.f32 %v600_v56, 0.0  ;;  %v455_v61 = vadd.f32 %v966_v57, %v1314_v1  ;;  %v615_v62 = vadd.f32 %v1014_v58, %v1314_v1 }
  0xef   :  { %v449_v63 = vpop.f32.mrf.mxu0  ;;  %v609_v0 = vpop.f32.mrf.mxu1 }
  0xf0   :  { %751 = vst.msk [vmem:[%s1639_s3 + $0x90] sm:$0xff] %vm732_vm2, %v686_v59  ;;  %783 = vst.msk [vmem:[%s1639_s3 + $0x190] sm:$0xff] %vm732_vm2, %v718_v60  ;;  %v689_v2 = vmax.f32 %v455_v61, 0.0  ;;  %v721_v3 = vmax.f32 %v615_v62, 0.0  ;;  %v450_v4 = vadd.f32 %v1314_v1, %v449_v63  ;;  %v610_v5 = vadd.f32 %v1314_v1, %v609_v0 }
  0xf1   :  { %v969_v6 = vpop.f32.mrf.mxu0  ;;  %v1017_v7 = vpop.f32.mrf.mxu1 }
  0xf2   :  { %754 = vst.msk [vmem:[%s1639_s3 + $0xa8] sm:$0xff] %vm732_vm2, %v689_v2  ;;  %786 = vst.msk [vmem:[%s1639_s3 + $0x1a8] sm:$0xff] %vm732_vm2, %v721_v3  ;;  %v688_v8 = vmax.f32 %v450_v4, 0.0  ;;  %v720_v9 = vmax.f32 %v610_v5, 0.0  ;;  %v465_v10 = vadd.f32 %v969_v6, %v1314_v1  ;;  %v625_v11 = vadd.f32 %v1017_v7, %v1314_v1 }
  0xf3   :  { %v459_v12 = vpop.f32.mrf.mxu0  ;;  %v619_v13 = vpop.f32.mrf.mxu1 }
  0xf4   :  { %753 = vst.msk [vmem:[%s1639_s3 + $0xa0] sm:$0xff] %vm732_vm2, %v688_v8  ;;  %785 = vst.msk [vmem:[%s1639_s3 + $0x1a0] sm:$0xff] %vm732_vm2, %v720_v9  ;;  %v691_v14 = vmax.f32 %v465_v10, 0.0  ;;  %v723_v15 = vmax.f32 %v625_v11, 0.0  ;;  %v460_v16 = vadd.f32 %v1314_v1, %v459_v12  ;;  %v620_v17 = vadd.f32 %v1314_v1, %v619_v13 }
  0xf5   :  { %v972_v18 = vpop.f32.mrf.mxu0  ;;  %v1020_v19 = vpop.f32.mrf.mxu1 }
  0xf6   :  { %756 = vst.msk [vmem:[%s1639_s3 + $0xb8] sm:$0xff] %vm732_vm2, %v691_v14  ;;  %788 = vst.msk [vmem:[%s1639_s3 + $0x1b8] sm:$0xff] %vm732_vm2, %v723_v15  ;;  %v690_v20 = vmax.f32 %v460_v16, 0.0  ;;  %v722_v21 = vmax.f32 %v620_v17, 0.0  ;;  %v475_v22 = vadd.f32 %v972_v18, %v1314_v1  ;;  %v635_v23 = vadd.f32 %v1020_v19, %v1314_v1 }
  0xf7   :  { %v469_v24 = vpop.f32.mrf.mxu0  ;;  %v629_v25 = vpop.f32.mrf.mxu1 }
  0xf8   :  { %755 = vst.msk [vmem:[%s1639_s3 + $0xb0] sm:$0xff] %vm732_vm2, %v690_v20  ;;  %787 = vst.msk [vmem:[%s1639_s3 + $0x1b0] sm:$0xff] %vm732_vm2, %v722_v21  ;;  %v693_v26 = vmax.f32 %v475_v22, 0.0  ;;  %v725_v27 = vmax.f32 %v635_v23, 0.0  ;;  %v470_v28 = vadd.f32 %v1314_v1, %v469_v24  ;;  %v630_v29 = vadd.f32 %v1314_v1, %v629_v25 }
  0xf9   :  { %v975_v30 = vpop.f32.mrf.mxu0  ;;  %v1023_v31 = vpop.f32.mrf.mxu1 }
  0xfa   :  { %758 = vst.msk [vmem:[%s1639_s3 + $0xc8] sm:$0xff] %vm732_vm2, %v693_v26  ;;  %790 = vst.msk [vmem:[%s1639_s3 + $0x1c8] sm:$0xff] %vm732_vm2, %v725_v27  ;;  %v692_v32 = vmax.f32 %v470_v28, 0.0  ;;  %v724_v33 = vmax.f32 %v630_v29, 0.0  ;;  %v485_v34 = vadd.f32 %v975_v30, %v1314_v1  ;;  %v645_v35 = vadd.f32 %v1023_v31, %v1314_v1 }
  0xfb   :  { %v479_v36 = vpop.f32.mrf.mxu0  ;;  %v639_v37 = vpop.f32.mrf.mxu1 }
  0xfc   :  { %757 = vst.msk [vmem:[%s1639_s3 + $0xc0] sm:$0xff] %vm732_vm2, %v692_v32  ;;  %789 = vst.msk [vmem:[%s1639_s3 + $0x1c0] sm:$0xff] %vm732_vm2, %v724_v33  ;;  %v695_v38 = vmax.f32 %v485_v34, 0.0  ;;  %v727_v39 = vmax.f32 %v645_v35, 0.0  ;;  %v480_v40 = vadd.f32 %v1314_v1, %v479_v36  ;;  %v640_v41 = vadd.f32 %v1314_v1, %v639_v37 }
  0xfd   :  { %v978_v42 = vpop.f32.mrf.mxu0  ;;  %v1026_v43 = vpop.f32.mrf.mxu1 }
  0xfe   :  { %760 = vst.msk [vmem:[%s1639_s3 + $0xd8] sm:$0xff] %vm732_vm2, %v695_v38  ;;  %792 = vst.msk [vmem:[%s1639_s3 + $0x1d8] sm:$0xff] %vm732_vm2, %v727_v39  ;;  %v694_v44 = vmax.f32 %v480_v40, 0.0  ;;  %v726_v45 = vmax.f32 %v640_v41, 0.0  ;;  %v495_v46 = vadd.f32 %v978_v42, %v1314_v1  ;;  %v655_v47 = vadd.f32 %v1026_v43, %v1314_v1 }
  0xff   :  { %v489_v48 = vpop.f32.mrf.mxu0  ;;  %v649_v49 = vpop.f32.mrf.mxu1 }
 0x100   :  { %759 = vst.msk [vmem:[%s1639_s3 + $0xd0] sm:$0xff] %vm732_vm2, %v694_v44  ;;  %791 = vst.msk [vmem:[%s1639_s3 + $0x1d0] sm:$0xff] %vm732_vm2, %v726_v45  ;;  %v697_v50 = vmax.f32 %v495_v46, 0.0  ;;  %v729_v51 = vmax.f32 %v655_v47, 0.0  ;;  %v490_v52 = vadd.f32 %v1314_v1, %v489_v48  ;;  %v650_v53 = vadd.f32 %v1314_v1, %v649_v49 }
 0x101   :  { %v981_v54 = vpop.f32.mrf.mxu0  ;;  %v1029_v55 = vpop.f32.mrf.mxu1 }
 0x102   :  { %762 = vst.msk [vmem:[%s1639_s3 + $0xe8] sm:$0xff] %vm732_vm2, %v697_v50  ;;  %794 = vst.msk [vmem:[%s1639_s3 + $0x1e8] sm:$0xff] %vm732_vm2, %v729_v51  ;;  %v696_v56 = vmax.f32 %v490_v52, 0.0  ;;  %v728_v57 = vmax.f32 %v650_v53, 0.0  ;;  %v505_v58 = vadd.f32 %v981_v54, %v1314_v1  ;;  %v665_v59 = vadd.f32 %v1029_v55, %v1314_v1 }
 0x103   :  { %v499_v60 = vpop.f32.mrf.mxu0  ;;  %v659_v61 = vpop.f32.mrf.mxu1 }
 0x104   :  { %761 = vst.msk [vmem:[%s1639_s3 + $0xe0] sm:$0xff] %vm732_vm2, %v696_v56  ;;  %793 = vst.msk [vmem:[%s1639_s3 + $0x1e0] sm:$0xff] %vm732_vm2, %v728_v57  ;;  %v699_v62 = vmax.f32 %v505_v58, 0.0  ;;  %v731_v63 = vmax.f32 %v665_v59, 0.0  ;;  %v500_v0 = vadd.f32 %v1314_v1, %v499_v60  ;;  %v660_v2 = vadd.f32 %v1314_v1, %v659_v61 }
 0x106   :  { %764 = vst.msk [vmem:[%s1639_s3 + $0xf8] sm:$0xff] %vm732_vm2, %v699_v62  ;;  %796 = vst.msk [vmem:[%s1639_s3 + $0x1f8] sm:$0xff] %vm732_vm2, %v731_v63  ;;  %v698_v3 = vmax.f32 %v500_v0, 0.0  ;;  %v730_v4 = vmax.f32 %v660_v2, 0.0 }
 0x108   :  { %763 = vst.msk [vmem:[%s1639_s3 + $0xf0] sm:$0xff] %vm732_vm2, %v698_v3  ;;  %795 = vst.msk [vmem:[%s1639_s3 + $0x1f0] sm:$0xff] %vm732_vm2, %v730_v4 }

// kernel: _lambda_.10
= control target key start
LH: loop header
LB: loop body
LE: loop exit
PB: predicated region body
PF: predicated region fallthrough
CT: control target
= control target key end

     0   :  { %s1535_s12 = smov 0   ;;  %s2312_s0 = inlined_call_operand.vmem [shape: f32[2,18,18,8], index: 0, kind: input, shape index: {}]   ;;  %s2313_s1 = inlined_call_operand.vmem [shape: f32[9,1,1,8], index: 1, kind: input, shape index: {}]   ;;  %s2314_s2 = inlined_call_operand.vmem [shape: f32[1,1,8], index: 2, kind: input, shape index: {}]   ;;  %s2315_s3 = inlined_call_operand.vmem [shape: f32[2,16,16,8], index: 3, kind: output, shape index: {}]  }
   0x1 LB: > { %s1267_s13 = sadd.s32 4294967295, %s1513_s12   ;;  %p1271_p0 = scmp.ge.s32.totalorder %s1513_s12, 1  ;;  %s1513_s12 = sphi %s1535_s12, %s13_s12  }
   0x2   : > { %p137_p1 = scmp.lt.s32.totalorder %s1513_s12, 3 }
   0x4   : > { %p138_p2 = pnand %p1271_p0, %p137_p1 }
   0x5   : > { %p161_p3 = scmp.lt.s32.totalorder (!%p138_p2), %s1267_s13, 1 }
   0x6   : > { %141 = sbr.rel (%p138_p2) target bundleno = 180 (0xb4), region = 32 }
   0xb   : > { %s2317_s13 = smov (!%p161_p3, %s1267_s13), 1  ;;  %v1549_v0 = vld [vmem:[%s2313_s1] ss:$0 sm:$0xff]  ;;  %v1554_v1 = vld [vmem:[%s2313_s1 + $0x1] ss:$0 sm:$0xff]  ;;  %vm1179_vm0 = vcmask 64512  }
   0xc   : > { %s1488_s14 = smul.u32 432, %s2317_s13  ;;  %v1559_v2 = vld [vmem:[%s2313_s1 + $0x2] ss:$0 sm:$0xff]  ;;  %v1564_v3 = vld [vmem:[%s2313_s1 + $0x3] ss:$0 sm:$0xff]  ;;  %s1487_s11 = sshll.u32 %s2317_s13, 8 }
   0xd   : > { %v1574_v4 = vld [vmem:[%s2313_s1 + $0x4] ss:$0 sm:$0xff]  ;;  %v1579_v5 = vld [vmem:[%s2313_s1 + $0x5] ss:$0 sm:$0xff]  ;;  %v1584_v6 = vld [vmem:[%s2313_s1 + $0x6] ss:$0 sm:$0xff]  ;;  %s1717_s15 = scalar_lea.vmem %s2315_s3, %s1487_s11 }
   0xe   : > { %s1569_s25 = scalar_lea.vmem %s2312_s0, %s1488_s14  ;;  %v1597_v15 = vld [vmem:[%s2313_s1 + $0x7] ss:$0 sm:$0xff]  ;;  %v1608_v20 = vld [vmem:[%s2313_s1 + $0x8] ss:$0 sm:$0xff] }
   0xf   : > { %v171_v7 = vld [vmem:[%s1569_s25] sm:$0xff]  ;;  %v1280_v13 = vld [vmem:[%s1569_s25 + $0x18] sm:$0xff]  ;;  %v1603_v19 = vld [vmem:[%s1569_s25 + $0x30] sm:$0xff] }
  0x10   : > { %v274_v8 = vld [vmem:[%s1569_s25 + $0x1] sm:$0xff]  ;;  %v210_v10 = vmul.f32 %v1549_v0, %v171_v7  ;;  %v1314_v14 = vld [vmem:[%s1569_s25 + $0x19] sm:$0xff]  ;;  %v523_v16 = vmul.f32 %v1564_v3, %v1280_v13  ;;  %v836_v23 = vmul.f32 %v1584_v6, %v1603_v19  ;;  %v275_v25 = vld [vmem:[%s1569_s25 + $0x9] sm:$0xff]  ;;  %v212_v27 = vmul.f32 %v1280_v13, %v1549_v0 }
  0x11   : > { %v378_v9 = vld [vmem:[%s1569_s25 + $0x2] sm:$0xff]  ;;  %v314_v11 = vmul.f32 %v1554_v1, %v274_v8  ;;  %v627_v17 = vmul.f32 %v1574_v4, %v1314_v14  ;;  %v1348_v18 = vld [vmem:[%s1569_s25 + $0x1a] sm:$0xff]  ;;  %v379_v26 = vld [vmem:[%s1569_s25 + $0xa] sm:$0xff]  ;;  %v315_v31 = vmul.f32 %v1554_v1, %v275_v25  ;;  %v316_v34 = vmul.f32 %v1314_v14, %v1554_v1 }
  0x12   : > { %v418_v12 = vmul.f32 %v1559_v2, %v378_v9  ;;  %v731_v22 = vmul.f32 %v1579_v5, %v1348_v18  ;;  %v172_v24 = vld [vmem:[%s1569_s25 + $0x8] sm:$0xff]  ;;  %v1416_v28 = vld [vmem:[%s1569_s25 + $0x31] sm:$0xff]  ;;  %v419_v32 = vmul.f32 %v1559_v2, %v379_v26  ;;  %v1281_v33 = vld [vmem:[%s1569_s25 + $0x20] sm:$0xff]  ;;  %v420_v50 = vmul.f32 %v1348_v18, %v1559_v2 }
  0x13   : > { %v346_v21 = vadd.f32 %v314_v11, %v210_v10  ;;  %v1450_v29 = vld [vmem:[%s1569_s25 + $0x32] sm:$0xff]  ;;  %v211_v30 = vmul.f32 %v1549_v0, %v172_v24  ;;  %v940_v36 = vmul.f32 %v1597_v15, %v1416_v28  ;;  %v524_v38 = vmul.f32 %v1564_v3, %v1281_v33  ;;  %v1315_v39 = vld [vmem:[%s1569_s25 + $0x21] sm:$0xff]  ;;  %v1657_v62 = vld [vmem:[%s1569_s25 + $0x49] sm:$0xff] }
  0x14   : > { %v1044_v37 = vmul.f32 %v1608_v20, %v1450_v29  ;;  %v1349_v40 = vld [vmem:[%s1569_s25 + $0x22] sm:$0xff]  ;;  %v1630_v41 = vld [vmem:[%s1569_s25 + $0x38] sm:$0xff]  ;;  %v628_v43 = vmul.f32 %v1574_v4, %v1315_v39  ;;  %v348_v49 = vadd.f32 %v316_v34, %v212_v27  ;;  %v525_v51 = vmul.f32 %v1603_v19, %v1564_v3  ;;  %v1660_v63 = vld [vmem:[%s1569_s25 + $0x4a] sm:$0xff] }
  0x15   : > { %v450_v35 = vadd.f32 %v418_v12, %v346_v21  ;;  %v347_v42 = vadd.f32 %v315_v31, %v211_v30  ;;  %v732_v44 = vmul.f32 %v1579_v5, %v1349_v40  ;;  %v837_v45 = vmul.f32 %v1584_v6, %v1630_v41  ;;  %v1637_v47 = vld [vmem:[%s1569_s25 + $0x39] sm:$0xff]  ;;  %v1651_v56 = vld [vmem:[%s1569_s25 + $0x48] sm:$0xff]  ;;  %v1674_v21 = vld [vmem:[%s1569_s25 + $0x50] sm:$0xff] }
  0x16   : > { %v1640_v48 = vld [vmem:[%s1569_s25 + $0x3a] sm:$0xff]  ;;  %v941_v53 = vmul.f32 %v1597_v15, %v1637_v47  ;;  %v629_v55 = vmul.f32 %v1416_v28, %v1574_v4  ;;  %v452_v58 = vadd.f32 %v420_v50, %v348_v49  ;;  %v733_v59 = vmul.f32 %v1450_v29, %v1579_v5  ;;  %v1681_v31 = vld [vmem:[%s1569_s25 + $0x51] sm:$0xff] }
  0x17   : > { %v555_v46 = vadd.f32 %v523_v16, %v450_v35  ;;  %v451_v52 = vadd.f32 %v419_v32, %v347_v42  ;;  %v1045_v54 = vmul.f32 %v1608_v20, %v1640_v48  ;;  %v838_v60 = vmul.f32 %v1584_v6, %v1651_v56 }
  0x18   : > { %v213_v7 = vmul.f32 %v1281_v33, %v1549_v0  ;;  %v317_v8 = vmul.f32 %v1315_v39, %v1554_v1  ;;  %v421_v9 = vmul.f32 %v1349_v40, %v1559_v2  ;;  %v557_v11 = vadd.f32 %v525_v51, %v452_v58  ;;  %v1692_v39 = vld [vmem:[%s2314_s2] ss:$0 sm:$0xff] }
  0x19   : > { %v659_v57 = vadd.f32 %v627_v17, %v555_v46  ;;  %v556_v61 = vadd.f32 %v524_v38, %v451_v52  ;;  %v942_v12 = vmul.f32 %v1597_v15, %v1657_v62  ;;  %v1046_v13 = vmul.f32 %v1608_v20, %v1660_v63  ;;  %v1707_v52 = vld [vmem:[%s1569_s25 + $0x60] sm:$0xff] }
  0x1a   : > { %v349_v16 = vadd.f32 %v317_v8, %v213_v7  ;;  %v526_v17 = vmul.f32 %v1630_v41, %v1564_v3  ;;  %v630_v18 = vmul.f32 %v1637_v47, %v1574_v4  ;;  %v661_v24 = vadd.f32 %v629_v55, %v557_v11 }
  0x1b   : > { %v763_v10 = vadd.f32 %v731_v22, %v659_v57  ;;  %v660_v14 = vadd.f32 %v628_v43, %v556_v61  ;;  %v734_v25 = vmul.f32 %v1640_v48, %v1579_v5  ;;  %v839_v26 = vmul.f32 %v1584_v6, %v1674_v21  ;;  %v1695_v43 = vld [vmem:[%s1569_s25 + $0x52] sm:$0xff] }
  0x1c   : > { %v453_v30 = vadd.f32 %v421_v9, %v349_v16  ;;  %v214_v32 = vmul.f32 %v1603_v19, %v1549_v0  ;;  %v318_v33 = vmul.f32 %v1416_v28, %v1554_v1  ;;  %v943_v35 = vmul.f32 %v1597_v15, %v1681_v31 }
  0x1d   : > { %v868_v22 = vadd.f32 %v836_v23, %v763_v10  ;;  %v764_v27 = vadd.f32 %v732_v44, %v660_v14  ;;  %v765_v23 = vadd.f32 %v733_v59, %v661_v24  ;;  %v422_v38 = vmul.f32 %v1450_v29, %v1559_v2 }
  0x1e   : > { %v558_v42 = vadd.f32 %v526_v17, %v453_v30  ;;  %v350_v19 = vadd.f32 %v318_v33, %v214_v32  ;;  %v527_v28 = vmul.f32 %v1651_v56, %v1564_v3  ;;  %v1047_v29 = vmul.f32 %v1608_v20, %v1695_v43 }
  0x1f   : > { %v972_v34 = vadd.f32 %v940_v36, %v868_v22  ;;  %v869_v40 = vadd.f32 %v837_v45, %v764_v27  ;;  %v870_v44 = vadd.f32 %v838_v60, %v765_v23  ;;  %v631_v46 = vmul.f32 %v1657_v62, %v1574_v4  ;;  %v1454_v22 = vld [vmem:[%s1569_s25 + $0x62] sm:$0xff] }
  0x20   : > { %v662_v50 = vadd.f32 %v630_v18, %v558_v42  ;;  %v454_v51 = vadd.f32 %v422_v38, %v350_v19  ;;  %v735_v45 = vmul.f32 %v1660_v63, %v1579_v5  ;;  %v215_v58 = vmul.f32 %v1630_v41, %v1549_v0  ;;  %v1387_v23 = vld [vmem:[%s1569_s25 + $0x68] sm:$0xff] }
  0x21   : > { %v1076_v36 = vadd.f32 %v1044_v37, %v972_v34  ;;  %v973_v49 = vadd.f32 %v941_v53, %v869_v40  ;;  %v974_v57 = vadd.f32 %v942_v12, %v870_v44  ;;  %v840_v37 = vmul.f32 %v1584_v6, %v1707_v52  ;;  %v1455_v44 = vld [vmem:[%s1569_s25 + $0x6a] sm:$0xff] }
  0x22   : > { %v766_v59 = vadd.f32 %v734_v25, %v662_v50  ;;  %v559_v60 = vadd.f32 %v527_v28, %v454_v51  ;;  %v319_v61 = vmul.f32 %v1637_v47, %v1554_v1  ;;  %v423_v9 = vmul.f32 %v1640_v48, %v1559_v2 }
  0x23   : > { %v1115_v55 = vadd.f32 %v1692_v39, %v1076_v36  ;;  %v1077_v53 = vadd.f32 %v1045_v54, %v973_v49  ;;  %v1078_v8 = vadd.f32 %v1046_v13, %v974_v57  ;;  %v528_v41 = vmul.f32 %v1674_v21, %v1564_v3  ;;  %v1727_v54 = vld [vmem:[%s1569_s25 + $0x61] sm:$0xff]  ;;  %v1421_v36 = vld [vmem:[%s1569_s25 + $0x69] sm:$0xff]  ;;  %v1764_v57 = vld [vmem:[%s1569_s25 + $0x78] sm:$0xff] }
  0x24   : > { %v871_v11 = vadd.f32 %v839_v26, %v766_v59  ;;  %v663_v12 = vadd.f32 %v631_v46, %v559_v60  ;;  %v351_v14 = vadd.f32 %v319_v61, %v215_v58  ;;  %v944_v13 = vmul.f32 %v1597_v15, %v1727_v54 }
  0x25   : > { %v1147_v7 = vmax.f32 %v1115_v55, 0.0  ;;  %v1116_v10 = vadd.f32 %v1692_v39, %v1077_v53  ;;  %v1117_v47 = vadd.f32 %v1692_v39, %v1078_v8  ;;  %v632_v48 = vmul.f32 %v1681_v31, %v1574_v4  ;;  %v1770_v53 = vld [vmem:[%s1569_s25 + $0x79] sm:$0xff] }
  0x26   : > { %v975_v17 = vadd.f32 %v943_v35, %v871_v11  ;;  %v767_v18 = vadd.f32 %v735_v45, %v663_v12  ;;  %v455_v24 = vadd.f32 %v423_v9, %v351_v14  ;;  %v1048_v26 = vmul.f32 %v1608_v20, %v1454_v22  ;;  %v1456_v9 = vld [vmem:[%s1569_s25 + $0x7a] sm:$0xff] }
  0x27   : > { %1180 = vst.msk [vmem:[%s1717_s15] sm:$0xff] %vm1179_vm0, %v1147_v7  ;;  %v1148_v16 = vmax.f32 %v1116_v10, 0.0  ;;  %v1149_v25 = vmax.f32 %v1117_v47, 0.0  ;;  %v736_v27 = vmul.f32 %v1695_v43, %v1579_v5  ;;  %v216_v30 = vmul.f32 %v1651_v56, %v1549_v0 }
  0x28   : > { %v1079_v32 = vadd.f32 %v1047_v29, %v975_v17  ;;  %v872_v33 = vadd.f32 %v840_v37, %v767_v18  ;;  %v560_v34 = vadd.f32 %v528_v41, %v455_v24  ;;  %v320_v35 = vmul.f32 %v1657_v62, %v1554_v1  ;;  %v1792_v17 = vld [vmem:[%s1569_s25 + $0x81] sm:$0xff] }
  0x29   : > { %1181 = vst.msk [vmem:[%s1717_s15 + $0x8] sm:$0xff] %vm1179_vm0, %v1148_v16  ;;  %1182 = vst.msk [vmem:[%s1717_s15 + $0x10] sm:$0xff] %vm1179_vm0, %v1149_v25  ;;  %v841_v38 = vmul.f32 %v1584_v6, %v1387_v23  ;;  %v424_v40 = vmul.f32 %v1660_v63, %v1559_v2  ;;  %v529_v56 = vmul.f32 %v1707_v52, %v1564_v3  ;;  %v1789_v16 = vld [vmem:[%s1569_s25 + $0x80] sm:$0xff] }
  0x2a   : > { %v1118_v42 = vadd.f32 %v1692_v39, %v1079_v32  ;;  %v976_v19 = vadd.f32 %v944_v13, %v872_v33  ;;  %v664_v28 = vadd.f32 %v632_v48, %v560_v34  ;;  %v352_v62 = vadd.f32 %v320_v35, %v216_v30  ;;  %v1457_v30 = vld [vmem:[%s1569_s25 + $0x82] sm:$0xff] }
  0x2b   : > { %v945_v29 = vmul.f32 %v1597_v15, %v1421_v36  ;;  %v1049_v46 = vmul.f32 %v1608_v20, %v1455_v44  ;;  %v633_v63 = vmul.f32 %v1727_v54, %v1574_v4  ;;  %v217_v49 = vmul.f32 %v1674_v21, %v1549_v0 }
  0x2c   : > { %v1150_v50 = vmax.f32 %v1118_v42, 0.0  ;;  %v1080_v51 = vadd.f32 %v1048_v26, %v976_v19  ;;  %v768_v45 = vadd.f32 %v736_v27, %v664_v28  ;;  %v456_v55 = vadd.f32 %v424_v40, %v352_v62  ;;  %v1812_v19 = vld [vmem:[%s1569_s25 + $0x90] sm:$0xff] }
  0x2d   : > { %v737_v37 = vmul.f32 %v1454_v22, %v1579_v5  ;;  %v842_v58 = vmul.f32 %v1584_v6, %v1764_v57  ;;  %v321_v59 = vmul.f32 %v1681_v31, %v1554_v1  ;;  %v425_v21 = vmul.f32 %v1695_v43, %v1559_v2 }
  0x2e   : > { %1183 = vst.msk [vmem:[%s1717_s15 + $0x18] sm:$0xff] %vm1179_vm0, %v1150_v50  ;;  %v1119_v60 = vadd.f32 %v1692_v39, %v1080_v51  ;;  %v873_v61 = vadd.f32 %v841_v38, %v768_v45  ;;  %v561_v7 = vadd.f32 %v529_v56, %v456_v55  ;;  %v946_v8 = vmul.f32 %v1597_v15, %v1770_v53  ;;  %v1823_v45 = vld [vmem:[%s1569_s25 + $0x92] sm:$0xff] }
  0x2f   : > { %v1050_v41 = vmul.f32 %v1608_v20, %v1456_v9  ;;  %v353_v10 = vadd.f32 %v321_v59, %v217_v49  ;;  %v530_v31 = vmul.f32 %v1387_v23, %v1564_v3  ;;  %v634_v43 = vmul.f32 %v1421_v36, %v1574_v4 }
  0x30   : > { %v1151_v11 = vmax.f32 %v1119_v60, 0.0  ;;  %v977_v12 = vadd.f32 %v945_v29, %v873_v61  ;;  %v665_v14 = vadd.f32 %v633_v63, %v561_v7  ;;  %v218_v47 = vmul.f32 %v1707_v52, %v1549_v0 }
  0x31   : > { %v457_v13 = vadd.f32 %v425_v21, %v353_v10  ;;  %v738_v48 = vmul.f32 %v1455_v44, %v1579_v5  ;;  %v322_v18 = vmul.f32 %v1727_v54, %v1554_v1  ;;  %v426_v24 = vmul.f32 %v1454_v22, %v1559_v2  ;;  %v1840_v10 = vld [vmem:[%s1569_s25 + $0x98] sm:$0xff] }
  0x32   : > { %1184 = vst.msk [vmem:[%s1717_s15 + $0x20] sm:$0xff] %vm1179_vm0, %v1151_v11  ;;  %v1081_v25 = vadd.f32 %v1049_v46, %v977_v12  ;;  %v769_v26 = vadd.f32 %v737_v37, %v665_v14  ;;  %v843_v52 = vmul.f32 %v1584_v6, %v1789_v16  ;;  %v947_v27 = vmul.f32 %v1597_v15, %v1792_v17 }
  0x33   : > { %v562_v32 = vadd.f32 %v530_v31, %v457_v13  ;;  %v1051_v33 = vmul.f32 %v1608_v20, %v1457_v30  ;;  %v354_v34 = vadd.f32 %v322_v18, %v218_v47  ;;  %v531_v54 = vmul.f32 %v1764_v57, %v1564_v3  ;;  %v1848_v13 = vld [vmem:[%s1569_s25 + $0x99] sm:$0xff] }
  0x34   : > { %v1120_v22 = vadd.f32 %v1692_v39, %v1081_v25  ;;  %v874_v35 = vadd.f32 %v842_v58, %v769_v26  ;;  %v635_v38 = vmul.f32 %v1770_v53, %v1574_v4  ;;  %v219_v40 = vmul.f32 %v1387_v23, %v1549_v0  ;;  %v1820_v23 = vld [vmem:[%s1569_s25 + $0x91] sm:$0xff]  ;;  %v1853_v18 = vld [vmem:[%s1569_s25 + $0x9a] sm:$0xff] }
  0x35   : > { %v666_v56 = vadd.f32 %v634_v43, %v562_v32  ;;  %v458_v42 = vadd.f32 %v426_v24, %v354_v34  ;;  %v323_v28 = vmul.f32 %v1421_v36, %v1554_v1  ;;  %v427_v62 = vmul.f32 %v1455_v44, %v1559_v2 }
  0x36   : > { %v1152_v29 = vmax.f32 %v1120_v22, 0.0  ;;  %v978_v46 = vadd.f32 %v946_v8, %v874_v35  ;;  %v739_v63 = vmul.f32 %v1456_v9, %v1579_v5  ;;  %v844_v49 = vmul.f32 %v1584_v6, %v1812_v19 }
  0x37   : > { %v770_v50 = vadd.f32 %v738_v48, %v666_v56  ;;  %v563_v51 = vadd.f32 %v531_v54, %v458_v42  ;;  %v355_v55 = vadd.f32 %v323_v28, %v219_v40  ;;  %v532_v36 = vmul.f32 %v1789_v16, %v1564_v3  ;;  %v1872_v42 = vld [vmem:[%s1569_s25 + $0xa8] sm:$0xff] }
  0x38   : > { %1185 = vst.msk [vmem:[%s1717_s15 + $0x28] sm:$0xff] %vm1179_vm0, %v1152_v29  ;;  %v1082_v44 = vadd.f32 %v1050_v41, %v978_v46  ;;  %v948_v37 = vmul.f32 %v1597_v15, %v1820_v23  ;;  %v1052_v58 = vmul.f32 %v1608_v20, %v1823_v45  ;;  %v636_v59 = vmul.f32 %v1792_v17, %v1574_v4 }
  0x39   : > { %v875_v21 = vadd.f32 %v843_v52, %v770_v50  ;;  %v667_v60 = vadd.f32 %v635_v38, %v563_v51  ;;  %v459_v61 = vadd.f32 %v427_v62, %v355_v55  ;;  %v220_v7 = vmul.f32 %v1764_v57, %v1549_v0 }
  0x3a   : > { %v1121_v8 = vadd.f32 %v1692_v39, %v1082_v44  ;;  %v740_v41 = vmul.f32 %v1457_v30, %v1579_v5  ;;  %v324_v31 = vmul.f32 %v1770_v53, %v1554_v1  ;;  %v428_v43 = vmul.f32 %v1456_v9, %v1559_v2 }
  0x3b   : > { %v979_v11 = vadd.f32 %v947_v27, %v875_v21  ;;  %v771_v12 = vadd.f32 %v739_v63, %v667_v60  ;;  %v564_v14 = vadd.f32 %v532_v36, %v459_v61  ;;  %v845_v47 = vmul.f32 %v1584_v6, %v1840_v10  ;;  %v1426_v63 = vld [vmem:[%s1569_s25 + $0xa9] sm:$0xff] }
  0x3c   : > { %v1153_v57 = vmax.f32 %v1121_v8, 0.0  ;;  %v949_v48 = vmul.f32 %v1597_v15, %v1848_v13  ;;  %v356_v24 = vadd.f32 %v324_v31, %v220_v7  ;;  %v533_v53 = vmul.f32 %v1812_v19, %v1564_v3  ;;  %v1891_v60 = vld [vmem:[%s1569_s25 + $0xb0] sm:$0xff] }
  0x3d   : > { %v1083_v9 = vadd.f32 %v1051_v33, %v979_v11  ;;  %v876_v25 = vadd.f32 %v844_v49, %v771_v12  ;;  %v668_v26 = vadd.f32 %v636_v59, %v564_v14  ;;  %v1053_v52 = vmul.f32 %v1608_v20, %v1853_v18  ;;  %v1460_v59 = vld [vmem:[%s1569_s25 + $0xaa] sm:$0xff]  ;;  %v1461_v14 = vld [vmem:[%s1569_s25 + $0xb2] sm:$0xff] }
  0x3e   : > { %1186 = vst.msk [vmem:[%s1717_s15 + $0x30] sm:$0xff] %vm1179_vm0, %v1153_v57  ;;  %v460_v27 = vadd.f32 %v428_v43, %v356_v24  ;;  %v637_v32 = vmul.f32 %v1820_v23, %v1574_v4  ;;  %v221_v34 = vmul.f32 %v1789_v16, %v1549_v0  ;;  %v325_v54 = vmul.f32 %v1792_v17, %v1554_v1  ;;  %v1427_v12 = vld [vmem:[%s1569_s25 + $0xb1] sm:$0xff] }
  0x3f   : > { %v1122_v33 = vadd.f32 %v1692_v39, %v1083_v9  ;;  %v980_v22 = vadd.f32 %v948_v37, %v876_v25  ;;  %v772_v35 = vadd.f32 %v740_v41, %v668_v26  ;;  %v429_v38 = vmul.f32 %v1457_v30, %v1559_v2 }
  0x40   : > { %v565_v40 = vadd.f32 %v533_v53, %v460_v27  ;;  %v741_v56 = vmul.f32 %v1823_v45, %v1579_v5  ;;  %v357_v28 = vadd.f32 %v325_v54, %v221_v34  ;;  %v534_v16 = vmul.f32 %v1840_v10, %v1564_v3 }
  0x41   : > { %v1154_v62 = vmax.f32 %v1122_v33, 0.0  ;;  %v1084_v17 = vadd.f32 %v1052_v58, %v980_v22  ;;  %v877_v29 = vadd.f32 %v845_v47, %v772_v35  ;;  %v846_v46 = vmul.f32 %v1584_v6, %v1872_v42 }
  0x42   : > { %v669_v30 = vadd.f32 %v637_v32, %v565_v40  ;;  %v950_v49 = vmul.f32 %v1597_v15, %v1426_v63  ;;  %v461_v50 = vadd.f32 %v429_v38, %v357_v28  ;;  %v638_v51 = vmul.f32 %v1848_v13, %v1574_v4  ;;  %v1914_v32 = vld [vmem:[%s1569_s25 + $0xc0] sm:$0xff] }
  0x43   : > { %1187 = vst.msk [vmem:[%s1717_s15 + $0x38] sm:$0xff] %vm1179_vm0, %v1154_v62  ;;  %v1123_v55 = vadd.f32 %v1692_v39, %v1084_v17  ;;  %v981_v36 = vadd.f32 %v949_v48, %v877_v29  ;;  %v742_v44 = vmul.f32 %v1853_v18, %v1579_v5  ;;  %v222_v37 = vmul.f32 %v1812_v19, %v1549_v0  ;;  %v1428_v40 = vld [vmem:[%s1569_s25 + $0xc1] sm:$0xff] }
  0x44   : > { %v773_v58 = vadd.f32 %v741_v56, %v669_v30  ;;  %v566_v21 = vadd.f32 %v534_v16, %v461_v50  ;;  %v326_v61 = vmul.f32 %v1820_v23, %v1554_v1  ;;  %v430_v7 = vmul.f32 %v1823_v45, %v1559_v2  ;;  %v1462_v56 = vld [vmem:[%s1569_s25 + $0xc2] sm:$0xff] }
  0x45   : > { %v1155_v8 = vmax.f32 %v1123_v55, 0.0  ;;  %v1085_v41 = vadd.f32 %v1053_v52, %v981_v36  ;;  %v1054_v31 = vmul.f32 %v1608_v20, %v1460_v59  ;;  %v847_v43 = vmul.f32 %v1584_v6, %v1891_v60 }
  0x46   : > { %v878_v19 = vadd.f32 %v846_v46, %v773_v58  ;;  %v670_v11 = vadd.f32 %v638_v51, %v566_v21  ;;  %v358_v47 = vadd.f32 %v326_v61, %v222_v37  ;;  %v535_v57 = vmul.f32 %v1872_v42, %v1564_v3  ;;  %v1395_v37 = vld [vmem:[%s1569_s25 + $0xc8] sm:$0xff] }
  0x47   : > { %1188 = vst.msk [vmem:[%s1717_s15 + $0x40] sm:$0xff] %vm1179_vm0, %v1155_v8  ;;  %v1124_v23 = vadd.f32 %v1692_v39, %v1085_v41  ;;  %v951_v45 = vmul.f32 %v1597_v15, %v1427_v12  ;;  %v1055_v48 = vmul.f32 %v1608_v20, %v1461_v14  ;;  %v639_v24 = vmul.f32 %v1426_v63, %v1574_v4  ;;  %v1429_v61 = vld [vmem:[%s1569_s25 + $0xc9] sm:$0xff] }
  0x48   : > { %v982_v53 = vadd.f32 %v950_v49, %v878_v19  ;;  %v774_v9 = vadd.f32 %v742_v44, %v670_v11  ;;  %v462_v25 = vadd.f32 %v430_v7, %v358_v47  ;;  %v223_v26 = vmul.f32 %v1840_v10, %v1549_v0  ;;  %v1941_v7 = vld [vmem:[%s1569_s25 + $0xca] sm:$0xff] }
  0x49   : > { %v1156_v52 = vmax.f32 %v1124_v23, 0.0  ;;  %v743_v27 = vmul.f32 %v1460_v59, %v1579_v5  ;;  %v327_v34 = vmul.f32 %v1848_v13, %v1554_v1  ;;  %v431_v54 = vmul.f32 %v1853_v18, %v1559_v2 }
  0x4a   : > { %v1086_v33 = vadd.f32 %v1054_v31, %v982_v53  ;;  %v879_v22 = vadd.f32 %v847_v43, %v774_v9  ;;  %v567_v35 = vadd.f32 %v535_v57, %v462_v25  ;;  %v848_v38 = vmul.f32 %v1584_v6, %v1914_v32 }
  0x4b   : > { %1189 = vst.msk [vmem:[%s1717_s15 + $0x48] sm:$0xff] %vm1179_vm0, %v1156_v52  ;;  %v952_v10 = vmul.f32 %v1597_v15, %v1428_v40  ;;  %v1056_v28 = vmul.f32 %v1608_v20, %v1462_v56  ;;  %v359_v16 = vadd.f32 %v327_v34, %v223_v26  ;;  %v536_v13 = vmul.f32 %v1891_v60, %v1564_v3  ;;  %v1430_v52 = vld [vmem:[%s1569_s25 + $0xd9] sm:$0xff] }
  0x4c   : > { %v1125_v18 = vadd.f32 %v1692_v39, %v1086_v33  ;;  %v983_v62 = vadd.f32 %v951_v45, %v879_v22  ;;  %v671_v17 = vadd.f32 %v639_v24, %v567_v35  ;;  %v640_v29 = vmul.f32 %v1427_v12, %v1574_v4  ;;  %v1955_v45 = vld [vmem:[%s1569_s25 + $0xd8] sm:$0xff] }
  0x4d   : > { %v463_v46 = vadd.f32 %v431_v54, %v359_v16  ;;  %v224_v30 = vmul.f32 %v1872_v42, %v1549_v0  ;;  %v328_v49 = vmul.f32 %v1426_v63, %v1554_v1  ;;  %v432_v50 = vmul.f32 %v1460_v59, %v1559_v2  ;;  %v1464_v34 = vld [vmem:[%s1569_s25 + $0xda] sm:$0xff] }
  0x4e   : > { %v1157_v51 = vmax.f32 %v1125_v18, 0.0  ;;  %v1087_v55 = vadd.f32 %v1055_v48, %v983_v62  ;;  %v775_v36 = vadd.f32 %v743_v27, %v671_v17  ;;  %v744_v44 = vmul.f32 %v1461_v14, %v1579_v5 }
  0x4f   : > { %v568_v58 = vadd.f32 %v536_v13, %v463_v46  ;;  %v849_v21 = vmul.f32 %v1584_v6, %v1395_v37  ;;  %v360_v8 = vadd.f32 %v328_v49, %v224_v30  ;;  %v537_v42 = vmul.f32 %v1914_v32, %v1564_v3  ;;  %v1397_v30 = vld [vmem:[%s1569_s25 + $0xe0] sm:$0xff] }
  0x50   : > { %1190 = vst.msk [vmem:[%s1717_s15 + $0x50] sm:$0xff] %vm1179_vm0, %v1157_v51  ;;  %v1126_v63 = vadd.f32 %v1692_v39, %v1087_v55  ;;  %v880_v59 = vadd.f32 %v848_v38, %v775_v36  ;;  %v953_v41 = vmul.f32 %v1597_v15, %v1429_v61  ;;  %v1057_v31 = vmul.f32 %v1608_v20, %v1941_v7  ;;  %v1431_v49 = vld [vmem:[%s1569_s25 + $0xe1] sm:$0xff] }
  0x51   : > { %v672_v43 = vadd.f32 %v640_v29, %v568_v58  ;;  %v464_v19 = vadd.f32 %v432_v50, %v360_v8  ;;  %v641_v11 = vmul.f32 %v1428_v40, %v1574_v4  ;;  %v225_v47 = vmul.f32 %v1891_v60, %v1549_v0 }
  0x52   : > { %v1158_v57 = vmax.f32 %v1126_v63, 0.0  ;;  %v984_v23 = vadd.f32 %v952_v10, %v880_v59  ;;  %v329_v48 = vmul.f32 %v1427_v12, %v1554_v1  ;;  %v433_v24 = vmul.f32 %v1461_v14, %v1559_v2 }
  0x53   : > { %v776_v53 = vadd.f32 %v744_v44, %v672_v43  ;;  %v569_v9 = vadd.f32 %v537_v42, %v464_v19  ;;  %v745_v25 = vmul.f32 %v1462_v56, %v1579_v5  ;;  %v850_v26 = vmul.f32 %v1584_v6, %v1955_v45  ;;  %v1465_v44 = vld [vmem:[%s1569_s25 + $0xe2] sm:$0xff] }
  0x54   : > { %1191 = vst.msk [vmem:[%s1717_s15 + $0x58] sm:$0xff] %vm1179_vm0, %v1158_v57  ;;  %v1088_v27 = vadd.f32 %v1056_v28, %v984_v23  ;;  %v954_v60 = vmul.f32 %v1597_v15, %v1430_v52  ;;  %v361_v54 = vadd.f32 %v329_v48, %v225_v47  ;;  %v538_v12 = vmul.f32 %v1395_v37, %v1564_v3  ;;  %v1398_v23 = vld [vmem:[%s1569_s25 + $0xf0] sm:$0xff] }
  0x55   : > { %v881_v14 = vadd.f32 %v849_v21, %v776_v53  ;;  %v673_v33 = vadd.f32 %v641_v11, %v569_v9  ;;  %v1058_v22 = vmul.f32 %v1608_v20, %v1464_v34  ;;  %v642_v35 = vmul.f32 %v1429_v61, %v1574_v4  ;;  %v1432_v48 = vld [vmem:[%s1569_s25 + $0xf1] sm:$0xff] }
  0x56   : > { %v1127_v38 = vadd.f32 %v1692_v39, %v1088_v27  ;;  %v465_v10 = vadd.f32 %v433_v24, %v361_v54  ;;  %v226_v28 = vmul.f32 %v1914_v32, %v1549_v0  ;;  %v330_v16 = vmul.f32 %v1428_v40, %v1554_v1 }
  0x57   : > { %v985_v13 = vadd.f32 %v953_v41, %v881_v14  ;;  %v777_v18 = vadd.f32 %v745_v25, %v673_v33  ;;  %v746_v62 = vmul.f32 %v1941_v7, %v1579_v5  ;;  %v434_v17 = vmul.f32 %v1462_v56, %v1559_v2 }
  0x58   : > { %v1159_v29 = vmax.f32 %v1127_v38, 0.0  ;;  %v570_v46 = vadd.f32 %v538_v12, %v465_v10  ;;  %v362_v50 = vadd.f32 %v330_v16, %v226_v28  ;;  %v539_v51 = vmul.f32 %v1955_v45, %v1564_v3 }
  0x59   : > { %v1089_v32 = vadd.f32 %v1057_v31, %v985_v13  ;;  %v882_v55 = vadd.f32 %v850_v26, %v777_v18  ;;  %v851_v40 = vmul.f32 %v1584_v6, %v1397_v30  ;;  %v955_v36 = vmul.f32 %v1597_v15, %v1431_v49  ;;  %v1466_v26 = vld [vmem:[%s1569_s25 + $0xf2] sm:$0xff] }
  0x5a   : > { %1192 = vst.msk [vmem:[%s1717_s15 + $0x60] sm:$0xff] %vm1179_vm0, %v1159_v29  ;;  %v674_v56 = vadd.f32 %v642_v35, %v570_v46  ;;  %v1059_v58 = vmul.f32 %v1608_v20, %v1465_v44  ;;  %v466_v21 = vadd.f32 %v434_v17, %v362_v50  ;;  %v643_v8 = vmul.f32 %v1430_v52, %v1574_v4  ;;  %v1399_v18 = vld [vmem:[%s1569_s25 + $0xf8] sm:$0xff] }
  0x5b   : > { %v1128_v42 = vadd.f32 %v1692_v39, %v1089_v32  ;;  %v986_v63 = vadd.f32 %v954_v60, %v882_v55  ;;  %v227_v59 = vmul.f32 %v1395_v37, %v1549_v0  ;;  %v331_v41 = vmul.f32 %v1429_v61, %v1554_v1 }
  0x5c   : > { %v778_v31 = vadd.f32 %v746_v62, %v674_v56  ;;  %v571_v43 = vadd.f32 %v539_v51, %v466_v21  ;;  %v747_v19 = vmul.f32 %v1464_v34, %v1579_v5  ;;  %v435_v11 = vmul.f32 %v1941_v7, %v1559_v2  ;;  %v1433_v62 = vld [vmem:[%s1569_s25 + $0xf9] sm:$0xff] }
  0x5d   : > { %v1160_v47 = vmax.f32 %v1128_v42, 0.0  ;;  %v1090_v57 = vadd.f32 %v1058_v22, %v986_v63  ;;  %v363_v24 = vadd.f32 %v331_v41, %v227_v59  ;;  %v540_v53 = vmul.f32 %v1397_v30, %v1564_v3 }
  0x5e   : > { %v883_v9 = vadd.f32 %v851_v40, %v778_v31  ;;  %v675_v37 = vadd.f32 %v643_v8, %v571_v43  ;;  %v852_v25 = vmul.f32 %v1584_v6, %v1398_v23  ;;  %v956_v61 = vmul.f32 %v1597_v15, %v1432_v48  ;;  %v1467_v8 = vld [vmem:[%s1569_s25 + $0xfa] sm:$0xff]  ;;  %v1400_v31 = vld [vmem:[%s1569_s25 + $0x108] sm:$0xff] }
  0x5f   : > { %1193 = vst.msk [vmem:[%s1717_s15 + $0x68] sm:$0xff] %vm1179_vm0, %v1160_v47  ;;  %v1129_v7 = vadd.f32 %v1692_v39, %v1090_v57  ;;  %v1060_v27 = vmul.f32 %v1608_v20, %v1466_v26  ;;  %v467_v60 = vadd.f32 %v435_v11, %v363_v24  ;;  %v644_v54 = vmul.f32 %v1431_v49, %v1574_v4  ;;  %v1434_v43 = vld [vmem:[%s1569_s25 + $0x109] sm:$0xff] }
  0x60   : > { %v987_v12 = vadd.f32 %v955_v36, %v883_v9  ;;  %v779_v14 = vadd.f32 %v747_v19, %v675_v37  ;;  %v228_v33 = vmul.f32 %v1955_v45, %v1549_v0  ;;  %v332_v22 = vmul.f32 %v1430_v52, %v1554_v1 }
  0x61   : > { %v1161_v35 = vmax.f32 %v1129_v7, 0.0  ;;  %v572_v38 = vadd.f32 %v540_v53, %v467_v60  ;;  %v748_v10 = vmul.f32 %v1465_v44, %v1579_v5  ;;  %v436_v28 = vmul.f32 %v1464_v34, %v1559_v2 }
  0x62   : > { %v1091_v16 = vadd.f32 %v1059_v58, %v987_v12  ;;  %v884_v13 = vadd.f32 %v852_v25, %v779_v14  ;;  %v364_v17 = vadd.f32 %v332_v22, %v228_v33  ;;  %v541_v29 = vmul.f32 %v1398_v23, %v1564_v3  ;;  %v1401_v33 = vld [vmem:[%s1569_s25 + $0x110] sm:$0xff] }
  0x63   : > { %1194 = vst.msk [vmem:[%s1717_s15 + $0x70] sm:$0xff] %vm1179_vm0, %v1161_v35  ;;  %v676_v46 = vadd.f32 %v644_v54, %v572_v38  ;;  %v853_v45 = vmul.f32 %v1584_v6, %v1399_v18  ;;  %v957_v52 = vmul.f32 %v1597_v15, %v1433_v62  ;;  %v645_v32 = vmul.f32 %v1432_v48, %v1574_v4 }
  0x64   : > { %v1130_v50 = vadd.f32 %v1692_v39, %v1091_v16  ;;  %v988_v34 = vadd.f32 %v956_v61, %v884_v13  ;;  %v468_v51 = vadd.f32 %v436_v28, %v364_v17  ;;  %v229_v40 = vmul.f32 %v1397_v30, %v1549_v0  ;;  %v1468_v61 = vld [vmem:[%s1569_s25 + $0x10a] sm:$0xff] }
  0x65   : > { %v780_v55 = vadd.f32 %v748_v10, %v676_v46  ;;  %v333_v36 = vmul.f32 %v1431_v49, %v1554_v1  ;;  %v437_v56 = vmul.f32 %v1465_v44, %v1559_v2  ;;  %v749_v63 = vmul.f32 %v1466_v26, %v1579_v5 }
  0x66   : > { %v1162_v58 = vmax.f32 %v1130_v50, 0.0  ;;  %v1092_v21 = vadd.f32 %v1060_v27, %v988_v34  ;;  %v573_v42 = vadd.f32 %v541_v29, %v468_v51  ;;  %v1061_v41 = vmul.f32 %v1608_v20, %v1467_v8 }
  0x67   : > { %v885_v59 = vadd.f32 %v853_v45, %v780_v55  ;;  %v365_v19 = vadd.f32 %v333_v36, %v229_v40  ;;  %v542_v11 = vmul.f32 %v1399_v18, %v1564_v3  ;;  %v854_v44 = vmul.f32 %v1584_v6, %v1400_v31  ;;  %v2055_v40 = vld [vmem:[%s1569_s25 + $0x120] sm:$0xff] }
  0x68   : > { %1195 = vst.msk [vmem:[%s1717_s15 + $0x78] sm:$0xff] %vm1179_vm0, %v1162_v58  ;;  %v1131_v30 = vadd.f32 %v1692_v39, %v1092_v21  ;;  %v677_v49 = vadd.f32 %v645_v32, %v573_v42  ;;  %v958_v47 = vmul.f32 %v1597_v15, %v1434_v43  ;;  %v646_v53 = vmul.f32 %v1433_v62, %v1574_v4  ;;  %v1469_v32 = vld [vmem:[%s1569_s25 + $0x112] sm:$0xff]  ;;  %v2058_v36 = vld [vmem:[%s1569_s25 + $0x121] sm:$0xff] }
  0x69   : > { %v989_v57 = vadd.f32 %v957_v52, %v885_v59  ;;  %v469_v24 = vadd.f32 %v437_v56, %v365_v19  ;;  %v230_v9 = vmul.f32 %v1398_v23, %v1549_v0  ;;  %v334_v7 = vmul.f32 %v1432_v48, %v1554_v1  ;;  %v1435_v23 = vld [vmem:[%s1569_s25 + $0x111] sm:$0xff] }
  0x6a   : > { %v1163_v37 = vmax.f32 %v1131_v30, 0.0  ;;  %v781_v25 = vadd.f32 %v749_v63, %v677_v49  ;;  %v438_v27 = vmul.f32 %v1466_v26, %v1559_v2  ;;  %v1062_v54 = vmul.f32 %v1608_v20, %v1468_v61 }
  0x6b   : > { %v1093_v60 = vadd.f32 %v1061_v41, %v989_v57  ;;  %v574_v12 = vadd.f32 %v542_v11, %v469_v24  ;;  %v750_v14 = vmul.f32 %v1467_v8, %v1579_v5  ;;  %v855_v35 = vmul.f32 %v1584_v6, %v1401_v33  ;;  %v1470_v57 = vld [vmem:[%s1569_s25 + $0x122] sm:$0xff] }
  0x6c   : > { %1196 = vst.msk [vmem:[%s1717_s15 + $0x80] sm:$0xff] %vm1179_vm0, %v1163_v37  ;;  %v886_v22 = vadd.f32 %v854_v44, %v781_v25  ;;  %v366_v38 = vadd.f32 %v334_v7, %v230_v9  ;;  %v543_v10 = vmul.f32 %v1400_v31, %v1564_v3  ;;  %v959_v28 = vmul.f32 %v1597_v15, %v1435_v23  ;;  %v2077_v25 = vld [vmem:[%s1569_s25 + $0x128] sm:$0xff] }
  0x6d   : > { %v1132_v48 = vadd.f32 %v1692_v39, %v1093_v60  ;;  %v678_v26 = vadd.f32 %v646_v53, %v574_v12  ;;  %v647_v16 = vmul.f32 %v1434_v43, %v1574_v4  ;;  %v231_v29 = vmul.f32 %v1399_v18, %v1549_v0  ;;  %v2101_v60 = vld [vmem:[%s2313_s1] ss:$0 sm:$0xff]  ;;  %v1471_v12 = vld [vmem:[%s1569_s25 + $0x12a] sm:$0xff] }
  0x6e   : > { %v990_v13 = vadd.f32 %v958_v47, %v886_v22  ;;  %v470_v17 = vadd.f32 %v438_v27, %v366_v38  ;;  %v335_v46 = vmul.f32 %v1433_v62, %v1554_v1  ;;  %v751_v50 = vmul.f32 %v1468_v61, %v1579_v5  ;;  %v2094_v27 = vld [vmem:[%s2313_s1 + $0x4] ss:$0 sm:$0xff] }
  0x6f   : > { %v1164_v45 = vmax.f32 %v1132_v48, 0.0  ;;  %v782_v52 = vadd.f32 %v750_v14, %v678_v26  ;;  %v439_v34 = vmul.f32 %v1467_v8, %v1559_v2  ;;  %v544_v58 = vmul.f32 %v1401_v33, %v1564_v3  ;;  %v2108_v14 = vld [vmem:[%s2313_s1 + $0x1] ss:$0 sm:$0xff]  ;;  %v2121_v26 = vld [vmem:[%s2313_s1 + $0x5] ss:$0 sm:$0xff] }
  0x70   : > { %v1094_v51 = vadd.f32 %v1062_v54, %v990_v13  ;;  %v575_v55 = vadd.f32 %v543_v10, %v470_v17  ;;  %v367_v56 = vadd.f32 %v335_v46, %v231_v29  ;;  %v1063_v62 = vmul.f32 %v1608_v20, %v1469_v32  ;;  %v1404_v13 = vld [vmem:[%s1569_s25 + $0x138] sm:$0xff]  ;;  %v2129_v46 = vld [vmem:[%s2313_s1 + $0x3] ss:$0 sm:$0xff] }
  0x71   : > { %1197 = vst.msk [vmem:[%s1717_s15 + $0x88] sm:$0xff] %vm1179_vm0, %v1164_v45  ;;  %v887_v18 = vadd.f32 %v855_v35, %v782_v52  ;;  %v856_v21 = vmul.f32 %v1584_v6, %v2055_v40  ;;  %v960_v8 = vmul.f32 %v1597_v15, %v2058_v36  ;;  %v648_v41 = vmul.f32 %v1435_v23, %v1574_v4  ;;  %v2080_v4 = vld [vmem:[%s1569_s25 + $0x129] sm:$0xff]  ;;  %v2114_v35 = vld [vmem:[%s2313_s1 + $0x2] ss:$0 sm:$0xff]  ;;  %v1438_v17 = vld [vmem:[%s1569_s25 + $0x139] sm:$0xff] }
  0x72   : > { %v1133_v42 = vadd.f32 %v1692_v39, %v1094_v51  ;;  %v679_v63 = vadd.f32 %v647_v16, %v575_v55  ;;  %v471_v59 = vadd.f32 %v439_v34, %v367_v56  ;;  %v232_v11 = vmul.f32 %v1400_v31, %v1549_v0  ;;  %v2138_v52 = vld [vmem:[%s2313_s1 + $0x6] ss:$0 sm:$0xff]  ;;  %v2144_v34 = vld [vmem:[%s2313_s1 + $0x7] ss:$0 sm:$0xff] }
  0x73   : > { %v991_v19 = vadd.f32 %v959_v28, %v887_v18  ;;  %v336_v30 = vmul.f32 %v1434_v43, %v1554_v1  ;;  %v440_v49 = vmul.f32 %v1468_v61, %v1559_v2  ;;  %v752_v53 = vmul.f32 %v1469_v32, %v1579_v5 }
  0x74   : > { %v1165_v44 = vmax.f32 %v1133_v42, 0.0  ;;  %v783_v47 = vadd.f32 %v751_v50, %v679_v63  ;;  %v576_v24 = vadd.f32 %v544_v58, %v471_v59  ;;  %v1064_v37 = vmul.f32 %v1608_v20, %v1470_v57  ;;  %v1472_v58 = vld [vmem:[%s1569_s25 + $0x13a] sm:$0xff] }
  0x75   : > { %v1095_v9 = vadd.f32 %v1063_v62, %v991_v19  ;;  %v368_v7 = vadd.f32 %v336_v30, %v232_v11  ;;  %v545_v0 = vmul.f32 %v2055_v40, %v1564_v3  ;;  %v857_v31 = vmul.f32 %v1584_v6, %v2077_v25 }
  0x76   : > { %1198 = vst.msk [vmem:[%s1717_s15 + $0x90] sm:$0xff] %vm1179_vm0, %v1165_v44  ;;  %v888_v1 = vadd.f32 %v856_v21, %v783_v47  ;;  %v680_v2 = vadd.f32 %v648_v41, %v576_v24  ;;  %v961_v5 = vmul.f32 %v1597_v15, %v2080_v4  ;;  %v649_v3 = vmul.f32 %v2094_v27, %v2058_v36  ;;  %v1439_v47 = vld [vmem:[%s1569_s25 + $0x141] sm:$0xff] }
  0x77   : > { %v1134_v43 = vadd.f32 %v1692_v39, %v1095_v9  ;;  %v472_v61 = vadd.f32 %v440_v49, %v368_v7  ;;  %v233_v6 = vmul.f32 %v2101_v60, %v1401_v33  ;;  %v337_v22 = vmul.f32 %v2108_v14, %v1435_v23 }
  0x78   : > { %v992_v15 = vadd.f32 %v960_v8, %v888_v1  ;;  %v784_v54 = vadd.f32 %v752_v53, %v680_v2  ;;  %v441_v38 = vmul.f32 %v2114_v35, %v1469_v32  ;;  %v1065_v10 = vmul.f32 %v1608_v20, %v1471_v12  ;;  %v2156_v8 = vld [vmem:[%s2313_s1 + $0x8] ss:$0 sm:$0xff] }
  0x79   : > { %v1166_v33 = vmax.f32 %v1134_v43, 0.0  ;;  %v577_v48 = vadd.f32 %v545_v0, %v472_v61  ;;  %v753_v28 = vmul.f32 %v2121_v26, %v1470_v57  ;;  %v369_v29 = vadd.f32 %v337_v22, %v233_v6  ;;  %v1473_v6 = vld [vmem:[%s1569_s25 + $0x142] sm:$0xff]  ;;  %v2181_v22 = vld [vmem:[%s1569_s25 + $0x151] sm:$0xff] }
  0x7a   : > { %v1096_v16 = vadd.f32 %v1064_v37, %v992_v15  ;;  %v889_v23 = vadd.f32 %v857_v31, %v784_v54  ;;  %v546_v20 = vmul.f32 %v2129_v46, %v2077_v25  ;;  %v858_v50 = vmul.f32 %v2138_v52, %v1404_v13  ;;  %v1406_v54 = vld [vmem:[%s1569_s25 + $0x150] sm:$0xff] }
  0x7b   : > { %1199 = vst.msk [vmem:[%s1717_s15 + $0x98] sm:$0xff] %vm1179_vm0, %v1166_v33  ;;  %v681_v45 = vadd.f32 %v649_v3, %v577_v48  ;;  %v962_v51 = vmul.f32 %v2144_v34, %v1438_v17  ;;  %v650_v32 = vmul.f32 %v2094_v27, %v2080_v4  ;;  %v473_v18 = vadd.f32 %v441_v38, %v369_v29 }
  0x7c   : > { %v1135_v55 = vadd.f32 %v1692_v39, %v1096_v16  ;;  %v993_v56 = vadd.f32 %v961_v5, %v889_v23  ;;  %v234_v62 = vmul.f32 %v2101_v60, %v2055_v40  ;;  %v1066_v42 = vmul.f32 %v2156_v8, %v1472_v58  ;;  %v1405_v40 = vld [vmem:[%s1569_s25 + $0x140] sm:$0xff] }
  0x7d   : > { %v785_v21 = vadd.f32 %v753_v28, %v681_v45  ;;  %v338_v63 = vmul.f32 %v2108_v14, %v2058_v36  ;;  %v442_v59 = vmul.f32 %v2114_v35, %v1470_v57  ;;  %v578_v11 = vadd.f32 %v546_v20, %v473_v18 }
  0x7e   : > { %v1167_v41 = vmax.f32 %v1135_v55, 0.0  ;;  %v1097_v19 = vadd.f32 %v1065_v10, %v993_v56  ;;  %v754_v30 = vmul.f32 %v2121_v26, %v1471_v12  ;;  %v859_v44 = vmul.f32 %v2138_v52, %v1405_v40  ;;  %v1474_v55 = vld [vmem:[%s1569_s25 + $0x152] sm:$0xff] }
  0x7f   : > { %v890_v49 = vadd.f32 %v858_v50, %v785_v21  ;;  %v370_v24 = vadd.f32 %v338_v63, %v234_v62  ;;  %v547_v53 = vmul.f32 %v2129_v46, %v1404_v13  ;;  %v682_v57 = vadd.f32 %v650_v32, %v578_v11  ;;  %v1407_v21 = vld [vmem:[%s1569_s25 + $0x158] sm:$0xff] }
  0x80   : > { %1200 = vst.msk [vmem:[%s1717_s15 + $0xa0] sm:$0xff] %vm1179_vm0, %v1167_v41  ;;  %v1136_v36 = vadd.f32 %v1692_v39, %v1097_v19  ;;  %v963_v9 = vmul.f32 %v2144_v34, %v1439_v47  ;;  %v651_v37 = vmul.f32 %v2094_v27, %v1438_v17  ;;  %v235_v1 = vmul.f32 %v2101_v60, %v2077_v25  ;;  %v2208_v19 = vld [vmem:[%s2314_s2] ss:$0 sm:$0xff] }
  0x81   : > { %v994_v7 = vadd.f32 %v962_v51, %v890_v49  ;;  %v474_v0 = vadd.f32 %v442_v59, %v370_v24  ;;  %v339_v2 = vmul.f32 %v2108_v14, %v2080_v4  ;;  %v786_v5 = vadd.f32 %v754_v30, %v682_v57 }
  0x82   : > { %v1168_v31 = vmax.f32 %v1136_v36, 0.0  ;;  %v755_v43 = vmul.f32 %v2121_v26, %v1472_v58  ;;  %v443_v61 = vmul.f32 %v2114_v35, %v1471_v12  ;;  %v548_v33 = vmul.f32 %v2129_v46, %v1405_v40  ;;  %v1475_v36 = vld [vmem:[%s1569_s25 + $0x15a] sm:$0xff] }
  0x83   : > { %v1098_v3 = vadd.f32 %v1066_v42, %v994_v7  ;;  %v579_v15 = vadd.f32 %v547_v53, %v474_v0  ;;  %v371_v38 = vadd.f32 %v339_v2, %v235_v1  ;;  %v891_v25 = vadd.f32 %v859_v44, %v786_v5  ;;  %v1441_v42 = vld [vmem:[%s1569_s25 + $0x159] sm:$0xff]  ;;  %v1408_v5 = vld [vmem:[%s1569_s25 + $0x168] sm:$0xff] }
  0x84   : > { %1201 = vst.msk [vmem:[%s1717_s15 + $0xa8] sm:$0xff] %vm1179_vm0, %v1168_v31  ;;  %v1067_v4 = vmul.f32 %v2156_v8, %v1473_v6  ;;  %v860_v10 = vmul.f32 %v2138_v52, %v1406_v54  ;;  %v964_v12 = vmul.f32 %v2144_v34, %v2181_v22  ;;  %v652_v23 = vmul.f32 %v2094_v27, %v1439_v47 }
  0x85   : > { %v1137_v48 = vadd.f32 %v1692_v39, %v1098_v3  ;;  %v683_v28 = vadd.f32 %v651_v37, %v579_v15  ;;  %v475_v16 = vadd.f32 %v443_v61, %v371_v38  ;;  %v995_v29 = vadd.f32 %v963_v9, %v891_v25  ;;  %v1476_v25 = vld [vmem:[%s1569_s25 + $0x16a] sm:$0xff] }
  0x86   : > { %v236_v20 = vmul.f32 %v2101_v60, %v1404_v13  ;;  %v340_v45 = vmul.f32 %v2108_v14, %v1438_v17  ;;  %v444_v50 = vmul.f32 %v2114_v35, %v1472_v58  ;;  %v756_v18 = vmul.f32 %v2121_v26, %v1473_v6 }
  0x87   : > { %v1169_v51 = vmax.f32 %v1137_v48, 0.0  ;;  %v787_v32 = vadd.f32 %v755_v43, %v683_v28  ;;  %v580_v56 = vadd.f32 %v548_v33, %v475_v16  ;;  %v1099_v39 = vadd.f32 %v1067_v4, %v995_v29  ;;  %v1442_v43 = vld [vmem:[%s1569_s25 + $0x169] sm:$0xff] }
  0x88   : > { %v1068_v62 = vmul.f32 %v2156_v8, %v1474_v55  ;;  %v372_v63 = vadd.f32 %v340_v45, %v236_v20  ;;  %v549_v59 = vmul.f32 %v2129_v46, %v1406_v54  ;;  %v861_v58 = vmul.f32 %v2138_v52, %v1407_v21 }
  0x89   : > { %1202 = vst.msk [vmem:[%s1717_s15 + $0xb0] sm:$0xff] %vm1179_vm0, %v1169_v51  ;;  %v892_v13 = vadd.f32 %v860_v10, %v787_v32  ;;  %v684_v17 = vadd.f32 %v652_v23, %v580_v56  ;;  %v965_v41 = vmul.f32 %v2144_v34, %v1441_v42  ;;  %v1138_v11 = vadd.f32 %v2208_v19, %v1099_v39  ;;  %v1443_v56 = vld [vmem:[%s1569_s25 + $0x171] sm:$0xff] }
  0x8a   : > { %v476_v30 = vadd.f32 %v444_v50, %v372_v63  ;;  %v653_v49 = vmul.f32 %v2094_v27, %v2181_v22  ;;  %v237_v44 = vmul.f32 %v2101_v60, %v1405_v40  ;;  %v341_v57 = vmul.f32 %v2108_v14, %v1439_v47  ;;  %v1409_v50 = vld [vmem:[%s1569_s25 + $0x170] sm:$0xff] }
  0x8b   : > { %v996_v24 = vadd.f32 %v964_v12, %v892_v13  ;;  %v788_v53 = vadd.f32 %v756_v18, %v684_v17  ;;  %v445_v9 = vmul.f32 %v2114_v35, %v1473_v6  ;;  %v1170_v37 = vmax.f32 %v1138_v11, 0.0 }
  0x8c   : > { %v1069_v7 = vmul.f32 %v2156_v8, %v1475_v36  ;;  %v581_v0 = vadd.f32 %v549_v59, %v476_v30  ;;  %v757_v1 = vmul.f32 %v2121_v26, %v1474_v55  ;;  %v373_v40 = vadd.f32 %v341_v57, %v237_v44  ;;  %v1477_v44 = vld [vmem:[%s1569_s25 + $0x172] sm:$0xff]  ;;  %v1444_v57 = vld [vmem:[%s1569_s25 + $0x181] sm:$0xff] }
  0x8d   : > { %v1100_v2 = vadd.f32 %v1068_v62, %v996_v24  ;;  %v893_v31 = vadd.f32 %v861_v58, %v788_v53  ;;  %v550_v61 = vmul.f32 %v2129_v46, %v1407_v21  ;;  %1203 = vst.msk [vmem:[%s1717_s15 + $0xb8] sm:$0xff] %vm1179_vm0, %v1170_v37  ;;  %v862_v47 = vmul.f32 %v2138_v52, %v1408_v5  ;;  %v1410_v53 = vld [vmem:[%s1569_s25 + $0x180] sm:$0xff] }
  0x8e   : > { %v685_v3 = vadd.f32 %v653_v49, %v581_v0  ;;  %v966_v6 = vmul.f32 %v2144_v34, %v1442_v43  ;;  %v654_v15 = vmul.f32 %v2094_v27, %v1441_v42  ;;  %v477_v4 = vadd.f32 %v445_v9, %v373_v40 }
  0x8f   : > { %v1139_v38 = vadd.f32 %v2208_v19, %v1100_v2  ;;  %v997_v33 = vadd.f32 %v965_v41, %v893_v31  ;;  %v238_v10 = vmul.f32 %v2101_v60, %v1406_v54  ;;  %v1070_v48 = vmul.f32 %v2156_v8, %v1476_v25 }
  0x90   : > { %v789_v12 = vadd.f32 %v757_v1, %v685_v3  ;;  %v342_v28 = vmul.f32 %v2108_v14, %v2181_v22  ;;  %v446_v16 = vmul.f32 %v2114_v35, %v1474_v55  ;;  %v582_v20 = vadd.f32 %v550_v61, %v477_v4 }
  0x91   : > { %v1171_v23 = vmax.f32 %v1139_v38, 0.0  ;;  %v1101_v29 = vadd.f32 %v1069_v7, %v997_v33  ;;  %v758_v45 = vmul.f32 %v2121_v26, %v1475_v36  ;;  %v863_v32 = vmul.f32 %v2138_v52, %v1409_v50  ;;  %v1478_v38 = vld [vmem:[%s1569_s25 + $0x182] sm:$0xff] }
  0x92   : > { %v894_v51 = vadd.f32 %v862_v47, %v789_v12  ;;  %v374_v18 = vadd.f32 %v342_v28, %v238_v10  ;;  %v551_v54 = vmul.f32 %v2129_v46, %v1408_v5  ;;  %v686_v55 = vadd.f32 %v654_v15, %v582_v20  ;;  %v1445_v28 = vld [vmem:[%s1569_s25 + $0x189] sm:$0xff] }
  0x93   : > { %1204 = vst.msk [vmem:[%s1717_s15 + $0xc0] sm:$0xff] %vm1179_vm0, %v1171_v23  ;;  %v1140_v22 = vadd.f32 %v2208_v19, %v1101_v29  ;;  %v967_v39 = vmul.f32 %v2144_v34, %v1443_v56  ;;  %v655_v62 = vmul.f32 %v2094_v27, %v1442_v43  ;;  %v239_v13 = vmul.f32 %v2101_v60, %v1407_v21 }
  0x94   : > { %v998_v63 = vadd.f32 %v966_v6, %v894_v51  ;;  %v478_v59 = vadd.f32 %v446_v16, %v374_v18  ;;  %v343_v17 = vmul.f32 %v2108_v14, %v1441_v42  ;;  %v790_v41 = vadd.f32 %v758_v45, %v686_v55  ;;  %v1412_v55 = vld [vmem:[%s1569_s25 + $0x198] sm:$0xff] }
  0x95   : > { %v1172_v58 = vmax.f32 %v1140_v22, 0.0  ;;  %v759_v11 = vmul.f32 %v2121_v26, %v1476_v25  ;;  %v447_v30 = vmul.f32 %v2114_v35, %v1475_v36  ;;  %v552_v37 = vmul.f32 %v2129_v46, %v1409_v50  ;;  %v1479_v22 = vld [vmem:[%s1569_s25 + $0x18a] sm:$0xff] }
  0x96   : > { %v1102_v49 = vadd.f32 %v1070_v48, %v998_v63  ;;  %v583_v24 = vadd.f32 %v551_v54, %v478_v59  ;;  %v375_v9 = vadd.f32 %v343_v17, %v239_v13  ;;  %v895_v21 = vadd.f32 %v863_v32, %v790_v41  ;;  %v1411_v48 = vld [vmem:[%s1569_s25 + $0x188] sm:$0xff] }
  0x97   : > { %1205 = vst.msk [vmem:[%s1717_s15 + $0xc8] sm:$0xff] %vm1179_vm0, %v1172_v58  ;;  %v1071_v42 = vmul.f32 %v2156_v8, %v1477_v44  ;;  %v864_v7 = vmul.f32 %v2138_v52, %v1410_v53  ;;  %v968_v0 = vmul.f32 %v2144_v34, %v1444_v57  ;;  %v656_v31 = vmul.f32 %v2094_v27, %v1443_v56 }
  0x98   : > { %v1141_v36 = vadd.f32 %v2208_v19, %v1102_v49  ;;  %v687_v1 = vadd.f32 %v655_v62, %v583_v24  ;;  %v479_v2 = vadd.f32 %v447_v30, %v375_v9  ;;  %v999_v40 = vadd.f32 %v967_v39, %v895_v21  ;;  %v1480_v49 = vld [vmem:[%s1569_s25 + $0x19a] sm:$0xff] }
  0x99   : > { %v240_v61 = vmul.f32 %v2101_v60, %v1408_v5  ;;  %v344_v3 = vmul.f32 %v2108_v14, %v1442_v43  ;;  %v448_v47 = vmul.f32 %v2114_v35, %v1476_v25  ;;  %v760_v4 = vmul.f32 %v2121_v26, %v1477_v44  ;;  %v1413_v9 = vld [vmem:[%s1569_s25 + $0x1a0] sm:$0xff] }
  0x9a   : > { %v1173_v6 = vmax.f32 %v1141_v36, 0.0  ;;  %v791_v15 = vadd.f32 %v759_v11, %v687_v1  ;;  %v584_v33 = vadd.f32 %v552_v37, %v479_v2  ;;  %v1103_v10 = vadd.f32 %v1071_v42, %v999_v40  ;;  %v1447_v36 = vld [vmem:[%s1569_s25 + $0x1a1] sm:$0xff] }
  0x9b   : > { %v1072_v12 = vmul.f32 %v2156_v8, %v1478_v38  ;;  %v376_v16 = vadd.f32 %v344_v3, %v240_v61  ;;  %v553_v5 = vmul.f32 %v2129_v46, %v1410_v53  ;;  %v865_v23 = vmul.f32 %v2138_v52, %v1411_v48  ;;  %v1481_v40 = vld [vmem:[%s1569_s25 + $0x1a2] sm:$0xff] }
  0x9c   : > { %1206 = vst.msk [vmem:[%s1717_s15 + $0xd0] sm:$0xff] %vm1179_vm0, %v1173_v6  ;;  %v896_v43 = vadd.f32 %v864_v7, %v791_v15  ;;  %v688_v25 = vadd.f32 %v656_v31, %v584_v33  ;;  %v969_v29 = vmul.f32 %v2144_v34, %v1445_v28  ;;  %v1142_v20 = vadd.f32 %v2208_v19, %v1103_v10 }
  0x9d   : > { %v480_v45 = vadd.f32 %v448_v47, %v376_v16  ;;  %v657_v51 = vmul.f32 %v2094_v27, %v1444_v57  ;;  %v241_v32 = vmul.f32 %v2101_v60, %v1409_v50  ;;  %v345_v39 = vmul.f32 %v2108_v14, %v1443_v56  ;;  %v1446_v60 = vld [vmem:[%s1569_s25 + $0x199] sm:$0xff] }
  0x9e   : > { %v1000_v18 = vadd.f32 %v968_v0, %v896_v43  ;;  %v792_v54 = vadd.f32 %v760_v4, %v688_v25  ;;  %v449_v62 = vmul.f32 %v2114_v35, %v1477_v44  ;;  %v1174_v63 = vmax.f32 %v1142_v20, 0.0 }
  0x9f   : > { %v1073_v59 = vmul.f32 %v2156_v8, %v1479_v22  ;;  %v585_v13 = vadd.f32 %v553_v5, %v480_v45  ;;  %v761_v17 = vmul.f32 %v2121_v26, %v1478_v38  ;;  %v377_v50 = vadd.f32 %v345_v39, %v241_v32 }
  0xa0   : > { %v1104_v58 = vadd.f32 %v1072_v12, %v1000_v18  ;;  %v897_v41 = vadd.f32 %v865_v23, %v792_v54  ;;  %v554_v11 = vmul.f32 %v2129_v46, %v1411_v48  ;;  %1207 = vst.msk [vmem:[%s1717_s15 + $0xd8] sm:$0xff] %vm1179_vm0, %v1174_v63  ;;  %v866_v14 = vmul.f32 %v2138_v52, %v1412_v55 }
  0xa1   : > { %v689_v30 = vadd.f32 %v657_v51, %v585_v13  ;;  %v481_v44 = vadd.f32 %v449_v62, %v377_v50  ;;  %v658_v24 = vmul.f32 %v2094_v27, %v1445_v28  ;;  %v970_v57 = vmul.f32 %v2144_v34, %v1446_v60 }
  0xa2   : > { %v1143_v35 = vadd.f32 %v2208_v19, %v1104_v58  ;;  %v1001_v56 = vadd.f32 %v969_v29, %v897_v41  ;;  %v762_v42 = vmul.f32 %v2121_v26, %v1479_v22  ;;  %v1074_v0 = vmul.f32 %v2156_v8, %v1480_v49 }
  0xa3   : > { %v793_v53 = vadd.f32 %v761_v17, %v689_v30  ;;  %v586_v21 = vadd.f32 %v554_v11, %v481_v44  ;;  %v867_v2 = vmul.f32 %v2138_v52, %v1413_v9  ;;  %v971_v47 = vmul.f32 %v2144_v34, %v1447_v36 }
  0xa4   : > { %v1175_v46 = vmax.f32 %v1143_v35, 0.0  ;;  %v1105_v37 = vadd.f32 %v1073_v59, %v1001_v56  ;;  %v1075_v15 = vmul.f32 %v2156_v8, %v1481_v40 }
  0xa5   : > { %v898_v7 = vadd.f32 %v866_v14, %v793_v53  ;;  %v690_v27 = vadd.f32 %v658_v24, %v586_v21 }
  0xa6   : > { %1208 = vst.msk [vmem:[%s1717_s15 + $0xe0] sm:$0xff] %vm1179_vm0, %v1175_v46  ;;  %v1144_v1 = vadd.f32 %v2208_v19, %v1105_v37 }
  0xa7   : > { %v1002_v31 = vadd.f32 %v970_v57, %v898_v7  ;;  %v794_v3 = vadd.f32 %v762_v42, %v690_v27 }
  0xa8   : > { %v1176_v61 = vmax.f32 %v1144_v1, 0.0 }
  0xa9   : > { %v1106_v26 = vadd.f32 %v1074_v0, %v1002_v31  ;;  %v899_v6 = vadd.f32 %v867_v2, %v794_v3 }
  0xaa   : > { %1209 = vst.msk [vmem:[%s1717_s15 + $0xe8] sm:$0xff] %vm1179_vm0, %v1176_v61 }
  0xab   : > { %v1145_v38 = vadd.f32 %v2208_v19, %v1106_v26  ;;  %v1003_v33 = vadd.f32 %v971_v47, %v899_v6 }
  0xad   : > { %v1177_v4 = vmax.f32 %v1145_v38, 0.0  ;;  %v1107_v10 = vadd.f32 %v1075_v15, %v1003_v33 }
  0xaf   : > { %1210 = vst.msk [vmem:[%s1717_s15 + $0xf0] sm:$0xff] %vm1179_vm0, %v1177_v4  ;;  %v1146_v52 = vadd.f32 %v2208_v19, %v1107_v10 }
  0xb1   : > { %v1178_v12 = vmax.f32 %v1146_v52, 0.0 }
  0xb3   : > { %1211 = vst.msk [vmem:[%s1717_s15 + $0xf8] sm:$0xff] %vm1179_vm0, %v1178_v12 }
  0xb4 PF: > { %s13_s12 = sadd.s32 1, %s1513_s12  }
  0xb5   : > { %p10_p4 = scmp.ge.s32.totalorder %s13_s12, 4  }
  0xb7   :  { %12 = sbr.rel (!%p10_p4) target bundleno = 1 (0x1), region = 72 }

// kernel: _lambda_.11
= control target key start
LH: loop header
LB: loop body
LE: loop exit
PB: predicated region body
PF: predicated region fallthrough
CT: control target
= control target key end

     0   :  { %s1296_s18 = smov 0   ;;  %s1490_s0 = inlined_call_operand.vmem [shape: f32[2,9,9,8], index: 0, kind: input, shape index: {}]   ;;  %s1491_s1 = inlined_call_operand.vmem [shape: f32[2,9,8,8], index: 1, kind: input, shape index: {}]   ;;  %s1492_s2 = inlined_call_operand.vmem [shape: f32[2,8,9,8], index: 2, kind: input, shape index: {}]   ;;  %s1493_s3 = inlined_call_operand.vmem [shape: f32[2,8,8,8], index: 3, kind: input, shape index: {}]   ;;  %s1494_s4 = inlined_call_operand.vmem [shape: f32[8,8], index: 4, kind: input, shape index: {}]   ;;  %s1495_s5 = inlined_call_operand.vmem [shape: f32[2,8,8,8], index: 5, kind: output, shape index: {}]  }
   0x1 LB: > { %s1131_s19 = sadd.s32 4294967295, %s1262_s18   ;;  %p1135_p0 = scmp.ge.s32.totalorder %s1262_s18, 1  ;;  %s1262_s18 = sphi %s1296_s18, %s15_s18  }
   0x2   : > { %p217_p1 = scmp.lt.s32.totalorder %s1262_s18, 3 }
   0x4   : > { %p218_p2 = pnand %p1135_p0, %p217_p1 }
   0x5   : > { %p260_p3 = scmp.lt.s32.totalorder (!%p218_p2), %s1131_s19, 1 }
   0x6   : > { %221 = sbr.rel (%p218_p2) target bundleno = 242 (0xf2), region = 40 }
   0xb   : > { %v1307_v0 = vld [vmem:[%s1494_s4] sm:$0xff]  ;;  %v1264_v1 = vmov 0.0   ;;  %s1497_s19 = smov (!%p260_p3, %s1131_s19), 1  ;;  %vm1265_vm0 = vmmov 0   ;;  %vm432_vm1 = vcmask 64512  }
   0xc   : > { %1204 = vmatprep.subr.mxu0 %v1264_v1  ;;  %1209 = vmatprep.subr.mxu1 %v1264_v1  ;;  %s1244_s22 = smul.u32 144, %s1497_s19  ;;  %s1185_s23 = sshll.u32 %s1497_s19, 7 }
   0xd   : > { %1205 = vmatpush3.msra.mxu0 %v1307_v0  ;;  %1210 = vmatpush3.msra.mxu1 %v1307_v0  ;;  %s1245_s24 = smul.u32 72, %s1497_s19  ;;  %s1327_s27 = scalar_lea.vmem %s1492_s2, %s1185_s23 }
   0xe   : > { %1206 = vmatprep.mubr.msk.f32.mxu0 %vm1265_vm0, %v1264_v1  ;;  %1211 = vmatprep.mubr.msk.f32.mxu1 %vm1265_vm0, %v1264_v1  ;;  %s1332_s30 = scalar_lea.vmem %s1490_s0, %s1244_s22  ;;  %s1186_s6 = sshll.u32 %s1497_s19, 6  ;;  %v333_v8 = vld [vmem:[%s1327_s27] sm:$0xff]  ;;  %v334_v11 = vld [vmem:[%s1327_s27 + $0x10] sm:$0xff] }
   0xf   : > { %1214 = vmatprep.subr.mxu0 %v1264_v1  ;;  %1219 = vmatprep.subr.mxu1 %v1264_v1  ;;  %s1338_s9 = scalar_lea.vmem %s1491_s1, %s1245_s24  ;;  %v285_v2 = vld [vmem:[%s1332_s30] sm:$0xff]  ;;  %v1144_v3 = vld [vmem:[%s1332_s30 + $0x10] sm:$0xff]  ;;  %s1347_s12 = scalar_lea.vmem %s1493_s3, %s1186_s6 }
  0x10   : > { %v301_v4 = vld [vmem:[%s1338_s9] sm:$0xff]  ;;  %v1352_v6 = vld [vmem:[%s1338_s9 + $0x8] sm:$0xff]  ;;  %v1356_v9 = vld [vmem:[%s1332_s30 + $0x11] sm:$0xff]  ;;  %s1469_s15 = scalar_lea.vmem %s1495_s5, %s1186_s6 }
  0x11   : > { %v317_v5 = vld [vmem:[%s1332_s30 + $0x1] sm:$0xff]  ;;  %v309_v7 = vadd.f32 %v301_v4, %v285_v2  ;;  %v310_v10 = vadd.f32 %v1352_v6, %v1144_v3  ;;  %v1153_v13 = vld [vmem:[%s1338_s9 + $0x10] sm:$0xff]  ;;  %v1154_v22 = vld [vmem:[%s1338_s9 + $0x18] sm:$0xff] }
  0x12   : > { %v1145_v12 = vld [vmem:[%s1332_s30 + $0x20] sm:$0xff]  ;;  %v350_v18 = vld [vmem:[%s1347_s12 + $0x8] sm:$0xff]  ;;  %v1146_v21 = vld [vmem:[%s1332_s30 + $0x30] sm:$0xff] }
  0x13   : > { %v1363_v14 = vld [vmem:[%s1332_s30 + $0x21] sm:$0xff]  ;;  %v325_v15 = vadd.f32 %v317_v5, %v309_v7  ;;  %v326_v17 = vadd.f32 %v1356_v9, %v310_v10  ;;  %v311_v19 = vadd.f32 %v1153_v13, %v1145_v12  ;;  %v1372_v23 = vld [vmem:[%s1332_s30 + $0x31] sm:$0xff]  ;;  %v312_v30 = vadd.f32 %v1154_v22, %v1146_v21 }
  0x14   : > { %v349_v16 = vld [vmem:[%s1347_s12] sm:$0xff]  ;;  %v366_v27 = vld [vmem:[%s1327_s27 + $0x11] sm:$0xff]  ;;  %v1389_v43 = vld [vmem:[%s1338_s9 + $0x28] sm:$0xff] }
  0x15   : > { %v335_v20 = vld [vmem:[%s1327_s27 + $0x20] sm:$0xff]  ;;  %v341_v24 = vadd.f32 %v333_v8, %v325_v15  ;;  %v342_v26 = vadd.f32 %v334_v11, %v326_v17  ;;  %v327_v28 = vadd.f32 %v1363_v14, %v311_v19  ;;  %v351_v29 = vld [vmem:[%s1347_s12 + $0x10] sm:$0xff]  ;;  %v328_v38 = vadd.f32 %v1372_v23, %v312_v30  ;;  %v352_v40 = vld [vmem:[%s1347_s12 + $0x18] sm:$0xff] }
  0x16   : > { %v365_v25 = vld [vmem:[%s1327_s27 + $0x1] sm:$0xff]  ;;  %v336_v31 = vld [vmem:[%s1327_s27 + $0x30] sm:$0xff]  ;;  %v1158_v7 = vld [vmem:[%s1338_s9 + $0x38] sm:$0xff] }
  0x17   : > { %v1147_v32 = vld [vmem:[%s1332_s30 + $0x40] sm:$0xff]  ;;  %v357_v34 = vadd.f32 %v349_v16, %v341_v24  ;;  %v358_v35 = vadd.f32 %v350_v18, %v342_v26  ;;  %v343_v36 = vadd.f32 %v335_v20, %v327_v28  ;;  %v1148_v42 = vld [vmem:[%s1332_s30 + $0x50] sm:$0xff]  ;;  %v344_v47 = vadd.f32 %v336_v31, %v328_v38 }
  0x18   : > { %v1155_v33 = vld [vmem:[%s1338_s9 + $0x20] sm:$0xff]  ;;  %v1393_v49 = vld [vmem:[%s1332_s30 + $0x51] sm:$0xff]  ;;  %v314_v52 = vadd.f32 %v1389_v43, %v1148_v42 }
  0x19   : > { %v367_v37 = vld [vmem:[%s1327_s27 + $0x21] sm:$0xff]  ;;  %v313_v41 = vadd.f32 %v1155_v33, %v1147_v32  ;;  %v373_v44 = vadd.f32 %v365_v25, %v357_v34  ;;  %v374_v45 = vadd.f32 %v366_v27, %v358_v35  ;;  %v359_v46 = vadd.f32 %v351_v29, %v343_v36  ;;  %v368_v50 = vld [vmem:[%s1327_s27 + $0x31] sm:$0xff] }
  0x1a   : > { %v1384_v39 = vld [vmem:[%s1332_s30 + $0x41] sm:$0xff]  ;;  %v1400_v54 = vld [vmem:[%s1338_s9 + $0x30] sm:$0xff]  ;;  %v360_v58 = vadd.f32 %v352_v40, %v344_v47  ;;  %v330_v2 = vadd.f32 %v1393_v49, %v314_v52  ;;  %v356_v36 = vld [vmem:[%s1347_s12 + $0x38] sm:$0xff] }
  0x1b   : > { %v337_v48 = vld [vmem:[%s1327_s27 + $0x40] sm:$0xff]  ;;  %v329_v51 = vadd.f32 %v1384_v39, %v313_v41  ;;  %v390_v55 = vadd.f32 %v1144_v3, %v373_v44  ;;  %v391_v56 = vadd.f32 %v1145_v12, %v374_v45  ;;  %v375_v57 = vadd.f32 %v367_v37, %v359_v46  ;;  %v338_v60 = vld [vmem:[%s1327_s27 + $0x50] sm:$0xff]  ;;  %v354_v12 = vld [vmem:[%s1347_s12 + $0x28] sm:$0xff] }
  0x1c   : > { %v1149_v53 = vld [vmem:[%s1332_s30 + $0x60] sm:$0xff]  ;;  %v1150_v5 = vld [vmem:[%s1332_s30 + $0x70] sm:$0xff]  ;;  %v376_v11 = vadd.f32 %v368_v50, %v360_v58  ;;  %v346_v18 = vadd.f32 %v338_v60, %v330_v2 }
  0x1d   : > { %v353_v59 = vld [vmem:[%s1347_s12 + $0x20] sm:$0xff]  ;;  %v345_v62 = vadd.f32 %v337_v48, %v329_v51  ;;  %v315_v4 = vadd.f32 %v1400_v54, %v1149_v53  ;;  %v407_v3 = vadd.f32 %v1352_v6, %v390_v55  ;;  %v408_v8 = vadd.f32 %v1153_v13, %v391_v56  ;;  %v1166_v16 = vld [vmem:[%s1332_s30 + $0x71] sm:$0xff] }
  0x1e   : > { %v1405_v61 = vld [vmem:[%s1332_s30 + $0x61] sm:$0xff]  ;;  %v392_v10 = vadd.f32 %v1146_v21, %v375_v57  ;;  %v316_v20 = vadd.f32 %v1158_v7, %v1150_v5  ;;  %v393_v6 = vadd.f32 %v1147_v32, %v376_v11  ;;  %v370_v27 = vld [vmem:[%s1327_s27 + $0x51] sm:$0xff]  ;;  %v362_v28 = vadd.f32 %v354_v12, %v346_v18 }
  0x1f   : > { %v369_v63 = vld [vmem:[%s1327_s27 + $0x41] sm:$0xff]  ;;  %v361_v17 = vadd.f32 %v353_v59, %v345_v62  ;;  %v331_v19 = vadd.f32 %v1405_v61, %v315_v4  ;;  %v423_v24 = vadd.f32 %v1356_v9, %v407_v3  ;;  %v424_v25 = vadd.f32 %v1363_v14, %v408_v8  ;;  %v355_v13 = vld [vmem:[%s1347_s12 + $0x30] sm:$0xff] }
  0x20   : > { %v339_v15 = vld [vmem:[%s1327_s27 + $0x60] sm:$0xff]  ;;  %v409_v26 = vadd.f32 %v1154_v22, %v392_v10  ;;  %v332_v30 = vadd.f32 %v1166_v16, %v316_v20  ;;  %v340_v31 = vld [vmem:[%s1327_s27 + $0x70] sm:$0xff]  ;;  %v410_v35 = vadd.f32 %v1155_v33, %v393_v6  ;;  %v378_v22 = vadd.f32 %v370_v27, %v362_v28 }
  0x21   : > { %v377_v21 = vadd.f32 %v369_v63, %v361_v17  ;;  %v347_v29 = vadd.f32 %v339_v15, %v331_v19  ;;  %1207 = vmatmul.mubr.msk.f32.vlgmr.msra.gmra.mxu0 %vm432_vm1, %v423_v24  ;;  %1212 = vmatmul.mubr.msk.f32.vlgmr.msra.gmra.mxu1 %vm432_vm1, %v424_v25  ;;  %v371_v9 = vld [vmem:[%s1327_s27 + $0x61] sm:$0xff]  ;;  %v372_v41 = vld [vmem:[%s1327_s27 + $0x71] sm:$0xff] }
  0x22   : > { %v425_v34 = vadd.f32 %v1372_v23, %v409_v26  ;;  %1215 = vmatpush3.msra.mxu0 %v1307_v0  ;;  %1220 = vmatpush3.msra.mxu1 %v1307_v0  ;;  %v426_v37 = vadd.f32 %v1384_v39, %v410_v35  ;;  %v348_v23 = vadd.f32 %v340_v31, %v332_v30  ;;  %v1167_v52 = vld [vmem:[%s1332_s30 + $0x81] sm:$0xff] }
  0x23   : > { %v394_v14 = vadd.f32 %v1148_v42, %v377_v21  ;;  %v363_v32 = vadd.f32 %v355_v13, %v347_v29  ;;  %1216 = vmatprep.mubr.msk.f32.mxu0 %vm1265_vm0, %v1264_v1  ;;  %1221 = vmatprep.mubr.msk.f32.mxu1 %vm1265_vm0, %v1264_v1  ;;  %v395_v38 = vadd.f32 %v1149_v53, %v378_v22 }
  0x24   : > { %1224 = vmatprep.subr.mxu0 %v1264_v1  ;;  %1229 = vmatprep.subr.mxu1 %v1264_v1  ;;  %v364_v42 = vadd.f32 %v356_v36, %v348_v23 }
  0x25   : > { %v411_v33 = vadd.f32 %v1389_v43, %v394_v14  ;;  %v379_v40 = vadd.f32 %v371_v9, %v363_v32  ;;  %1217 = vmatmul.mubr.msk.f32.vlgmr.msra.gmra.mxu0 %vm432_vm1, %v425_v34  ;;  %1222 = vmatmul.mubr.msk.f32.vlgmr.msra.gmra.mxu1 %vm432_vm1, %v426_v37  ;;  %v412_v44 = vadd.f32 %v1400_v54, %v395_v38  ;;  %v1151_v43 = vld [vmem:[%s1332_s30 + $0x80] sm:$0xff] }
  0x26   : > { %1225 = vmatpush3.msra.mxu0 %v1307_v0  ;;  %1230 = vmatpush3.msra.mxu1 %v1307_v0  ;;  %v380_v46 = vadd.f32 %v372_v41, %v364_v42 }
  0x27   : > { %v427_v39 = vadd.f32 %v1393_v49, %v411_v33  ;;  %v396_v45 = vadd.f32 %v1150_v5, %v379_v40  ;;  %1226 = vmatprep.mubr.msk.f32.mxu0 %vm1265_vm0, %v1264_v1  ;;  %1231 = vmatprep.mubr.msk.f32.mxu1 %vm1265_vm0, %v1264_v1  ;;  %v428_v47 = vadd.f32 %v1405_v61, %v412_v44  ;;  %v1159_v49 = vld [vmem:[%s1338_s9 + $0x40] sm:$0xff] }
  0x28   : > { %1234 = vmatprep.subr.mxu0 %v1264_v1  ;;  %1239 = vmatprep.subr.mxu1 %v1264_v1  ;;  %v397_v50 = vadd.f32 %v1151_v43, %v380_v46 }
  0x29   : > { %v413_v48 = vadd.f32 %v1158_v7, %v396_v45  ;;  %1227 = vmatmul.mubr.msk.f32.vlgmr.msra.gmra.mxu0 %vm432_vm1, %v427_v39  ;;  %1232 = vmatmul.mubr.msk.f32.vlgmr.msra.gmra.mxu1 %vm432_vm1, %v428_v47 }
  0x2a   : > { %1235 = vmatpush3.msra.mxu0 %v1307_v0  ;;  %1240 = vmatpush3.msra.mxu1 %v1307_v0  ;;  %v414_v53 = vadd.f32 %v1159_v49, %v397_v50 }
  0x2b   : > { %v429_v51 = vadd.f32 %v1166_v16, %v413_v48  ;;  %1236 = vmatprep.mubr.msk.f32.mxu0 %vm1265_vm0, %v1264_v1  ;;  %1241 = vmatprep.mubr.msk.f32.mxu1 %vm1265_vm0, %v1264_v1 }
  0x2c   : > { %v430_v54 = vadd.f32 %v1167_v52, %v414_v53 }
  0x2d   : > { %1237 = vmatmul.mubr.msk.f32.vlgmr.msra.gmra.mxu0 %vm432_vm1, %v429_v51 }
  0x2e   : > { %1242 = vmatmul.mubr.msk.f32.vlgmr.msra.gmra.mxu1 %vm432_vm1, %v430_v54 }
  0xe1   : > { %v502_v0 = vpop.f32.mrf.mxu0  ;;  %v577_v55 = vpop.f32.mrf.mxu1 }
  0xe2   : > { %v506_v56 = vmax.f32 %v502_v0, 0.0  ;;  %v581_v57 = vmax.f32 %v577_v55, 0.0 }
  0xe3   : > { %v1208_v1 = vpop.f32.mrf.mxu0  ;;  %v1213_v58 = vpop.f32.mrf.mxu1 }
  0xe4   : > { %507 = vst.msk [vmem:[%s1469_s15] sm:$0xff] %vm432_vm1, %v506_v56  ;;  %1170 = vst.msk [vmem:[%s1469_s15 + $0x8] sm:$0xff] %vm432_vm1, %v581_v57 }
  0xe5   : > { %v653_v59 = vpop.f32.mrf.mxu0  ;;  %v729_v60 = vpop.f32.mrf.mxu1 }
  0xe6   : > { %v657_v61 = vmax.f32 %v653_v59, 0.0  ;;  %v733_v62 = vmax.f32 %v729_v60, 0.0 }
  0xe7   : > { %v1218_v63 = vpop.f32.mrf.mxu0  ;;  %v1223_v2 = vpop.f32.mrf.mxu1 }
  0xe8   : > { %1172 = vst.msk [vmem:[%s1469_s15 + $0x10] sm:$0xff] %vm432_vm1, %v657_v61  ;;  %1174 = vst.msk [vmem:[%s1469_s15 + $0x18] sm:$0xff] %vm432_vm1, %v733_v62 }
  0xe9   : > { %v805_v4 = vpop.f32.mrf.mxu0  ;;  %v881_v7 = vpop.f32.mrf.mxu1 }
  0xea   : > { %v809_v5 = vmax.f32 %v805_v4, 0.0  ;;  %v885_v3 = vmax.f32 %v881_v7, 0.0 }
  0xeb   : > { %v1228_v8 = vpop.f32.mrf.mxu0  ;;  %v1233_v10 = vpop.f32.mrf.mxu1 }
  0xec   : > { %1176 = vst.msk [vmem:[%s1469_s15 + $0x20] sm:$0xff] %vm432_vm1, %v809_v5  ;;  %1178 = vst.msk [vmem:[%s1469_s15 + $0x28] sm:$0xff] %vm432_vm1, %v885_v3 }
  0xed   : > { %v957_v11 = vpop.f32.mrf.mxu0 }
  0xee   : > { %v961_v12 = vmax.f32 %v957_v11, 0.0  ;;  %v1033_v15 = vpop.f32.mrf.mxu1 }
  0xef   : > { %v1238_v16 = vpop.f32.mrf.mxu0  ;;  %v1037_v17 = vmax.f32 %v1033_v15, 0.0 }
  0xf0   : > { %1180 = vst.msk [vmem:[%s1469_s15 + $0x30] sm:$0xff] %vm432_vm1, %v961_v12  ;;  %v1243_v18 = vpop.f32.mrf.mxu1 }
  0xf1   : > { %1182 = vst.msk [vmem:[%s1469_s15 + $0x38] sm:$0xff] %vm432_vm1, %v1037_v17 }
  0xf2 PF: > { %s15_s18 = sadd.s32 1, %s1262_s18  }
  0xf3   : > { %p12_p4 = scmp.ge.s32.totalorder %s15_s18, 4  }
  0xf5   :  { %14 = sbr.rel (!%p12_p4) target bundleno = 1 (0x1), region = 88 }

// kernel: _lambda_.12
= control target key start
LH: loop header
LB: loop body
LE: loop exit
PB: predicated region body
PF: predicated region fallthrough
CT: control target
= control target key end

     0   :  { %s1189_s9 = smov 0   ;;  %s1663_s0 = inlined_call_operand.vmem [shape: f32[16,2,8,2,8], index: 0, kind: input, shape index: {}]   ;;  %s1664_s1 = inlined_call_operand.vmem [shape: f32[16,1,8,1,8], index: 1, kind: input, shape index: {}]   ;;  %s1665_s2 = inlined_call_operand.vmem [shape: f32[16,2,8,2,8], index: 2, kind: output, shape index: {}]  }
   0x1 LB: > { %s1077_s10 = sadd.s32 4294967295, %s1172_s9   ;;  %p1081_p0 = scmp.ge.s32.totalorder %s1172_s9, 1  ;;  %s1172_s9 = sphi %s1189_s9, %s12_s9  }
   0x2   : > { %p125_p1 = scmp.lt.s32.totalorder %s1172_s9, 3 }
   0x4   : > { %p126_p2 = pnand %p1081_p0, %p125_p1 }
   0x5   : > { %s1082_s11 = sshll.u32 (!%p126_p2), %s1077_s10, 3 }
   0x6   : > { %129 = sbr.rel (%p126_p2) target bundleno = 122 (0x7a), region = 28  ;;  %p155_p3 = scmp.lt.s32.totalorder (!%p126_p2), %s1082_s11, 15 }
   0xb   : > { %s1667_s11 = smov (!%p155_p3, %s1082_s11), 15  ;;  %vm878_vm0 = vcmask 58368  }
   0xc   : > { %s1156_s12 = sshll.u32 %s1667_s11, 5  ;;  %s1086_s13 = sshll.u32 %s1667_s11, 3 }
   0xd   : > { %s1200_s16 = scalar_lea.vmem %s1663_s0, %s1156_s12  ;;  %s1205_s19 = scalar_lea.vmem %s1664_s1, %s1086_s13 }
   0xe   : > { %s1210_s22 = scalar_lea.vmem %s1665_s2, %s1156_s12  ;;  %v174_v0 = vld [vmem:[%s1200_s16] sm:$0x3]  ;;  %v175_v2 = vld [vmem:[%s1200_s16 + $0x2] sm:$0x3]  ;;  %v176_v5 = vld [vmem:[%s1200_s16 + $0x4] sm:$0x3] }
   0xf   : > { %v1090_v1 = vld [vmem:[%s1205_s19] ss:$0 sm:$0xff]  ;;  %v1091_v4 = vld [vmem:[%s1205_s19 + $0x1] ss:$0 sm:$0xff]  ;;  %v1092_v6 = vld [vmem:[%s1205_s19 + $0x2] ss:$0 sm:$0xff] }
  0x10   : > { %v750_v3 = vadd.f32 %v1090_v1, %v174_v0  ;;  %v751_v7 = vadd.f32 %v1091_v4, %v175_v2  ;;  %v752_v8 = vadd.f32 %v1092_v6, %v176_v5  ;;  %v177_v9 = vld [vmem:[%s1200_s16 + $0x6] sm:$0x3]  ;;  %v1093_v10 = vld [vmem:[%s1205_s19 + $0x3] ss:$0 sm:$0xff]  ;;  %v178_v11 = vld [vmem:[%s1200_s16 + $0x8] sm:$0x3] }
  0x11   : > { %v753_v12 = vadd.f32 %v1093_v10, %v177_v9  ;;  %v1094_v13 = vld [vmem:[%s1205_s19 + $0x4] ss:$0 sm:$0xff]  ;;  %v179_v14 = vld [vmem:[%s1200_s16 + $0xa] sm:$0x3]  ;;  %v1095_v15 = vld [vmem:[%s1205_s19 + $0x5] ss:$0 sm:$0xff] }
  0x12   : > { %879 = vst.msk [vmem:[%s1210_s22] sm:$0x3] %vm878_vm0, %v750_v3  ;;  %880 = vst.msk [vmem:[%s1210_s22 + $0x2] sm:$0x3] %vm878_vm0, %v751_v7  ;;  %v754_v16 = vadd.f32 %v1094_v13, %v178_v11  ;;  %v755_v17 = vadd.f32 %v1095_v15, %v179_v14  ;;  %v180_v18 = vld [vmem:[%s1200_s16 + $0xc] sm:$0x3] }
  0x13   : > { %881 = vst.msk [vmem:[%s1210_s22 + $0x4] sm:$0x3] %vm878_vm0, %v752_v8  ;;  %v1096_v19 = vld [vmem:[%s1205_s19 + $0x6] ss:$0 sm:$0xff]  ;;  %v181_v20 = vld [vmem:[%s1200_s16 + $0xe] sm:$0x3] }
  0x14   : > { %882 = vst.msk [vmem:[%s1210_s22 + $0x6] sm:$0x3] %vm878_vm0, %v753_v12  ;;  %v756_v21 = vadd.f32 %v1096_v19, %v180_v18  ;;  %v1097_v22 = vld [vmem:[%s1205_s19 + $0x7] ss:$0 sm:$0xff]  ;;  %v182_v23 = vld [vmem:[%s1200_s16 + $0x10] sm:$0x3] }
  0x15   : > { %v183_v24 = vld [vmem:[%s1200_s16 + $0x12] sm:$0x3]  ;;  %883 = vst.msk [vmem:[%s1210_s22 + $0x8] sm:$0x3] %vm878_vm0, %v754_v16  ;;  %884 = vst.msk [vmem:[%s1210_s22 + $0xa] sm:$0x3] %vm878_vm0, %v755_v17  ;;  %v757_v25 = vadd.f32 %v1097_v22, %v181_v20  ;;  %v758_v26 = vadd.f32 %v1090_v1, %v182_v23 }
  0x16   : > { %v759_v27 = vadd.f32 %v1091_v4, %v183_v24  ;;  %v184_v28 = vld [vmem:[%s1200_s16 + $0x14] sm:$0x3]  ;;  %v185_v29 = vld [vmem:[%s1200_s16 + $0x16] sm:$0x3]  ;;  %v186_v30 = vld [vmem:[%s1200_s16 + $0x18] sm:$0x3] }
  0x17   : > { %885 = vst.msk [vmem:[%s1210_s22 + $0xc] sm:$0x3] %vm878_vm0, %v756_v21  ;;  %v760_v31 = vadd.f32 %v1092_v6, %v184_v28  ;;  %v761_v32 = vadd.f32 %v1093_v10, %v185_v29  ;;  %v762_v33 = vadd.f32 %v1094_v13, %v186_v30  ;;  %v187_v34 = vld [vmem:[%s1200_s16 + $0x1a] sm:$0x3]  ;;  %v188_v35 = vld [vmem:[%s1200_s16 + $0x1c] sm:$0x3] }
  0x18   : > { %v189_v36 = vld [vmem:[%s1200_s16 + $0x1e] sm:$0x3]  ;;  %886 = vst.msk [vmem:[%s1210_s22 + $0xe] sm:$0x3] %vm878_vm0, %v757_v25  ;;  %887 = vst.msk [vmem:[%s1210_s22 + $0x10] sm:$0x3] %vm878_vm0, %v758_v26  ;;  %v763_v37 = vadd.f32 %v1095_v15, %v187_v34  ;;  %v764_v38 = vadd.f32 %v1096_v19, %v188_v35 }
  0x19   : > { %888 = vst.msk [vmem:[%s1210_s22 + $0x12] sm:$0x3] %vm878_vm0, %v759_v27  ;;  %v765_v39 = vadd.f32 %v1097_v22, %v189_v36  ;;  %v190_v40 = vld [vmem:[%s1200_s16 + $0x20] sm:$0x3]  ;;  %v1098_v41 = vld [vmem:[%s1205_s19 + $0x8] ss:$0 sm:$0xff] }
  0x1a   : > { %v191_v42 = vld [vmem:[%s1200_s16 + $0x22] sm:$0x3]  ;;  %889 = vst.msk [vmem:[%s1210_s22 + $0x14] sm:$0x3] %vm878_vm0, %v760_v31  ;;  %890 = vst.msk [vmem:[%s1210_s22 + $0x16] sm:$0x3] %vm878_vm0, %v761_v32  ;;  %v766_v43 = vadd.f32 %v1098_v41, %v190_v40 }
  0x1b   : > { %891 = vst.msk [vmem:[%s1210_s22 + $0x18] sm:$0x3] %vm878_vm0, %v762_v33  ;;  %v1099_v44 = vld [vmem:[%s1205_s19 + $0x9] ss:$0 sm:$0xff]  ;;  %v192_v45 = vld [vmem:[%s1200_s16 + $0x24] sm:$0x3] }
  0x1c   : > { %v1100_v46 = vld [vmem:[%s1205_s19 + $0xa] ss:$0 sm:$0xff]  ;;  %892 = vst.msk [vmem:[%s1210_s22 + $0x1a] sm:$0x3] %vm878_vm0, %v763_v37  ;;  %893 = vst.msk [vmem:[%s1210_s22 + $0x1c] sm:$0x3] %vm878_vm0, %v764_v38  ;;  %v767_v47 = vadd.f32 %v1099_v44, %v191_v42 }
  0x1d   : > { %894 = vst.msk [vmem:[%s1210_s22 + $0x1e] sm:$0x3] %vm878_vm0, %v765_v39  ;;  %v768_v48 = vadd.f32 %v1100_v46, %v192_v45  ;;  %v193_v49 = vld [vmem:[%s1200_s16 + $0x26] sm:$0x3]  ;;  %v1101_v50 = vld [vmem:[%s1205_s19 + $0xb] ss:$0 sm:$0xff] }
  0x1e   : > { %v194_v51 = vld [vmem:[%s1200_s16 + $0x28] sm:$0x3]  ;;  %895 = vst.msk [vmem:[%s1210_s22 + $0x20] sm:$0x3] %vm878_vm0, %v766_v43  ;;  %v769_v52 = vadd.f32 %v1101_v50, %v193_v49  ;;  %v1102_v53 = vld [vmem:[%s1205_s19 + $0xc] ss:$0 sm:$0xff] }
  0x1f   : > { %v195_v54 = vld [vmem:[%s1200_s16 + $0x2a] sm:$0x3]  ;;  %v1103_v55 = vld [vmem:[%s1205_s19 + $0xd] ss:$0 sm:$0xff]  ;;  %896 = vst.msk [vmem:[%s1210_s22 + $0x22] sm:$0x3] %vm878_vm0, %v767_v47  ;;  %v770_v56 = vadd.f32 %v1102_v53, %v194_v51 }
  0x20   : > { %897 = vst.msk [vmem:[%s1210_s22 + $0x24] sm:$0x3] %vm878_vm0, %v768_v48  ;;  %v771_v57 = vadd.f32 %v1103_v55, %v195_v54  ;;  %v196_v58 = vld [vmem:[%s1200_s16 + $0x2c] sm:$0x3]  ;;  %v1104_v59 = vld [vmem:[%s1205_s19 + $0xe] ss:$0 sm:$0xff] }
  0x21   : > { %v197_v60 = vld [vmem:[%s1200_s16 + $0x2e] sm:$0x3]  ;;  %898 = vst.msk [vmem:[%s1210_s22 + $0x26] sm:$0x3] %vm878_vm0, %v769_v52  ;;  %v772_v61 = vadd.f32 %v1104_v59, %v196_v58  ;;  %v198_v63 = vld [vmem:[%s1200_s16 + $0x30] sm:$0x3] }
  0x22   : > { %v1105_v62 = vld [vmem:[%s1205_s19 + $0xf] ss:$0 sm:$0xff]  ;;  %v199_v0 = vld [vmem:[%s1200_s16 + $0x32] sm:$0x3]  ;;  %899 = vst.msk [vmem:[%s1210_s22 + $0x28] sm:$0x3] %vm878_vm0, %v770_v56  ;;  %v774_v2 = vadd.f32 %v1098_v41, %v198_v63 }
  0x23   : > { %900 = vst.msk [vmem:[%s1210_s22 + $0x2a] sm:$0x3] %vm878_vm0, %v771_v57  ;;  %v773_v1 = vadd.f32 %v1105_v62, %v197_v60  ;;  %v775_v3 = vadd.f32 %v1099_v44, %v199_v0  ;;  %v200_v4 = vld [vmem:[%s1200_s16 + $0x34] sm:$0x3]  ;;  %v201_v5 = vld [vmem:[%s1200_s16 + $0x36] sm:$0x3] }
  0x24   : > { %v202_v6 = vld [vmem:[%s1200_s16 + $0x38] sm:$0x3]  ;;  %901 = vst.msk [vmem:[%s1210_s22 + $0x2c] sm:$0x3] %vm878_vm0, %v772_v61  ;;  %v776_v7 = vadd.f32 %v1100_v46, %v200_v4  ;;  %v777_v8 = vadd.f32 %v1101_v50, %v201_v5  ;;  %v203_v10 = vld [vmem:[%s1200_s16 + $0x3a] sm:$0x3] }
  0x25   : > { %v778_v9 = vadd.f32 %v1102_v53, %v202_v6  ;;  %v204_v11 = vld [vmem:[%s1200_s16 + $0x3c] sm:$0x3]  ;;  %v205_v12 = vld [vmem:[%s1200_s16 + $0x3e] sm:$0x3]  ;;  %902 = vst.msk [vmem:[%s1210_s22 + $0x2e] sm:$0x3] %vm878_vm0, %v773_v1  ;;  %v779_v13 = vadd.f32 %v1103_v55, %v203_v10 }
  0x26   : > { %903 = vst.msk [vmem:[%s1210_s22 + $0x30] sm:$0x3] %vm878_vm0, %v774_v2  ;;  %904 = vst.msk [vmem:[%s1210_s22 + $0x32] sm:$0x3] %vm878_vm0, %v775_v3  ;;  %v780_v14 = vadd.f32 %v1104_v59, %v204_v11  ;;  %v781_v15 = vadd.f32 %v1105_v62, %v205_v12  ;;  %v206_v16 = vld [vmem:[%s1200_s16 + $0x40] sm:$0x3] }
  0x27   : > { %v1106_v17 = vld [vmem:[%s1205_s19 + $0x10] ss:$0 sm:$0xff]  ;;  %v207_v18 = vld [vmem:[%s1200_s16 + $0x42] sm:$0x3]  ;;  %905 = vst.msk [vmem:[%s1210_s22 + $0x34] sm:$0x3] %vm878_vm0, %v776_v7 }
  0x28   : > { %906 = vst.msk [vmem:[%s1210_s22 + $0x36] sm:$0x3] %vm878_vm0, %v777_v8  ;;  %907 = vst.msk [vmem:[%s1210_s22 + $0x38] sm:$0x3] %vm878_vm0, %v778_v9  ;;  %v782_v19 = vadd.f32 %v1106_v17, %v206_v16  ;;  %v1107_v20 = vld [vmem:[%s1205_s19 + $0x11] ss:$0 sm:$0xff] }
  0x29   : > { %v208_v21 = vld [vmem:[%s1200_s16 + $0x44] sm:$0x3]  ;;  %v1108_v22 = vld [vmem:[%s1205_s19 + $0x12] ss:$0 sm:$0xff]  ;;  %908 = vst.msk [vmem:[%s1210_s22 + $0x3a] sm:$0x3] %vm878_vm0, %v779_v13  ;;  %v783_v23 = vadd.f32 %v1107_v20, %v207_v18 }
  0x2a   : > { %909 = vst.msk [vmem:[%s1210_s22 + $0x3c] sm:$0x3] %vm878_vm0, %v780_v14  ;;  %910 = vst.msk [vmem:[%s1210_s22 + $0x3e] sm:$0x3] %vm878_vm0, %v781_v15  ;;  %v784_v24 = vadd.f32 %v1108_v22, %v208_v21  ;;  %v209_v25 = vld [vmem:[%s1200_s16 + $0x46] sm:$0x3] }
  0x2b   : > { %v1109_v26 = vld [vmem:[%s1205_s19 + $0x13] ss:$0 sm:$0xff]  ;;  %v210_v27 = vld [vmem:[%s1200_s16 + $0x48] sm:$0x3]  ;;  %911 = vst.msk [vmem:[%s1210_s22 + $0x40] sm:$0x3] %vm878_vm0, %v782_v19 }
  0x2c   : > { %v785_v28 = vadd.f32 %v1109_v26, %v209_v25  ;;  %v1110_v29 = vld [vmem:[%s1205_s19 + $0x14] ss:$0 sm:$0xff]  ;;  %v211_v30 = vld [vmem:[%s1200_s16 + $0x4a] sm:$0x3]  ;;  %v1111_v31 = vld [vmem:[%s1205_s19 + $0x15] ss:$0 sm:$0xff] }
  0x2d   : > { %912 = vst.msk [vmem:[%s1210_s22 + $0x42] sm:$0x3] %vm878_vm0, %v783_v23  ;;  %913 = vst.msk [vmem:[%s1210_s22 + $0x44] sm:$0x3] %vm878_vm0, %v784_v24  ;;  %v786_v32 = vadd.f32 %v1110_v29, %v210_v27  ;;  %v787_v33 = vadd.f32 %v1111_v31, %v211_v30  ;;  %v212_v34 = vld [vmem:[%s1200_s16 + $0x4c] sm:$0x3] }
  0x2e   : > { %v1112_v35 = vld [vmem:[%s1205_s19 + $0x16] ss:$0 sm:$0xff]  ;;  %v213_v36 = vld [vmem:[%s1200_s16 + $0x4e] sm:$0x3]  ;;  %914 = vst.msk [vmem:[%s1210_s22 + $0x46] sm:$0x3] %vm878_vm0, %v785_v28 }
  0x2f   : > { %v788_v37 = vadd.f32 %v1112_v35, %v212_v34  ;;  %v1113_v38 = vld [vmem:[%s1205_s19 + $0x17] ss:$0 sm:$0xff]  ;;  %v214_v39 = vld [vmem:[%s1200_s16 + $0x50] sm:$0x3]  ;;  %v215_v40 = vld [vmem:[%s1200_s16 + $0x52] sm:$0x3] }
  0x30   : > { %915 = vst.msk [vmem:[%s1210_s22 + $0x48] sm:$0x3] %vm878_vm0, %v786_v32  ;;  %916 = vst.msk [vmem:[%s1210_s22 + $0x4a] sm:$0x3] %vm878_vm0, %v787_v33  ;;  %v789_v41 = vadd.f32 %v1113_v38, %v213_v36  ;;  %v790_v42 = vadd.f32 %v1106_v17, %v214_v39  ;;  %v791_v43 = vadd.f32 %v1107_v20, %v215_v40  ;;  %v216_v44 = vld [vmem:[%s1200_s16 + $0x54] sm:$0x3] }
  0x31   : > { %v217_v45 = vld [vmem:[%s1200_s16 + $0x56] sm:$0x3]  ;;  %v218_v46 = vld [vmem:[%s1200_s16 + $0x58] sm:$0x3]  ;;  %917 = vst.msk [vmem:[%s1210_s22 + $0x4c] sm:$0x3] %vm878_vm0, %v788_v37  ;;  %v792_v47 = vadd.f32 %v1108_v22, %v216_v44 }
  0x32   : > { %v793_v48 = vadd.f32 %v1109_v26, %v217_v45  ;;  %v794_v49 = vadd.f32 %v1110_v29, %v218_v46  ;;  %v219_v50 = vld [vmem:[%s1200_s16 + $0x5a] sm:$0x3]  ;;  %v220_v51 = vld [vmem:[%s1200_s16 + $0x5c] sm:$0x3]  ;;  %v221_v52 = vld [vmem:[%s1200_s16 + $0x5e] sm:$0x3] }
  0x33   : > { %918 = vst.msk [vmem:[%s1210_s22 + $0x4e] sm:$0x3] %vm878_vm0, %v789_v41  ;;  %919 = vst.msk [vmem:[%s1210_s22 + $0x50] sm:$0x3] %vm878_vm0, %v790_v42  ;;  %v795_v53 = vadd.f32 %v1111_v31, %v219_v50  ;;  %v796_v54 = vadd.f32 %v1112_v35, %v220_v51  ;;  %v797_v55 = vadd.f32 %v1113_v38, %v221_v52  ;;  %v222_v56 = vld [vmem:[%s1200_s16 + $0x60] sm:$0x3] }
  0x34   : > { %920 = vst.msk [vmem:[%s1210_s22 + $0x52] sm:$0x3] %vm878_vm0, %v791_v43  ;;  %v1114_v57 = vld [vmem:[%s1205_s19 + $0x18] ss:$0 sm:$0xff]  ;;  %v223_v58 = vld [vmem:[%s1200_s16 + $0x62] sm:$0x3] }
  0x35   : > { %921 = vst.msk [vmem:[%s1210_s22 + $0x54] sm:$0x3] %vm878_vm0, %v792_v47  ;;  %922 = vst.msk [vmem:[%s1210_s22 + $0x56] sm:$0x3] %vm878_vm0, %v793_v48  ;;  %v798_v59 = vadd.f32 %v1114_v57, %v222_v56  ;;  %v1115_v60 = vld [vmem:[%s1205_s19 + $0x19] ss:$0 sm:$0xff] }
  0x36   : > { %923 = vst.msk [vmem:[%s1210_s22 + $0x58] sm:$0x3] %vm878_vm0, %v794_v49  ;;  %v224_v61 = vld [vmem:[%s1200_s16 + $0x64] sm:$0x3]  ;;  %v1116_v62 = vld [vmem:[%s1205_s19 + $0x1a] ss:$0 sm:$0xff]  ;;  %v799_v63 = vadd.f32 %v1115_v60, %v223_v58 }
  0x37   : > { %924 = vst.msk [vmem:[%s1210_s22 + $0x5a] sm:$0x3] %vm878_vm0, %v795_v53  ;;  %925 = vst.msk [vmem:[%s1210_s22 + $0x5c] sm:$0x3] %vm878_vm0, %v796_v54  ;;  %v800_v0 = vadd.f32 %v1116_v62, %v224_v61  ;;  %v225_v1 = vld [vmem:[%s1200_s16 + $0x66] sm:$0x3] }
  0x38   : > { %926 = vst.msk [vmem:[%s1210_s22 + $0x5e] sm:$0x3] %vm878_vm0, %v797_v55  ;;  %v1117_v2 = vld [vmem:[%s1205_s19 + $0x1b] ss:$0 sm:$0xff]  ;;  %v226_v3 = vld [vmem:[%s1200_s16 + $0x68] sm:$0x3] }
  0x39   : > { %927 = vst.msk [vmem:[%s1210_s22 + $0x60] sm:$0x3] %vm878_vm0, %v798_v59  ;;  %v801_v4 = vadd.f32 %v1117_v2, %v225_v1  ;;  %v1118_v5 = vld [vmem:[%s1205_s19 + $0x1c] ss:$0 sm:$0xff]  ;;  %v227_v6 = vld [vmem:[%s1200_s16 + $0x6a] sm:$0x3] }
  0x3a   : > { %v1119_v7 = vld [vmem:[%s1205_s19 + $0x1d] ss:$0 sm:$0xff]  ;;  %928 = vst.msk [vmem:[%s1210_s22 + $0x62] sm:$0x3] %vm878_vm0, %v799_v63  ;;  %929 = vst.msk [vmem:[%s1210_s22 + $0x64] sm:$0x3] %vm878_vm0, %v800_v0  ;;  %v802_v8 = vadd.f32 %v1118_v5, %v226_v3 }
  0x3b   : > { %v803_v9 = vadd.f32 %v1119_v7, %v227_v6  ;;  %v228_v10 = vld [vmem:[%s1200_s16 + $0x6c] sm:$0x3]  ;;  %v1120_v11 = vld [vmem:[%s1205_s19 + $0x1e] ss:$0 sm:$0xff]  ;;  %v229_v12 = vld [vmem:[%s1200_s16 + $0x6e] sm:$0x3] }
  0x3c   : > { %930 = vst.msk [vmem:[%s1210_s22 + $0x66] sm:$0x3] %vm878_vm0, %v801_v4  ;;  %v804_v13 = vadd.f32 %v1120_v11, %v228_v10  ;;  %v1121_v14 = vld [vmem:[%s1205_s19 + $0x1f] ss:$0 sm:$0xff]  ;;  %v230_v15 = vld [vmem:[%s1200_s16 + $0x70] sm:$0x3] }
  0x3d   : > { %v231_v16 = vld [vmem:[%s1200_s16 + $0x72] sm:$0x3]  ;;  %931 = vst.msk [vmem:[%s1210_s22 + $0x68] sm:$0x3] %vm878_vm0, %v802_v8  ;;  %932 = vst.msk [vmem:[%s1210_s22 + $0x6a] sm:$0x3] %vm878_vm0, %v803_v9  ;;  %v805_v17 = vadd.f32 %v1121_v14, %v229_v12  ;;  %v806_v18 = vadd.f32 %v1114_v57, %v230_v15 }
  0x3e   : > { %v807_v19 = vadd.f32 %v1115_v60, %v231_v16  ;;  %v232_v20 = vld [vmem:[%s1200_s16 + $0x74] sm:$0x3]  ;;  %v233_v21 = vld [vmem:[%s1200_s16 + $0x76] sm:$0x3]  ;;  %v234_v22 = vld [vmem:[%s1200_s16 + $0x78] sm:$0x3] }
  0x3f   : > { %933 = vst.msk [vmem:[%s1210_s22 + $0x6c] sm:$0x3] %vm878_vm0, %v804_v13  ;;  %v808_v23 = vadd.f32 %v1116_v62, %v232_v20  ;;  %v809_v24 = vadd.f32 %v1117_v2, %v233_v21  ;;  %v810_v25 = vadd.f32 %v1118_v5, %v234_v22  ;;  %v235_v26 = vld [vmem:[%s1200_s16 + $0x7a] sm:$0x3]  ;;  %v236_v27 = vld [vmem:[%s1200_s16 + $0x7c] sm:$0x3] }
  0x40   : > { %v237_v28 = vld [vmem:[%s1200_s16 + $0x7e] sm:$0x3]  ;;  %934 = vst.msk [vmem:[%s1210_s22 + $0x6e] sm:$0x3] %vm878_vm0, %v805_v17  ;;  %935 = vst.msk [vmem:[%s1210_s22 + $0x70] sm:$0x3] %vm878_vm0, %v806_v18  ;;  %v811_v29 = vadd.f32 %v1119_v7, %v235_v26  ;;  %v812_v30 = vadd.f32 %v1120_v11, %v236_v27 }
  0x41   : > { %936 = vst.msk [vmem:[%s1210_s22 + $0x72] sm:$0x3] %vm878_vm0, %v807_v19  ;;  %v813_v31 = vadd.f32 %v1121_v14, %v237_v28  ;;  %v238_v32 = vld [vmem:[%s1200_s16 + $0x80] sm:$0x3]  ;;  %v239_v34 = vld [vmem:[%s1200_s16 + $0x82] sm:$0x3] }
  0x42   : > { %v1122_v33 = vld [vmem:[%s1205_s19 + $0x20] ss:$0 sm:$0xff]  ;;  %937 = vst.msk [vmem:[%s1210_s22 + $0x74] sm:$0x3] %vm878_vm0, %v808_v23  ;;  %938 = vst.msk [vmem:[%s1210_s22 + $0x76] sm:$0x3] %vm878_vm0, %v809_v24 }
  0x43   : > { %939 = vst.msk [vmem:[%s1210_s22 + $0x78] sm:$0x3] %vm878_vm0, %v810_v25  ;;  %v814_v35 = vadd.f32 %v1122_v33, %v238_v32  ;;  %v1123_v36 = vld [vmem:[%s1205_s19 + $0x21] ss:$0 sm:$0xff]  ;;  %v240_v37 = vld [vmem:[%s1200_s16 + $0x84] sm:$0x3] }
  0x44   : > { %v1124_v38 = vld [vmem:[%s1205_s19 + $0x22] ss:$0 sm:$0xff]  ;;  %940 = vst.msk [vmem:[%s1210_s22 + $0x7a] sm:$0x3] %vm878_vm0, %v811_v29  ;;  %941 = vst.msk [vmem:[%s1210_s22 + $0x7c] sm:$0x3] %vm878_vm0, %v812_v30  ;;  %v815_v39 = vadd.f32 %v1123_v36, %v239_v34 }
  0x45   : > { %942 = vst.msk [vmem:[%s1210_s22 + $0x7e] sm:$0x3] %vm878_vm0, %v813_v31  ;;  %v816_v40 = vadd.f32 %v1124_v38, %v240_v37  ;;  %v241_v41 = vld [vmem:[%s1200_s16 + $0x86] sm:$0x3]  ;;  %v1125_v42 = vld [vmem:[%s1205_s19 + $0x23] ss:$0 sm:$0xff] }
  0x46   : > { %v242_v43 = vld [vmem:[%s1200_s16 + $0x88] sm:$0x3]  ;;  %943 = vst.msk [vmem:[%s1210_s22 + $0x80] sm:$0x3] %vm878_vm0, %v814_v35  ;;  %v817_v44 = vadd.f32 %v1125_v42, %v241_v41  ;;  %v1126_v45 = vld [vmem:[%s1205_s19 + $0x24] ss:$0 sm:$0xff] }
  0x47   : > { %v243_v46 = vld [vmem:[%s1200_s16 + $0x8a] sm:$0x3]  ;;  %v1127_v47 = vld [vmem:[%s1205_s19 + $0x25] ss:$0 sm:$0xff]  ;;  %944 = vst.msk [vmem:[%s1210_s22 + $0x82] sm:$0x3] %vm878_vm0, %v815_v39  ;;  %v818_v48 = vadd.f32 %v1126_v45, %v242_v43 }
  0x48   : > { %945 = vst.msk [vmem:[%s1210_s22 + $0x84] sm:$0x3] %vm878_vm0, %v816_v40  ;;  %v819_v49 = vadd.f32 %v1127_v47, %v243_v46  ;;  %v244_v50 = vld [vmem:[%s1200_s16 + $0x8c] sm:$0x3]  ;;  %v1128_v51 = vld [vmem:[%s1205_s19 + $0x26] ss:$0 sm:$0xff] }
  0x49   : > { %v245_v52 = vld [vmem:[%s1200_s16 + $0x8e] sm:$0x3]  ;;  %946 = vst.msk [vmem:[%s1210_s22 + $0x86] sm:$0x3] %vm878_vm0, %v817_v44  ;;  %v820_v53 = vadd.f32 %v1128_v51, %v244_v50  ;;  %v1129_v54 = vld [vmem:[%s1205_s19 + $0x27] ss:$0 sm:$0xff] }
  0x4a   : > { %v246_v55 = vld [vmem:[%s1200_s16 + $0x90] sm:$0x3]  ;;  %v247_v56 = vld [vmem:[%s1200_s16 + $0x92] sm:$0x3]  ;;  %947 = vst.msk [vmem:[%s1210_s22 + $0x88] sm:$0x3] %vm878_vm0, %v818_v48  ;;  %v821_v57 = vadd.f32 %v1129_v54, %v245_v52 }
  0x4b   : > { %948 = vst.msk [vmem:[%s1210_s22 + $0x8a] sm:$0x3] %vm878_vm0, %v819_v49  ;;  %v822_v58 = vadd.f32 %v1122_v33, %v246_v55  ;;  %v823_v59 = vadd.f32 %v1123_v36, %v247_v56  ;;  %v248_v60 = vld [vmem:[%s1200_s16 + $0x94] sm:$0x3]  ;;  %v249_v61 = vld [vmem:[%s1200_s16 + $0x96] sm:$0x3] }
  0x4c   : > { %v250_v62 = vld [vmem:[%s1200_s16 + $0x98] sm:$0x3]  ;;  %949 = vst.msk [vmem:[%s1210_s22 + $0x8c] sm:$0x3] %vm878_vm0, %v820_v53  ;;  %v824_v63 = vadd.f32 %v1124_v38, %v248_v60  ;;  %v825_v0 = vadd.f32 %v1125_v42, %v249_v61  ;;  %v251_v2 = vld [vmem:[%s1200_s16 + $0x9a] sm:$0x3] }
  0x4d   : > { %v826_v1 = vadd.f32 %v1126_v45, %v250_v62  ;;  %v252_v3 = vld [vmem:[%s1200_s16 + $0x9c] sm:$0x3]  ;;  %v253_v4 = vld [vmem:[%s1200_s16 + $0x9e] sm:$0x3]  ;;  %950 = vst.msk [vmem:[%s1210_s22 + $0x8e] sm:$0x3] %vm878_vm0, %v821_v57  ;;  %v827_v5 = vadd.f32 %v1127_v47, %v251_v2 }
  0x4e   : > { %951 = vst.msk [vmem:[%s1210_s22 + $0x90] sm:$0x3] %vm878_vm0, %v822_v58  ;;  %952 = vst.msk [vmem:[%s1210_s22 + $0x92] sm:$0x3] %vm878_vm0, %v823_v59  ;;  %v828_v6 = vadd.f32 %v1128_v51, %v252_v3  ;;  %v829_v7 = vadd.f32 %v1129_v54, %v253_v4  ;;  %v254_v8 = vld [vmem:[%s1200_s16 + $0xa0] sm:$0x3] }
  0x4f   : > { %v1130_v9 = vld [vmem:[%s1205_s19 + $0x28] ss:$0 sm:$0xff]  ;;  %v255_v10 = vld [vmem:[%s1200_s16 + $0xa2] sm:$0x3]  ;;  %953 = vst.msk [vmem:[%s1210_s22 + $0x94] sm:$0x3] %vm878_vm0, %v824_v63 }
  0x50   : > { %954 = vst.msk [vmem:[%s1210_s22 + $0x96] sm:$0x3] %vm878_vm0, %v825_v0  ;;  %955 = vst.msk [vmem:[%s1210_s22 + $0x98] sm:$0x3] %vm878_vm0, %v826_v1  ;;  %v830_v11 = vadd.f32 %v1130_v9, %v254_v8  ;;  %v1131_v12 = vld [vmem:[%s1205_s19 + $0x29] ss:$0 sm:$0xff] }
  0x51   : > { %v256_v13 = vld [vmem:[%s1200_s16 + $0xa4] sm:$0x3]  ;;  %v1132_v14 = vld [vmem:[%s1205_s19 + $0x2a] ss:$0 sm:$0xff]  ;;  %956 = vst.msk [vmem:[%s1210_s22 + $0x9a] sm:$0x3] %vm878_vm0, %v827_v5  ;;  %v831_v15 = vadd.f32 %v1131_v12, %v255_v10 }
  0x52   : > { %957 = vst.msk [vmem:[%s1210_s22 + $0x9c] sm:$0x3] %vm878_vm0, %v828_v6  ;;  %958 = vst.msk [vmem:[%s1210_s22 + $0x9e] sm:$0x3] %vm878_vm0, %v829_v7  ;;  %v832_v16 = vadd.f32 %v1132_v14, %v256_v13  ;;  %v257_v17 = vld [vmem:[%s1200_s16 + $0xa6] sm:$0x3] }
  0x53   : > { %v1133_v18 = vld [vmem:[%s1205_s19 + $0x2b] ss:$0 sm:$0xff]  ;;  %v258_v19 = vld [vmem:[%s1200_s16 + $0xa8] sm:$0x3]  ;;  %959 = vst.msk [vmem:[%s1210_s22 + $0xa0] sm:$0x3] %vm878_vm0, %v830_v11 }
  0x54   : > { %v833_v20 = vadd.f32 %v1133_v18, %v257_v17  ;;  %v1134_v21 = vld [vmem:[%s1205_s19 + $0x2c] ss:$0 sm:$0xff]  ;;  %v259_v22 = vld [vmem:[%s1200_s16 + $0xaa] sm:$0x3]  ;;  %v1135_v23 = vld [vmem:[%s1205_s19 + $0x2d] ss:$0 sm:$0xff] }
  0x55   : > { %960 = vst.msk [vmem:[%s1210_s22 + $0xa2] sm:$0x3] %vm878_vm0, %v831_v15  ;;  %961 = vst.msk [vmem:[%s1210_s22 + $0xa4] sm:$0x3] %vm878_vm0, %v832_v16  ;;  %v834_v24 = vadd.f32 %v1134_v21, %v258_v19  ;;  %v835_v25 = vadd.f32 %v1135_v23, %v259_v22  ;;  %v260_v26 = vld [vmem:[%s1200_s16 + $0xac] sm:$0x3] }
  0x56   : > { %v1136_v27 = vld [vmem:[%s1205_s19 + $0x2e] ss:$0 sm:$0xff]  ;;  %962 = vst.msk [vmem:[%s1210_s22 + $0xa6] sm:$0x3] %vm878_vm0, %v833_v20  ;;  %v1137_v30 = vld [vmem:[%s1205_s19 + $0x2f] ss:$0 sm:$0xff] }
  0x57   : > { %v261_v28 = vld [vmem:[%s1200_s16 + $0xae] sm:$0x3]  ;;  %v836_v29 = vadd.f32 %v1136_v27, %v260_v26  ;;  %v262_v31 = vld [vmem:[%s1200_s16 + $0xb0] sm:$0x3]  ;;  %v263_v32 = vld [vmem:[%s1200_s16 + $0xb2] sm:$0x3] }
  0x58   : > { %963 = vst.msk [vmem:[%s1210_s22 + $0xa8] sm:$0x3] %vm878_vm0, %v834_v24  ;;  %964 = vst.msk [vmem:[%s1210_s22 + $0xaa] sm:$0x3] %vm878_vm0, %v835_v25  ;;  %v837_v33 = vadd.f32 %v1137_v30, %v261_v28  ;;  %v838_v34 = vadd.f32 %v1130_v9, %v262_v31  ;;  %v839_v35 = vadd.f32 %v1131_v12, %v263_v32  ;;  %v264_v36 = vld [vmem:[%s1200_s16 + $0xb4] sm:$0x3] }
  0x59   : > { %v265_v37 = vld [vmem:[%s1200_s16 + $0xb6] sm:$0x3]  ;;  %v266_v38 = vld [vmem:[%s1200_s16 + $0xb8] sm:$0x3]  ;;  %965 = vst.msk [vmem:[%s1210_s22 + $0xac] sm:$0x3] %vm878_vm0, %v836_v29  ;;  %v840_v39 = vadd.f32 %v1132_v14, %v264_v36 }
  0x5a   : > { %v841_v40 = vadd.f32 %v1133_v18, %v265_v37  ;;  %v842_v41 = vadd.f32 %v1134_v21, %v266_v38  ;;  %v267_v42 = vld [vmem:[%s1200_s16 + $0xba] sm:$0x3]  ;;  %v268_v43 = vld [vmem:[%s1200_s16 + $0xbc] sm:$0x3]  ;;  %v269_v44 = vld [vmem:[%s1200_s16 + $0xbe] sm:$0x3] }
  0x5b   : > { %966 = vst.msk [vmem:[%s1210_s22 + $0xae] sm:$0x3] %vm878_vm0, %v837_v33  ;;  %967 = vst.msk [vmem:[%s1210_s22 + $0xb0] sm:$0x3] %vm878_vm0, %v838_v34  ;;  %v843_v45 = vadd.f32 %v1135_v23, %v267_v42  ;;  %v844_v46 = vadd.f32 %v1136_v27, %v268_v43  ;;  %v845_v47 = vadd.f32 %v1137_v30, %v269_v44  ;;  %v270_v48 = vld [vmem:[%s1200_s16 + $0xc0] sm:$0x3] }
  0x5c   : > { %968 = vst.msk [vmem:[%s1210_s22 + $0xb2] sm:$0x3] %vm878_vm0, %v839_v35  ;;  %v1138_v49 = vld [vmem:[%s1205_s19 + $0x30] ss:$0 sm:$0xff]  ;;  %v271_v50 = vld [vmem:[%s1200_s16 + $0xc2] sm:$0x3] }
  0x5d   : > { %969 = vst.msk [vmem:[%s1210_s22 + $0xb4] sm:$0x3] %vm878_vm0, %v840_v39  ;;  %970 = vst.msk [vmem:[%s1210_s22 + $0xb6] sm:$0x3] %vm878_vm0, %v841_v40  ;;  %v846_v51 = vadd.f32 %v1138_v49, %v270_v48  ;;  %v1139_v52 = vld [vmem:[%s1205_s19 + $0x31] ss:$0 sm:$0xff] }
  0x5e   : > { %971 = vst.msk [vmem:[%s1210_s22 + $0xb8] sm:$0x3] %vm878_vm0, %v842_v41  ;;  %v272_v53 = vld [vmem:[%s1200_s16 + $0xc4] sm:$0x3]  ;;  %v1140_v54 = vld [vmem:[%s1205_s19 + $0x32] ss:$0 sm:$0xff]  ;;  %v847_v55 = vadd.f32 %v1139_v52, %v271_v50 }
  0x5f   : > { %972 = vst.msk [vmem:[%s1210_s22 + $0xba] sm:$0x3] %vm878_vm0, %v843_v45  ;;  %973 = vst.msk [vmem:[%s1210_s22 + $0xbc] sm:$0x3] %vm878_vm0, %v844_v46  ;;  %v848_v56 = vadd.f32 %v1140_v54, %v272_v53  ;;  %v273_v57 = vld [vmem:[%s1200_s16 + $0xc6] sm:$0x3] }
  0x60   : > { %974 = vst.msk [vmem:[%s1210_s22 + $0xbe] sm:$0x3] %vm878_vm0, %v845_v47  ;;  %v1141_v58 = vld [vmem:[%s1205_s19 + $0x33] ss:$0 sm:$0xff]  ;;  %v274_v59 = vld [vmem:[%s1200_s16 + $0xc8] sm:$0x3] }
  0x61   : > { %975 = vst.msk [vmem:[%s1210_s22 + $0xc0] sm:$0x3] %vm878_vm0, %v846_v51  ;;  %v849_v60 = vadd.f32 %v1141_v58, %v273_v57  ;;  %v1142_v61 = vld [vmem:[%s1205_s19 + $0x34] ss:$0 sm:$0xff]  ;;  %v275_v62 = vld [vmem:[%s1200_s16 + $0xca] sm:$0x3] }
  0x62   : > { %v1143_v63 = vld [vmem:[%s1205_s19 + $0x35] ss:$0 sm:$0xff]  ;;  %976 = vst.msk [vmem:[%s1210_s22 + $0xc2] sm:$0x3] %vm878_vm0, %v847_v55  ;;  %977 = vst.msk [vmem:[%s1210_s22 + $0xc4] sm:$0x3] %vm878_vm0, %v848_v56  ;;  %v850_v0 = vadd.f32 %v1142_v61, %v274_v59 }
  0x63   : > { %v851_v1 = vadd.f32 %v1143_v63, %v275_v62  ;;  %v276_v2 = vld [vmem:[%s1200_s16 + $0xcc] sm:$0x3]  ;;  %v1144_v3 = vld [vmem:[%s1205_s19 + $0x36] ss:$0 sm:$0xff]  ;;  %v277_v4 = vld [vmem:[%s1200_s16 + $0xce] sm:$0x3] }
  0x64   : > { %978 = vst.msk [vmem:[%s1210_s22 + $0xc6] sm:$0x3] %vm878_vm0, %v849_v60  ;;  %v852_v5 = vadd.f32 %v1144_v3, %v276_v2  ;;  %v1145_v6 = vld [vmem:[%s1205_s19 + $0x37] ss:$0 sm:$0xff]  ;;  %v278_v7 = vld [vmem:[%s1200_s16 + $0xd0] sm:$0x3] }
  0x65   : > { %v279_v8 = vld [vmem:[%s1200_s16 + $0xd2] sm:$0x3]  ;;  %979 = vst.msk [vmem:[%s1210_s22 + $0xc8] sm:$0x3] %vm878_vm0, %v850_v0  ;;  %980 = vst.msk [vmem:[%s1210_s22 + $0xca] sm:$0x3] %vm878_vm0, %v851_v1  ;;  %v853_v9 = vadd.f32 %v1145_v6, %v277_v4  ;;  %v854_v10 = vadd.f32 %v1138_v49, %v278_v7 }
  0x66   : > { %v855_v11 = vadd.f32 %v1139_v52, %v279_v8  ;;  %v280_v12 = vld [vmem:[%s1200_s16 + $0xd4] sm:$0x3]  ;;  %v281_v13 = vld [vmem:[%s1200_s16 + $0xd6] sm:$0x3]  ;;  %v282_v14 = vld [vmem:[%s1200_s16 + $0xd8] sm:$0x3] }
  0x67   : > { %981 = vst.msk [vmem:[%s1210_s22 + $0xcc] sm:$0x3] %vm878_vm0, %v852_v5  ;;  %v856_v15 = vadd.f32 %v1140_v54, %v280_v12  ;;  %v857_v16 = vadd.f32 %v1141_v58, %v281_v13  ;;  %v858_v17 = vadd.f32 %v1142_v61, %v282_v14  ;;  %v283_v18 = vld [vmem:[%s1200_s16 + $0xda] sm:$0x3]  ;;  %v284_v19 = vld [vmem:[%s1200_s16 + $0xdc] sm:$0x3] }
  0x68   : > { %v285_v20 = vld [vmem:[%s1200_s16 + $0xde] sm:$0x3]  ;;  %982 = vst.msk [vmem:[%s1210_s22 + $0xce] sm:$0x3] %vm878_vm0, %v853_v9  ;;  %983 = vst.msk [vmem:[%s1210_s22 + $0xd0] sm:$0x3] %vm878_vm0, %v854_v10  ;;  %v859_v21 = vadd.f32 %v1143_v63, %v283_v18  ;;  %v860_v22 = vadd.f32 %v1144_v3, %v284_v19 }
  0x69   : > { %984 = vst.msk [vmem:[%s1210_s22 + $0xd2] sm:$0x3] %vm878_vm0, %v855_v11  ;;  %v861_v23 = vadd.f32 %v1145_v6, %v285_v20  ;;  %v286_v24 = vld [vmem:[%s1200_s16 + $0xe0] sm:$0x3]  ;;  %v1146_v25 = vld [vmem:[%s1205_s19 + $0x38] ss:$0 sm:$0xff] }
  0x6a   : > { %v287_v26 = vld [vmem:[%s1200_s16 + $0xe2] sm:$0x3]  ;;  %985 = vst.msk [vmem:[%s1210_s22 + $0xd4] sm:$0x3] %vm878_vm0, %v856_v15  ;;  %986 = vst.msk [vmem:[%s1210_s22 + $0xd6] sm:$0x3] %vm878_vm0, %v857_v16  ;;  %v862_v27 = vadd.f32 %v1146_v25, %v286_v24 }
  0x6b   : > { %987 = vst.msk [vmem:[%s1210_s22 + $0xd8] sm:$0x3] %vm878_vm0, %v858_v17  ;;  %v1147_v28 = vld [vmem:[%s1205_s19 + $0x39] ss:$0 sm:$0xff]  ;;  %v288_v29 = vld [vmem:[%s1200_s16 + $0xe4] sm:$0x3] }
  0x6c   : > { %v1148_v30 = vld [vmem:[%s1205_s19 + $0x3a] ss:$0 sm:$0xff]  ;;  %988 = vst.msk [vmem:[%s1210_s22 + $0xda] sm:$0x3] %vm878_vm0, %v859_v21  ;;  %989 = vst.msk [vmem:[%s1210_s22 + $0xdc] sm:$0x3] %vm878_vm0, %v860_v22  ;;  %v863_v31 = vadd.f32 %v1147_v28, %v287_v26 }
  0x6d   : > { %990 = vst.msk [vmem:[%s1210_s22 + $0xde] sm:$0x3] %vm878_vm0, %v861_v23  ;;  %v864_v32 = vadd.f32 %v1148_v30, %v288_v29  ;;  %v289_v33 = vld [vmem:[%s1200_s16 + $0xe6] sm:$0x3]  ;;  %v1149_v34 = vld [vmem:[%s1205_s19 + $0x3b] ss:$0 sm:$0xff] }
  0x6e   : > { %v290_v35 = vld [vmem:[%s1200_s16 + $0xe8] sm:$0x3]  ;;  %991 = vst.msk [vmem:[%s1210_s22 + $0xe0] sm:$0x3] %vm878_vm0, %v862_v27  ;;  %v865_v36 = vadd.f32 %v1149_v34, %v289_v33  ;;  %v1150_v37 = vld [vmem:[%s1205_s19 + $0x3c] ss:$0 sm:$0xff] }
  0x6f   : > { %v291_v38 = vld [vmem:[%s1200_s16 + $0xea] sm:$0x3]  ;;  %v1151_v39 = vld [vmem:[%s1205_s19 + $0x3d] ss:$0 sm:$0xff]  ;;  %992 = vst.msk [vmem:[%s1210_s22 + $0xe2] sm:$0x3] %vm878_vm0, %v863_v31  ;;  %v866_v40 = vadd.f32 %v1150_v37, %v290_v35 }
  0x70   : > { %993 = vst.msk [vmem:[%s1210_s22 + $0xe4] sm:$0x3] %vm878_vm0, %v864_v32  ;;  %v867_v41 = vadd.f32 %v1151_v39, %v291_v38  ;;  %v292_v42 = vld [vmem:[%s1200_s16 + $0xec] sm:$0x3]  ;;  %v1152_v43 = vld [vmem:[%s1205_s19 + $0x3e] ss:$0 sm:$0xff] }
  0x71   : > { %v293_v44 = vld [vmem:[%s1200_s16 + $0xee] sm:$0x3]  ;;  %994 = vst.msk [vmem:[%s1210_s22 + $0xe6] sm:$0x3] %vm878_vm0, %v865_v36  ;;  %v868_v45 = vadd.f32 %v1152_v43, %v292_v42  ;;  %v1153_v46 = vld [vmem:[%s1205_s19 + $0x3f] ss:$0 sm:$0xff] }
  0x72   : > { %v294_v47 = vld [vmem:[%s1200_s16 + $0xf0] sm:$0x3]  ;;  %v295_v48 = vld [vmem:[%s1200_s16 + $0xf2] sm:$0x3]  ;;  %995 = vst.msk [vmem:[%s1210_s22 + $0xe8] sm:$0x3] %vm878_vm0, %v866_v40  ;;  %v869_v49 = vadd.f32 %v1153_v46, %v293_v44 }
  0x73   : > { %996 = vst.msk [vmem:[%s1210_s22 + $0xea] sm:$0x3] %vm878_vm0, %v867_v41  ;;  %v870_v50 = vadd.f32 %v1146_v25, %v294_v47  ;;  %v871_v51 = vadd.f32 %v1147_v28, %v295_v48  ;;  %v296_v52 = vld [vmem:[%s1200_s16 + $0xf4] sm:$0x3]  ;;  %v297_v53 = vld [vmem:[%s1200_s16 + $0xf6] sm:$0x3] }
  0x74   : > { %v298_v54 = vld [vmem:[%s1200_s16 + $0xf8] sm:$0x3]  ;;  %997 = vst.msk [vmem:[%s1210_s22 + $0xec] sm:$0x3] %vm878_vm0, %v868_v45  ;;  %v872_v55 = vadd.f32 %v1148_v30, %v296_v52  ;;  %v873_v56 = vadd.f32 %v1149_v34, %v297_v53  ;;  %v299_v58 = vld [vmem:[%s1200_s16 + $0xfa] sm:$0x3] }
  0x75   : > { %v874_v57 = vadd.f32 %v1150_v37, %v298_v54  ;;  %v300_v59 = vld [vmem:[%s1200_s16 + $0xfc] sm:$0x3]  ;;  %v301_v60 = vld [vmem:[%s1200_s16 + $0xfe] sm:$0x3]  ;;  %998 = vst.msk [vmem:[%s1210_s22 + $0xee] sm:$0x3] %vm878_vm0, %v869_v49  ;;  %v875_v61 = vadd.f32 %v1151_v39, %v299_v58 }
  0x76   : > { %999 = vst.msk [vmem:[%s1210_s22 + $0xf0] sm:$0x3] %vm878_vm0, %v870_v50  ;;  %1000 = vst.msk [vmem:[%s1210_s22 + $0xf2] sm:$0x3] %vm878_vm0, %v871_v51  ;;  %v876_v62 = vadd.f32 %v1152_v43, %v300_v59  ;;  %v877_v63 = vadd.f32 %v1153_v46, %v301_v60 }
  0x77   : > { %1001 = vst.msk [vmem:[%s1210_s22 + $0xf4] sm:$0x3] %vm878_vm0, %v872_v55  ;;  %1002 = vst.msk [vmem:[%s1210_s22 + $0xf6] sm:$0x3] %vm878_vm0, %v873_v56 }
  0x78   : > { %1003 = vst.msk [vmem:[%s1210_s22 + $0xf8] sm:$0x3] %vm878_vm0, %v874_v57  ;;  %1004 = vst.msk [vmem:[%s1210_s22 + $0xfa] sm:$0x3] %vm878_vm0, %v875_v61 }
  0x79   : > { %1005 = vst.msk [vmem:[%s1210_s22 + $0xfc] sm:$0x3] %vm878_vm0, %v876_v62  ;;  %1006 = vst.msk [vmem:[%s1210_s22 + $0xfe] sm:$0x3] %vm878_vm0, %v877_v63 }
  0x7a PF: > { %s12_s9 = sadd.s32 1, %s1172_s9  }
  0x7b   : > { %p9_p4 = scmp.ge.s32.totalorder %s12_s9, 4  }
  0x7d   :  { %11 = sbr.rel (!%p9_p4) target bundleno = 1 (0x1), region = 61 }

// kernel: _lambda_.13
= control target key start
LH: loop header
LB: loop body
LE: loop exit
PB: predicated region body
PF: predicated region fallthrough
CT: control target
= control target key end

     0   :  { %s829_s21 = smov 0   ;;  %s1078_s0 = inlined_call_operand.vmem [shape: f32[2,9,9,8], index: 0, kind: input, shape index: {}]   ;;  %s1079_s1 = inlined_call_operand.vmem [shape: f32[2,9,8,8], index: 1, kind: input, shape index: {}]   ;;  %s1080_s2 = inlined_call_operand.vmem [shape: f32[2,8,9,8], index: 2, kind: input, shape index: {}]   ;;  %s1081_s3 = inlined_call_operand.vmem [shape: f32[2,8,8,8], index: 3, kind: input, shape index: {}]   ;;  %s1082_s4 = inlined_call_operand.vmem [shape: f32[9,1,1,8], index: 4, kind: input, shape index: {}]   ;;  %s1083_s5 = inlined_call_operand.vmem [shape: f32[1,1,8], index: 5, kind: input, shape index: {}]   ;;  %s1084_s6 = inlined_call_operand.vmem [shape: f32[2,8,8,8], index: 6, kind: output, shape index: {}]  }
   0x1 LB: > { %s716_s22 = sadd.s32 4294967295, %s792_s21   ;;  %p720_p0 = scmp.ge.s32.totalorder %s792_s21, 1  ;;  %s792_s21 = sphi %s829_s21, %s16_s21  }
   0x2   : > { %p242_p1 = scmp.lt.s32.totalorder %s792_s21, 3 }
   0x4   : > { %p243_p2 = pnand %p720_p0, %p242_p1 }
   0x5   : > { %p287_p3 = scmp.lt.s32.totalorder (!%p243_p2), %s716_s22, 1 }
   0x6   : > { %246 = sbr.rel (%p243_p2) target bundleno = 64 (0x40), region = 44 }
   0xb   : > { %s1086_s22 = smov (!%p287_p3, %s716_s22), 1  ;;  %v842_v0 = vld [vmem:[%s1082_s4] ss:$0 sm:$0xff]  ;;  %v849_v1 = vld [vmem:[%s1082_s4 + $0x1] ss:$0 sm:$0xff]  ;;  %vm616_vm0 = vcmask 64512  }
   0xc   : > { %s776_s25 = smul.u32 144, %s1086_s22  ;;  %s773_s26 = sshll.u32 %s1086_s22, 7  ;;  %v854_v2 = vld [vmem:[%s1082_s4 + $0x2] ss:$0 sm:$0xff]  ;;  %v859_v3 = vld [vmem:[%s1082_s4 + $0x3] ss:$0 sm:$0xff] }
   0xd   : > { %v864_v4 = vld [vmem:[%s1082_s4 + $0x5] ss:$0 sm:$0xff]  ;;  %s777_s11 = smul.u32 72, %s1086_s22  ;;  %s870_s14 = scalar_lea.vmem %s1080_s2, %s773_s26  ;;  %v875_v5 = vld [vmem:[%s1082_s4 + $0x4] ss:$0 sm:$0xff] }
   0xe   : > { %v880_v6 = vld [vmem:[%s1082_s4 + $0x6] ss:$0 sm:$0xff]  ;;  %v885_v7 = vld [vmem:[%s1082_s4 + $0x7] ss:$0 sm:$0xff]  ;;  %s890_s26 = scalar_lea.vmem %s1078_s0, %s776_s25  ;;  %s774_s27 = sshll.u32 %s1086_s22, 6  ;;  %v408_v11 = vld [vmem:[%s870_s14 + $0x10] sm:$0xff] }
   0xf   : > { %v407_v8 = vld [vmem:[%s870_s14] sm:$0xff]  ;;  %v898_v10 = vld [vmem:[%s1082_s4 + $0x8] ss:$0 sm:$0xff]  ;;  %s904_s8 = scalar_lea.vmem %s1079_s1, %s777_s11  ;;  %s911_s10 = scalar_lea.vmem %s1081_s3, %s774_s27  ;;  %v740_v14 = vld [vmem:[%s890_s26 + $0x10] sm:$0xff]  ;;  %v424_v26 = vmul.f32 %v859_v3, %v408_v11 }
  0x10   : > { %v471_v9 = vld [vmem:[%s870_s14 + $0x1] sm:$0xff]  ;;  %v423_v17 = vmul.f32 %v859_v3, %v407_v8  ;;  %v328_v21 = vmul.f32 %v740_v14, %v842_v0  ;;  %v760_v24 = vld [vmem:[%s890_s26 + $0x11] sm:$0xff]  ;;  %v520_v30 = vmul.f32 %v880_v6, %v740_v14  ;;  %s1004_s16 = scalar_lea.vmem %s1084_s6, %s774_s27 }
  0x11   : > { %v312_v12 = vld [vmem:[%s890_s26] sm:$0xff]  ;;  %v487_v19 = vmul.f32 %v864_v4, %v471_v9  ;;  %v750_v20 = vld [vmem:[%s904_s8 + $0x8] sm:$0xff]  ;;  %v472_v28 = vld [vmem:[%s870_s14 + $0x11] sm:$0xff]  ;;  %v392_v32 = vmul.f32 %v760_v24, %v854_v2  ;;  %v940_v37 = vmul.f32 %v898_v10, %v760_v24 }
  0x12   : > { %v375_v13 = vld [vmem:[%s890_s26 + $0x1] sm:$0xff]  ;;  %v327_v15 = vmul.f32 %v842_v0, %v312_v12  ;;  %v360_v25 = vmul.f32 %v750_v20, %v849_v1  ;;  %v933_v31 = vmul.f32 %v885_v7, %v750_v20  ;;  %v751_v34 = vld [vmem:[%s904_s8 + $0x10] sm:$0xff]  ;;  %v488_v42 = vmul.f32 %v864_v4, %v472_v28  ;;  %v752_v52 = vld [vmem:[%s904_s8 + $0x18] sm:$0xff] }
  0x13   : > { %v343_v16 = vld [vmem:[%s904_s8] sm:$0xff]  ;;  %v391_v23 = vmul.f32 %v854_v2, %v375_v13  ;;  %v440_v27 = vld [vmem:[%s911_s10 + $0x8] sm:$0xff]  ;;  %v441_v41 = vld [vmem:[%s911_s10 + $0x10] sm:$0xff]  ;;  %v361_v44 = vmul.f32 %v751_v34, %v849_v1  ;;  %v554_v51 = vmul.f32 %v885_v7, %v751_v34  ;;  %v362_v11 = vmul.f32 %v752_v52, %v849_v1 }
  0x14   : > { %v439_v18 = vld [vmem:[%s911_s10] sm:$0xff]  ;;  %v359_v22 = vmul.f32 %v849_v1, %v343_v16  ;;  %v368_v38 = vadd.f32 %v360_v25, %v328_v21  ;;  %v456_v39 = vmul.f32 %v875_v5, %v440_v27  ;;  %v742_v47 = vld [vmem:[%s890_s26 + $0x30] sm:$0xff]  ;;  %v457_v57 = vmul.f32 %v875_v5, %v441_v41  ;;  %v442_v63 = vld [vmem:[%s911_s10 + $0x18] sm:$0xff] }
  0x15   : > { %v455_v29 = vmul.f32 %v875_v5, %v439_v18  ;;  %v741_v33 = vld [vmem:[%s890_s26 + $0x20] sm:$0xff]  ;;  %v762_v53 = vld [vmem:[%s890_s26 + $0x31] sm:$0xff]  ;;  %v330_v61 = vmul.f32 %v742_v47, %v842_v0  ;;  %v522_v9 = vmul.f32 %v880_v6, %v742_v47  ;;  %v458_v25 = vmul.f32 %v875_v5, %v442_v63 }
  0x16   : > { %v761_v35 = vld [vmem:[%s890_s26 + $0x21] sm:$0xff]  ;;  %v367_v36 = vadd.f32 %v359_v22, %v327_v15  ;;  %v329_v43 = vmul.f32 %v741_v33, %v842_v0  ;;  %v400_v49 = vadd.f32 %v392_v32, %v368_v38  ;;  %v521_v50 = vmul.f32 %v880_v6, %v741_v33  ;;  %v410_v62 = vld [vmem:[%s870_s14 + $0x30] sm:$0xff] }
  0x17   : > { %v409_v40 = vld [vmem:[%s870_s14 + $0x20] sm:$0xff]  ;;  %v393_v45 = vmul.f32 %v761_v35, %v854_v2  ;;  %v586_v54 = vmul.f32 %v898_v10, %v761_v35  ;;  %v394_v12 = vmul.f32 %v762_v53, %v854_v2  ;;  %v474_v13 = vld [vmem:[%s870_s14 + $0x31] sm:$0xff]  ;;  %v587_v18 = vmul.f32 %v898_v10, %v762_v53 }
  0x18   : > { %v473_v46 = vld [vmem:[%s870_s14 + $0x21] sm:$0xff]  ;;  %v399_v48 = vadd.f32 %v391_v23, %v367_v36  ;;  %v369_v55 = vadd.f32 %v361_v44, %v329_v43  ;;  %v425_v56 = vmul.f32 %v859_v3, %v409_v40  ;;  %v432_v59 = vadd.f32 %v424_v26, %v400_v49  ;;  %v744_v47 = vld [vmem:[%s890_s26 + $0x50] sm:$0xff] }
  0x19   : > { %v489_v60 = vmul.f32 %v864_v4, %v473_v46  ;;  %v743_v14 = vld [vmem:[%s890_s26 + $0x40] sm:$0xff]  ;;  %v370_v23 = vadd.f32 %v362_v11, %v330_v61  ;;  %v426_v24 = vmul.f32 %v859_v3, %v410_v62  ;;  %v490_v28 = vmul.f32 %v864_v4, %v474_v13  ;;  %v764_v53 = vld [vmem:[%s890_s26 + $0x51] sm:$0xff] }
  0x1a   : > { %v431_v58 = vadd.f32 %v423_v17, %v399_v48  ;;  %v401_v8 = vadd.f32 %v393_v45, %v369_v55  ;;  %v464_v16 = vadd.f32 %v456_v39, %v432_v59  ;;  %v555_v17 = vmul.f32 %v885_v7, %v752_v52  ;;  %v753_v20 = vld [vmem:[%s904_s8 + $0x20] sm:$0xff]  ;;  %v754_v48 = vld [vmem:[%s904_s8 + $0x28] sm:$0xff] }
  0x1b   : > { %v763_v21 = vld [vmem:[%s890_s26 + $0x41] sm:$0xff]  ;;  %v402_v34 = vadd.f32 %v394_v12, %v370_v23  ;;  %v363_v35 = vmul.f32 %v753_v20, %v849_v1  ;;  %v556_v41 = vmul.f32 %v885_v7, %v753_v20  ;;  %v992_v55 = vld [vmem:[%s1083_s5] ss:$0 sm:$0xff]  ;;  %v332_v61 = vmul.f32 %v744_v47, %v842_v0  ;;  %v755_v23 = vld [vmem:[%s904_s8 + $0x30] sm:$0xff] }
  0x1c   : > { %v463_v15 = vadd.f32 %v455_v29, %v431_v58  ;;  %v433_v22 = vadd.f32 %v425_v56, %v401_v8  ;;  %v496_v27 = vadd.f32 %v488_v42, %v464_v16  ;;  %v331_v29 = vmul.f32 %v743_v14, %v842_v0  ;;  %v411_v32 = vld [vmem:[%s870_s14 + $0x40] sm:$0xff] }
  0x1d   : > { %v395_v36 = vmul.f32 %v763_v21, %v854_v2  ;;  %v443_v38 = vld [vmem:[%s911_s10 + $0x20] sm:$0xff]  ;;  %v434_v44 = vadd.f32 %v426_v24, %v402_v34  ;;  %v427_v46 = vmul.f32 %v859_v3, %v411_v32  ;;  %v364_v62 = vmul.f32 %v754_v48, %v849_v1 }
  0x1e   : > { %v495_v26 = vadd.f32 %v487_v19, %v463_v15  ;;  %v465_v33 = vadd.f32 %v457_v57, %v433_v22  ;;  %v529_v40 = vadd.f32 %v521_v50, %v496_v27  ;;  %v523_v19 = vmul.f32 %v880_v6, %v743_v14  ;;  %v475_v42 = vld [vmem:[%s870_s14 + $0x41] sm:$0xff]  ;;  %v476_v15 = vld [vmem:[%s870_s14 + $0x51] sm:$0xff] }
  0x1f   : > { %v371_v45 = vadd.f32 %v363_v35, %v331_v29  ;;  %v459_v50 = vmul.f32 %v875_v5, %v443_v38  ;;  %v466_v57 = vadd.f32 %v458_v25, %v434_v44  ;;  %v491_v59 = vmul.f32 %v864_v4, %v475_v42  ;;  %v745_v22 = vld [vmem:[%s890_s26 + $0x60] sm:$0xff]  ;;  %v746_v42 = vld [vmem:[%s890_s26 + $0x70] sm:$0xff] }
  0x20   : > { %v528_v39 = vadd.f32 %v520_v30, %v495_v26  ;;  %v497_v43 = vadd.f32 %v489_v60, %v465_v33  ;;  %v562_v52 = vadd.f32 %v554_v51, %v529_v40  ;;  %v588_v30 = vmul.f32 %v898_v10, %v763_v21  ;;  %v412_v60 = vld [vmem:[%s870_s14 + $0x50] sm:$0xff]  ;;  %v765_v24 = vld [vmem:[%s890_s26 + $0x61] sm:$0xff] }
  0x21   : > { %v403_v58 = vadd.f32 %v395_v36, %v371_v45  ;;  %v498_v8 = vadd.f32 %v490_v28, %v466_v57  ;;  %v372_v13 = vadd.f32 %v364_v62, %v332_v61  ;;  %v428_v14 = vmul.f32 %v859_v3, %v412_v60  ;;  %v413_v33 = vld [vmem:[%s870_s14 + $0x60] sm:$0xff] }
  0x22   : > { %v561_v49 = vadd.f32 %v933_v31, %v528_v39  ;;  %v530_v56 = vadd.f32 %v522_v9, %v497_v43  ;;  %v594_v51 = vadd.f32 %v586_v54, %v562_v52  ;;  %v444_v54 = vld [vmem:[%s911_s10 + $0x28] sm:$0xff]  ;;  %v524_v21 = vmul.f32 %v880_v6, %v744_v47  ;;  %v445_v39 = vld [vmem:[%s911_s10 + $0x30] sm:$0xff]  ;;  %v756_v43 = vld [vmem:[%s904_s8 + $0x38] sm:$0xff] }
  0x23   : > { %v435_v9 = vadd.f32 %v427_v46, %v403_v58  ;;  %v531_v20 = vadd.f32 %v523_v19, %v498_v8  ;;  %v557_v25 = vmul.f32 %v885_v7, %v754_v48  ;;  %v492_v32 = vmul.f32 %v864_v4, %v476_v15  ;;  %v477_v48 = vld [vmem:[%s870_s14 + $0x61] sm:$0xff] }
  0x24   : > { %v593_v31 = vadd.f32 %v940_v37, %v561_v49  ;;  %v563_v63 = vadd.f32 %v555_v17, %v530_v56  ;;  %v396_v37 = vmul.f32 %v764_v53, %v854_v2  ;;  %v609_v12 = vadd.f32 %v992_v55, %v594_v51  ;;  %v766_v49 = vld [vmem:[%s890_s26 + $0x71] sm:$0xff] }
  0x25   : > { %v467_v17 = vadd.f32 %v459_v50, %v435_v9  ;;  %v564_v28 = vadd.f32 %v556_v41, %v531_v20  ;;  %v333_v35 = vmul.f32 %v745_v22, %v842_v0  ;;  %v365_v36 = vmul.f32 %v755_v23, %v849_v1 }
  0x26   : > { %v608_v11 = vadd.f32 %v992_v55, %v593_v31  ;;  %v595_v16 = vadd.f32 %v587_v18, %v563_v63  ;;  %618 = vst.msk [vmem:[%s1004_s16 + $0x8] sm:$0xff] %vm616_vm0, %v609_v12  ;;  %v404_v26 = vadd.f32 %v396_v37, %v372_v13  ;;  %v460_v18 = vmul.f32 %v875_v5, %v444_v54  ;;  %v446_v63 = vld [vmem:[%s911_s10 + $0x38] sm:$0xff] }
  0x27   : > { %v499_v29 = vadd.f32 %v491_v59, %v467_v17  ;;  %v397_v38 = vmul.f32 %v765_v24, %v854_v2  ;;  %v596_v40 = vadd.f32 %v588_v30, %v564_v28  ;;  %v589_v41 = vmul.f32 %v898_v10, %v764_v53  ;;  %v414_v53 = vld [vmem:[%s870_s14 + $0x70] sm:$0xff] }
  0x28   : > { %617 = vst.msk [vmem:[%s1004_s16] sm:$0xff] %vm616_vm0, %v608_v11  ;;  %v610_v27 = vadd.f32 %v992_v55, %v595_v16  ;;  %v436_v34 = vadd.f32 %v428_v14, %v404_v26  ;;  %v525_v45 = vmul.f32 %v880_v6, %v745_v22  ;;  %v373_v46 = vadd.f32 %v365_v36, %v333_v35  ;;  %v478_v11 = vld [vmem:[%s870_s14 + $0x71] sm:$0xff]  ;;  %v747_v16 = vld [vmem:[%s890_s26 + $0x80] sm:$0xff] }
  0x29   : > { %v532_v19 = vadd.f32 %v524_v21, %v499_v29  ;;  %v429_v47 = vmul.f32 %v859_v3, %v413_v33  ;;  %v611_v52 = vadd.f32 %v992_v55, %v596_v40  ;;  %v558_v30 = vmul.f32 %v885_v7, %v755_v23  ;;  %v757_v23 = vld [vmem:[%s904_s8 + $0x40] sm:$0xff] }
  0x2a   : > { %619 = vst.msk [vmem:[%s1004_s16 + $0x10] sm:$0xff] %vm616_vm0, %v610_v27  ;;  %v468_v44 = vadd.f32 %v460_v18, %v436_v34  ;;  %v461_v56 = vmul.f32 %v875_v5, %v445_v39  ;;  %v405_v58 = vadd.f32 %v397_v38, %v373_v46  ;;  %v334_v59 = vmul.f32 %v746_v42, %v842_v0  ;;  %v767_v18 = vld [vmem:[%s890_s26 + $0x81] sm:$0xff] }
  0x2b   : > { %v565_v50 = vadd.f32 %v557_v25, %v532_v19  ;;  %v366_v60 = vmul.f32 %v756_v43, %v849_v1  ;;  %620 = vst.msk [vmem:[%s1004_s16 + $0x18] sm:$0xff] %vm616_vm0, %v611_v52  ;;  %v590_v51 = vmul.f32 %v898_v10, %v765_v24  ;;  %v493_v61 = vmul.f32 %v864_v4, %v477_v48 }
  0x2c   : > { %v500_v57 = vadd.f32 %v492_v32, %v468_v44  ;;  %v398_v62 = vmul.f32 %v766_v49, %v854_v2  ;;  %v437_v9 = vadd.f32 %v429_v47, %v405_v58  ;;  %v430_v54 = vmul.f32 %v859_v3, %v414_v53 }
  0x2d   : > { %v597_v31 = vadd.f32 %v589_v41, %v565_v50  ;;  %v374_v37 = vadd.f32 %v366_v60, %v334_v59  ;;  %v526_v1 = vmul.f32 %v880_v6, %v746_v42  ;;  %v462_v15 = vmul.f32 %v875_v5, %v446_v63 }
  0x2e   : > { %v533_v8 = vadd.f32 %v525_v45, %v500_v57  ;;  %v469_v13 = vadd.f32 %v461_v56, %v437_v9  ;;  %v559_v2 = vmul.f32 %v885_v7, %v756_v43  ;;  %v494_v21 = vmul.f32 %v864_v4, %v478_v11 }
  0x2f   : > { %v612_v0 = vadd.f32 %v992_v55, %v597_v31  ;;  %v406_v14 = vadd.f32 %v398_v62, %v374_v37  ;;  %v591_v22 = vmul.f32 %v898_v10, %v766_v49  ;;  %v527_v5 = vmul.f32 %v880_v6, %v747_v16 }
  0x30   : > { %v566_v12 = vadd.f32 %v558_v30, %v533_v8  ;;  %v501_v3 = vadd.f32 %v493_v61, %v469_v13  ;;  %v560_v29 = vmul.f32 %v885_v7, %v757_v23  ;;  %v592_v33 = vmul.f32 %v898_v10, %v767_v18 }
  0x31   : > { %621 = vst.msk [vmem:[%s1004_s16 + $0x20] sm:$0xff] %vm616_vm0, %v612_v0  ;;  %v438_v17 = vadd.f32 %v430_v54, %v406_v14 }
  0x32   : > { %v598_v20 = vadd.f32 %v590_v51, %v566_v12  ;;  %v534_v25 = vadd.f32 %v526_v1, %v501_v3 }
  0x33   : > { %v470_v26 = vadd.f32 %v462_v15, %v438_v17 }
  0x34   : > { %v613_v24 = vadd.f32 %v992_v55, %v598_v20  ;;  %v567_v27 = vadd.f32 %v559_v2, %v534_v25 }
  0x35   : > { %v502_v28 = vadd.f32 %v494_v21, %v470_v26 }
  0x36   : > { %622 = vst.msk [vmem:[%s1004_s16 + $0x28] sm:$0xff] %vm616_vm0, %v613_v24  ;;  %v599_v32 = vadd.f32 %v591_v22, %v567_v27 }
  0x37   : > { %v535_v4 = vadd.f32 %v527_v5, %v502_v28 }
  0x38   : > { %v614_v34 = vadd.f32 %v992_v55, %v599_v32 }
  0x39   : > { %v568_v35 = vadd.f32 %v560_v29, %v535_v4 }
  0x3a   : > { %623 = vst.msk [vmem:[%s1004_s16 + $0x30] sm:$0xff] %vm616_vm0, %v614_v34 }
  0x3b   : > { %v600_v36 = vadd.f32 %v592_v33, %v568_v35 }
  0x3d   : > { %v615_v38 = vadd.f32 %v992_v55, %v600_v36 }
  0x3f   : > { %624 = vst.msk [vmem:[%s1004_s16 + $0x38] sm:$0xff] %vm616_vm0, %v615_v38 }
  0x40 PF: > { %s16_s21 = sadd.s32 1, %s792_s21  }
  0x41   : > { %p13_p4 = scmp.ge.s32.totalorder %s16_s21, 4  }
  0x43   :  { %15 = sbr.rel (!%p13_p4) target bundleno = 1 (0x1), region = 93 }

// kernel: _lambda_.14
= control target key start
LH: loop header
LB: loop body
LE: loop exit
PB: predicated region body
PF: predicated region fallthrough
CT: control target
= control target key end

     0   :  { %s873_s18 = smov 0   ;;  %s978_s0 = inlined_call_operand.vmem [shape: f32[2,5,5,8], index: 0, kind: input, shape index: {}]   ;;  %s979_s1 = inlined_call_operand.vmem [shape: f32[2,5,4,8], index: 1, kind: input, shape index: {}]   ;;  %s980_s2 = inlined_call_operand.vmem [shape: f32[2,4,5,8], index: 2, kind: input, shape index: {}]   ;;  %s981_s3 = inlined_call_operand.vmem [shape: f32[2,4,4,8], index: 3, kind: input, shape index: {}]   ;;  %s982_s4 = inlined_call_operand.vmem [shape: f32[8,8], index: 4, kind: input, shape index: {}]   ;;  %s983_s5 = inlined_call_operand.vmem [shape: f32[2,4,4,8], index: 5, kind: output, shape index: {}]  }
   0x1 LB: > { %s756_s19 = sadd.s32 4294967295, %s839_s18   ;;  %p760_p0 = scmp.ge.s32.totalorder %s839_s18, 1  ;;  %s839_s18 = sphi %s873_s18, %s15_s18  }
   0x2   : > { %p217_p1 = scmp.lt.s32.totalorder %s839_s18, 3 }
   0x4   : > { %p218_p2 = pnand %p760_p0, %p217_p1 }
   0x5   : > { %p260_p3 = scmp.lt.s32.totalorder (!%p218_p2), %s756_s19, 1 }
   0x6   : > { %221 = sbr.rel (%p218_p2) target bundleno = 233 (0xe9), region = 40 }
   0xb   : > { %v884_v0 = vld [vmem:[%s982_s4] sm:$0xff]  ;;  %v841_v1 = vmov 0.0   ;;  %s985_s19 = smov (!%p260_p3, %s756_s19), 1  ;;  %vm842_vm0 = vmmov 0   ;;  %vm360_vm1 = vcmask 64512   ;;  %vm435_vm2 = vcmask 60416  }
   0xc   : > { %801 = vmatprep.subr.mxu0 %v841_v1  ;;  %806 = vmatprep.subr.mxu1 %v841_v1  ;;  %s821_s22 = smul.u32 40, %s985_s19  ;;  %s790_s23 = sshll.u32 %s985_s19, 5 }
   0xd   : > { %802 = vmatpush3.msra.mxu0 %v884_v0  ;;  %807 = vmatpush3.msra.mxu1 %v884_v0  ;;  %s822_s24 = smul.u32 20, %s985_s19  ;;  %s791_s28 = sshll.u32 %s985_s19, 4 }
   0xe   : > { %803 = vmatprep.mubr.msk.f32.mxu0 %vm842_vm0, %v841_v1  ;;  %808 = vmatprep.mubr.msk.f32.mxu1 %vm842_vm0, %v841_v1  ;;  %s904_s27 = scalar_lea.vmem %s978_s0, %s821_s22  ;;  %s915_s9 = scalar_lea.vmem %s980_s2, %s790_s23 }
   0xf   : > { %811 = vmatprep.subr.mxu0 %v841_v1  ;;  %816 = vmatprep.subr.mxu1 %v841_v1  ;;  %s910_s6 = scalar_lea.vmem %s979_s1, %s822_s24  ;;  %v285_v2 = vld [vmem:[%s904_s27] sm:$0xf]  ;;  %s925_s12 = scalar_lea.vmem %s981_s3, %s791_s28  ;;  %v286_v6 = vld [vmem:[%s904_s27 + $0x8] sm:$0xf]  ;;  %v287_v15 = vld [vmem:[%s904_s27 + $0x10] sm:$0xf] }
  0x10   : > { %v293_v3 = vld [vmem:[%s910_s6] sm:$0xf]  ;;  %v294_v7 = vld [vmem:[%s910_s6 + $0x4] sm:$0xf]  ;;  %v302_v10 = vld [vmem:[%s904_s27 + $0x9] sm:$0xf]  ;;  %s284_s15 = scalar_lea.vmem %s983_s5, %s791_s28 }
  0x11   : > { %v301_v4 = vld [vmem:[%s904_s27 + $0x1] sm:$0xf]  ;;  %v297_v5 = vadd.f32 %v293_v3, %v285_v2  ;;  %v298_v9 = vadd.f32 %v294_v7, %v286_v6  ;;  %v310_v12 = vld [vmem:[%s915_s9 + $0x8] sm:$0xf]  ;;  %v303_v20 = vld [vmem:[%s904_s27 + $0x11] sm:$0xf] }
  0x12   : > { %v309_v8 = vld [vmem:[%s915_s9] sm:$0xf]  ;;  %v295_v16 = vld [vmem:[%s910_s6 + $0x8] sm:$0xf]  ;;  %v318_v18 = vld [vmem:[%s925_s12 + $0x4] sm:$0xf] }
  0x13   : > { %v305_v11 = vadd.f32 %v301_v4, %v297_v5  ;;  %v317_v13 = vld [vmem:[%s925_s12] sm:$0xf]  ;;  %v306_v14 = vadd.f32 %v302_v10, %v298_v9  ;;  %v299_v19 = vadd.f32 %v295_v16, %v287_v15  ;;  %v311_v23 = vld [vmem:[%s915_s9 + $0x10] sm:$0xf]  ;;  %v326_v25 = vld [vmem:[%s915_s9 + $0x9] sm:$0xf] }
  0x14   : > { %v325_v21 = vld [vmem:[%s915_s9 + $0x1] sm:$0xf]  ;;  %v288_v27 = vld [vmem:[%s904_s27 + $0x18] sm:$0xf]  ;;  %v296_v28 = vld [vmem:[%s910_s6 + $0xc] sm:$0xf] }
  0x15   : > { %v313_v17 = vadd.f32 %v309_v8, %v305_v11  ;;  %v314_v22 = vadd.f32 %v310_v12, %v306_v14  ;;  %v307_v26 = vadd.f32 %v303_v20, %v299_v19  ;;  %v769_v29 = vld [vmem:[%s904_s27 + $0x8] sm:$0xf]  ;;  %v300_v32 = vadd.f32 %v296_v28, %v288_v27  ;;  %v304_v33 = vld [vmem:[%s904_s27 + $0x19] sm:$0xf]  ;;  %v770_v35 = vld [vmem:[%s904_s27 + $0x10] sm:$0xf] }
  0x16   : > { %v319_v31 = vld [vmem:[%s925_s12 + $0x8] sm:$0xf]  ;;  %v312_v37 = vld [vmem:[%s915_s9 + $0x18] sm:$0xf]  ;;  %v773_v38 = vld [vmem:[%s910_s6 + $0x4] sm:$0xf] }
  0x17   : > { %v321_v24 = vadd.f32 %v317_v13, %v313_v17  ;;  %v322_v30 = vadd.f32 %v318_v18, %v314_v22  ;;  %v315_v36 = vadd.f32 %v311_v23, %v307_v26  ;;  %v327_v40 = vld [vmem:[%s915_s9 + $0x11] sm:$0xf]  ;;  %v308_v41 = vadd.f32 %v304_v33, %v300_v32  ;;  %v774_v43 = vld [vmem:[%s910_s6 + $0x8] sm:$0xf]  ;;  %v320_v45 = vld [vmem:[%s925_s12 + $0xc] sm:$0xf] }
  0x18   : > { %v777_v46 = vld [vmem:[%s904_s27 + $0x9] sm:$0xf]  ;;  %v771_v48 = vld [vmem:[%s904_s27 + $0x18] sm:$0xf]  ;;  %v778_v51 = vld [vmem:[%s904_s27 + $0x11] sm:$0xf] }
  0x19   : > { %v329_v34 = vadd.f32 %v325_v21, %v321_v24  ;;  %v330_v39 = vadd.f32 %v326_v25, %v322_v30  ;;  %v323_v44 = vadd.f32 %v319_v31, %v315_v36  ;;  %v316_v49 = vadd.f32 %v312_v37, %v308_v41  ;;  %v328_v53 = vld [vmem:[%s915_s9 + $0x19] sm:$0xf]  ;;  %v775_v55 = vld [vmem:[%s910_s6 + $0xc] sm:$0xf]  ;;  %v772_v59 = vld [vmem:[%s904_s27 + $0x20] sm:$0xf] }
  0x1a   : > { %v779_v61 = vld [vmem:[%s904_s27 + $0x19] sm:$0xf]  ;;  %v776_v2 = vld [vmem:[%s910_s6 + $0x10] sm:$0xf]  ;;  %v780_v5 = vld [vmem:[%s904_s27 + $0x21] sm:$0xf] }
  0x1b   : > { %v338_v42 = vadd.f32 %v769_v29, %v329_v34  ;;  %v339_v47 = vadd.f32 %v770_v35, %v330_v39  ;;  %v331_v52 = vadd.f32 %v327_v40, %v323_v44  ;;  %v324_v56 = vadd.f32 %v320_v45, %v316_v49 }
  0x1d   : > { %v347_v50 = vadd.f32 %v773_v38, %v338_v42  ;;  %v348_v54 = vadd.f32 %v774_v43, %v339_v47  ;;  %v340_v58 = vadd.f32 %v771_v48, %v331_v52  ;;  %v332_v62 = vadd.f32 %v328_v53, %v324_v56 }
  0x1f   : > { %v355_v57 = vadd.f32 %v777_v46, %v347_v50  ;;  %v356_v60 = vadd.f32 %v778_v51, %v348_v54  ;;  %v349_v63 = vadd.f32 %v775_v55, %v340_v58  ;;  %v341_v3 = vadd.f32 %v772_v59, %v332_v62 }
  0x21   : > { %804 = vmatmul.mubr.msk.f32.vlgmr.msra.gmra.mxu0 %vm360_vm1, %v355_v57  ;;  %809 = vmatmul.mubr.msk.f32.vlgmr.msra.gmra.mxu1 %vm360_vm1, %v356_v60  ;;  %v357_v4 = vadd.f32 %v779_v61, %v349_v63  ;;  %v350_v6 = vadd.f32 %v776_v2, %v341_v3 }
  0x22   : > { %812 = vmatpush3.msra.mxu0 %v884_v0  ;;  %817 = vmatpush3.msra.mxu1 %v884_v0 }
  0x23   : > { %813 = vmatprep.mubr.msk.f32.mxu0 %vm842_vm0, %v841_v1  ;;  %818 = vmatprep.mubr.msk.f32.mxu1 %vm842_vm0, %v841_v1  ;;  %v358_v7 = vadd.f32 %v780_v5, %v350_v6 }
  0x25   : > { %814 = vmatmul.mubr.msk.f32.vlgmr.msra.gmra.mxu0 %vm360_vm1, %v357_v4  ;;  %819 = vmatmul.mubr.msk.f32.vlgmr.msra.gmra.mxu1 %vm360_vm1, %v358_v7 }
  0xe1   : > { %v430_v0 = vpop.f32.mrf.mxu0  ;;  %v506_v9 = vpop.f32.mrf.mxu1 }
  0xe2   : > { %v434_v8 = vmax.f32 %v430_v0, 0.0  ;;  %v510_v10 = vmax.f32 %v506_v9, 0.0 }
  0xe3   : > { %v805_v11 = vpop.f32.mrf.mxu0  ;;  %v810_v12 = vpop.f32.mrf.mxu1 }
  0xe4   : > { %436 = vst.msk [vmem:[%s284_s15] sm:$0xf] %vm435_vm2, %v434_v8  ;;  %783 = vst.msk [vmem:[%s284_s15 + $0x4] sm:$0xf] %vm435_vm2, %v510_v10 }
  0xe5   : > { %v582_v1 = vpop.f32.mrf.mxu0  ;;  %v658_v15 = vpop.f32.mrf.mxu1 }
  0xe6   : > { %v586_v13 = vmax.f32 %v582_v1, 0.0  ;;  %v662_v16 = vmax.f32 %v658_v15, 0.0 }
  0xe7   : > { %v815_v14 = vpop.f32.mrf.mxu0  ;;  %v820_v17 = vpop.f32.mrf.mxu1 }
  0xe8   : > { %785 = vst.msk [vmem:[%s284_s15 + $0x8] sm:$0xf] %vm435_vm2, %v586_v13  ;;  %787 = vst.msk [vmem:[%s284_s15 + $0xc] sm:$0xf] %vm435_vm2, %v662_v16 }
  0xe9 PF: > { %s15_s18 = sadd.s32 1, %s839_s18  }
  0xea   : > { %p12_p4 = scmp.ge.s32.totalorder %s15_s18, 4  }
  0xec   :  { %14 = sbr.rel (!%p12_p4) target bundleno = 1 (0x1), region = 84 }

// kernel: _lambda_.15
= control target key start
LH: loop header
LB: loop body
LE: loop exit
PB: predicated region body
PF: predicated region fallthrough
CT: control target
= control target key end

     0   :  { %s654_s12 = smov 0   ;;  %s829_s0 = inlined_call_operand.vmem [shape: f32[8,2,4,2,8], index: 0, kind: input, shape index: {}]   ;;  %s830_s1 = inlined_call_operand.vmem [shape: f32[8,2,4,2,8], index: 1, kind: input, shape index: {}]   ;;  %s831_s2 = inlined_call_operand.vmem [shape: f32[8,1,4,1,8], index: 2, kind: input, shape index: {}]   ;;  %s832_s3 = inlined_call_operand.vmem [shape: f32[8,2,4,2,8], index: 3, kind: output, shape index: {}]  }
   0x1 LB: > { %s581_s13 = sadd.s32 4294967295, %s632_s12   ;;  %p585_p0 = scmp.ge.s32.totalorder %s632_s12, 1  ;;  %s632_s12 = sphi %s654_s12, %s13_s12  }
   0x2   : > { %p162_p1 = scmp.lt.s32.totalorder %s632_s12, 3 }
   0x4   : > { %p163_p2 = pnand %p585_p0, %p162_p1 }
   0x5   : > { %s586_s14 = sshll.u32 (!%p163_p2), %s581_s13, 2 }
   0x6   : > { %166 = sbr.rel (%p163_p2) target bundleno = 55 (0x37), region = 32  ;;  %p200_p3 = scmp.lt.s32.totalorder (!%p163_p2), %s586_s14, 7 }
   0xb   : > { %s834_s14 = smov (!%p200_p3, %s586_s14), 7  ;;  %vm466_vm0 = vcmask 58368  }
   0xc   : > { %s615_s15 = sshll.u32 %s834_s14, 4  ;;  %s593_s16 = sshll.u32 %s834_s14, 2 }
   0xd   : > { %s665_s19 = scalar_lea.vmem %s829_s0, %s615_s15  ;;  %s670_s22 = scalar_lea.vmem %s830_s1, %s615_s15 }
   0xe   : > { %s675_s25 = scalar_lea.vmem %s831_s2, %s593_s16  ;;  %v226_v0 = vld [vmem:[%s665_s19] sm:$0x3]  ;;  %v227_v2 = vld [vmem:[%s665_s19 + $0x2] sm:$0x3]  ;;  %s686_s28 = scalar_lea.vmem %s832_s3, %s615_s15  ;;  %v228_v8 = vld [vmem:[%s665_s19 + $0x4] sm:$0x3] }
   0xf   : > { %v258_v1 = vld [vmem:[%s670_s22] sm:$0x3]  ;;  %v259_v5 = vld [vmem:[%s670_s22 + $0x2] sm:$0x3]  ;;  %v260_v9 = vld [vmem:[%s670_s22 + $0x4] sm:$0x3] }
  0x10   : > { %v290_v3 = vadd.f32 %v258_v1, %v226_v0  ;;  %v597_v4 = vld [vmem:[%s675_s25] ss:$0 sm:$0xff]  ;;  %v598_v6 = vld [vmem:[%s675_s25 + $0x1] ss:$0 sm:$0xff]  ;;  %v291_v7 = vadd.f32 %v259_v5, %v227_v2  ;;  %v599_v10 = vld [vmem:[%s675_s25 + $0x2] ss:$0 sm:$0xff]  ;;  %v292_v12 = vadd.f32 %v260_v9, %v228_v8 }
  0x11   : > { %v229_v13 = vld [vmem:[%s665_s19 + $0x6] sm:$0x3]  ;;  %v600_v15 = vld [vmem:[%s675_s25 + $0x3] ss:$0 sm:$0xff]  ;;  %v230_v18 = vld [vmem:[%s665_s19 + $0x8] sm:$0x3] }
  0x12   : > { %v434_v11 = vadd.f32 %v597_v4, %v290_v3  ;;  %v261_v14 = vld [vmem:[%s670_s22 + $0x6] sm:$0x3]  ;;  %v435_v16 = vadd.f32 %v598_v6, %v291_v7  ;;  %v262_v19 = vld [vmem:[%s670_s22 + $0x8] sm:$0x3]  ;;  %v231_v20 = vld [vmem:[%s665_s19 + $0xa] sm:$0x3]  ;;  %v436_v21 = vadd.f32 %v599_v10, %v292_v12 }
  0x13   : > { %v293_v17 = vadd.f32 %v261_v14, %v229_v13  ;;  %v294_v22 = vadd.f32 %v262_v19, %v230_v18  ;;  %v263_v23 = vld [vmem:[%s670_s22 + $0xa] sm:$0x3]  ;;  %v232_v24 = vld [vmem:[%s665_s19 + $0xc] sm:$0x3]  ;;  %v233_v29 = vld [vmem:[%s665_s19 + $0xe] sm:$0x3] }
  0x14   : > { %467 = vst.msk [vmem:[%s686_s28] sm:$0x3] %vm466_vm0, %v434_v11  ;;  %v264_v25 = vld [vmem:[%s670_s22 + $0xc] sm:$0x3]  ;;  %468 = vst.msk [vmem:[%s686_s28 + $0x2] sm:$0x3] %vm466_vm0, %v435_v16  ;;  %v295_v27 = vadd.f32 %v263_v23, %v231_v20 }
  0x15   : > { %v437_v26 = vadd.f32 %v600_v15, %v293_v17  ;;  %v296_v28 = vadd.f32 %v264_v25, %v232_v24  ;;  %v265_v30 = vld [vmem:[%s670_s22 + $0xe] sm:$0x3]  ;;  %v234_v31 = vld [vmem:[%s665_s19 + $0x10] sm:$0x3]  ;;  %469 = vst.msk [vmem:[%s686_s28 + $0x4] sm:$0x3] %vm466_vm0, %v436_v21  ;;  %v438_v32 = vadd.f32 %v597_v4, %v294_v22 }
  0x16   : > { %v297_v33 = vadd.f32 %v265_v30, %v233_v29  ;;  %v266_v34 = vld [vmem:[%s670_s22 + $0x10] sm:$0x3]  ;;  %v601_v35 = vld [vmem:[%s675_s25 + $0x4] ss:$0 sm:$0xff]  ;;  %v235_v36 = vld [vmem:[%s665_s19 + $0x12] sm:$0x3]  ;;  %v439_v37 = vadd.f32 %v598_v6, %v295_v27 }
  0x17   : > { %470 = vst.msk [vmem:[%s686_s28 + $0x6] sm:$0x3] %vm466_vm0, %v437_v26  ;;  %v440_v38 = vadd.f32 %v599_v10, %v296_v28  ;;  %v298_v39 = vadd.f32 %v266_v34, %v234_v31  ;;  %v267_v40 = vld [vmem:[%s670_s22 + $0x12] sm:$0x3]  ;;  %v602_v41 = vld [vmem:[%s675_s25 + $0x5] ss:$0 sm:$0xff] }
  0x18   : > { %v236_v42 = vld [vmem:[%s665_s19 + $0x14] sm:$0x3]  ;;  %471 = vst.msk [vmem:[%s686_s28 + $0x8] sm:$0x3] %vm466_vm0, %v438_v32  ;;  %v441_v43 = vadd.f32 %v600_v15, %v297_v33  ;;  %v299_v44 = vadd.f32 %v267_v40, %v235_v36  ;;  %v603_v46 = vld [vmem:[%s675_s25 + $0x6] ss:$0 sm:$0xff] }
  0x19   : > { %v268_v45 = vld [vmem:[%s670_s22 + $0x14] sm:$0x3]  ;;  %v237_v47 = vld [vmem:[%s665_s19 + $0x16] sm:$0x3]  ;;  %472 = vst.msk [vmem:[%s686_s28 + $0xa] sm:$0x3] %vm466_vm0, %v439_v37  ;;  %v442_v48 = vadd.f32 %v601_v35, %v298_v39 }
  0x1a   : > { %473 = vst.msk [vmem:[%s686_s28 + $0xc] sm:$0x3] %vm466_vm0, %v440_v38  ;;  %v300_v49 = vadd.f32 %v268_v45, %v236_v42  ;;  %v269_v50 = vld [vmem:[%s670_s22 + $0x16] sm:$0x3]  ;;  %v604_v51 = vld [vmem:[%s675_s25 + $0x7] ss:$0 sm:$0xff]  ;;  %v443_v53 = vadd.f32 %v602_v41, %v299_v44 }
  0x1b   : > { %v238_v52 = vld [vmem:[%s665_s19 + $0x18] sm:$0x3]  ;;  %474 = vst.msk [vmem:[%s686_s28 + $0xe] sm:$0x3] %vm466_vm0, %v441_v43  ;;  %v301_v54 = vadd.f32 %v269_v50, %v237_v47  ;;  %v239_v56 = vld [vmem:[%s665_s19 + $0x1a] sm:$0x3] }
  0x1c   : > { %v270_v55 = vld [vmem:[%s670_s22 + $0x18] sm:$0x3]  ;;  %v271_v57 = vld [vmem:[%s670_s22 + $0x1a] sm:$0x3]  ;;  %475 = vst.msk [vmem:[%s686_s28 + $0x10] sm:$0x3] %vm466_vm0, %v442_v48  ;;  %v444_v58 = vadd.f32 %v603_v46, %v300_v49 }
  0x1d   : > { %v302_v59 = vadd.f32 %v270_v55, %v238_v52  ;;  %v303_v60 = vadd.f32 %v271_v57, %v239_v56  ;;  %v240_v61 = vld [vmem:[%s665_s19 + $0x1c] sm:$0x3]  ;;  %v241_v63 = vld [vmem:[%s665_s19 + $0x1e] sm:$0x3]  ;;  %476 = vst.msk [vmem:[%s686_s28 + $0x12] sm:$0x3] %vm466_vm0, %v443_v53  ;;  %v445_v0 = vadd.f32 %v604_v51, %v301_v54 }
  0x1e   : > { %v272_v62 = vld [vmem:[%s670_s22 + $0x1c] sm:$0x3]  ;;  %v273_v2 = vld [vmem:[%s670_s22 + $0x1e] sm:$0x3]  ;;  %v242_v3 = vld [vmem:[%s665_s19 + $0x20] sm:$0x3] }
  0x1f   : > { %v304_v1 = vadd.f32 %v272_v62, %v240_v61  ;;  %v274_v4 = vld [vmem:[%s670_s22 + $0x20] sm:$0x3]  ;;  %477 = vst.msk [vmem:[%s686_s28 + $0x14] sm:$0x3] %vm466_vm0, %v444_v58  ;;  %v446_v5 = vadd.f32 %v601_v35, %v302_v59  ;;  %v447_v6 = vadd.f32 %v602_v41, %v303_v60  ;;  %v305_v7 = vadd.f32 %v273_v2, %v241_v63  ;;  %v605_v9 = vld [vmem:[%s675_s25 + $0x8] ss:$0 sm:$0xff] }
  0x20   : > { %v306_v8 = vadd.f32 %v274_v4, %v242_v3  ;;  %v243_v10 = vld [vmem:[%s665_s19 + $0x22] sm:$0x3]  ;;  %478 = vst.msk [vmem:[%s686_s28 + $0x16] sm:$0x3] %vm466_vm0, %v445_v0  ;;  %v606_v14 = vld [vmem:[%s675_s25 + $0x9] ss:$0 sm:$0xff] }
  0x21   : > { %v275_v11 = vld [vmem:[%s670_s22 + $0x22] sm:$0x3]  ;;  %v448_v12 = vadd.f32 %v603_v46, %v304_v1  ;;  %v244_v15 = vld [vmem:[%s665_s19 + $0x24] sm:$0x3]  ;;  %479 = vst.msk [vmem:[%s686_s28 + $0x18] sm:$0x3] %vm466_vm0, %v446_v5  ;;  %v449_v17 = vadd.f32 %v604_v51, %v305_v7 }
  0x22   : > { %v307_v13 = vadd.f32 %v275_v11, %v243_v10  ;;  %v276_v16 = vld [vmem:[%s670_s22 + $0x24] sm:$0x3]  ;;  %480 = vst.msk [vmem:[%s686_s28 + $0x1a] sm:$0x3] %vm466_vm0, %v447_v6  ;;  %v450_v18 = vadd.f32 %v605_v9, %v306_v8  ;;  %v607_v20 = vld [vmem:[%s675_s25 + $0xa] ss:$0 sm:$0xff] }
  0x23   : > { %v308_v19 = vadd.f32 %v276_v16, %v244_v15  ;;  %v245_v21 = vld [vmem:[%s665_s19 + $0x26] sm:$0x3]  ;;  %481 = vst.msk [vmem:[%s686_s28 + $0x1c] sm:$0x3] %vm466_vm0, %v448_v12  ;;  %v608_v25 = vld [vmem:[%s675_s25 + $0xb] ss:$0 sm:$0xff] }
  0x24   : > { %v277_v22 = vld [vmem:[%s670_s22 + $0x26] sm:$0x3]  ;;  %v451_v23 = vadd.f32 %v606_v14, %v307_v13  ;;  %v246_v26 = vld [vmem:[%s665_s19 + $0x28] sm:$0x3]  ;;  %482 = vst.msk [vmem:[%s686_s28 + $0x1e] sm:$0x3] %vm466_vm0, %v449_v17 }
  0x25   : > { %v309_v24 = vadd.f32 %v277_v22, %v245_v21  ;;  %v278_v27 = vld [vmem:[%s670_s22 + $0x28] sm:$0x3]  ;;  %483 = vst.msk [vmem:[%s686_s28 + $0x20] sm:$0x3] %vm466_vm0, %v450_v18  ;;  %v452_v28 = vadd.f32 %v607_v20, %v308_v19  ;;  %v247_v30 = vld [vmem:[%s665_s19 + $0x2a] sm:$0x3] }
  0x26   : > { %v310_v29 = vadd.f32 %v278_v27, %v246_v26  ;;  %v279_v31 = vld [vmem:[%s670_s22 + $0x2a] sm:$0x3]  ;;  %v248_v32 = vld [vmem:[%s665_s19 + $0x2c] sm:$0x3]  ;;  %484 = vst.msk [vmem:[%s686_s28 + $0x22] sm:$0x3] %vm466_vm0, %v451_v23 }
  0x27   : > { %v453_v33 = vadd.f32 %v608_v25, %v309_v24  ;;  %v311_v34 = vadd.f32 %v279_v31, %v247_v30  ;;  %v280_v35 = vld [vmem:[%s670_s22 + $0x2c] sm:$0x3]  ;;  %v249_v36 = vld [vmem:[%s665_s19 + $0x2e] sm:$0x3]  ;;  %485 = vst.msk [vmem:[%s686_s28 + $0x24] sm:$0x3] %vm466_vm0, %v452_v28 }
  0x28   : > { %v281_v37 = vld [vmem:[%s670_s22 + $0x2e] sm:$0x3]  ;;  %v454_v38 = vadd.f32 %v605_v9, %v310_v29  ;;  %v312_v39 = vadd.f32 %v280_v35, %v248_v32  ;;  %v250_v41 = vld [vmem:[%s665_s19 + $0x30] sm:$0x3]  ;;  %v609_v43 = vld [vmem:[%s675_s25 + $0xc] ss:$0 sm:$0xff] }
  0x29   : > { %v313_v40 = vadd.f32 %v281_v37, %v249_v36  ;;  %v282_v42 = vld [vmem:[%s670_s22 + $0x30] sm:$0x3]  ;;  %486 = vst.msk [vmem:[%s686_s28 + $0x26] sm:$0x3] %vm466_vm0, %v453_v33  ;;  %v455_v44 = vadd.f32 %v606_v14, %v311_v34  ;;  %v251_v46 = vld [vmem:[%s665_s19 + $0x32] sm:$0x3] }
  0x2a   : > { %v314_v45 = vadd.f32 %v282_v42, %v250_v41  ;;  %v283_v47 = vld [vmem:[%s670_s22 + $0x32] sm:$0x3]  ;;  %v610_v48 = vld [vmem:[%s675_s25 + $0xd] ss:$0 sm:$0xff]  ;;  %487 = vst.msk [vmem:[%s686_s28 + $0x28] sm:$0x3] %vm466_vm0, %v454_v38  ;;  %v456_v49 = vadd.f32 %v607_v20, %v312_v39 }
  0x2b   : > { %v457_v50 = vadd.f32 %v608_v25, %v313_v40  ;;  %v315_v51 = vadd.f32 %v283_v47, %v251_v46  ;;  %v252_v52 = vld [vmem:[%s665_s19 + $0x34] sm:$0x3]  ;;  %v611_v54 = vld [vmem:[%s675_s25 + $0xe] ss:$0 sm:$0xff]  ;;  %488 = vst.msk [vmem:[%s686_s28 + $0x2a] sm:$0x3] %vm466_vm0, %v455_v44 }
  0x2c   : > { %v284_v53 = vld [vmem:[%s670_s22 + $0x34] sm:$0x3]  ;;  %v458_v55 = vadd.f32 %v609_v43, %v314_v45  ;;  %v253_v57 = vld [vmem:[%s665_s19 + $0x36] sm:$0x3]  ;;  %v612_v59 = vld [vmem:[%s675_s25 + $0xf] ss:$0 sm:$0xff] }
  0x2d   : > { %v316_v56 = vadd.f32 %v284_v53, %v252_v52  ;;  %v285_v58 = vld [vmem:[%s670_s22 + $0x36] sm:$0x3]  ;;  %489 = vst.msk [vmem:[%s686_s28 + $0x2c] sm:$0x3] %vm466_vm0, %v456_v49  ;;  %490 = vst.msk [vmem:[%s686_s28 + $0x2e] sm:$0x3] %vm466_vm0, %v457_v50  ;;  %v459_v60 = vadd.f32 %v610_v48, %v315_v51 }
  0x2e   : > { %v317_v61 = vadd.f32 %v285_v58, %v253_v57  ;;  %v254_v62 = vld [vmem:[%s665_s19 + $0x38] sm:$0x3]  ;;  %v255_v0 = vld [vmem:[%s665_s19 + $0x3a] sm:$0x3]  ;;  %491 = vst.msk [vmem:[%s686_s28 + $0x30] sm:$0x3] %vm466_vm0, %v458_v55 }
  0x2f   : > { %v286_v63 = vld [vmem:[%s670_s22 + $0x38] sm:$0x3]  ;;  %v460_v1 = vadd.f32 %v611_v54, %v316_v56  ;;  %v287_v3 = vld [vmem:[%s670_s22 + $0x3a] sm:$0x3]  ;;  %v256_v4 = vld [vmem:[%s665_s19 + $0x3c] sm:$0x3] }
  0x30   : > { %v318_v2 = vadd.f32 %v286_v63, %v254_v62  ;;  %v288_v5 = vld [vmem:[%s670_s22 + $0x3c] sm:$0x3]  ;;  %492 = vst.msk [vmem:[%s686_s28 + $0x32] sm:$0x3] %vm466_vm0, %v459_v60  ;;  %v461_v6 = vadd.f32 %v612_v59, %v317_v61  ;;  %v319_v7 = vadd.f32 %v287_v3, %v255_v0  ;;  %v257_v9 = vld [vmem:[%s665_s19 + $0x3e] sm:$0x3] }
  0x31   : > { %v320_v8 = vadd.f32 %v288_v5, %v256_v4  ;;  %v289_v10 = vld [vmem:[%s670_s22 + $0x3e] sm:$0x3]  ;;  %493 = vst.msk [vmem:[%s686_s28 + $0x34] sm:$0x3] %vm466_vm0, %v460_v1 }
  0x32   : > { %v462_v11 = vadd.f32 %v609_v43, %v318_v2  ;;  %v321_v12 = vadd.f32 %v289_v10, %v257_v9  ;;  %494 = vst.msk [vmem:[%s686_s28 + $0x36] sm:$0x3] %vm466_vm0, %v461_v6  ;;  %v463_v13 = vadd.f32 %v610_v48, %v319_v7 }
  0x33   : > { %v464_v14 = vadd.f32 %v611_v54, %v320_v8 }
  0x34   : > { %495 = vst.msk [vmem:[%s686_s28 + $0x38] sm:$0x3] %vm466_vm0, %v462_v11  ;;  %v465_v15 = vadd.f32 %v612_v59, %v321_v12  ;;  %496 = vst.msk [vmem:[%s686_s28 + $0x3a] sm:$0x3] %vm466_vm0, %v463_v13 }
  0x35   : > { %497 = vst.msk [vmem:[%s686_s28 + $0x3c] sm:$0x3] %vm466_vm0, %v464_v14 }
  0x36   : > { %498 = vst.msk [vmem:[%s686_s28 + $0x3e] sm:$0x3] %vm466_vm0, %v465_v15 }
  0x37 PF: > { %s13_s12 = sadd.s32 1, %s632_s12  }
  0x38   : > { %p10_p4 = scmp.ge.s32.totalorder %s13_s12, 4  }
  0x3a   :  { %12 = sbr.rel (!%p10_p4) target bundleno = 1 (0x1), region = 68 }

// kernel: _lambda_.9
= control target key start
LH: loop header
LB: loop body
LE: loop exit
PB: predicated region body
PF: predicated region fallthrough
CT: control target
= control target key end

     0   :  { %s1581_s27 = smov 0   ;;  %s1886_s0 = inlined_call_operand.vmem [shape: f32[2,9,9,4], index: 0, kind: input, shape index: {}]   ;;  %s1887_s1 = inlined_call_operand.vmem [shape: f32[2,9,8,4], index: 1, kind: input, shape index: {}]   ;;  %s1888_s2 = inlined_call_operand.vmem [shape: f32[2,8,9,4], index: 2, kind: input, shape index: {}]   ;;  %s1889_s3 = inlined_call_operand.vmem [shape: f32[2,8,8,4], index: 3, kind: input, shape index: {}]   ;;  %s1890_s4 = inlined_call_operand.vmem [shape: f32[9,1,1,4], index: 4, kind: input, shape index: {}]   ;;  %s1891_s5 = inlined_call_operand.vmem [shape: f32[1,1,4], index: 5, kind: input, shape index: {}]   ;;  %s1892_s6 = inlined_call_operand.vmem [shape: f32[4,8], index: 6, kind: input, shape index: {}]   ;;  %s1893_s7 = inlined_call_operand.vmem [shape: f32[1,8], index: 7, kind: input, shape index: {}]   ;;  %s1894_s8 = inlined_call_operand.vmem [shape: f32[2,8,8,8], index: 8, kind: output, shape index: {}]  }
   0x1 LB: > { %s1374_s28 = sadd.s32 4294967295, %s1532_s27   ;;  %p1378_p0 = scmp.ge.s32.totalorder %s1532_s27, 1  ;;  %s1532_s27 = sphi %s1581_s27, %s18_s27  }
   0x2   : > { %p292_p1 = scmp.lt.s32.totalorder %s1532_s27, 3 }
   0x4   : > { %p293_p2 = pnand %p1378_p0, %p292_p1 }
   0x5   : > { %p341_p3 = scmp.lt.s32.totalorder (!%p293_p2), %s1374_s28, 1 }
   0x6   : > { %296 = sbr.rel (%p293_p2) target bundleno = 261 (0x105), region = 52 }
   0xb   : > { %v1592_v0 = vld [vmem:[%s1892_s6] sm:$0xf]  ;;  %vm682_vm0 = vcmask 1043456   ;;  %v1534_v1 = vmov 0.0   ;;  %s1896_s28 = smov (!%p341_p3, %s1374_s28), 1  ;;  %vm1535_vm1 = vmmov 0  }
   0xc   : > { %1474 = vmatprep.subr.mxu0 %v1534_v1  ;;  %1479 = vmatprep.subr.mxu1 %v1534_v1  ;;  %v1609_v2 = vld [vmem:[%s1890_s4] ss:$0 sm:$0xff]  ;;  %s1514_s11 = smul.u32 144, %s1896_s28  ;;  %s1455_s12 = sshll.u32 %s1896_s28, 7  ;;  %v1618_v3 = vld [vmem:[%s1890_s4 + $0x1] ss:$0 sm:$0xff] }
   0xd   : > { %1475 = vmatpush3.msk.msra.mxu0 %vm682_vm0, %v1592_v0  ;;  %1480 = vmatpush3.msk.msra.mxu1 %vm682_vm0, %v1592_v0  ;;  %v1623_v4 = vld [vmem:[%s1890_s4 + $0x2] ss:$0 sm:$0xff]  ;;  %v1628_v5 = vld [vmem:[%s1890_s4 + $0x3] ss:$0 sm:$0xff]  ;;  %v1633_v6 = vld [vmem:[%s1890_s4 + $0x5] ss:$0 sm:$0xff]  ;;  %s1639_s24 = scalar_lea.vmem %s1888_s2, %s1455_s12 }
   0xe   : > { %1476 = vmatprep.mubr.msk.f32.mxu0 %vm1535_vm1, %v1534_v1  ;;  %1481 = vmatprep.mubr.msk.f32.mxu1 %vm1535_vm1, %v1534_v1  ;;  %s1515_s21 = smul.u32 72, %s1896_s28  ;;  %v1644_v7 = vld [vmem:[%s1890_s4 + $0x4] ss:$0 sm:$0xff]  ;;  %v1649_v8 = vld [vmem:[%s1890_s4 + $0x6] ss:$0 sm:$0xff]  ;;  %s1659_s14 = scalar_lea.vmem %s1886_s0, %s1514_s11  ;;  %v462_v13 = vld [vmem:[%s1639_s24 + $0x10] sm:$0xff] }
   0xf   : > { %1484 = vmatprep.subr.mxu0 %v1534_v1  ;;  %1489 = vmatprep.subr.mxu1 %v1534_v1  ;;  %v1654_v9 = vld [vmem:[%s1890_s4 + $0x7] ss:$0 sm:$0xff]  ;;  %s1456_s15 = sshll.u32 %s1896_s28, 6  ;;  %v1667_v12 = vld [vmem:[%s1890_s4 + $0x8] ss:$0 sm:$0xff]  ;;  %v1398_v16 = vld [vmem:[%s1659_s14 + $0x10] sm:$0xff]  ;;  %v478_v28 = vmul.f32 %v1628_v5, %v462_v13 }
  0x10   : > { %v461_v10 = vld [vmem:[%s1639_s24] sm:$0xff]  ;;  %s1673_s20 = scalar_lea.vmem %s1887_s1, %s1515_s21  ;;  %s1680_s23 = scalar_lea.vmem %s1889_s3, %s1456_s15  ;;  %v382_v23 = vmul.f32 %v1398_v16, %v1609_v2  ;;  %v1418_v26 = vld [vmem:[%s1659_s14 + $0x11] sm:$0xff]  ;;  %v574_v32 = vmul.f32 %v1649_v8, %v1398_v16  ;;  %vm678_vm2 = vcmask 31744   ;;  %vm756_vm3 = vcmask 64512  }
  0x11   : > { %v525_v11 = vld [vmem:[%s1639_s24 + $0x1] sm:$0xff]  ;;  %v477_v19 = vmul.f32 %v1628_v5, %v461_v10  ;;  %v526_v30 = vld [vmem:[%s1639_s24 + $0x11] sm:$0xff]  ;;  %v446_v34 = vmul.f32 %v1418_v26, %v1623_v4  ;;  %v1709_v39 = vmul.f32 %v1667_v12, %v1418_v26  ;;  %s1865_s9 = scalar_lea.vmem %s1894_s8, %s1456_s15 }
  0x12   : > { %v366_v14 = vld [vmem:[%s1659_s14] sm:$0xff]  ;;  %v541_v21 = vmul.f32 %v1633_v6, %v525_v11  ;;  %v1408_v22 = vld [vmem:[%s1673_s20 + $0x8] sm:$0xff]  ;;  %v1409_v36 = vld [vmem:[%s1673_s20 + $0x10] sm:$0xff]  ;;  %v542_v44 = vmul.f32 %v1633_v6, %v526_v30 }
  0x13   : > { %v429_v15 = vld [vmem:[%s1659_s14 + $0x1] sm:$0xff]  ;;  %v381_v17 = vmul.f32 %v1609_v2, %v366_v14  ;;  %v414_v27 = vmul.f32 %v1408_v22, %v1618_v3  ;;  %v1702_v33 = vmul.f32 %v1654_v9, %v1408_v22  ;;  %v495_v43 = vld [vmem:[%s1680_s23 + $0x10] sm:$0xff]  ;;  %v415_v46 = vmul.f32 %v1409_v36, %v1618_v3  ;;  %v1410_v54 = vld [vmem:[%s1673_s20 + $0x18] sm:$0xff] }
  0x14   : > { %v397_v18 = vld [vmem:[%s1673_s20] sm:$0xff]  ;;  %v445_v25 = vmul.f32 %v1623_v4, %v429_v15  ;;  %v494_v29 = vld [vmem:[%s1680_s23 + $0x8] sm:$0xff]  ;;  %v1400_v49 = vld [vmem:[%s1659_s14 + $0x30] sm:$0xff]  ;;  %v608_v53 = vmul.f32 %v1654_v9, %v1409_v36  ;;  %v511_v59 = vmul.f32 %v1644_v7, %v495_v43  ;;  %v416_v15 = vmul.f32 %v1410_v54, %v1618_v3 }
  0x15   : > { %v493_v20 = vld [vmem:[%s1680_s23] sm:$0xff]  ;;  %v413_v24 = vmul.f32 %v1618_v3, %v397_v18  ;;  %v422_v40 = vadd.f32 %v414_v27, %v382_v23  ;;  %v510_v41 = vmul.f32 %v1644_v7, %v494_v29  ;;  %v1420_v55 = vld [vmem:[%s1659_s14 + $0x31] sm:$0xff]  ;;  %v384_v63 = vmul.f32 %v1400_v49, %v1609_v2 }
  0x16   : > { %v509_v31 = vmul.f32 %v1644_v7, %v493_v20  ;;  %v1399_v35 = vld [vmem:[%s1659_s14 + $0x20] sm:$0xff]  ;;  %v464_v10 = vld [vmem:[%s1639_s24 + $0x30] sm:$0xff]  ;;  %v496_v11 = vld [vmem:[%s1680_s23 + $0x18] sm:$0xff]  ;;  %v576_v14 = vmul.f32 %v1649_v8, %v1400_v49  ;;  %v448_v16 = vmul.f32 %v1420_v55, %v1623_v4  ;;  %v609_v22 = vmul.f32 %v1654_v9, %v1410_v54 }
  0x17   : > { %v1419_v37 = vld [vmem:[%s1659_s14 + $0x21] sm:$0xff]  ;;  %v421_v38 = vadd.f32 %v413_v24, %v381_v17  ;;  %v383_v45 = vmul.f32 %v1399_v35, %v1609_v2  ;;  %v454_v51 = vadd.f32 %v446_v34, %v422_v40  ;;  %v575_v52 = vmul.f32 %v1649_v8, %v1399_v35  ;;  %v528_v17 = vld [vmem:[%s1639_s24 + $0x31] sm:$0xff] }
  0x18   : > { %v463_v42 = vld [vmem:[%s1639_s24 + $0x20] sm:$0xff]  ;;  %v447_v47 = vmul.f32 %v1419_v37, %v1623_v4  ;;  %v640_v56 = vmul.f32 %v1667_v12, %v1419_v37  ;;  %v641_v23 = vmul.f32 %v1667_v12, %v1420_v55  ;;  %v424_v27 = vadd.f32 %v416_v15, %v384_v63  ;;  %v1412_v54 = vld [vmem:[%s1673_s20 + $0x28] sm:$0xff] }
  0x19   : > { %v527_v48 = vld [vmem:[%s1639_s24 + $0x21] sm:$0xff]  ;;  %v453_v50 = vadd.f32 %v445_v25, %v421_v38  ;;  %v423_v57 = vadd.f32 %v415_v46, %v383_v45  ;;  %v479_v58 = vmul.f32 %v1628_v5, %v463_v42  ;;  %v486_v61 = vadd.f32 %v478_v28, %v454_v51  ;;  %v1402_v51 = vld [vmem:[%s1659_s14 + $0x50] sm:$0xff] }
  0x1a   : > { %v543_v62 = vmul.f32 %v1633_v6, %v527_v48  ;;  %v1401_v18 = vld [vmem:[%s1659_s14 + $0x40] sm:$0xff]  ;;  %v480_v28 = vmul.f32 %v1628_v5, %v464_v10  ;;  %v512_v29 = vmul.f32 %v1644_v7, %v496_v11  ;;  %v456_v38 = vadd.f32 %v448_v16, %v424_v27  ;;  %v466_v10 = vld [vmem:[%s1639_s24 + $0x50] sm:$0xff] }
  0x1b   : > { %v485_v60 = vadd.f32 %v477_v19, %v453_v50  ;;  %v455_v13 = vadd.f32 %v447_v47, %v423_v57  ;;  %v518_v20 = vadd.f32 %v510_v41, %v486_v61  ;;  %v1411_v24 = vld [vmem:[%s1673_s20 + $0x20] sm:$0xff]  ;;  %v385_v35 = vmul.f32 %v1401_v18, %v1609_v2  ;;  %v530_v27 = vld [vmem:[%s1639_s24 + $0x51] sm:$0xff] }
  0x1c   : > { %v1421_v25 = vld [vmem:[%s1659_s14 + $0x41] sm:$0xff]  ;;  %v417_v40 = vmul.f32 %v1411_v24, %v1618_v3  ;;  %v488_v48 = vadd.f32 %v480_v28, %v456_v38  ;;  %v386_v11 = vmul.f32 %v1402_v51, %v1609_v2  ;;  %v611_v28 = vmul.f32 %v1654_v9, %v1412_v54 }
  0x1d   : > { %v517_v19 = vadd.f32 %v509_v31, %v485_v60  ;;  %v487_v26 = vadd.f32 %v479_v58, %v455_v13  ;;  %v550_v34 = vadd.f32 %v542_v44, %v518_v20  ;;  %v544_v31 = vmul.f32 %v1633_v6, %v528_v17  ;;  %v465_v36 = vld [vmem:[%s1639_s24 + $0x40] sm:$0xff] }
  0x1e   : > { %v449_v41 = vmul.f32 %v1421_v25, %v1623_v4  ;;  %v497_v42 = vld [vmem:[%s1680_s23 + $0x20] sm:$0xff]  ;;  %v610_v44 = vmul.f32 %v1654_v9, %v1411_v24  ;;  %v425_v49 = vadd.f32 %v417_v40, %v385_v35  ;;  %v481_v50 = vmul.f32 %v1628_v5, %v465_v36  ;;  %v1413_v36 = vld [vmem:[%s1673_s20 + $0x30] sm:$0xff] }
  0x1f   : > { %v549_v30 = vadd.f32 %v541_v21, %v517_v19  ;;  %v519_v37 = vadd.f32 %v511_v59, %v487_v26  ;;  %v583_v45 = vadd.f32 %v575_v52, %v550_v34  ;;  %v577_v21 = vmul.f32 %v1649_v8, %v1401_v18  ;;  %v529_v46 = vld [vmem:[%s1639_s24 + $0x41] sm:$0xff]  ;;  %v1422_v52 = vld [vmem:[%s1659_s14 + $0x51] sm:$0xff]  ;;  %v1761_v59 = vld [vmem:[%s1891_s5] ss:$0 sm:$0xff] }
  0x20   : > { %v642_v58 = vmul.f32 %v1667_v12, %v1421_v25  ;;  %v520_v61 = vadd.f32 %v512_v29, %v488_v48  ;;  %v545_v63 = vmul.f32 %v1633_v6, %v529_v46  ;;  %v418_v13 = vmul.f32 %v1412_v54, %v1618_v3  ;;  %v1403_v34 = vld [vmem:[%s1659_s14 + $0x60] sm:$0xff] }
  0x21   : > { %v582_v43 = vadd.f32 %v574_v32, %v549_v30  ;;  %v551_v47 = vadd.f32 %v543_v62, %v519_v37  ;;  %v616_v57 = vadd.f32 %v608_v53, %v583_v45  ;;  %v513_v32 = vmul.f32 %v1644_v7, %v497_v42  ;;  %v1423_v37 = vld [vmem:[%s1659_s14 + $0x61] sm:$0xff] }
  0x22   : > { %v457_v62 = vadd.f32 %v449_v41, %v425_v49  ;;  %v552_v16 = vadd.f32 %v544_v31, %v520_v61  ;;  %v450_v18 = vmul.f32 %v1422_v52, %v1623_v4  ;;  %v426_v24 = vadd.f32 %v418_v13, %v386_v11  ;;  %v499_v49 = vld [vmem:[%s1680_s23 + $0x30] sm:$0xff] }
  0x23   : > { %v615_v55 = vadd.f32 %v1702_v33, %v582_v43  ;;  %v584_v60 = vadd.f32 %v576_v14, %v551_v47  ;;  %v648_v53 = vadd.f32 %v640_v56, %v616_v57  ;;  %v498_v14 = vld [vmem:[%s1680_s23 + $0x28] sm:$0xff]  ;;  %v643_v38 = vmul.f32 %v1667_v12, %v1422_v52  ;;  %v1424_v61 = vld [vmem:[%s1659_s14 + $0x71] sm:$0xff] }
  0x24   : > { %v489_v17 = vadd.f32 %v481_v50, %v457_v62  ;;  %v585_v25 = vadd.f32 %v577_v21, %v552_v16  ;;  %v458_v29 = vadd.f32 %v450_v18, %v426_v24  ;;  %v514_v30 = vmul.f32 %v1644_v7, %v498_v14  ;;  %v467_v21 = vld [vmem:[%s1639_s24 + $0x60] sm:$0xff]  ;;  %v1404_v50 = vld [vmem:[%s1659_s14 + $0x70] sm:$0xff]  ;;  %v500_v16 = vld [vmem:[%s1680_s23 + $0x38] sm:$0xff] }
  0x25   : > { %v647_v33 = vadd.f32 %v1709_v39, %v615_v55  ;;  %v617_v15 = vadd.f32 %v609_v22, %v584_v60  ;;  %v663_v20 = vadd.f32 %v1761_v59, %v648_v53  ;;  %v482_v39 = vmul.f32 %v1628_v5, %v466_v10  ;;  %v1414_v55 = vld [vmem:[%s1673_s20 + $0x38] sm:$0xff]  ;;  %v531_v60 = vld [vmem:[%s1639_s24 + $0x61] sm:$0xff]  ;;  %v468_v53 = vld [vmem:[%s1639_s24 + $0x70] sm:$0xff] }
  0x26   : > { %v521_v26 = vadd.f32 %v513_v32, %v489_v17  ;;  %v578_v22 = vmul.f32 %v1649_v8, %v1402_v51  ;;  %v618_v31 = vadd.f32 %v610_v44, %v585_v25  ;;  %v546_v41 = vmul.f32 %v1633_v6, %v530_v27 }
  0x27   : > { %v662_v19 = vadd.f32 %v1761_v59, %v647_v33  ;;  %v649_v56 = vadd.f32 %v641_v23, %v617_v15  ;;  %1482 = vmatmul.mubr.msk.f32.vlgmr.msra.gmra.mxu1 %vm678_vm2, %v663_v20  ;;  %v490_v40 = vadd.f32 %v482_v39, %v458_v29  ;;  %v387_v45 = vmul.f32 %v1403_v34, %v1609_v2 }
  0x28   : > { %1490 = vmatpush3.msk.msra.mxu1 %vm682_vm0, %v1592_v0  ;;  %v553_v35 = vadd.f32 %v545_v63, %v521_v26  ;;  %1491 = vmatprep.mubr.msk.f32.mxu1 %vm1535_vm1, %v1534_v1  ;;  %v650_v42 = vadd.f32 %v642_v58, %v618_v31  ;;  %v579_v46 = vmul.f32 %v1649_v8, %v1403_v34 }
  0x29   : > { %1477 = vmatmul.mubr.msk.f32.vlgmr.msra.gmra.mxu0 %vm678_vm2, %v662_v19  ;;  %v664_v23 = vadd.f32 %v1761_v59, %v649_v56  ;;  %1499 = vmatprep.subr.mxu1 %v1534_v1  ;;  %v522_v44 = vadd.f32 %v514_v30, %v490_v40  ;;  %v419_v47 = vmul.f32 %v1413_v36, %v1618_v3  ;;  %v532_v56 = vld [vmem:[%s1639_s24 + $0x71] sm:$0xff]  ;;  %v1415_v30 = vld [vmem:[%s1673_s20 + $0x40] sm:$0xff] }
  0x2a   : > { %1485 = vmatpush3.msk.msra.mxu0 %vm682_vm0, %v1592_v0  ;;  %1486 = vmatprep.mubr.msk.f32.mxu0 %vm1535_vm1, %v1534_v1  ;;  %v586_v43 = vadd.f32 %v578_v22, %v553_v35  ;;  %v451_v48 = vmul.f32 %v1423_v37, %v1623_v4  ;;  %v665_v51 = vadd.f32 %v1761_v59, %v650_v42  ;;  %v1405_v22 = vld [vmem:[%s1659_s14 + $0x80] sm:$0xff] }
  0x2b   : > { %1494 = vmatprep.subr.mxu0 %v1534_v1  ;;  %v554_v57 = vadd.f32 %v546_v41, %v522_v44  ;;  %v612_v58 = vmul.f32 %v1654_v9, %v1413_v36  ;;  %v427_v32 = vadd.f32 %v419_v47, %v387_v45  ;;  %v483_v52 = vmul.f32 %v1628_v5, %v467_v21  ;;  %v1425_v36 = vld [vmem:[%s1659_s14 + $0x81] sm:$0xff] }
  0x2c   : > { %v619_v54 = vadd.f32 %v611_v28, %v586_v43  ;;  %1492 = vmatmul.mubr.msk.f32.vlgmr.msra.gmra.mxu1 %vm678_vm2, %v665_v51  ;;  %v644_v63 = vmul.f32 %v1667_v12, %v1423_v37  ;;  %v515_v10 = vmul.f32 %v1644_v7, %v499_v49  ;;  %v388_v33 = vmul.f32 %v1404_v50, %v1609_v2 }
  0x2d   : > { %1487 = vmatmul.mubr.msk.f32.vlgmr.msra.gmra.mxu0 %vm678_vm2, %v664_v23  ;;  %1500 = vmatpush3.msk.msra.mxu1 %vm682_vm0, %v1592_v0  ;;  %v587_v11 = vadd.f32 %v579_v46, %v554_v57  ;;  %v459_v13 = vadd.f32 %v451_v48, %v427_v32  ;;  %v420_v15 = vmul.f32 %v1414_v55, %v1618_v3 }
  0x2e   : > { %1495 = vmatpush3.msk.msra.mxu0 %vm682_vm0, %v1592_v0  ;;  %1496 = vmatprep.mubr.msk.f32.mxu0 %vm1535_vm1, %v1534_v1  ;;  %v651_v62 = vadd.f32 %v643_v38, %v619_v54  ;;  %v547_v18 = vmul.f32 %v1633_v6, %v531_v60  ;;  %v452_v2 = vmul.f32 %v1424_v61, %v1623_v4 }
  0x2f   : > { %1504 = vmatprep.subr.mxu0 %v1534_v1  ;;  %1501 = vmatprep.mubr.msk.f32.mxu1 %vm1535_vm1, %v1534_v1  ;;  %v620_v14 = vadd.f32 %v612_v58, %v587_v11  ;;  %v491_v19 = vadd.f32 %v483_v52, %v459_v13  ;;  %v428_v20 = vadd.f32 %v420_v15, %v388_v33 }
  0x30   : > { %1509 = vmatprep.subr.mxu1 %v1534_v1  ;;  %v666_v17 = vadd.f32 %v1761_v59, %v651_v62  ;;  %v484_v24 = vmul.f32 %v1628_v5, %v468_v53  ;;  %v580_v3 = vmul.f32 %v1649_v8, %v1404_v50  ;;  %v516_v39 = vmul.f32 %v1644_v7, %v500_v16 }
  0x31   : > { %v652_v25 = vadd.f32 %v644_v63, %v620_v14  ;;  %v523_v4 = vadd.f32 %v515_v10, %v491_v19  ;;  %v460_v26 = vadd.f32 %v452_v2, %v428_v20  ;;  %v613_v5 = vmul.f32 %v1654_v9, %v1414_v55 }
  0x32   : > { %1497 = vmatmul.mubr.msk.f32.vlgmr.msra.gmra.mxu0 %vm678_vm2, %v666_v17  ;;  %v548_v7 = vmul.f32 %v1633_v6, %v532_v56  ;;  %v645_v23 = vmul.f32 %v1667_v12, %v1424_v61  ;;  %v581_v35 = vmul.f32 %v1649_v8, %v1405_v22  ;;  %v614_v6 = vmul.f32 %v1654_v9, %v1415_v30 }
  0x33   : > { %1505 = vmatpush3.msk.msra.mxu0 %vm682_vm0, %v1592_v0  ;;  %1506 = vmatprep.mubr.msk.f32.mxu0 %vm1535_vm1, %v1534_v1  ;;  %v667_v27 = vadd.f32 %v1761_v59, %v652_v25  ;;  %v555_v28 = vadd.f32 %v547_v18, %v523_v4  ;;  %v492_v29 = vadd.f32 %v484_v24, %v460_v26 }
  0x34   : > { %v646_v42 = vmul.f32 %v1667_v12, %v1425_v36 }
  0x35   : > { %1502 = vmatmul.mubr.msk.f32.vlgmr.msra.gmra.mxu1 %vm678_vm2, %v667_v27  ;;  %v588_v34 = vadd.f32 %v580_v3, %v555_v28  ;;  %v524_v31 = vadd.f32 %v516_v39, %v492_v29 }
  0x36   : > { %1510 = vmatpush3.msk.msra.mxu1 %vm682_vm0, %v1592_v0  ;;  %1511 = vmatprep.mubr.msk.f32.mxu1 %vm1535_vm1, %v1534_v1  ;;  %v1429_v1 = vld [vmem:[%s1893_s7] ss:$0 sm:$0xff] }
  0x37   : > { %v621_v37 = vadd.f32 %v613_v5, %v588_v34  ;;  %v556_v38 = vadd.f32 %v548_v7, %v524_v31 }
  0x39   : > { %v653_v40 = vadd.f32 %v645_v23, %v621_v37  ;;  %v589_v41 = vadd.f32 %v581_v35, %v556_v38 }
  0x3b   : > { %v668_v43 = vadd.f32 %v1761_v59, %v653_v40  ;;  %v622_v45 = vadd.f32 %v614_v6, %v589_v41 }
  0x3d   : > { %1507 = vmatmul.mubr.msk.f32.vlgmr.msra.gmra.mxu0 %vm678_vm2, %v668_v43  ;;  %v654_v8 = vadd.f32 %v646_v42, %v622_v45 }
  0x3f   : > { %v669_v0 = vadd.f32 %v1761_v59, %v654_v8 }
  0x41   : > { %1512 = vmatmul.mubr.msk.f32.vlgmr.msra.gmra.mxu1 %vm678_vm2, %v669_v0 }
  0xe7   : > { %v827_v12 = vpop.f32.mrf.mxu1 }
  0xe8   : > { %v828_v21 = vadd.f32 %v1429_v1, %v827_v12 }
  0xe9   : > { %v752_v9 = vpop.f32.mrf.mxu0  ;;  %v1483_v46 = vpop.f32.mrf.mxu1 }
  0xea   : > { %v753_v59 = vadd.f32 %v1429_v1, %v752_v9  ;;  %1434 = vst.msk [vmem:[%s1865_s9 + $0x8] sm:$0xff] %vm756_vm3, %v828_v21 }
  0xeb   : > { %v1478_v44 = vpop.f32.mrf.mxu0 }
  0xec   : > { %757 = vst.msk [vmem:[%s1865_s9] sm:$0xff] %vm756_vm3, %v753_v59  ;;  %v977_v50 = vpop.f32.mrf.mxu1 }
  0xed   : > { %v902_v47 = vpop.f32.mrf.mxu0  ;;  %v978_v51 = vadd.f32 %v1429_v1, %v977_v50 }
  0xee   : > { %v903_v48 = vadd.f32 %v1429_v1, %v902_v47  ;;  %v1493_v54 = vpop.f32.mrf.mxu1 }
  0xef   : > { %v1488_v49 = vpop.f32.mrf.mxu0  ;;  %1440 = vst.msk [vmem:[%s1865_s9 + $0x18] sm:$0xff] %vm756_vm3, %v978_v51 }
  0xf0   : > { %1437 = vst.msk [vmem:[%s1865_s9 + $0x10] sm:$0xff] %vm756_vm3, %v903_v48 }
  0xf2   : > { %v1052_v55 = vpop.f32.mrf.mxu0 }
  0xf3   : > { %v1053_v57 = vadd.f32 %v1429_v1, %v1052_v55 }
  0xf4   : > { %v1498_v58 = vpop.f32.mrf.mxu0 }
  0xf5   : > { %1443 = vst.msk [vmem:[%s1865_s9 + $0x20] sm:$0xff] %vm756_vm3, %v1053_v57  ;;  %v1127_v32 = vpop.f32.mrf.mxu1 }
  0xf6   : > { %v1128_v52 = vadd.f32 %v1429_v1, %v1127_v32 }
  0xf7   : > { %v1503_v60 = vpop.f32.mrf.mxu1 }
  0xf8   : > { %1446 = vst.msk [vmem:[%s1865_s9 + $0x28] sm:$0xff] %vm756_vm3, %v1128_v52 }
  0xfd   : > { %v1202_v61 = vpop.f32.mrf.mxu0 }
  0xfe   : > { %v1203_v62 = vadd.f32 %v1429_v1, %v1202_v61 }
  0xff   : > { %v1508_v63 = vpop.f32.mrf.mxu0 }
 0x100   : > { %1449 = vst.msk [vmem:[%s1865_s9 + $0x30] sm:$0xff] %vm756_vm3, %v1203_v62 }
 0x101   : > { %v1277_v10 = vpop.f32.mrf.mxu1 }
 0x102   : > { %v1278_v33 = vadd.f32 %v1429_v1, %v1277_v10 }
 0x103   : > { %v1513_v53 = vpop.f32.mrf.mxu1 }
 0x104   : > { %1452 = vst.msk [vmem:[%s1865_s9 + $0x38] sm:$0xff] %vm756_vm3, %v1278_v33 }
 0x105 PF: > { %s18_s27 = sadd.s32 1, %s1532_s27  }
 0x106   : > { %p15_p4 = scmp.ge.s32.totalorder %s18_s27, 4  }
 0x108   :  { %17 = sbr.rel (!%p15_p4) target bundleno = 1 (0x1), region = 108 }

</bundles_post_ra>
